<compile_context>
chip_gen: v7x
topology: tpu7x:2x2x1
jax: 0.10.0
libtpu: 0.0.40
codegen_flags: <defaults>
</compile_context>

<pallas_src>
import jax
import jax.numpy as jnp
from jax.experimental import pallas as pl
from jax.experimental.pallas import tpu as pltpu

EPS = 1e-5
NEG_SLOPE = 0.2


# ----------------------------------------------------------------------------
# Fused kernel: all four layers for one batch tile.
#
# Layout: activations are (channels, M) with M = b*R + r on lanes, where
#   r = I*(W/4)+J indexes the 4x4 input block and b the image within the tile.
# Input taps are s = u*4+v (pixel (4I+u, 4J+v)); layer-2 output sub-positions
# are t = p*2+q (pixel (2I+p, 2J+q)); layer-3/4 output pixel is (I, J).
# ----------------------------------------------------------------------------
def _disc2_kernel(x_ref, w1_ref, b1_ref, w2_ref, t2_ref, w3_ref, t3_ref,
                  w4_ref, b4_ref, o_ref, a1_ref, a2_ref):
    def lrelu(v):
        return jnp.where(v >= 0, v, NEG_SLOPE * v)

    x = x_ref[0]                                            # (16*cin, M) bf16

    # layer 1: 1x1 conv (+bias) + LeakyReLU.  w1 is expanded block-diagonally
    # over the 16 taps, so the result lands directly in the packed (s, ci)
    # contraction layout needed by layer 2 -- no in-kernel scatter/relayout.
    a1 = jnp.dot(w1_ref[...], x, preferred_element_type=jnp.float32)
    a1_ref[...] = lrelu(a1 + b1_ref[...]).astype(jnp.bfloat16)

    # layer 2: 2x2 stride-2 conv (no bias) + BN + LeakyReLU.
    # BN eval scale is folded into the weight rows; all 4 output sub-positions
    # come out of this single K=16*ndf matmul.
    a2 = jnp.dot(w2_ref[...], a1_ref[...], preferred_element_type=jnp.float32)
    a2_ref[...] = lrelu(a2 + t2_ref[...]).astype(jnp.bfloat16)

    # layer 3: 2x2 stride-2 conv (no bias) + BN + LeakyReLU, K=4*ndf packed.
    a3 = jnp.dot(w3_ref[...], a2_ref[...], preferred_element_type=jnp.float32)
    h3 = lrelu(a3 + t3_ref[...])                            # (2*ndf, M) f32

    # layer 4: 1x1 conv to 1 channel (+bias): VPU multiply + sublane reduce,
    # producing a lane-dense (1, M) output row (no masked partial stores).
    o = jnp.sum(h3 * w4_ref[...], axis=0, keepdims=True) + b4_ref[...]
    o_ref[0] = o.astype(o_ref.dtype)


# ----------------------------------------------------------------------------
# Parameter init (deterministic, synthetic)
# ----------------------------------------------------------------------------
def init_params(key, in_ch=1, ndf=64):
    ks = jax.random.split(key, 10)
    s = 0.05
    return {
        "w1_oihw": jax.random.normal(ks[0], (ndf, in_ch, 1, 1), jnp.float32) * s,
        "b1": jax.random.normal(ks[1], (ndf,), jnp.float32) * s,
        "w2_oihw": jax.random.normal(ks[2], (ndf, ndf, 2, 2), jnp.float32) * s,
        "bn2_gamma": 1.0 + jax.random.normal(ks[3], (ndf,), jnp.float32) * s,
        "bn2_beta": jax.random.normal(ks[4], (ndf,), jnp.float32) * s,
        "w3_oihw": jax.random.normal(ks[5], (ndf * 2, ndf, 2, 2), jnp.float32) * s,
        "bn3_gamma": 1.0 + jax.random.normal(ks[6], (ndf * 2,), jnp.float32) * s,
        "bn3_beta": jax.random.normal(ks[7], (ndf * 2,), jnp.float32) * s,
        "w4_oihw": jax.random.normal(ks[8], (1, ndf * 2, 1, 1), jnp.float32) * s,
        "b4": jax.random.normal(ks[9], (1,), jnp.float32) * s,
    }


# ----------------------------------------------------------------------------
# Forward pass (single fused Pallas kernel, batch-tiled grid)
# ----------------------------------------------------------------------------
def discriminator2_forward(params, x_nchw, noise=0.0, rng=None, batch_tile=None):
    if rng is not None:
        x_nchw = x_nchw + noise * jax.random.normal(rng, x_nchw.shape, x_nchw.dtype)

    N, cin, H, W = x_nchw.shape
    assert H % 4 == 0 and W % 4 == 0, "H and W must be multiples of 4"
    ndf = params["w1_oihw"].shape[0]
    R = (H // 4) * (W // 4)

    # Batch tile: aim for a ~512-wide lane (M) dim so the MXU N-dim is full and
    # per-grid-step overhead is amortized; never exceed the batch.
    if batch_tile is None:
        batch_tile = max(1, min(N, max(1, 512 // R)))
    bt = int(batch_tile)
    gn = -(-N // bt)                 # ceil-div -> grid length
    n_pad = gn * bt
    M = bt * R
    K1 = 16 * cin

    # ---- input packing (one-time XLA transform on the RAW input only) ------
    # xT[g, (u*4+v)*cin + ci, b*R + I*(W/4) + J] = x[g*bt+b, ci, 4I+u, 4J+v]
    xp = x_nchw
    if n_pad != N:
        xp = jnp.concatenate(
            [xp, jnp.zeros((n_pad - N, cin, H, W), xp.dtype)], axis=0)
    xp = xp.reshape(gn, bt, cin, H // 4, 4, W // 4, 4)      # (g,b,ci,I,u,J,v)
    xp = xp.transpose(0, 4, 6, 2, 1, 3, 5)                  # (g,u,v,ci,b,I,J)
    xp = xp.reshape(gn, K1, M).astype(jnp.bfloat16)

    # ---- weight / BN packing (tiny, done by XLA once per call) -------------
    # layer 1: block-diagonal expansion over the 16 taps.
    w1_m = params["w1_oihw"][:, :, 0, 0].astype(jnp.float32)          # (ndf, cin)
    w1e = jnp.einsum("st,oc->sotc", jnp.eye(16, dtype=jnp.float32), w1_m)
    w1e = w1e.reshape(16 * ndf, K1).astype(jnp.bfloat16)
    b1_col = jnp.tile(params["b1"].astype(jnp.float32), 16).reshape(16 * ndf, 1)

    # layer 2: rows = (t = output sub-position, co); cols = (s = input tap, ci).
    # BatchNorm eval scale (running mean=0, var=1) folded into the rows.
    sc2 = (params["bn2_gamma"] / jnp.sqrt(1.0 + EPS)).astype(jnp.float32)
    w2s = params["w2_oihw"].astype(jnp.float32) * sc2[:, None, None, None]
    w2t = jnp.zeros((4, ndf, 16, ndf), jnp.float32)
    for t in range(4):
        p, q = divmod(t, 2)
        for a in range(2):
            for b in range(2):
                s = (2 * p + a) * 4 + (2 * q + b)
                w2t = w2t.at[t, :, s, :].set(w2s[:, :, a, b])
    w2t = w2t.reshape(4 * ndf, 16 * ndf).astype(jnp.bfloat16)
    t2_col = jnp.tile(params["bn2_beta"].astype(jnp.float32), 4).reshape(4 * ndf, 1)

    # layer 3: rows = co; cols = (t, ci). BN scale folded in.
    sc3 = (params["bn3_gamma"] / jnp.sqrt(1.0 + EPS)).astype(jnp.float32)
    w3s = params["w3_oihw"].astype(jnp.float32) * sc3[:, None, None, None]
    w3t = jnp.transpose(w3s, (0, 2, 3, 1)).reshape(2 * ndf, 4 * ndf).astype(jnp.bfloat16)
    t3_col = params["bn3_beta"].astype(jnp.float32).reshape(2 * ndf, 1)

    w4_col = params["w4_oihw"][0, :, 0, 0].astype(jnp.float32).reshape(2 * ndf, 1)
    b4 = params["b4"].astype(jnp.float32).reshape(1, 1)

    out = pl.pallas_call(
        _disc2_kernel,
        out_shape=jax.ShapeDtypeStruct((gn, 1, M), jnp.float32),
        grid_spec=pltpu.PrefetchScalarGridSpec(
            num_scalar_prefetch=0,
            grid=(gn,),
            in_specs=[
                pl.BlockSpec((1, K1, M), lambda g: (g, 0, 0)),        # x tile (bf16)
                pl.BlockSpec((16 * ndf, K1), lambda g: (0, 0)),       # W1 expanded
                pl.BlockSpec((16 * ndf, 1), lambda g: (0, 0)),        # b1 column
                pl.BlockSpec((4 * ndf, 16 * ndf), lambda g: (0, 0)),  # W2 packed
                pl.BlockSpec((4 * ndf, 1), lambda g: (0, 0)),         # bn2 beta
                pl.BlockSpec((2 * ndf, 4 * ndf), lambda g: (0, 0)),   # W3 packed
                pl.BlockSpec((2 * ndf, 1), lambda g: (0, 0)),         # bn3 beta
                pl.BlockSpec((2 * ndf, 1), lambda g: (0, 0)),         # w4 column
                pl.BlockSpec((1, 1), lambda g: (0, 0)),               # b4
            ],
            out_specs=pl.BlockSpec((1, 1, M), lambda g: (g, 0, 0)),
            scratch_shapes=[
                pltpu.VMEM((16 * ndf, M), jnp.bfloat16),              # a1 (packed h1)
                pltpu.VMEM((4 * ndf, M), jnp.bfloat16),               # a2 (packed h2)
            ],
        ),
        compiler_params=pltpu.CompilerParams(
            dimension_semantics=("parallel",),
            vmem_limit_bytes=32 * 1024 * 1024,
        ),
    )(xp, w1e, b1_col, w2t, t2_col, w3t, t3_col, w4_col, b4)

    # out[g, 0, b*R + I*(W/4)+J] -> NCHW (N, 1, H/4, W/4)
    out = out.reshape(gn * bt, H // 4, W // 4)[:N]
    return out[:, None, :, :]


# ----------------------------------------------------------------------------
# Pure-JAX (lax.conv, f32) reference for verification
# ----------------------------------------------------------------------------
def reference_forward(params, x_nchw):
    def conv(x, w, stride):
        return jax.lax.conv_general_dilated(
            x, w, (stride, stride), "VALID",
            dimension_numbers=("NCHW", "OIHW", "NCHW"))

    def lrelu(x):
        return jnp.where(x >= 0, x, NEG_SLOPE * x)

    def bn(x, gamma, beta):
        return x / jnp.sqrt(1.0 + EPS) * gamma[None, :, None, None] + beta[None, :, None, None]

    h = lrelu(conv(x_nchw, params["w1_oihw"], 1) + params["b1"][None, :, None, None])
    h = lrelu(bn(conv(h, params["w2_oihw"], 2), params["bn2_gamma"], params["bn2_beta"]))
    h = lrelu(bn(conv(h, params["w3_oihw"], 2), params["bn3_gamma"], params["bn3_beta"]))
    h = conv(h, params["w4_oihw"], 1) + params["b4"][None, :, None, None]
    return h


if __name__ == "__main__":
    key = jax.random.PRNGKey(0)
    k_param, k_x, k_param2, k_x2 = jax.random.split(key, 4)

    ndf = 64

    # ---- check 1: module defaults (in_ch=1), small batch -------------------
    in_ch = 1
    x = jax.random.normal(k_x, (2, in_ch, 16, 16), jnp.float32)     # NCHW
    params = init_params(k_param, in_ch=in_ch, ndf=ndf)

    fwd = jax.jit(discriminator2_forward)
    out = jax.block_until_ready(fwd(params, x))
    ref = jax.block_until_ready(reference_forward(params, x))
    assert out.shape == (2, 1, 4, 4), out.shape
    # bf16 MXU operands (f32 accumulate) -> small tolerance vs f32 reference.
    assert jnp.allclose(out, ref, atol=1e-2, rtol=1e-2), float(jnp.max(jnp.abs(out - ref)))

    # ---- check 2: multi-channel input, batch > tile (grid > 1 + padding) ---
    in_ch2 = 3
    x2 = jax.random.normal(k_x2, (40, in_ch2, 16, 16), jnp.float32)
    params2 = init_params(k_param2, in_ch=in_ch2, ndf=ndf)
    out2 = jax.block_until_ready(jax.jit(discriminator2_forward)(params2, x2))
    ref2 = jax.block_until_ready(reference_forward(params2, x2))
    assert out2.shape == (40, 1, 4, 4), out2.shape
    assert jnp.allclose(out2, ref2, atol=1e-2, rtol=1e-2), float(jnp.max(jnp.abs(out2 - ref2)))

    print("KERNEL_OK")
</pallas_src>

<mosaic_0001>
module attributes {stable_mosaic.version = 11 : i64} {
  func.func @_disc2_kernel(%arg0: i32, %arg1: memref<1x16x32xbf16, #tpu.memory_space<vmem>>, %arg2: memref<1024x16xbf16, #tpu.memory_space<vmem>>, %arg3: memref<1024x1xf32, #tpu.memory_space<vmem>>, %arg4: memref<256x1024xbf16, #tpu.memory_space<vmem>>, %arg5: memref<256x1xf32, #tpu.memory_space<vmem>>, %arg6: memref<128x256xbf16, #tpu.memory_space<vmem>>, %arg7: memref<128x1xf32, #tpu.memory_space<vmem>>, %arg8: memref<128x1xf32, #tpu.memory_space<vmem>>, %arg9: memref<1x1xf32, #tpu.memory_space<vmem>>, %arg10: memref<1x1x32xf32, #tpu.memory_space<vmem>>, %arg11: memref<1024x32xbf16, #tpu.memory_space<vmem>>, %arg12: memref<256x32xbf16, #tpu.memory_space<vmem>>) attributes {dimension_semantics = [#tpu.dimension_semantics<parallel>], iteration_bounds = array<i64: 1>, scalar_prefetch = 0 : i64, scratch_operands = 2 : i64, tpu.core_type = #tpu.core_type<tc>, window_params = [{transform_indices = @transform_0, window_bounds = array<i64: 1, 16, 32>}, {pipeline_mode = #tpu.pipeline_mode<synchronous>, transform_indices = @transform_1, window_bounds = array<i64: 1024, 16>}, {pipeline_mode = #tpu.pipeline_mode<synchronous>, transform_indices = @transform_2, window_bounds = array<i64: 1024, 1>}, {pipeline_mode = #tpu.pipeline_mode<synchronous>, transform_indices = @transform_3, window_bounds = array<i64: 256, 1024>}, {pipeline_mode = #tpu.pipeline_mode<synchronous>, transform_indices = @transform_4, window_bounds = array<i64: 256, 1>}, {pipeline_mode = #tpu.pipeline_mode<synchronous>, transform_indices = @transform_5, window_bounds = array<i64: 128, 256>}, {pipeline_mode = #tpu.pipeline_mode<synchronous>, transform_indices = @transform_6, window_bounds = array<i64: 128, 1>}, {pipeline_mode = #tpu.pipeline_mode<synchronous>, transform_indices = @transform_7, window_bounds = array<i64: 128, 1>}, {pipeline_mode = #tpu.pipeline_mode<synchronous>, transform_indices = @transform_8, window_bounds = array<i64: 1, 1>}, {transform_indices = @transform_9, window_bounds = array<i64: 1, 1, 32>}]} {
    %c0 = arith.constant 0 : index
    %c0_0 = arith.constant 0 : index
    %c0_1 = arith.constant 0 : index
    %0 = vector.load %arg1[%c0, %c0_0, %c0_1] : memref<1x16x32xbf16, #tpu.memory_space<vmem>>, vector<1x16x32xbf16>
    %1 = vector.shape_cast %0 : vector<1x16x32xbf16> to vector<16x32xbf16>
    %c0_2 = arith.constant 0 : index
    %c0_3 = arith.constant 0 : index
    %2 = vector.load %arg2[%c0_2, %c0_3] : memref<1024x16xbf16, #tpu.memory_space<vmem>>, vector<1024x16xbf16>
    %cst = arith.constant dense<0.000000e+00> : vector<1024x32xf32>
    %3 = tpu.matmul %2, %1, %cst {dimension_numbers = #tpu.dot_dimension_numbers<[1], [0], [0], [1], [0, 0, 1, 1], [], []>} : vector<1024x16xbf16>, vector<16x32xbf16>, vector<1024x32xf32> -> vector<1024x32xf32>
    %c0_4 = arith.constant 0 : index
    %c0_5 = arith.constant 0 : index
    %4 = vector.load %arg3[%c0_4, %c0_5] : memref<1024x1xf32, #tpu.memory_space<vmem>>, vector<1024x1xf32>
    %5 = vector.broadcast %4 : vector<1024x1xf32> to vector<1024x32xf32>
    %6 = arith.addf %3, %5 : vector<1024x32xf32>
    %cst_6 = arith.constant 0.000000e+00 : f32
    %7 = vector.broadcast %cst_6 : f32 to vector<1024x32xf32>
    %8 = arith.cmpf oge, %6, %7 : vector<1024x32xf32>
    %cst_7 = arith.constant 2.000000e-01 : f32
    %9 = vector.broadcast %cst_7 : f32 to vector<1024x32xf32>
    %10 = arith.mulf %9, %6 : vector<1024x32xf32>
    %11 = arith.select %8, %6, %10 : vector<1024x32xi1>, vector<1024x32xf32>
    %12 = arith.truncf %11 : vector<1024x32xf32> to vector<1024x32xbf16>
    %c0_8 = arith.constant 0 : index
    %c0_9 = arith.constant 0 : index
    %13 = vector.load %arg11[%c0_8, %c0_9] : memref<1024x32xbf16, #tpu.memory_space<vmem>>, vector<1024x32xbf16>
    tpu.vector_store %arg11[%c0_8, %c0_9], %12 {strides = array<i32>} : memref<1024x32xbf16, #tpu.memory_space<vmem>>, vector<1024x32xbf16>,
    %c0_10 = arith.constant 0 : index
    %c0_11 = arith.constant 0 : index
    %14 = vector.load %arg4[%c0_10, %c0_11] : memref<256x1024xbf16, #tpu.memory_space<vmem>>, vector<256x1024xbf16>
    %c0_12 = arith.constant 0 : index
    %c0_13 = arith.constant 0 : index
    %15 = vector.load %arg11[%c0_12, %c0_13] : memref<1024x32xbf16, #tpu.memory_space<vmem>>, vector<1024x32xbf16>
    %cst_14 = arith.constant dense<0.000000e+00> : vector<256x32xf32>
    %16 = tpu.matmul %14, %15, %cst_14 {dimension_numbers = #tpu.dot_dimension_numbers<[1], [0], [0], [1], [0, 0, 1, 1], [], []>} : vector<256x1024xbf16>, vector<1024x32xbf16>, vector<256x32xf32> -> vector<256x32xf32>
    %c0_15 = arith.constant 0 : index
    %c0_16 = arith.constant 0 : index
    %17 = vector.load %arg5[%c0_15, %c0_16] : memref<256x1xf32, #tpu.memory_space<vmem>>, vector<256x1xf32>
    %18 = vector.broadcast %17 : vector<256x1xf32> to vector<256x32xf32>
    %19 = arith.addf %16, %18 : vector<256x32xf32>
    %cst_17 = arith.constant 0.000000e+00 : f32
    %20 = vector.broadcast %cst_17 : f32 to vector<256x32xf32>
    %21 = arith.cmpf oge, %19, %20 : vector<256x32xf32>
    %cst_18 = arith.constant 2.000000e-01 : f32
    %22 = vector.broadcast %cst_18 : f32 to vector<256x32xf32>
    %23 = arith.mulf %22, %19 : vector<256x32xf32>
    %24 = arith.select %21, %19, %23 : vector<256x32xi1>, vector<256x32xf32>
    %25 = arith.truncf %24 : vector<256x32xf32> to vector<256x32xbf16>
    %c0_19 = arith.constant 0 : index
    %c0_20 = arith.constant 0 : index
    %26 = vector.load %arg12[%c0_19, %c0_20] : memref<256x32xbf16, #tpu.memory_space<vmem>>, vector<256x32xbf16>
    tpu.vector_store %arg12[%c0_19, %c0_20], %25 {strides = array<i32>} : memref<256x32xbf16, #tpu.memory_space<vmem>>, vector<256x32xbf16>,
    %c0_21 = arith.constant 0 : index
    %c0_22 = arith.constant 0 : index
    %27 = vector.load %arg6[%c0_21, %c0_22] : memref<128x256xbf16, #tpu.memory_space<vmem>>, vector<128x256xbf16>
    %c0_23 = arith.constant 0 : index
    %c0_24 = arith.constant 0 : index
    %28 = vector.load %arg12[%c0_23, %c0_24] : memref<256x32xbf16, #tpu.memory_space<vmem>>, vector<256x32xbf16>
    %cst_25 = arith.constant dense<0.000000e+00> : vector<128x32xf32>
    %29 = tpu.matmul %27, %28, %cst_25 {dimension_numbers = #tpu.dot_dimension_numbers<[1], [0], [0], [1], [0, 0, 1, 1], [], []>} : vector<128x256xbf16>, vector<256x32xbf16>, vector<128x32xf32> -> vector<128x32xf32>
    %c0_26 = arith.constant 0 : index
    %c0_27 = arith.constant 0 : index
    %30 = vector.load %arg7[%c0_26, %c0_27] : memref<128x1xf32, #tpu.memory_space<vmem>>, vector<128x1xf32>
    %31 = vector.broadcast %30 : vector<128x1xf32> to vector<128x32xf32>
    %32 = arith.addf %29, %31 : vector<128x32xf32>
    %cst_28 = arith.constant 0.000000e+00 : f32
    %33 = vector.broadcast %cst_28 : f32 to vector<128x32xf32>
    %34 = arith.cmpf oge, %32, %33 : vector<128x32xf32>
    %cst_29 = arith.constant 2.000000e-01 : f32
    %35 = vector.broadcast %cst_29 : f32 to vector<128x32xf32>
    %36 = arith.mulf %35, %32 : vector<128x32xf32>
    %37 = arith.select %34, %32, %36 : vector<128x32xi1>, vector<128x32xf32>
    %c0_30 = arith.constant 0 : index
    %c0_31 = arith.constant 0 : index
    %38 = vector.load %arg8[%c0_30, %c0_31] : memref<128x1xf32, #tpu.memory_space<vmem>>, vector<128x1xf32>
    %39 = vector.broadcast %38 : vector<128x1xf32> to vector<128x32xf32>
    %40 = arith.mulf %37, %39 : vector<128x32xf32>
    %cst_32 = arith.constant dense<0.000000e+00> : vector<32xf32>
    %41 = vector.multi_reduction <add>, %40, %cst_32 [0] : vector<128x32xf32> to vector<32xf32>
    %42 = vector.shape_cast %41 : vector<32xf32> to vector<1x32xf32>
    %c0_33 = arith.constant 0 : index
    %c0_34 = arith.constant 0 : index
    %43 = vector.load %arg9[%c0_33, %c0_34] : memref<1x1xf32, #tpu.memory_space<vmem>>, vector<1x1xf32>
    %44 = vector.broadcast %43 : vector<1x1xf32> to vector<1x32xf32>
    %45 = arith.addf %42, %44 : vector<1x32xf32>
    %c0_35 = arith.constant 0 : index
    %c0_36 = arith.constant 0 : index
    %c0_37 = arith.constant 0 : index
    %46 = vector.load %arg10[%c0_35, %c0_36, %c0_37] : memref<1x1x32xf32, #tpu.memory_space<vmem>>, vector<1x1x32xf32>
    %47 = vector.shape_cast %46 : vector<1x1x32xf32> to vector<1x32xf32>
    %48 = vector.shape_cast %45 : vector<1x32xf32> to vector<1x1x32xf32>
    tpu.vector_store %arg10[%c0_35, %c0_36, %c0_37], %48 {strides = array<i32>} : memref<1x1x32xf32, #tpu.memory_space<vmem>>, vector<1x1x32xf32>,
    return
  }
  func.func @transform_0(%arg0: i32) -> (i32, i32, i32) {
    %c0_i32 = arith.constant 0 : i32
    %c0_i32_0 = arith.constant 0 : i32
    %c0_i32_1 = arith.constant 0 : i32
    return %arg0, %c0_i32, %c0_i32_0 : i32, i32, i32
  }
  func.func @transform_1(%arg0: i32) -> (i32, i32) {
    %c0_i32 = arith.constant 0 : i32
    %c0_i32_0 = arith.constant 0 : i32
    %c0_i32_1 = arith.constant 0 : i32
    return %c0_i32, %c0_i32_0 : i32, i32
  }
  func.func @transform_2(%arg0: i32) -> (i32, i32) {
    %c0_i32 = arith.constant 0 : i32
    %c0_i32_0 = arith.constant 0 : i32
    %c0_i32_1 = arith.constant 0 : i32
    return %c0_i32, %c0_i32_0 : i32, i32
  }
  func.func @transform_3(%arg0: i32) -> (i32, i32) {
    %c0_i32 = arith.constant 0 : i32
    %c0_i32_0 = arith.constant 0 : i32
    %c0_i32_1 = arith.constant 0 : i32
    return %c0_i32, %c0_i32_0 : i32, i32
  }
  func.func @transform_4(%arg0: i32) -> (i32, i32) {
    %c0_i32 = arith.constant 0 : i32
    %c0_i32_0 = arith.constant 0 : i32
    %c0_i32_1 = arith.constant 0 : i32
    return %c0_i32, %c0_i32_0 : i32, i32
  }
  func.func @transform_5(%arg0: i32) -> (i32, i32) {
    %c0_i32 = arith.constant 0 : i32
    %c0_i32_0 = arith.constant 0 : i32
    %c0_i32_1 = arith.constant 0 : i32
    return %c0_i32, %c0_i32_0 : i32, i32
  }
  func.func @transform_6(%arg0: i32) -> (i32, i32) {
    %c0_i32 = arith.constant 0 : i32
    %c0_i32_0 = arith.constant 0 : i32
    %c0_i32_1 = arith.constant 0 : i32
    return %c0_i32, %c0_i32_0 : i32, i32
  }
  func.func @transform_7(%arg0: i32) -> (i32, i32) {
    %c0_i32 = arith.constant 0 : i32
    %c0_i32_0 = arith.constant 0 : i32
    %c0_i32_1 = arith.constant 0 : i32
    return %c0_i32, %c0_i32_0 : i32, i32
  }
  func.func @transform_8(%arg0: i32) -> (i32, i32) {
    %c0_i32 = arith.constant 0 : i32
    %c0_i32_0 = arith.constant 0 : i32
    %c0_i32_1 = arith.constant 0 : i32
    return %c0_i32, %c0_i32_0 : i32, i32
  }
  func.func @transform_9(%arg0: i32) -> (i32, i32, i32) {
    %c0_i32 = arith.constant 0 : i32
    %c0_i32_0 = arith.constant 0 : i32
    %c0_i32_1 = arith.constant 0 : i32
    return %arg0, %c0_i32, %c0_i32_0 : i32, i32, i32
  }
}

</mosaic_0001>

<bundles_post_ra>
// kernel: tile.13
= control target key start
LH: loop header
LB: loop body
LE: loop exit
PB: predicated region body
PF: predicated region fallthrough
CT: control target
= control target key end

     0   :  { %s28_s0 = inlined_call_operand.vmem [shape: f32[64], index: 0, kind: input, shape index: {}]   ;;  %s29_s1 = inlined_call_operand.vmem [shape: f32[16,64], index: 1, kind: output, shape index: {}]  }
   0x1   :  { %v4_v0 = vld [vmem:[%s28_s0] ss:$0 sm:$0xff] }
   0x2   :  { %5 = vst [vmem:[%s29_s1] sm:$0xff] %v4_v0  ;;  %8 = vst [vmem:[%s29_s1 + $0x8] sm:$0xff] %v4_v0 }

// kernel: tile.0
= control target key start
LH: loop header
LB: loop body
LE: loop exit
PB: predicated region body
PF: predicated region fallthrough
CT: control target
= control target key end

     0   :  { %s3771_s8 = smov 126   ;;  %s3772_s9 = smov 127   ;;  %vm3_vm0 = vcmask 7168   ;;  %s8092_s0 = inlined_call_operand.vmem [shape: f32[16,64], index: 0, kind: input, shape index: {}]   ;;  %s8093_s1 = inlined_call_operand.vmem [shape: f32[1024,1], index: 1, kind: output, shape index: {}]  }
   0x1   :  { %v3847_v0 = vld [vmem:[%s8092_s0] sm:$0xff]   ;;  %v3854_v1 = vld [vmem:[%s8092_s0 + $0x8] sm:$0xff]   ;;  %s3773_s12 = smov 125   ;;  %s3774_s13 = smov 124  }
   0x2   :  { %80 = vrot.lane.b32.xlu1 %v3847_v0, %s3771_s8  ;;  %39 = vrot.lane.b32.xlu0 %v3847_v0, %s3772_s9  ;;  %s3775_s14 = smov 123   ;;  %s3776_s15 = smov 122   ;;  %v4905_v32 = vld [vmem:[%s8092_s0] sm:$0xff]   ;;  %v4976_v35 = vld [vmem:[%s8092_s0 + $0x8] sm:$0xff]  }
   0x3   :  { %s3777_s16 = smov 121   ;;  %s3778_s17 = smov 120  }
   0x4   :  { %s3779_s18 = smov 119   ;;  %s3780_s19 = smov 118  }
   0x5   :  { %s3781_s20 = smov 117   ;;  %s3782_s21 = smov 116  }
   0x6   :  { %101 = vrot.lane.b32.xlu1 %v3854_v1, %s3771_s8  ;;  %60 = vrot.lane.b32.xlu0 %v3854_v1, %s3772_s9  ;;  %s3783_s22 = smov 115   ;;  %s3784_s23 = smov 114  }
   0x7   :  { %s3785_s24 = smov 113   ;;  %s3786_s25 = smov 112  }
   0x8   :  { %s3787_s26 = smov 111   ;;  %s3788_s27 = smov 110  }
   0x9   :  { %s3789_s28 = smov 109   ;;  %s3790_s29 = smov 108  }
   0xa   :  { %142 = vrot.lane.b32.xlu1 %v3854_v1, %s3773_s12  ;;  %121 = vrot.lane.b32.xlu0 %v3847_v0, %s3773_s12  ;;  %s3791_s30 = smov 107   ;;  %s3792_s2 = smov 106  }
   0xb   :  { %s3793_s3 = smov 105   ;;  %s3794_s4 = smov 104  }
   0xc   :  { %s3795_s5 = smov 103   ;;  %s3796_s6 = smov 102  }
   0xd   :  { %s3797_s7 = smov 101   ;;  %s3798_s8 = smov 100  }
   0xe   :  { %183 = vrot.lane.b32.xlu1 %v3854_v1, %s3774_s13  ;;  %162 = vrot.lane.b32.xlu0 %v3847_v0, %s3774_s13  ;;  %s3799_s9 = smov 99   ;;  %s3800_s13 = smov 98  }
   0xf   :  { %s3807_s12 = smov 91   ;;  %s3814_s11 = smov 84  }
  0x10   :  { %s3820_s10 = smov 78  }
  0x12   :  { %224 = vrot.lane.b32.xlu1 %v3854_v1, %s3775_s14  ;;  %203 = vrot.lane.b32.xlu0 %v3847_v0, %s3775_s14  ;;  %s3821_s14 = smov 77  }
  0x16   :  { %265 = vrot.lane.b32.xlu1 %v3854_v1, %s3776_s15  ;;  %244 = vrot.lane.b32.xlu0 %v3847_v0, %s3776_s15 }
  0x1a   :  { %306 = vrot.lane.b32.xlu1 %v3854_v1, %s3777_s16  ;;  %285 = vrot.lane.b32.xlu0 %v3847_v0, %s3777_s16  ;;  %s3808_s16 = smov 90  }
  0x1e   :  { %347 = vrot.lane.b32.xlu1 %v3854_v1, %s3778_s17  ;;  %326 = vrot.lane.b32.xlu0 %v3847_v0, %s3778_s17  ;;  %s3801_s17 = smov 97  }
  0x22   :  { %388 = vrot.lane.b32.xlu1 %v3854_v1, %s3779_s18  ;;  %367 = vrot.lane.b32.xlu0 %v3847_v0, %s3779_s18  ;;  %s3822_s18 = smov 76  }
  0x26   :  { %429 = vrot.lane.b32.xlu1 %v3854_v1, %s3780_s19  ;;  %408 = vrot.lane.b32.xlu0 %v3847_v0, %s3780_s19 }
  0x2a   :  { %470 = vrot.lane.b32.xlu1 %v3854_v1, %s3781_s20  ;;  %449 = vrot.lane.b32.xlu0 %v3847_v0, %s3781_s20  ;;  %s3809_s20 = smov 89  }
  0x2e   :  { %511 = vrot.lane.b32.xlu1 %v3854_v1, %s3782_s21  ;;  %490 = vrot.lane.b32.xlu0 %v3847_v0, %s3782_s21  ;;  %s3802_s21 = smov 96  }
  0x32   :  { %552 = vrot.lane.b32.xlu1 %v3854_v1, %s3783_s22  ;;  %531 = vrot.lane.b32.xlu0 %v3847_v0, %s3783_s22  ;;  %s3823_s22 = smov 75  }
  0x36   :  { %593 = vrot.lane.b32.xlu1 %v3854_v1, %s3784_s23  ;;  %572 = vrot.lane.b32.xlu0 %v3847_v0, %s3784_s23  ;;  %s3816_s23 = smov 82  }
  0x3a   :  { %634 = vrot.lane.b32.xlu1 %v3854_v1, %s3785_s24  ;;  %613 = vrot.lane.b32.xlu0 %v3847_v0, %s3785_s24  ;;  %s3810_s24 = smov 88  }
  0x3e   :  { %675 = vrot.lane.b32.xlu1 %v3854_v1, %s3786_s25  ;;  %654 = vrot.lane.b32.xlu0 %v3847_v0, %s3786_s25  ;;  %s3803_s25 = smov 95  }
  0x42   :  { %716 = vrot.lane.b32.xlu1 %v3854_v1, %s3787_s26  ;;  %695 = vrot.lane.b32.xlu0 %v3847_v0, %s3787_s26  ;;  %s3824_s26 = smov 74  }
  0x46   :  { %757 = vrot.lane.b32.xlu1 %v3854_v1, %s3788_s27  ;;  %736 = vrot.lane.b32.xlu0 %v3847_v0, %s3788_s27  ;;  %s3817_s27 = smov 81  }
  0x4a   :  { %798 = vrot.lane.b32.xlu1 %v3854_v1, %s3789_s28  ;;  %777 = vrot.lane.b32.xlu0 %v3847_v0, %s3789_s28  ;;  %s3811_s28 = smov 87  }
  0x4e   :  { %839 = vrot.lane.b32.xlu1 %v3854_v1, %s3790_s29  ;;  %818 = vrot.lane.b32.xlu0 %v3847_v0, %s3790_s29  ;;  %s3804_s29 = smov 94  }
  0x52   :  { %880 = vrot.lane.b32.xlu1 %v3854_v1, %s3791_s30  ;;  %859 = vrot.lane.b32.xlu0 %v3847_v0, %s3791_s30  ;;  %s3825_s30 = smov 73  }
  0x56   :  { %921 = vrot.lane.b32.xlu1 %v3854_v1, %s3792_s2  ;;  %900 = vrot.lane.b32.xlu0 %v3847_v0, %s3792_s2  ;;  %s3818_s2 = smov 80  }
  0x5a   :  { %962 = vrot.lane.b32.xlu1 %v3854_v1, %s3793_s3  ;;  %941 = vrot.lane.b32.xlu0 %v3847_v0, %s3793_s3  ;;  %s3812_s3 = smov 86  }
  0x5e   :  { %1003 = vrot.lane.b32.xlu1 %v3854_v1, %s3794_s4  ;;  %982 = vrot.lane.b32.xlu0 %v3847_v0, %s3794_s4  ;;  %s3805_s4 = smov 93  }
  0x62   :  { %1044 = vrot.lane.b32.xlu1 %v3854_v1, %s3795_s5  ;;  %1023 = vrot.lane.b32.xlu0 %v3847_v0, %s3795_s5  ;;  %s3826_s5 = smov 72  }
  0x66   :  { %1085 = vrot.lane.b32.xlu1 %v3854_v1, %s3796_s6  ;;  %1064 = vrot.lane.b32.xlu0 %v3847_v0, %s3796_s6  ;;  %s3819_s6 = smov 79  }
  0x6a   :  { %1126 = vrot.lane.b32.xlu1 %v3854_v1, %s3797_s7  ;;  %1105 = vrot.lane.b32.xlu0 %v3847_v0, %s3797_s7  ;;  %s3813_s7 = smov 85  }
  0x6e   :  { %1167 = vrot.lane.b32.xlu1 %v3854_v1, %s3798_s8  ;;  %1146 = vrot.lane.b32.xlu0 %v3847_v0, %s3798_s8  ;;  %s3806_s8 = smov 92  }
  0x72   :  { %1208 = vrot.lane.b32.xlu1 %v3854_v1, %s3799_s9  ;;  %1187 = vrot.lane.b32.xlu0 %v3847_v0, %s3799_s9  ;;  %s3827_s9 = smov 71  }
  0x74   :  { %v81_v2 = vpop.permute.xlu1 %80   ;;  %v40_v3 = vpop.permute.xlu0 %39  }
  0x75   :  { %2654 = vst.msk [vmem:[%s8093_s1 + $0x2] sm:$0x1] %vm3_vm0, %v81_v2   ;;  %2655 = vst.msk [vmem:[%s8093_s1 + $0x41] sm:$0x2] %vm3_vm0, %v81_v2  }
  0x76   :  { %2656 = vst.msk [vmem:[%s8093_s1 + $0x80] sm:$0x4] %vm3_vm0, %v81_v2   ;;  %2657 = vst.msk [vmem:[%s8093_s1 + $0xbf] sm:$0x8] %vm3_vm0, %v81_v2   ;;  %1249 = vrot.lane.b32.xlu1 %v3854_v1, %s3800_s13  ;;  %1228 = vrot.lane.b32.xlu0 %v3847_v0, %s3800_s13  ;;  %s3828_s13 = smov 70  }
  0x77   :  { %2658 = vst.msk [vmem:[%s8093_s1 + $0xfe] sm:$0x10] %vm3_vm0, %v81_v2   ;;  %2659 = vst.msk [vmem:[%s8093_s1 + $0x13d] sm:$0x20] %vm3_vm0, %v81_v2  }
  0x78   :  { %2660 = vst.msk [vmem:[%s8093_s1 + $0x17c] sm:$0x40] %vm3_vm0, %v81_v2   ;;  %2661 = vst.msk [vmem:[%s8093_s1 + $0x1bb] sm:$0x80] %vm3_vm0, %v81_v2   ;;  %v102_v4 = vpop.permute.xlu1 %101   ;;  %v61_v5 = vpop.permute.xlu0 %60   ;;  %v2_v2 = vld [vmem:[%s8092_s0] sm:$0xff]  }
  0x79   :  { %2637 = vst.msk [vmem:[%s8093_s1 + $0x1] sm:$0x1] %vm3_vm0, %v40_v3   ;;  %2638 = vst.msk [vmem:[%s8093_s1 + $0x40] sm:$0x2] %vm3_vm0, %v40_v3  }
  0x7a   :  { %2639 = vst.msk [vmem:[%s8093_s1 + $0x7f] sm:$0x4] %vm3_vm0, %v40_v3   ;;  %2640 = vst.msk [vmem:[%s8093_s1 + $0xbe] sm:$0x8] %vm3_vm0, %v40_v3   ;;  %1290 = vrot.lane.b32.xlu1 %v3854_v1, %s3801_s17  ;;  %1269 = vrot.lane.b32.xlu0 %v3847_v0, %s3801_s17  ;;  %s3815_s17 = smov 83  }
  0x7b   :  { %2641 = vst.msk [vmem:[%s8093_s1 + $0xfd] sm:$0x10] %vm3_vm0, %v40_v3   ;;  %2642 = vst.msk [vmem:[%s8093_s1 + $0x13c] sm:$0x20] %vm3_vm0, %v40_v3  }
  0x7c   :  { %2643 = vst.msk [vmem:[%s8093_s1 + $0x17b] sm:$0x40] %vm3_vm0, %v40_v3   ;;  %2644 = vst.msk [vmem:[%s8093_s1 + $0x1ba] sm:$0x80] %vm3_vm0, %v40_v3   ;;  %v143_v6 = vpop.permute.xlu1 %142   ;;  %v122_v7 = vpop.permute.xlu0 %121   ;;  %v2628_v3 = vld [vmem:[%s8092_s0 + $0x8] sm:$0xff]  }
  0x7d   :  { %2663 = vst.msk [vmem:[%s8093_s1 + $0x202] sm:$0x1] %vm3_vm0, %v102_v4   ;;  %2664 = vst.msk [vmem:[%s8093_s1 + $0x241] sm:$0x2] %vm3_vm0, %v102_v4  }
  0x7e   :  { %2665 = vst.msk [vmem:[%s8093_s1 + $0x280] sm:$0x4] %vm3_vm0, %v102_v4   ;;  %2666 = vst.msk [vmem:[%s8093_s1 + $0x2bf] sm:$0x8] %vm3_vm0, %v102_v4   ;;  %1331 = vrot.lane.b32.xlu1 %v3854_v1, %s3802_s21  ;;  %1310 = vrot.lane.b32.xlu0 %v3847_v0, %s3802_s21 }
  0x7f   :  { %2667 = vst.msk [vmem:[%s8093_s1 + $0x2fe] sm:$0x10] %vm3_vm0, %v102_v4   ;;  %2668 = vst.msk [vmem:[%s8093_s1 + $0x33d] sm:$0x20] %vm3_vm0, %v102_v4  }
  0x80   :  { %2669 = vst.msk [vmem:[%s8093_s1 + $0x37c] sm:$0x40] %vm3_vm0, %v102_v4   ;;  %2670 = vst.msk [vmem:[%s8093_s1 + $0x3bb] sm:$0x80] %vm3_vm0, %v102_v4   ;;  %v184_v8 = vpop.permute.xlu1 %183   ;;  %v163_v9 = vpop.permute.xlu0 %162  }
  0x81   :  { %2646 = vst.msk [vmem:[%s8093_s1 + $0x201] sm:$0x1] %vm3_vm0, %v61_v5   ;;  %2647 = vst.msk [vmem:[%s8093_s1 + $0x240] sm:$0x2] %vm3_vm0, %v61_v5  }
  0x82   :  { %2648 = vst.msk [vmem:[%s8093_s1 + $0x27f] sm:$0x4] %vm3_vm0, %v61_v5   ;;  %2649 = vst.msk [vmem:[%s8093_s1 + $0x2be] sm:$0x8] %vm3_vm0, %v61_v5   ;;  %1372 = vrot.lane.b32.xlu1 %v3854_v1, %s3803_s25  ;;  %1351 = vrot.lane.b32.xlu0 %v3847_v0, %s3803_s25  ;;  %s3830_s25 = smov 68  }
  0x83   :  { %2650 = vst.msk [vmem:[%s8093_s1 + $0x2fd] sm:$0x10] %vm3_vm0, %v61_v5   ;;  %2651 = vst.msk [vmem:[%s8093_s1 + $0x33c] sm:$0x20] %vm3_vm0, %v61_v5  }
  0x84   :  { %2652 = vst.msk [vmem:[%s8093_s1 + $0x37b] sm:$0x40] %vm3_vm0, %v61_v5   ;;  %2653 = vst.msk [vmem:[%s8093_s1 + $0x3ba] sm:$0x80] %vm3_vm0, %v61_v5   ;;  %v225_v10 = vpop.permute.xlu1 %224   ;;  %v204_v11 = vpop.permute.xlu0 %203  }
  0x85   :  { %2680 = vst.msk [vmem:[%s8093_s1 + $0x203] sm:$0x1] %vm3_vm0, %v143_v6   ;;  %2681 = vst.msk [vmem:[%s8093_s1 + $0x242] sm:$0x2] %vm3_vm0, %v143_v6  }
  0x86   :  { %2682 = vst.msk [vmem:[%s8093_s1 + $0x281] sm:$0x4] %vm3_vm0, %v143_v6   ;;  %2683 = vst.msk [vmem:[%s8093_s1 + $0x2c0] sm:$0x8] %vm3_vm0, %v143_v6   ;;  %1413 = vrot.lane.b32.xlu1 %v3854_v1, %s3804_s29  ;;  %1392 = vrot.lane.b32.xlu0 %v3847_v0, %s3804_s29 }
  0x87   :  { %2684 = vst.msk [vmem:[%s8093_s1 + $0x2ff] sm:$0x10] %vm3_vm0, %v143_v6   ;;  %2685 = vst.msk [vmem:[%s8093_s1 + $0x33e] sm:$0x20] %vm3_vm0, %v143_v6  }
  0x88   :  { %2686 = vst.msk [vmem:[%s8093_s1 + $0x37d] sm:$0x40] %vm3_vm0, %v143_v6   ;;  %2687 = vst.msk [vmem:[%s8093_s1 + $0x3bc] sm:$0x80] %vm3_vm0, %v143_v6   ;;  %v266_v12 = vpop.permute.xlu1 %265   ;;  %v245_v13 = vpop.permute.xlu0 %244  }
  0x89   :  { %2671 = vst.msk [vmem:[%s8093_s1 + $0x3] sm:$0x1] %vm3_vm0, %v122_v7   ;;  %2672 = vst.msk [vmem:[%s8093_s1 + $0x42] sm:$0x2] %vm3_vm0, %v122_v7  }
  0x8a   :  { %2673 = vst.msk [vmem:[%s8093_s1 + $0x81] sm:$0x4] %vm3_vm0, %v122_v7   ;;  %2674 = vst.msk [vmem:[%s8093_s1 + $0xc0] sm:$0x8] %vm3_vm0, %v122_v7   ;;  %1454 = vrot.lane.b32.xlu1 %v3854_v1, %s3805_s4  ;;  %1433 = vrot.lane.b32.xlu0 %v3847_v0, %s3805_s4 }
  0x8b   :  { %2675 = vst.msk [vmem:[%s8093_s1 + $0xff] sm:$0x10] %vm3_vm0, %v122_v7   ;;  %2676 = vst.msk [vmem:[%s8093_s1 + $0x13e] sm:$0x20] %vm3_vm0, %v122_v7  }
  0x8c   :  { %2677 = vst.msk [vmem:[%s8093_s1 + $0x17d] sm:$0x40] %vm3_vm0, %v122_v7   ;;  %2678 = vst.msk [vmem:[%s8093_s1 + $0x1bc] sm:$0x80] %vm3_vm0, %v122_v7   ;;  %v307_v14 = vpop.permute.xlu1 %306   ;;  %v286_v15 = vpop.permute.xlu0 %285  }
  0x8d   :  { %2697 = vst.msk [vmem:[%s8093_s1 + $0x204] sm:$0x1] %vm3_vm0, %v184_v8   ;;  %2698 = vst.msk [vmem:[%s8093_s1 + $0x243] sm:$0x2] %vm3_vm0, %v184_v8  }
  0x8e   :  { %2699 = vst.msk [vmem:[%s8093_s1 + $0x282] sm:$0x4] %vm3_vm0, %v184_v8   ;;  %2700 = vst.msk [vmem:[%s8093_s1 + $0x2c1] sm:$0x8] %vm3_vm0, %v184_v8   ;;  %1495 = vrot.lane.b32.xlu1 %v3854_v1, %s3806_s8  ;;  %1474 = vrot.lane.b32.xlu0 %v3847_v0, %s3806_s8 }
  0x8f   :  { %2701 = vst.msk [vmem:[%s8093_s1 + $0x300] sm:$0x10] %vm3_vm0, %v184_v8   ;;  %2702 = vst.msk [vmem:[%s8093_s1 + $0x33f] sm:$0x20] %vm3_vm0, %v184_v8  }
  0x90   :  { %2703 = vst.msk [vmem:[%s8093_s1 + $0x37e] sm:$0x40] %vm3_vm0, %v184_v8   ;;  %2704 = vst.msk [vmem:[%s8093_s1 + $0x3bd] sm:$0x80] %vm3_vm0, %v184_v8   ;;  %v348_v16 = vpop.permute.xlu1 %347   ;;  %v327_v17 = vpop.permute.xlu0 %326  }
  0x91   :  { %2688 = vst.msk [vmem:[%s8093_s1 + $0x4] sm:$0x1] %vm3_vm0, %v163_v9   ;;  %2689 = vst.msk [vmem:[%s8093_s1 + $0x43] sm:$0x2] %vm3_vm0, %v163_v9  }
  0x92   :  { %2690 = vst.msk [vmem:[%s8093_s1 + $0x82] sm:$0x4] %vm3_vm0, %v163_v9   ;;  %2691 = vst.msk [vmem:[%s8093_s1 + $0xc1] sm:$0x8] %vm3_vm0, %v163_v9   ;;  %1536 = vrot.lane.b32.xlu1 %v3854_v1, %s3807_s12  ;;  %1515 = vrot.lane.b32.xlu0 %v3847_v0, %s3807_s12 }
  0x93   :  { %2692 = vst.msk [vmem:[%s8093_s1 + $0x100] sm:$0x10] %vm3_vm0, %v163_v9   ;;  %2693 = vst.msk [vmem:[%s8093_s1 + $0x13f] sm:$0x20] %vm3_vm0, %v163_v9  }
  0x94   :  { %2694 = vst.msk [vmem:[%s8093_s1 + $0x17e] sm:$0x40] %vm3_vm0, %v163_v9   ;;  %2695 = vst.msk [vmem:[%s8093_s1 + $0x1bd] sm:$0x80] %vm3_vm0, %v163_v9   ;;  %v389_v18 = vpop.permute.xlu1 %388   ;;  %v368_v19 = vpop.permute.xlu0 %367  }
  0x95   :  { %2714 = vst.msk [vmem:[%s8093_s1 + $0x205] sm:$0x1] %vm3_vm0, %v225_v10   ;;  %2715 = vst.msk [vmem:[%s8093_s1 + $0x244] sm:$0x2] %vm3_vm0, %v225_v10  }
  0x96   :  { %2716 = vst.msk [vmem:[%s8093_s1 + $0x283] sm:$0x4] %vm3_vm0, %v225_v10   ;;  %2717 = vst.msk [vmem:[%s8093_s1 + $0x2c2] sm:$0x8] %vm3_vm0, %v225_v10   ;;  %1577 = vrot.lane.b32.xlu1 %v3854_v1, %s3808_s16  ;;  %1556 = vrot.lane.b32.xlu0 %v3847_v0, %s3808_s16 }
  0x97   :  { %2718 = vst.msk [vmem:[%s8093_s1 + $0x301] sm:$0x10] %vm3_vm0, %v225_v10   ;;  %2719 = vst.msk [vmem:[%s8093_s1 + $0x340] sm:$0x20] %vm3_vm0, %v225_v10  }
  0x98   :  { %2720 = vst.msk [vmem:[%s8093_s1 + $0x37f] sm:$0x40] %vm3_vm0, %v225_v10   ;;  %2721 = vst.msk [vmem:[%s8093_s1 + $0x3be] sm:$0x80] %vm3_vm0, %v225_v10   ;;  %v430_v20 = vpop.permute.xlu1 %429   ;;  %v409_v21 = vpop.permute.xlu0 %408  }
  0x99   :  { %2705 = vst.msk [vmem:[%s8093_s1 + $0x5] sm:$0x1] %vm3_vm0, %v204_v11   ;;  %2706 = vst.msk [vmem:[%s8093_s1 + $0x44] sm:$0x2] %vm3_vm0, %v204_v11  }
  0x9a   :  { %2707 = vst.msk [vmem:[%s8093_s1 + $0x83] sm:$0x4] %vm3_vm0, %v204_v11   ;;  %2708 = vst.msk [vmem:[%s8093_s1 + $0xc2] sm:$0x8] %vm3_vm0, %v204_v11   ;;  %1618 = vrot.lane.b32.xlu1 %v3854_v1, %s3809_s20  ;;  %1597 = vrot.lane.b32.xlu0 %v3847_v0, %s3809_s20 }
  0x9b   :  { %2709 = vst.msk [vmem:[%s8093_s1 + $0x101] sm:$0x10] %vm3_vm0, %v204_v11   ;;  %2710 = vst.msk [vmem:[%s8093_s1 + $0x140] sm:$0x20] %vm3_vm0, %v204_v11  }
  0x9c   :  { %2711 = vst.msk [vmem:[%s8093_s1 + $0x17f] sm:$0x40] %vm3_vm0, %v204_v11   ;;  %2712 = vst.msk [vmem:[%s8093_s1 + $0x1be] sm:$0x80] %vm3_vm0, %v204_v11   ;;  %v471_v22 = vpop.permute.xlu1 %470   ;;  %v450_v23 = vpop.permute.xlu0 %449  }
  0x9d   :  { %2731 = vst.msk [vmem:[%s8093_s1 + $0x206] sm:$0x1] %vm3_vm0, %v266_v12   ;;  %2732 = vst.msk [vmem:[%s8093_s1 + $0x245] sm:$0x2] %vm3_vm0, %v266_v12  }
  0x9e   :  { %2733 = vst.msk [vmem:[%s8093_s1 + $0x284] sm:$0x4] %vm3_vm0, %v266_v12   ;;  %2734 = vst.msk [vmem:[%s8093_s1 + $0x2c3] sm:$0x8] %vm3_vm0, %v266_v12   ;;  %1659 = vrot.lane.b32.xlu1 %v3854_v1, %s3810_s24  ;;  %1638 = vrot.lane.b32.xlu0 %v3847_v0, %s3810_s24 }
  0x9f   :  { %2735 = vst.msk [vmem:[%s8093_s1 + $0x302] sm:$0x10] %vm3_vm0, %v266_v12   ;;  %2736 = vst.msk [vmem:[%s8093_s1 + $0x341] sm:$0x20] %vm3_vm0, %v266_v12  }
  0xa0   :  { %2737 = vst.msk [vmem:[%s8093_s1 + $0x380] sm:$0x40] %vm3_vm0, %v266_v12   ;;  %2738 = vst.msk [vmem:[%s8093_s1 + $0x3bf] sm:$0x80] %vm3_vm0, %v266_v12   ;;  %v512_v24 = vpop.permute.xlu1 %511   ;;  %v491_v25 = vpop.permute.xlu0 %490  }
  0xa1   :  { %2722 = vst.msk [vmem:[%s8093_s1 + $0x6] sm:$0x1] %vm3_vm0, %v245_v13   ;;  %2723 = vst.msk [vmem:[%s8093_s1 + $0x45] sm:$0x2] %vm3_vm0, %v245_v13  }
  0xa2   :  { %2724 = vst.msk [vmem:[%s8093_s1 + $0x84] sm:$0x4] %vm3_vm0, %v245_v13   ;;  %2725 = vst.msk [vmem:[%s8093_s1 + $0xc3] sm:$0x8] %vm3_vm0, %v245_v13   ;;  %1700 = vrot.lane.b32.xlu1 %v3854_v1, %s3811_s28  ;;  %1679 = vrot.lane.b32.xlu0 %v3847_v0, %s3811_s28  ;;  %s3831_s28 = smov 67  }
  0xa3   :  { %2726 = vst.msk [vmem:[%s8093_s1 + $0x102] sm:$0x10] %vm3_vm0, %v245_v13   ;;  %2727 = vst.msk [vmem:[%s8093_s1 + $0x141] sm:$0x20] %vm3_vm0, %v245_v13  }
  0xa4   :  { %2728 = vst.msk [vmem:[%s8093_s1 + $0x180] sm:$0x40] %vm3_vm0, %v245_v13   ;;  %2729 = vst.msk [vmem:[%s8093_s1 + $0x1bf] sm:$0x80] %vm3_vm0, %v245_v13   ;;  %v553_v26 = vpop.permute.xlu1 %552   ;;  %v532_v27 = vpop.permute.xlu0 %531  }
  0xa5   :  { %2748 = vst.msk [vmem:[%s8093_s1 + $0x207] sm:$0x1] %vm3_vm0, %v307_v14   ;;  %2749 = vst.msk [vmem:[%s8093_s1 + $0x246] sm:$0x2] %vm3_vm0, %v307_v14  }
  0xa6   :  { %2750 = vst.msk [vmem:[%s8093_s1 + $0x285] sm:$0x4] %vm3_vm0, %v307_v14   ;;  %2751 = vst.msk [vmem:[%s8093_s1 + $0x2c4] sm:$0x8] %vm3_vm0, %v307_v14   ;;  %1741 = vrot.lane.b32.xlu1 %v3854_v1, %s3812_s3  ;;  %1720 = vrot.lane.b32.xlu0 %v3847_v0, %s3812_s3 }
  0xa7   :  { %2752 = vst.msk [vmem:[%s8093_s1 + $0x303] sm:$0x10] %vm3_vm0, %v307_v14   ;;  %2753 = vst.msk [vmem:[%s8093_s1 + $0x342] sm:$0x20] %vm3_vm0, %v307_v14  }
  0xa8   :  { %2754 = vst.msk [vmem:[%s8093_s1 + $0x381] sm:$0x40] %vm3_vm0, %v307_v14   ;;  %2755 = vst.msk [vmem:[%s8093_s1 + $0x3c0] sm:$0x80] %vm3_vm0, %v307_v14   ;;  %v594_v28 = vpop.permute.xlu1 %593   ;;  %v573_v29 = vpop.permute.xlu0 %572  }
  0xa9   :  { %2739 = vst.msk [vmem:[%s8093_s1 + $0x7] sm:$0x1] %vm3_vm0, %v286_v15   ;;  %2740 = vst.msk [vmem:[%s8093_s1 + $0x46] sm:$0x2] %vm3_vm0, %v286_v15  }
  0xaa   :  { %2741 = vst.msk [vmem:[%s8093_s1 + $0x85] sm:$0x4] %vm3_vm0, %v286_v15   ;;  %2742 = vst.msk [vmem:[%s8093_s1 + $0xc4] sm:$0x8] %vm3_vm0, %v286_v15   ;;  %1782 = vrot.lane.b32.xlu1 %v3854_v1, %s3813_s7  ;;  %1761 = vrot.lane.b32.xlu0 %v3847_v0, %s3813_s7 }
  0xab   :  { %2743 = vst.msk [vmem:[%s8093_s1 + $0x103] sm:$0x10] %vm3_vm0, %v286_v15   ;;  %2744 = vst.msk [vmem:[%s8093_s1 + $0x142] sm:$0x20] %vm3_vm0, %v286_v15  }
  0xac   :  { %2745 = vst.msk [vmem:[%s8093_s1 + $0x181] sm:$0x40] %vm3_vm0, %v286_v15   ;;  %2746 = vst.msk [vmem:[%s8093_s1 + $0x1c0] sm:$0x80] %vm3_vm0, %v286_v15   ;;  %v635_v30 = vpop.permute.xlu1 %634   ;;  %v614_v31 = vpop.permute.xlu0 %613  }
  0xad   :  { %2765 = vst.msk [vmem:[%s8093_s1 + $0x208] sm:$0x1] %vm3_vm0, %v348_v16   ;;  %2766 = vst.msk [vmem:[%s8093_s1 + $0x247] sm:$0x2] %vm3_vm0, %v348_v16  }
  0xae   :  { %2767 = vst.msk [vmem:[%s8093_s1 + $0x286] sm:$0x4] %vm3_vm0, %v348_v16   ;;  %2768 = vst.msk [vmem:[%s8093_s1 + $0x2c5] sm:$0x8] %vm3_vm0, %v348_v16   ;;  %1823 = vrot.lane.b32.xlu1 %v3854_v1, %s3814_s11  ;;  %1802 = vrot.lane.b32.xlu0 %v3847_v0, %s3814_s11 }
  0xaf   :  { %2769 = vst.msk [vmem:[%s8093_s1 + $0x304] sm:$0x10] %vm3_vm0, %v348_v16   ;;  %2770 = vst.msk [vmem:[%s8093_s1 + $0x343] sm:$0x20] %vm3_vm0, %v348_v16  }
  0xb0   :  { %2771 = vst.msk [vmem:[%s8093_s1 + $0x382] sm:$0x40] %vm3_vm0, %v348_v16   ;;  %2772 = vst.msk [vmem:[%s8093_s1 + $0x3c1] sm:$0x80] %vm3_vm0, %v348_v16   ;;  %v676_v33 = vpop.permute.xlu1 %675   ;;  %v655_v34 = vpop.permute.xlu0 %654  }
  0xb1   :  { %2756 = vst.msk [vmem:[%s8093_s1 + $0x8] sm:$0x1] %vm3_vm0, %v327_v17   ;;  %2757 = vst.msk [vmem:[%s8093_s1 + $0x47] sm:$0x2] %vm3_vm0, %v327_v17  }
  0xb2   :  { %2758 = vst.msk [vmem:[%s8093_s1 + $0x86] sm:$0x4] %vm3_vm0, %v327_v17   ;;  %2759 = vst.msk [vmem:[%s8093_s1 + $0xc5] sm:$0x8] %vm3_vm0, %v327_v17   ;;  %1864 = vrot.lane.b32.xlu1 %v3854_v1, %s3815_s17  ;;  %1843 = vrot.lane.b32.xlu0 %v4905_v32, %s3815_s17  ;;  %s3829_s17 = smov 69  }
  0xb3   :  { %2760 = vst.msk [vmem:[%s8093_s1 + $0x104] sm:$0x10] %vm3_vm0, %v327_v17   ;;  %2761 = vst.msk [vmem:[%s8093_s1 + $0x143] sm:$0x20] %vm3_vm0, %v327_v17  }
  0xb4   :  { %2762 = vst.msk [vmem:[%s8093_s1 + $0x182] sm:$0x40] %vm3_vm0, %v327_v17   ;;  %2763 = vst.msk [vmem:[%s8093_s1 + $0x1c1] sm:$0x80] %vm3_vm0, %v327_v17   ;;  %v717_v36 = vpop.permute.xlu1 %716   ;;  %v696_v37 = vpop.permute.xlu0 %695  }
  0xb5   :  { %2782 = vst.msk [vmem:[%s8093_s1 + $0x209] sm:$0x1] %vm3_vm0, %v389_v18   ;;  %2783 = vst.msk [vmem:[%s8093_s1 + $0x248] sm:$0x2] %vm3_vm0, %v389_v18  }
  0xb6   :  { %2784 = vst.msk [vmem:[%s8093_s1 + $0x287] sm:$0x4] %vm3_vm0, %v389_v18   ;;  %2785 = vst.msk [vmem:[%s8093_s1 + $0x2c6] sm:$0x8] %vm3_vm0, %v389_v18   ;;  %1905 = vrot.lane.b32.xlu1 %v4976_v35, %s3816_s23  ;;  %1884 = vrot.lane.b32.xlu0 %v4905_v32, %s3816_s23 }
  0xb7   :  { %2786 = vst.msk [vmem:[%s8093_s1 + $0x305] sm:$0x10] %vm3_vm0, %v389_v18   ;;  %2787 = vst.msk [vmem:[%s8093_s1 + $0x344] sm:$0x20] %vm3_vm0, %v389_v18  }
  0xb8   :  { %2788 = vst.msk [vmem:[%s8093_s1 + $0x383] sm:$0x40] %vm3_vm0, %v389_v18   ;;  %2789 = vst.msk [vmem:[%s8093_s1 + $0x3c2] sm:$0x80] %vm3_vm0, %v389_v18   ;;  %v758_v38 = vpop.permute.xlu1 %757   ;;  %v737_v39 = vpop.permute.xlu0 %736  }
  0xb9   :  { %2773 = vst.msk [vmem:[%s8093_s1 + $0x9] sm:$0x1] %vm3_vm0, %v368_v19   ;;  %2774 = vst.msk [vmem:[%s8093_s1 + $0x48] sm:$0x2] %vm3_vm0, %v368_v19  }
  0xba   :  { %2775 = vst.msk [vmem:[%s8093_s1 + $0x87] sm:$0x4] %vm3_vm0, %v368_v19   ;;  %2776 = vst.msk [vmem:[%s8093_s1 + $0xc6] sm:$0x8] %vm3_vm0, %v368_v19   ;;  %1946 = vrot.lane.b32.xlu1 %v4976_v35, %s3817_s27  ;;  %1925 = vrot.lane.b32.xlu0 %v4905_v32, %s3817_s27 }
  0xbb   :  { %2777 = vst.msk [vmem:[%s8093_s1 + $0x105] sm:$0x10] %vm3_vm0, %v368_v19   ;;  %2778 = vst.msk [vmem:[%s8093_s1 + $0x144] sm:$0x20] %vm3_vm0, %v368_v19  }
  0xbc   :  { %2779 = vst.msk [vmem:[%s8093_s1 + $0x183] sm:$0x40] %vm3_vm0, %v368_v19   ;;  %2780 = vst.msk [vmem:[%s8093_s1 + $0x1c2] sm:$0x80] %vm3_vm0, %v368_v19   ;;  %v799_v40 = vpop.permute.xlu1 %798   ;;  %v778_v41 = vpop.permute.xlu0 %777  }
  0xbd   :  { %2799 = vst.msk [vmem:[%s8093_s1 + $0x20a] sm:$0x1] %vm3_vm0, %v430_v20   ;;  %2800 = vst.msk [vmem:[%s8093_s1 + $0x249] sm:$0x2] %vm3_vm0, %v430_v20  }
  0xbe   :  { %2801 = vst.msk [vmem:[%s8093_s1 + $0x288] sm:$0x4] %vm3_vm0, %v430_v20   ;;  %2802 = vst.msk [vmem:[%s8093_s1 + $0x2c7] sm:$0x8] %vm3_vm0, %v430_v20   ;;  %1987 = vrot.lane.b32.xlu1 %v4976_v35, %s3818_s2  ;;  %1966 = vrot.lane.b32.xlu0 %v4905_v32, %s3818_s2  ;;  %s3832_s2 = smov 66  }
  0xbf   :  { %2803 = vst.msk [vmem:[%s8093_s1 + $0x306] sm:$0x10] %vm3_vm0, %v430_v20   ;;  %2804 = vst.msk [vmem:[%s8093_s1 + $0x345] sm:$0x20] %vm3_vm0, %v430_v20  }
  0xc0   :  { %2805 = vst.msk [vmem:[%s8093_s1 + $0x384] sm:$0x40] %vm3_vm0, %v430_v20   ;;  %2806 = vst.msk [vmem:[%s8093_s1 + $0x3c3] sm:$0x80] %vm3_vm0, %v430_v20   ;;  %v840_v42 = vpop.permute.xlu1 %839   ;;  %v819_v43 = vpop.permute.xlu0 %818  }
  0xc1   :  { %2790 = vst.msk [vmem:[%s8093_s1 + $0xa] sm:$0x1] %vm3_vm0, %v409_v21   ;;  %2791 = vst.msk [vmem:[%s8093_s1 + $0x49] sm:$0x2] %vm3_vm0, %v409_v21  }
  0xc2   :  { %2792 = vst.msk [vmem:[%s8093_s1 + $0x88] sm:$0x4] %vm3_vm0, %v409_v21   ;;  %2793 = vst.msk [vmem:[%s8093_s1 + $0xc7] sm:$0x8] %vm3_vm0, %v409_v21   ;;  %2028 = vrot.lane.b32.xlu1 %v4976_v35, %s3819_s6  ;;  %2007 = vrot.lane.b32.xlu0 %v4905_v32, %s3819_s6 }
  0xc3   :  { %2794 = vst.msk [vmem:[%s8093_s1 + $0x106] sm:$0x10] %vm3_vm0, %v409_v21   ;;  %2795 = vst.msk [vmem:[%s8093_s1 + $0x145] sm:$0x20] %vm3_vm0, %v409_v21  }
  0xc4   :  { %2796 = vst.msk [vmem:[%s8093_s1 + $0x184] sm:$0x40] %vm3_vm0, %v409_v21   ;;  %2797 = vst.msk [vmem:[%s8093_s1 + $0x1c3] sm:$0x80] %vm3_vm0, %v409_v21   ;;  %v881_v44 = vpop.permute.xlu1 %880   ;;  %v860_v45 = vpop.permute.xlu0 %859  }
  0xc5   :  { %2816 = vst.msk [vmem:[%s8093_s1 + $0x20b] sm:$0x1] %vm3_vm0, %v471_v22   ;;  %2817 = vst.msk [vmem:[%s8093_s1 + $0x24a] sm:$0x2] %vm3_vm0, %v471_v22  }
  0xc6   :  { %2818 = vst.msk [vmem:[%s8093_s1 + $0x289] sm:$0x4] %vm3_vm0, %v471_v22   ;;  %2819 = vst.msk [vmem:[%s8093_s1 + $0x2c8] sm:$0x8] %vm3_vm0, %v471_v22   ;;  %2069 = vrot.lane.b32.xlu1 %v4976_v35, %s3820_s10  ;;  %2048 = vrot.lane.b32.xlu0 %v4905_v32, %s3820_s10 }
  0xc7   :  { %2820 = vst.msk [vmem:[%s8093_s1 + $0x307] sm:$0x10] %vm3_vm0, %v471_v22   ;;  %2821 = vst.msk [vmem:[%s8093_s1 + $0x346] sm:$0x20] %vm3_vm0, %v471_v22  }
  0xc8   :  { %2822 = vst.msk [vmem:[%s8093_s1 + $0x385] sm:$0x40] %vm3_vm0, %v471_v22   ;;  %2823 = vst.msk [vmem:[%s8093_s1 + $0x3c4] sm:$0x80] %vm3_vm0, %v471_v22   ;;  %v922_v46 = vpop.permute.xlu1 %921   ;;  %v901_v47 = vpop.permute.xlu0 %900  }
  0xc9   :  { %2807 = vst.msk [vmem:[%s8093_s1 + $0xb] sm:$0x1] %vm3_vm0, %v450_v23   ;;  %2808 = vst.msk [vmem:[%s8093_s1 + $0x4a] sm:$0x2] %vm3_vm0, %v450_v23  }
  0xca   :  { %2809 = vst.msk [vmem:[%s8093_s1 + $0x89] sm:$0x4] %vm3_vm0, %v450_v23   ;;  %2810 = vst.msk [vmem:[%s8093_s1 + $0xc8] sm:$0x8] %vm3_vm0, %v450_v23   ;;  %2110 = vrot.lane.b32.xlu1 %v4976_v35, %s3821_s14  ;;  %2089 = vrot.lane.b32.xlu0 %v4905_v32, %s3821_s14 }
  0xcb   :  { %2811 = vst.msk [vmem:[%s8093_s1 + $0x107] sm:$0x10] %vm3_vm0, %v450_v23   ;;  %2812 = vst.msk [vmem:[%s8093_s1 + $0x146] sm:$0x20] %vm3_vm0, %v450_v23  }
  0xcc   :  { %2813 = vst.msk [vmem:[%s8093_s1 + $0x185] sm:$0x40] %vm3_vm0, %v450_v23   ;;  %2814 = vst.msk [vmem:[%s8093_s1 + $0x1c4] sm:$0x80] %vm3_vm0, %v450_v23   ;;  %v963_v48 = vpop.permute.xlu1 %962   ;;  %v942_v49 = vpop.permute.xlu0 %941  }
  0xcd   :  { %2833 = vst.msk [vmem:[%s8093_s1 + $0x20c] sm:$0x1] %vm3_vm0, %v512_v24   ;;  %2834 = vst.msk [vmem:[%s8093_s1 + $0x24b] sm:$0x2] %vm3_vm0, %v512_v24  }
  0xce   :  { %2835 = vst.msk [vmem:[%s8093_s1 + $0x28a] sm:$0x4] %vm3_vm0, %v512_v24   ;;  %2836 = vst.msk [vmem:[%s8093_s1 + $0x2c9] sm:$0x8] %vm3_vm0, %v512_v24   ;;  %2151 = vrot.lane.b32.xlu1 %v4976_v35, %s3822_s18  ;;  %2130 = vrot.lane.b32.xlu0 %v4905_v32, %s3822_s18 }
  0xcf   :  { %2837 = vst.msk [vmem:[%s8093_s1 + $0x308] sm:$0x10] %vm3_vm0, %v512_v24   ;;  %2838 = vst.msk [vmem:[%s8093_s1 + $0x347] sm:$0x20] %vm3_vm0, %v512_v24  }
  0xd0   :  { %2839 = vst.msk [vmem:[%s8093_s1 + $0x386] sm:$0x40] %vm3_vm0, %v512_v24   ;;  %2840 = vst.msk [vmem:[%s8093_s1 + $0x3c5] sm:$0x80] %vm3_vm0, %v512_v24   ;;  %v1004_v50 = vpop.permute.xlu1 %1003   ;;  %v983_v51 = vpop.permute.xlu0 %982  }
  0xd1   :  { %2824 = vst.msk [vmem:[%s8093_s1 + $0xc] sm:$0x1] %vm3_vm0, %v491_v25   ;;  %2825 = vst.msk [vmem:[%s8093_s1 + $0x4b] sm:$0x2] %vm3_vm0, %v491_v25  }
  0xd2   :  { %2826 = vst.msk [vmem:[%s8093_s1 + $0x8a] sm:$0x4] %vm3_vm0, %v491_v25   ;;  %2827 = vst.msk [vmem:[%s8093_s1 + $0xc9] sm:$0x8] %vm3_vm0, %v491_v25   ;;  %2192 = vrot.lane.b32.xlu1 %v4976_v35, %s3823_s22  ;;  %2171 = vrot.lane.b32.xlu0 %v4905_v32, %s3823_s22 }
  0xd3   :  { %2828 = vst.msk [vmem:[%s8093_s1 + $0x108] sm:$0x10] %vm3_vm0, %v491_v25   ;;  %2829 = vst.msk [vmem:[%s8093_s1 + $0x147] sm:$0x20] %vm3_vm0, %v491_v25  }
  0xd4   :  { %2830 = vst.msk [vmem:[%s8093_s1 + $0x186] sm:$0x40] %vm3_vm0, %v491_v25   ;;  %2831 = vst.msk [vmem:[%s8093_s1 + $0x1c5] sm:$0x80] %vm3_vm0, %v491_v25   ;;  %v1045_v52 = vpop.permute.xlu1 %1044   ;;  %v1024_v53 = vpop.permute.xlu0 %1023  }
  0xd5   :  { %2850 = vst.msk [vmem:[%s8093_s1 + $0x20d] sm:$0x1] %vm3_vm0, %v553_v26   ;;  %2851 = vst.msk [vmem:[%s8093_s1 + $0x24c] sm:$0x2] %vm3_vm0, %v553_v26  }
  0xd6   :  { %2852 = vst.msk [vmem:[%s8093_s1 + $0x28b] sm:$0x4] %vm3_vm0, %v553_v26   ;;  %2853 = vst.msk [vmem:[%s8093_s1 + $0x2ca] sm:$0x8] %vm3_vm0, %v553_v26   ;;  %2233 = vrot.lane.b32.xlu1 %v4976_v35, %s3824_s26  ;;  %2212 = vrot.lane.b32.xlu0 %v4905_v32, %s3824_s26 }
  0xd7   :  { %2854 = vst.msk [vmem:[%s8093_s1 + $0x309] sm:$0x10] %vm3_vm0, %v553_v26   ;;  %2855 = vst.msk [vmem:[%s8093_s1 + $0x348] sm:$0x20] %vm3_vm0, %v553_v26  }
  0xd8   :  { %2856 = vst.msk [vmem:[%s8093_s1 + $0x387] sm:$0x40] %vm3_vm0, %v553_v26   ;;  %2857 = vst.msk [vmem:[%s8093_s1 + $0x3c6] sm:$0x80] %vm3_vm0, %v553_v26   ;;  %v1086_v54 = vpop.permute.xlu1 %1085   ;;  %v1065_v55 = vpop.permute.xlu0 %1064  }
  0xd9   :  { %2841 = vst.msk [vmem:[%s8093_s1 + $0xd] sm:$0x1] %vm3_vm0, %v532_v27   ;;  %2842 = vst.msk [vmem:[%s8093_s1 + $0x4c] sm:$0x2] %vm3_vm0, %v532_v27  }
  0xda   :  { %2843 = vst.msk [vmem:[%s8093_s1 + $0x8b] sm:$0x4] %vm3_vm0, %v532_v27   ;;  %2844 = vst.msk [vmem:[%s8093_s1 + $0xca] sm:$0x8] %vm3_vm0, %v532_v27   ;;  %2274 = vrot.lane.b32.xlu1 %v4976_v35, %s3825_s30  ;;  %2253 = vrot.lane.b32.xlu0 %v4905_v32, %s3825_s30 }
  0xdb   :  { %2845 = vst.msk [vmem:[%s8093_s1 + $0x109] sm:$0x10] %vm3_vm0, %v532_v27   ;;  %2846 = vst.msk [vmem:[%s8093_s1 + $0x148] sm:$0x20] %vm3_vm0, %v532_v27  }
  0xdc   :  { %2847 = vst.msk [vmem:[%s8093_s1 + $0x187] sm:$0x40] %vm3_vm0, %v532_v27   ;;  %2848 = vst.msk [vmem:[%s8093_s1 + $0x1c6] sm:$0x80] %vm3_vm0, %v532_v27   ;;  %v1127_v56 = vpop.permute.xlu1 %1126   ;;  %v1106_v57 = vpop.permute.xlu0 %1105  }
  0xdd   :  { %2867 = vst.msk [vmem:[%s8093_s1 + $0x20e] sm:$0x1] %vm3_vm0, %v594_v28   ;;  %2868 = vst.msk [vmem:[%s8093_s1 + $0x24d] sm:$0x2] %vm3_vm0, %v594_v28  }
  0xde   :  { %2869 = vst.msk [vmem:[%s8093_s1 + $0x28c] sm:$0x4] %vm3_vm0, %v594_v28   ;;  %2870 = vst.msk [vmem:[%s8093_s1 + $0x2cb] sm:$0x8] %vm3_vm0, %v594_v28   ;;  %2315 = vrot.lane.b32.xlu1 %v4976_v35, %s3826_s5  ;;  %2294 = vrot.lane.b32.xlu0 %v4905_v32, %s3826_s5  ;;  %s3833_s5 = smov 65  }
  0xdf   :  { %2871 = vst.msk [vmem:[%s8093_s1 + $0x30a] sm:$0x10] %vm3_vm0, %v594_v28   ;;  %2872 = vst.msk [vmem:[%s8093_s1 + $0x349] sm:$0x20] %vm3_vm0, %v594_v28  }
  0xe0   :  { %2873 = vst.msk [vmem:[%s8093_s1 + $0x388] sm:$0x40] %vm3_vm0, %v594_v28   ;;  %2874 = vst.msk [vmem:[%s8093_s1 + $0x3c7] sm:$0x80] %vm3_vm0, %v594_v28   ;;  %v1168_v58 = vpop.permute.xlu1 %1167   ;;  %v1147_v59 = vpop.permute.xlu0 %1146  }
  0xe1   :  { %2858 = vst.msk [vmem:[%s8093_s1 + $0xe] sm:$0x1] %vm3_vm0, %v573_v29   ;;  %2859 = vst.msk [vmem:[%s8093_s1 + $0x4d] sm:$0x2] %vm3_vm0, %v573_v29  }
  0xe2   :  { %2860 = vst.msk [vmem:[%s8093_s1 + $0x8c] sm:$0x4] %vm3_vm0, %v573_v29   ;;  %2861 = vst.msk [vmem:[%s8093_s1 + $0xcb] sm:$0x8] %vm3_vm0, %v573_v29   ;;  %2356 = vrot.lane.b32.xlu1 %v4976_v35, %s3827_s9  ;;  %2335 = vrot.lane.b32.xlu0 %v4905_v32, %s3827_s9 }
  0xe3   :  { %2862 = vst.msk [vmem:[%s8093_s1 + $0x10a] sm:$0x10] %vm3_vm0, %v573_v29   ;;  %2863 = vst.msk [vmem:[%s8093_s1 + $0x149] sm:$0x20] %vm3_vm0, %v573_v29  }
  0xe4   :  { %2864 = vst.msk [vmem:[%s8093_s1 + $0x188] sm:$0x40] %vm3_vm0, %v573_v29   ;;  %2865 = vst.msk [vmem:[%s8093_s1 + $0x1c7] sm:$0x80] %vm3_vm0, %v573_v29   ;;  %v1209_v60 = vpop.permute.xlu1 %1208   ;;  %v1188_v61 = vpop.permute.xlu0 %1187  }
  0xe5   :  { %2884 = vst.msk [vmem:[%s8093_s1 + $0x20f] sm:$0x1] %vm3_vm0, %v635_v30   ;;  %2885 = vst.msk [vmem:[%s8093_s1 + $0x24e] sm:$0x2] %vm3_vm0, %v635_v30  }
  0xe6   :  { %2886 = vst.msk [vmem:[%s8093_s1 + $0x28d] sm:$0x4] %vm3_vm0, %v635_v30   ;;  %2887 = vst.msk [vmem:[%s8093_s1 + $0x2cc] sm:$0x8] %vm3_vm0, %v635_v30   ;;  %2397 = vrot.lane.b32.xlu1 %v4976_v35, %s3828_s13  ;;  %2376 = vrot.lane.b32.xlu0 %v4905_v32, %s3828_s13 }
  0xe7   :  { %2888 = vst.msk [vmem:[%s8093_s1 + $0x30b] sm:$0x10] %vm3_vm0, %v635_v30   ;;  %2889 = vst.msk [vmem:[%s8093_s1 + $0x34a] sm:$0x20] %vm3_vm0, %v635_v30  }
  0xe8   :  { %2890 = vst.msk [vmem:[%s8093_s1 + $0x389] sm:$0x40] %vm3_vm0, %v635_v30   ;;  %2891 = vst.msk [vmem:[%s8093_s1 + $0x3c8] sm:$0x80] %vm3_vm0, %v635_v30   ;;  %v1250_v62 = vpop.permute.xlu1 %1249   ;;  %v1229_v63 = vpop.permute.xlu0 %1228  }
  0xe9   :  { %2875 = vst.msk [vmem:[%s8093_s1 + $0xf] sm:$0x1] %vm3_vm0, %v614_v31   ;;  %2876 = vst.msk [vmem:[%s8093_s1 + $0x4e] sm:$0x2] %vm3_vm0, %v614_v31  }
  0xea   :  { %2877 = vst.msk [vmem:[%s8093_s1 + $0x8d] sm:$0x4] %vm3_vm0, %v614_v31   ;;  %2878 = vst.msk [vmem:[%s8093_s1 + $0xcc] sm:$0x8] %vm3_vm0, %v614_v31   ;;  %2438 = vrot.lane.b32.xlu1 %v4976_v35, %s3829_s17  ;;  %2417 = vrot.lane.b32.xlu0 %v4905_v32, %s3829_s17 }
  0xeb   :  { %2879 = vst.msk [vmem:[%s8093_s1 + $0x10b] sm:$0x10] %vm3_vm0, %v614_v31   ;;  %2880 = vst.msk [vmem:[%s8093_s1 + $0x14a] sm:$0x20] %vm3_vm0, %v614_v31  }
  0xec   :  { %2881 = vst.msk [vmem:[%s8093_s1 + $0x189] sm:$0x40] %vm3_vm0, %v614_v31   ;;  %2882 = vst.msk [vmem:[%s8093_s1 + $0x1c8] sm:$0x80] %vm3_vm0, %v614_v31   ;;  %v1291_v0 = vpop.permute.xlu1 %1290   ;;  %v1270_v1 = vpop.permute.xlu0 %1269  }
  0xed   :  { %2901 = vst.msk [vmem:[%s8093_s1 + $0x210] sm:$0x1] %vm3_vm0, %v676_v33   ;;  %2902 = vst.msk [vmem:[%s8093_s1 + $0x24f] sm:$0x2] %vm3_vm0, %v676_v33  }
  0xee   :  { %2903 = vst.msk [vmem:[%s8093_s1 + $0x28e] sm:$0x4] %vm3_vm0, %v676_v33   ;;  %2904 = vst.msk [vmem:[%s8093_s1 + $0x2cd] sm:$0x8] %vm3_vm0, %v676_v33   ;;  %2479 = vrot.lane.b32.xlu1 %v4976_v35, %s3830_s25  ;;  %2458 = vrot.lane.b32.xlu0 %v4905_v32, %s3830_s25 }
  0xef   :  { %2905 = vst.msk [vmem:[%s8093_s1 + $0x30c] sm:$0x10] %vm3_vm0, %v676_v33   ;;  %2906 = vst.msk [vmem:[%s8093_s1 + $0x34b] sm:$0x20] %vm3_vm0, %v676_v33  }
  0xf0   :  { %2907 = vst.msk [vmem:[%s8093_s1 + $0x38a] sm:$0x40] %vm3_vm0, %v676_v33   ;;  %2908 = vst.msk [vmem:[%s8093_s1 + $0x3c9] sm:$0x80] %vm3_vm0, %v676_v33   ;;  %v1332_v4 = vpop.permute.xlu1 %1331   ;;  %v1311_v5 = vpop.permute.xlu0 %1310  }
  0xf1   :  { %2892 = vst.msk [vmem:[%s8093_s1 + $0x10] sm:$0x1] %vm3_vm0, %v655_v34   ;;  %2893 = vst.msk [vmem:[%s8093_s1 + $0x4f] sm:$0x2] %vm3_vm0, %v655_v34  }
  0xf2   :  { %2894 = vst.msk [vmem:[%s8093_s1 + $0x8e] sm:$0x4] %vm3_vm0, %v655_v34   ;;  %2895 = vst.msk [vmem:[%s8093_s1 + $0xcd] sm:$0x8] %vm3_vm0, %v655_v34   ;;  %2520 = vrot.lane.b32.xlu1 %v4976_v35, %s3831_s28  ;;  %2499 = vrot.lane.b32.xlu0 %v4905_v32, %s3831_s28 }
  0xf3   :  { %2896 = vst.msk [vmem:[%s8093_s1 + $0x10c] sm:$0x10] %vm3_vm0, %v655_v34   ;;  %2897 = vst.msk [vmem:[%s8093_s1 + $0x14b] sm:$0x20] %vm3_vm0, %v655_v34  }
  0xf4   :  { %2898 = vst.msk [vmem:[%s8093_s1 + $0x18a] sm:$0x40] %vm3_vm0, %v655_v34   ;;  %2899 = vst.msk [vmem:[%s8093_s1 + $0x1c9] sm:$0x80] %vm3_vm0, %v655_v34   ;;  %v1373_v6 = vpop.permute.xlu1 %1372   ;;  %v1352_v7 = vpop.permute.xlu0 %1351  }
  0xf5   :  { %2918 = vst.msk [vmem:[%s8093_s1 + $0x211] sm:$0x1] %vm3_vm0, %v717_v36   ;;  %2919 = vst.msk [vmem:[%s8093_s1 + $0x250] sm:$0x2] %vm3_vm0, %v717_v36  }
  0xf6   :  { %2920 = vst.msk [vmem:[%s8093_s1 + $0x28f] sm:$0x4] %vm3_vm0, %v717_v36   ;;  %2921 = vst.msk [vmem:[%s8093_s1 + $0x2ce] sm:$0x8] %vm3_vm0, %v717_v36   ;;  %2561 = vrot.lane.b32.xlu1 %v4976_v35, %s3832_s2  ;;  %2540 = vrot.lane.b32.xlu0 %v4905_v32, %s3832_s2 }
  0xf7   :  { %2922 = vst.msk [vmem:[%s8093_s1 + $0x30d] sm:$0x10] %vm3_vm0, %v717_v36   ;;  %2923 = vst.msk [vmem:[%s8093_s1 + $0x34c] sm:$0x20] %vm3_vm0, %v717_v36  }
  0xf8   :  { %2924 = vst.msk [vmem:[%s8093_s1 + $0x38b] sm:$0x40] %vm3_vm0, %v717_v36   ;;  %2925 = vst.msk [vmem:[%s8093_s1 + $0x3ca] sm:$0x80] %vm3_vm0, %v717_v36   ;;  %v1414_v8 = vpop.permute.xlu1 %1413   ;;  %v1393_v9 = vpop.permute.xlu0 %1392  }
  0xf9   :  { %2909 = vst.msk [vmem:[%s8093_s1 + $0x11] sm:$0x1] %vm3_vm0, %v696_v37   ;;  %2910 = vst.msk [vmem:[%s8093_s1 + $0x50] sm:$0x2] %vm3_vm0, %v696_v37  }
  0xfa   :  { %2911 = vst.msk [vmem:[%s8093_s1 + $0x8f] sm:$0x4] %vm3_vm0, %v696_v37   ;;  %2912 = vst.msk [vmem:[%s8093_s1 + $0xce] sm:$0x8] %vm3_vm0, %v696_v37   ;;  %2602 = vrot.lane.b32.xlu1 %v4976_v35, %s3833_s5  ;;  %2581 = vrot.lane.b32.xlu0 %v4905_v32, %s3833_s5 }
  0xfb   :  { %2913 = vst.msk [vmem:[%s8093_s1 + $0x10d] sm:$0x10] %vm3_vm0, %v696_v37   ;;  %2914 = vst.msk [vmem:[%s8093_s1 + $0x14c] sm:$0x20] %vm3_vm0, %v696_v37  }
  0xfc   :  { %2915 = vst.msk [vmem:[%s8093_s1 + $0x18b] sm:$0x40] %vm3_vm0, %v696_v37   ;;  %2916 = vst.msk [vmem:[%s8093_s1 + $0x1ca] sm:$0x80] %vm3_vm0, %v696_v37   ;;  %v1455_v10 = vpop.permute.xlu1 %1454   ;;  %v1434_v11 = vpop.permute.xlu0 %1433  }
  0xfd   :  { %2935 = vst.msk [vmem:[%s8093_s1 + $0x212] sm:$0x1] %vm3_vm0, %v758_v38   ;;  %2936 = vst.msk [vmem:[%s8093_s1 + $0x251] sm:$0x2] %vm3_vm0, %v758_v38  }
  0xfe   :  { %2937 = vst.msk [vmem:[%s8093_s1 + $0x290] sm:$0x4] %vm3_vm0, %v758_v38   ;;  %2938 = vst.msk [vmem:[%s8093_s1 + $0x2cf] sm:$0x8] %vm3_vm0, %v758_v38  }
  0xff   :  { %2939 = vst.msk [vmem:[%s8093_s1 + $0x30e] sm:$0x10] %vm3_vm0, %v758_v38   ;;  %2940 = vst.msk [vmem:[%s8093_s1 + $0x34d] sm:$0x20] %vm3_vm0, %v758_v38  }
 0x100   :  { %2941 = vst.msk [vmem:[%s8093_s1 + $0x38c] sm:$0x40] %vm3_vm0, %v758_v38   ;;  %2942 = vst.msk [vmem:[%s8093_s1 + $0x3cb] sm:$0x80] %vm3_vm0, %v758_v38   ;;  %v1496_v12 = vpop.permute.xlu1 %1495   ;;  %v1475_v13 = vpop.permute.xlu0 %1474  }
 0x101   :  { %2926 = vst.msk [vmem:[%s8093_s1 + $0x12] sm:$0x1] %vm3_vm0, %v737_v39   ;;  %2927 = vst.msk [vmem:[%s8093_s1 + $0x51] sm:$0x2] %vm3_vm0, %v737_v39  }
 0x102   :  { %2928 = vst.msk [vmem:[%s8093_s1 + $0x90] sm:$0x4] %vm3_vm0, %v737_v39   ;;  %2929 = vst.msk [vmem:[%s8093_s1 + $0xcf] sm:$0x8] %vm3_vm0, %v737_v39  }
 0x103   :  { %2930 = vst.msk [vmem:[%s8093_s1 + $0x10e] sm:$0x10] %vm3_vm0, %v737_v39   ;;  %2931 = vst.msk [vmem:[%s8093_s1 + $0x14d] sm:$0x20] %vm3_vm0, %v737_v39  }
 0x104   :  { %2932 = vst.msk [vmem:[%s8093_s1 + $0x18c] sm:$0x40] %vm3_vm0, %v737_v39   ;;  %2933 = vst.msk [vmem:[%s8093_s1 + $0x1cb] sm:$0x80] %vm3_vm0, %v737_v39   ;;  %v1537_v14 = vpop.permute.xlu1 %1536   ;;  %v1516_v15 = vpop.permute.xlu0 %1515  }
 0x105   :  { %2952 = vst.msk [vmem:[%s8093_s1 + $0x213] sm:$0x1] %vm3_vm0, %v799_v40   ;;  %2953 = vst.msk [vmem:[%s8093_s1 + $0x252] sm:$0x2] %vm3_vm0, %v799_v40  }
 0x106   :  { %2954 = vst.msk [vmem:[%s8093_s1 + $0x291] sm:$0x4] %vm3_vm0, %v799_v40   ;;  %2955 = vst.msk [vmem:[%s8093_s1 + $0x2d0] sm:$0x8] %vm3_vm0, %v799_v40  }
 0x107   :  { %2956 = vst.msk [vmem:[%s8093_s1 + $0x30f] sm:$0x10] %vm3_vm0, %v799_v40   ;;  %2957 = vst.msk [vmem:[%s8093_s1 + $0x34e] sm:$0x20] %vm3_vm0, %v799_v40  }
 0x108   :  { %2958 = vst.msk [vmem:[%s8093_s1 + $0x38d] sm:$0x40] %vm3_vm0, %v799_v40   ;;  %2959 = vst.msk [vmem:[%s8093_s1 + $0x3cc] sm:$0x80] %vm3_vm0, %v799_v40   ;;  %v1578_v16 = vpop.permute.xlu1 %1577   ;;  %v1557_v17 = vpop.permute.xlu0 %1556  }
 0x109   :  { %2943 = vst.msk [vmem:[%s8093_s1 + $0x13] sm:$0x1] %vm3_vm0, %v778_v41   ;;  %2944 = vst.msk [vmem:[%s8093_s1 + $0x52] sm:$0x2] %vm3_vm0, %v778_v41  }
 0x10a   :  { %2945 = vst.msk [vmem:[%s8093_s1 + $0x91] sm:$0x4] %vm3_vm0, %v778_v41   ;;  %2946 = vst.msk [vmem:[%s8093_s1 + $0xd0] sm:$0x8] %vm3_vm0, %v778_v41  }
 0x10b   :  { %2947 = vst.msk [vmem:[%s8093_s1 + $0x10f] sm:$0x10] %vm3_vm0, %v778_v41   ;;  %2948 = vst.msk [vmem:[%s8093_s1 + $0x14e] sm:$0x20] %vm3_vm0, %v778_v41  }
 0x10c   :  { %2949 = vst.msk [vmem:[%s8093_s1 + $0x18d] sm:$0x40] %vm3_vm0, %v778_v41   ;;  %2950 = vst.msk [vmem:[%s8093_s1 + $0x1cc] sm:$0x80] %vm3_vm0, %v778_v41   ;;  %v1619_v18 = vpop.permute.xlu1 %1618   ;;  %v1598_v19 = vpop.permute.xlu0 %1597  }
 0x10d   :  { %2969 = vst.msk [vmem:[%s8093_s1 + $0x214] sm:$0x1] %vm3_vm0, %v840_v42   ;;  %2970 = vst.msk [vmem:[%s8093_s1 + $0x253] sm:$0x2] %vm3_vm0, %v840_v42  }
 0x10e   :  { %2971 = vst.msk [vmem:[%s8093_s1 + $0x292] sm:$0x4] %vm3_vm0, %v840_v42   ;;  %2972 = vst.msk [vmem:[%s8093_s1 + $0x2d1] sm:$0x8] %vm3_vm0, %v840_v42  }
 0x10f   :  { %2973 = vst.msk [vmem:[%s8093_s1 + $0x310] sm:$0x10] %vm3_vm0, %v840_v42   ;;  %2974 = vst.msk [vmem:[%s8093_s1 + $0x34f] sm:$0x20] %vm3_vm0, %v840_v42  }
 0x110   :  { %2975 = vst.msk [vmem:[%s8093_s1 + $0x38e] sm:$0x40] %vm3_vm0, %v840_v42   ;;  %2976 = vst.msk [vmem:[%s8093_s1 + $0x3cd] sm:$0x80] %vm3_vm0, %v840_v42   ;;  %v1660_v20 = vpop.permute.xlu1 %1659   ;;  %v1639_v21 = vpop.permute.xlu0 %1638  }
 0x111   :  { %2960 = vst.msk [vmem:[%s8093_s1 + $0x14] sm:$0x1] %vm3_vm0, %v819_v43   ;;  %2961 = vst.msk [vmem:[%s8093_s1 + $0x53] sm:$0x2] %vm3_vm0, %v819_v43  }
 0x112   :  { %2962 = vst.msk [vmem:[%s8093_s1 + $0x92] sm:$0x4] %vm3_vm0, %v819_v43   ;;  %2963 = vst.msk [vmem:[%s8093_s1 + $0xd1] sm:$0x8] %vm3_vm0, %v819_v43  }
 0x113   :  { %2964 = vst.msk [vmem:[%s8093_s1 + $0x110] sm:$0x10] %vm3_vm0, %v819_v43   ;;  %2965 = vst.msk [vmem:[%s8093_s1 + $0x14f] sm:$0x20] %vm3_vm0, %v819_v43  }
 0x114   :  { %2966 = vst.msk [vmem:[%s8093_s1 + $0x18e] sm:$0x40] %vm3_vm0, %v819_v43   ;;  %2967 = vst.msk [vmem:[%s8093_s1 + $0x1cd] sm:$0x80] %vm3_vm0, %v819_v43   ;;  %v1701_v22 = vpop.permute.xlu1 %1700   ;;  %v1680_v23 = vpop.permute.xlu0 %1679  }
 0x115   :  { %2986 = vst.msk [vmem:[%s8093_s1 + $0x215] sm:$0x1] %vm3_vm0, %v881_v44   ;;  %2987 = vst.msk [vmem:[%s8093_s1 + $0x254] sm:$0x2] %vm3_vm0, %v881_v44  }
 0x116   :  { %2988 = vst.msk [vmem:[%s8093_s1 + $0x293] sm:$0x4] %vm3_vm0, %v881_v44   ;;  %2989 = vst.msk [vmem:[%s8093_s1 + $0x2d2] sm:$0x8] %vm3_vm0, %v881_v44  }
 0x117   :  { %2990 = vst.msk [vmem:[%s8093_s1 + $0x311] sm:$0x10] %vm3_vm0, %v881_v44   ;;  %2991 = vst.msk [vmem:[%s8093_s1 + $0x350] sm:$0x20] %vm3_vm0, %v881_v44  }
 0x118   :  { %2992 = vst.msk [vmem:[%s8093_s1 + $0x38f] sm:$0x40] %vm3_vm0, %v881_v44   ;;  %2993 = vst.msk [vmem:[%s8093_s1 + $0x3ce] sm:$0x80] %vm3_vm0, %v881_v44   ;;  %v1742_v24 = vpop.permute.xlu1 %1741   ;;  %v1721_v25 = vpop.permute.xlu0 %1720  }
 0x119   :  { %2977 = vst.msk [vmem:[%s8093_s1 + $0x15] sm:$0x1] %vm3_vm0, %v860_v45   ;;  %2978 = vst.msk [vmem:[%s8093_s1 + $0x54] sm:$0x2] %vm3_vm0, %v860_v45  }
 0x11a   :  { %2979 = vst.msk [vmem:[%s8093_s1 + $0x93] sm:$0x4] %vm3_vm0, %v860_v45   ;;  %2980 = vst.msk [vmem:[%s8093_s1 + $0xd2] sm:$0x8] %vm3_vm0, %v860_v45  }
 0x11b   :  { %2981 = vst.msk [vmem:[%s8093_s1 + $0x111] sm:$0x10] %vm3_vm0, %v860_v45   ;;  %2982 = vst.msk [vmem:[%s8093_s1 + $0x150] sm:$0x20] %vm3_vm0, %v860_v45  }
 0x11c   :  { %2983 = vst.msk [vmem:[%s8093_s1 + $0x18f] sm:$0x40] %vm3_vm0, %v860_v45   ;;  %2984 = vst.msk [vmem:[%s8093_s1 + $0x1ce] sm:$0x80] %vm3_vm0, %v860_v45   ;;  %v1783_v26 = vpop.permute.xlu1 %1782   ;;  %v1762_v27 = vpop.permute.xlu0 %1761  }
 0x11d   :  { %3003 = vst.msk [vmem:[%s8093_s1 + $0x216] sm:$0x1] %vm3_vm0, %v922_v46   ;;  %3004 = vst.msk [vmem:[%s8093_s1 + $0x255] sm:$0x2] %vm3_vm0, %v922_v46  }
 0x11e   :  { %3005 = vst.msk [vmem:[%s8093_s1 + $0x294] sm:$0x4] %vm3_vm0, %v922_v46   ;;  %3006 = vst.msk [vmem:[%s8093_s1 + $0x2d3] sm:$0x8] %vm3_vm0, %v922_v46  }
 0x11f   :  { %3007 = vst.msk [vmem:[%s8093_s1 + $0x312] sm:$0x10] %vm3_vm0, %v922_v46   ;;  %3008 = vst.msk [vmem:[%s8093_s1 + $0x351] sm:$0x20] %vm3_vm0, %v922_v46  }
 0x120   :  { %3009 = vst.msk [vmem:[%s8093_s1 + $0x390] sm:$0x40] %vm3_vm0, %v922_v46   ;;  %3010 = vst.msk [vmem:[%s8093_s1 + $0x3cf] sm:$0x80] %vm3_vm0, %v922_v46   ;;  %v1824_v28 = vpop.permute.xlu1 %1823   ;;  %v1803_v29 = vpop.permute.xlu0 %1802  }
 0x121   :  { %2994 = vst.msk [vmem:[%s8093_s1 + $0x16] sm:$0x1] %vm3_vm0, %v901_v47   ;;  %2995 = vst.msk [vmem:[%s8093_s1 + $0x55] sm:$0x2] %vm3_vm0, %v901_v47  }
 0x122   :  { %2996 = vst.msk [vmem:[%s8093_s1 + $0x94] sm:$0x4] %vm3_vm0, %v901_v47   ;;  %2997 = vst.msk [vmem:[%s8093_s1 + $0xd3] sm:$0x8] %vm3_vm0, %v901_v47  }
 0x123   :  { %2998 = vst.msk [vmem:[%s8093_s1 + $0x112] sm:$0x10] %vm3_vm0, %v901_v47   ;;  %2999 = vst.msk [vmem:[%s8093_s1 + $0x151] sm:$0x20] %vm3_vm0, %v901_v47  }
 0x124   :  { %3000 = vst.msk [vmem:[%s8093_s1 + $0x190] sm:$0x40] %vm3_vm0, %v901_v47   ;;  %3001 = vst.msk [vmem:[%s8093_s1 + $0x1cf] sm:$0x80] %vm3_vm0, %v901_v47   ;;  %v1865_v30 = vpop.permute.xlu1 %1864   ;;  %v1844_v31 = vpop.permute.xlu0 %1843  }
 0x125   :  { %3020 = vst.msk [vmem:[%s8093_s1 + $0x217] sm:$0x1] %vm3_vm0, %v963_v48   ;;  %3021 = vst.msk [vmem:[%s8093_s1 + $0x256] sm:$0x2] %vm3_vm0, %v963_v48  }
 0x126   :  { %3022 = vst.msk [vmem:[%s8093_s1 + $0x295] sm:$0x4] %vm3_vm0, %v963_v48   ;;  %3023 = vst.msk [vmem:[%s8093_s1 + $0x2d4] sm:$0x8] %vm3_vm0, %v963_v48  }
 0x127   :  { %3024 = vst.msk [vmem:[%s8093_s1 + $0x313] sm:$0x10] %vm3_vm0, %v963_v48   ;;  %3025 = vst.msk [vmem:[%s8093_s1 + $0x352] sm:$0x20] %vm3_vm0, %v963_v48  }
 0x128   :  { %3026 = vst.msk [vmem:[%s8093_s1 + $0x391] sm:$0x40] %vm3_vm0, %v963_v48   ;;  %3027 = vst.msk [vmem:[%s8093_s1 + $0x3d0] sm:$0x80] %vm3_vm0, %v963_v48   ;;  %v1906_v32 = vpop.permute.xlu1 %1905   ;;  %v1885_v33 = vpop.permute.xlu0 %1884  }
 0x129   :  { %3011 = vst.msk [vmem:[%s8093_s1 + $0x17] sm:$0x1] %vm3_vm0, %v942_v49   ;;  %3012 = vst.msk [vmem:[%s8093_s1 + $0x56] sm:$0x2] %vm3_vm0, %v942_v49  }
 0x12a   :  { %3013 = vst.msk [vmem:[%s8093_s1 + $0x95] sm:$0x4] %vm3_vm0, %v942_v49   ;;  %3014 = vst.msk [vmem:[%s8093_s1 + $0xd4] sm:$0x8] %vm3_vm0, %v942_v49  }
 0x12b   :  { %3015 = vst.msk [vmem:[%s8093_s1 + $0x113] sm:$0x10] %vm3_vm0, %v942_v49   ;;  %3016 = vst.msk [vmem:[%s8093_s1 + $0x152] sm:$0x20] %vm3_vm0, %v942_v49  }
 0x12c   :  { %3017 = vst.msk [vmem:[%s8093_s1 + $0x191] sm:$0x40] %vm3_vm0, %v942_v49   ;;  %3018 = vst.msk [vmem:[%s8093_s1 + $0x1d0] sm:$0x80] %vm3_vm0, %v942_v49   ;;  %v1947_v34 = vpop.permute.xlu1 %1946   ;;  %v1926_v35 = vpop.permute.xlu0 %1925  }
 0x12d   :  { %3037 = vst.msk [vmem:[%s8093_s1 + $0x218] sm:$0x1] %vm3_vm0, %v1004_v50   ;;  %3038 = vst.msk [vmem:[%s8093_s1 + $0x257] sm:$0x2] %vm3_vm0, %v1004_v50  }
 0x12e   :  { %3039 = vst.msk [vmem:[%s8093_s1 + $0x296] sm:$0x4] %vm3_vm0, %v1004_v50   ;;  %3040 = vst.msk [vmem:[%s8093_s1 + $0x2d5] sm:$0x8] %vm3_vm0, %v1004_v50  }
 0x12f   :  { %3041 = vst.msk [vmem:[%s8093_s1 + $0x314] sm:$0x10] %vm3_vm0, %v1004_v50   ;;  %3042 = vst.msk [vmem:[%s8093_s1 + $0x353] sm:$0x20] %vm3_vm0, %v1004_v50  }
 0x130   :  { %3043 = vst.msk [vmem:[%s8093_s1 + $0x392] sm:$0x40] %vm3_vm0, %v1004_v50   ;;  %3044 = vst.msk [vmem:[%s8093_s1 + $0x3d1] sm:$0x80] %vm3_vm0, %v1004_v50   ;;  %v1988_v36 = vpop.permute.xlu1 %1987   ;;  %v1967_v37 = vpop.permute.xlu0 %1966  }
 0x131   :  { %3028 = vst.msk [vmem:[%s8093_s1 + $0x18] sm:$0x1] %vm3_vm0, %v983_v51   ;;  %3029 = vst.msk [vmem:[%s8093_s1 + $0x57] sm:$0x2] %vm3_vm0, %v983_v51  }
 0x132   :  { %3030 = vst.msk [vmem:[%s8093_s1 + $0x96] sm:$0x4] %vm3_vm0, %v983_v51   ;;  %3031 = vst.msk [vmem:[%s8093_s1 + $0xd5] sm:$0x8] %vm3_vm0, %v983_v51  }
 0x133   :  { %3032 = vst.msk [vmem:[%s8093_s1 + $0x114] sm:$0x10] %vm3_vm0, %v983_v51   ;;  %3033 = vst.msk [vmem:[%s8093_s1 + $0x153] sm:$0x20] %vm3_vm0, %v983_v51  }
 0x134   :  { %3034 = vst.msk [vmem:[%s8093_s1 + $0x192] sm:$0x40] %vm3_vm0, %v983_v51   ;;  %3035 = vst.msk [vmem:[%s8093_s1 + $0x1d1] sm:$0x80] %vm3_vm0, %v983_v51   ;;  %v2029_v38 = vpop.permute.xlu1 %2028   ;;  %v2008_v39 = vpop.permute.xlu0 %2007  }
 0x135   :  { %3054 = vst.msk [vmem:[%s8093_s1 + $0x219] sm:$0x1] %vm3_vm0, %v1045_v52   ;;  %3055 = vst.msk [vmem:[%s8093_s1 + $0x258] sm:$0x2] %vm3_vm0, %v1045_v52  }
 0x136   :  { %3056 = vst.msk [vmem:[%s8093_s1 + $0x297] sm:$0x4] %vm3_vm0, %v1045_v52   ;;  %3057 = vst.msk [vmem:[%s8093_s1 + $0x2d6] sm:$0x8] %vm3_vm0, %v1045_v52  }
 0x137   :  { %3058 = vst.msk [vmem:[%s8093_s1 + $0x315] sm:$0x10] %vm3_vm0, %v1045_v52   ;;  %3059 = vst.msk [vmem:[%s8093_s1 + $0x354] sm:$0x20] %vm3_vm0, %v1045_v52  }
 0x138   :  { %3060 = vst.msk [vmem:[%s8093_s1 + $0x393] sm:$0x40] %vm3_vm0, %v1045_v52   ;;  %3061 = vst.msk [vmem:[%s8093_s1 + $0x3d2] sm:$0x80] %vm3_vm0, %v1045_v52   ;;  %v2070_v40 = vpop.permute.xlu1 %2069   ;;  %v2049_v41 = vpop.permute.xlu0 %2048  }
 0x139   :  { %3045 = vst.msk [vmem:[%s8093_s1 + $0x19] sm:$0x1] %vm3_vm0, %v1024_v53   ;;  %3046 = vst.msk [vmem:[%s8093_s1 + $0x58] sm:$0x2] %vm3_vm0, %v1024_v53  }
 0x13a   :  { %3047 = vst.msk [vmem:[%s8093_s1 + $0x97] sm:$0x4] %vm3_vm0, %v1024_v53   ;;  %3048 = vst.msk [vmem:[%s8093_s1 + $0xd6] sm:$0x8] %vm3_vm0, %v1024_v53  }
 0x13b   :  { %3049 = vst.msk [vmem:[%s8093_s1 + $0x115] sm:$0x10] %vm3_vm0, %v1024_v53   ;;  %3050 = vst.msk [vmem:[%s8093_s1 + $0x154] sm:$0x20] %vm3_vm0, %v1024_v53  }
 0x13c   :  { %3051 = vst.msk [vmem:[%s8093_s1 + $0x193] sm:$0x40] %vm3_vm0, %v1024_v53   ;;  %3052 = vst.msk [vmem:[%s8093_s1 + $0x1d2] sm:$0x80] %vm3_vm0, %v1024_v53   ;;  %v2111_v42 = vpop.permute.xlu1 %2110   ;;  %v2090_v43 = vpop.permute.xlu0 %2089  }
 0x13d   :  { %3071 = vst.msk [vmem:[%s8093_s1 + $0x21a] sm:$0x1] %vm3_vm0, %v1086_v54   ;;  %3072 = vst.msk [vmem:[%s8093_s1 + $0x259] sm:$0x2] %vm3_vm0, %v1086_v54  }
 0x13e   :  { %3073 = vst.msk [vmem:[%s8093_s1 + $0x298] sm:$0x4] %vm3_vm0, %v1086_v54   ;;  %3074 = vst.msk [vmem:[%s8093_s1 + $0x2d7] sm:$0x8] %vm3_vm0, %v1086_v54  }
 0x13f   :  { %3075 = vst.msk [vmem:[%s8093_s1 + $0x316] sm:$0x10] %vm3_vm0, %v1086_v54   ;;  %3076 = vst.msk [vmem:[%s8093_s1 + $0x355] sm:$0x20] %vm3_vm0, %v1086_v54  }
 0x140   :  { %3077 = vst.msk [vmem:[%s8093_s1 + $0x394] sm:$0x40] %vm3_vm0, %v1086_v54   ;;  %3078 = vst.msk [vmem:[%s8093_s1 + $0x3d3] sm:$0x80] %vm3_vm0, %v1086_v54   ;;  %v2152_v44 = vpop.permute.xlu1 %2151   ;;  %v2131_v45 = vpop.permute.xlu0 %2130  }
 0x141   :  { %3062 = vst.msk [vmem:[%s8093_s1 + $0x1a] sm:$0x1] %vm3_vm0, %v1065_v55   ;;  %3063 = vst.msk [vmem:[%s8093_s1 + $0x59] sm:$0x2] %vm3_vm0, %v1065_v55  }
 0x142   :  { %3064 = vst.msk [vmem:[%s8093_s1 + $0x98] sm:$0x4] %vm3_vm0, %v1065_v55   ;;  %3065 = vst.msk [vmem:[%s8093_s1 + $0xd7] sm:$0x8] %vm3_vm0, %v1065_v55  }
 0x143   :  { %3066 = vst.msk [vmem:[%s8093_s1 + $0x116] sm:$0x10] %vm3_vm0, %v1065_v55   ;;  %3067 = vst.msk [vmem:[%s8093_s1 + $0x155] sm:$0x20] %vm3_vm0, %v1065_v55  }
 0x144   :  { %3068 = vst.msk [vmem:[%s8093_s1 + $0x194] sm:$0x40] %vm3_vm0, %v1065_v55   ;;  %3069 = vst.msk [vmem:[%s8093_s1 + $0x1d3] sm:$0x80] %vm3_vm0, %v1065_v55   ;;  %v2193_v46 = vpop.permute.xlu1 %2192   ;;  %v2172_v47 = vpop.permute.xlu0 %2171  }
 0x145   :  { %3088 = vst.msk [vmem:[%s8093_s1 + $0x21b] sm:$0x1] %vm3_vm0, %v1127_v56   ;;  %3089 = vst.msk [vmem:[%s8093_s1 + $0x25a] sm:$0x2] %vm3_vm0, %v1127_v56  }
 0x146   :  { %3090 = vst.msk [vmem:[%s8093_s1 + $0x299] sm:$0x4] %vm3_vm0, %v1127_v56   ;;  %3091 = vst.msk [vmem:[%s8093_s1 + $0x2d8] sm:$0x8] %vm3_vm0, %v1127_v56  }
 0x147   :  { %3092 = vst.msk [vmem:[%s8093_s1 + $0x317] sm:$0x10] %vm3_vm0, %v1127_v56   ;;  %3093 = vst.msk [vmem:[%s8093_s1 + $0x356] sm:$0x20] %vm3_vm0, %v1127_v56  }
 0x148   :  { %3094 = vst.msk [vmem:[%s8093_s1 + $0x395] sm:$0x40] %vm3_vm0, %v1127_v56   ;;  %3095 = vst.msk [vmem:[%s8093_s1 + $0x3d4] sm:$0x80] %vm3_vm0, %v1127_v56   ;;  %v2234_v48 = vpop.permute.xlu1 %2233   ;;  %v2213_v49 = vpop.permute.xlu0 %2212  }
 0x149   :  { %3079 = vst.msk [vmem:[%s8093_s1 + $0x1b] sm:$0x1] %vm3_vm0, %v1106_v57   ;;  %3080 = vst.msk [vmem:[%s8093_s1 + $0x5a] sm:$0x2] %vm3_vm0, %v1106_v57  }
 0x14a   :  { %3081 = vst.msk [vmem:[%s8093_s1 + $0x99] sm:$0x4] %vm3_vm0, %v1106_v57   ;;  %3082 = vst.msk [vmem:[%s8093_s1 + $0xd8] sm:$0x8] %vm3_vm0, %v1106_v57  }
 0x14b   :  { %3083 = vst.msk [vmem:[%s8093_s1 + $0x117] sm:$0x10] %vm3_vm0, %v1106_v57   ;;  %3084 = vst.msk [vmem:[%s8093_s1 + $0x156] sm:$0x20] %vm3_vm0, %v1106_v57  }
 0x14c   :  { %3085 = vst.msk [vmem:[%s8093_s1 + $0x195] sm:$0x40] %vm3_vm0, %v1106_v57   ;;  %3086 = vst.msk [vmem:[%s8093_s1 + $0x1d4] sm:$0x80] %vm3_vm0, %v1106_v57   ;;  %v2275_v50 = vpop.permute.xlu1 %2274   ;;  %v2254_v51 = vpop.permute.xlu0 %2253  }
 0x14d   :  { %3105 = vst.msk [vmem:[%s8093_s1 + $0x21c] sm:$0x1] %vm3_vm0, %v1168_v58   ;;  %3106 = vst.msk [vmem:[%s8093_s1 + $0x25b] sm:$0x2] %vm3_vm0, %v1168_v58  }
 0x14e   :  { %3107 = vst.msk [vmem:[%s8093_s1 + $0x29a] sm:$0x4] %vm3_vm0, %v1168_v58   ;;  %3108 = vst.msk [vmem:[%s8093_s1 + $0x2d9] sm:$0x8] %vm3_vm0, %v1168_v58  }
 0x14f   :  { %3109 = vst.msk [vmem:[%s8093_s1 + $0x318] sm:$0x10] %vm3_vm0, %v1168_v58   ;;  %3110 = vst.msk [vmem:[%s8093_s1 + $0x357] sm:$0x20] %vm3_vm0, %v1168_v58  }
 0x150   :  { %3111 = vst.msk [vmem:[%s8093_s1 + $0x396] sm:$0x40] %vm3_vm0, %v1168_v58   ;;  %3112 = vst.msk [vmem:[%s8093_s1 + $0x3d5] sm:$0x80] %vm3_vm0, %v1168_v58   ;;  %v2316_v52 = vpop.permute.xlu1 %2315   ;;  %v2295_v53 = vpop.permute.xlu0 %2294  }
 0x151   :  { %3096 = vst.msk [vmem:[%s8093_s1 + $0x1c] sm:$0x1] %vm3_vm0, %v1147_v59   ;;  %3097 = vst.msk [vmem:[%s8093_s1 + $0x5b] sm:$0x2] %vm3_vm0, %v1147_v59  }
 0x152   :  { %3098 = vst.msk [vmem:[%s8093_s1 + $0x9a] sm:$0x4] %vm3_vm0, %v1147_v59   ;;  %3099 = vst.msk [vmem:[%s8093_s1 + $0xd9] sm:$0x8] %vm3_vm0, %v1147_v59  }
 0x153   :  { %3100 = vst.msk [vmem:[%s8093_s1 + $0x118] sm:$0x10] %vm3_vm0, %v1147_v59   ;;  %3101 = vst.msk [vmem:[%s8093_s1 + $0x157] sm:$0x20] %vm3_vm0, %v1147_v59  }
 0x154   :  { %3102 = vst.msk [vmem:[%s8093_s1 + $0x196] sm:$0x40] %vm3_vm0, %v1147_v59   ;;  %3103 = vst.msk [vmem:[%s8093_s1 + $0x1d5] sm:$0x80] %vm3_vm0, %v1147_v59   ;;  %v2357_v54 = vpop.permute.xlu1 %2356   ;;  %v2336_v55 = vpop.permute.xlu0 %2335  }
 0x155   :  { %3122 = vst.msk [vmem:[%s8093_s1 + $0x21d] sm:$0x1] %vm3_vm0, %v1209_v60   ;;  %3123 = vst.msk [vmem:[%s8093_s1 + $0x25c] sm:$0x2] %vm3_vm0, %v1209_v60  }
 0x156   :  { %3124 = vst.msk [vmem:[%s8093_s1 + $0x29b] sm:$0x4] %vm3_vm0, %v1209_v60   ;;  %3125 = vst.msk [vmem:[%s8093_s1 + $0x2da] sm:$0x8] %vm3_vm0, %v1209_v60  }
 0x157   :  { %3126 = vst.msk [vmem:[%s8093_s1 + $0x319] sm:$0x10] %vm3_vm0, %v1209_v60   ;;  %3127 = vst.msk [vmem:[%s8093_s1 + $0x358] sm:$0x20] %vm3_vm0, %v1209_v60  }
 0x158   :  { %3128 = vst.msk [vmem:[%s8093_s1 + $0x397] sm:$0x40] %vm3_vm0, %v1209_v60   ;;  %3129 = vst.msk [vmem:[%s8093_s1 + $0x3d6] sm:$0x80] %vm3_vm0, %v1209_v60   ;;  %v2398_v56 = vpop.permute.xlu1 %2397   ;;  %v2377_v57 = vpop.permute.xlu0 %2376  }
 0x159   :  { %3113 = vst.msk [vmem:[%s8093_s1 + $0x1d] sm:$0x1] %vm3_vm0, %v1188_v61   ;;  %3114 = vst.msk [vmem:[%s8093_s1 + $0x5c] sm:$0x2] %vm3_vm0, %v1188_v61  }
 0x15a   :  { %3115 = vst.msk [vmem:[%s8093_s1 + $0x9b] sm:$0x4] %vm3_vm0, %v1188_v61   ;;  %3116 = vst.msk [vmem:[%s8093_s1 + $0xda] sm:$0x8] %vm3_vm0, %v1188_v61  }
 0x15b   :  { %3117 = vst.msk [vmem:[%s8093_s1 + $0x119] sm:$0x10] %vm3_vm0, %v1188_v61   ;;  %3118 = vst.msk [vmem:[%s8093_s1 + $0x158] sm:$0x20] %vm3_vm0, %v1188_v61  }
 0x15c   :  { %3119 = vst.msk [vmem:[%s8093_s1 + $0x197] sm:$0x40] %vm3_vm0, %v1188_v61   ;;  %3120 = vst.msk [vmem:[%s8093_s1 + $0x1d6] sm:$0x80] %vm3_vm0, %v1188_v61   ;;  %v2439_v58 = vpop.permute.xlu1 %2438   ;;  %v2418_v59 = vpop.permute.xlu0 %2417  }
 0x15d   :  { %3139 = vst.msk [vmem:[%s8093_s1 + $0x21e] sm:$0x1] %vm3_vm0, %v1250_v62   ;;  %3140 = vst.msk [vmem:[%s8093_s1 + $0x25d] sm:$0x2] %vm3_vm0, %v1250_v62  }
 0x15e   :  { %3141 = vst.msk [vmem:[%s8093_s1 + $0x29c] sm:$0x4] %vm3_vm0, %v1250_v62   ;;  %3142 = vst.msk [vmem:[%s8093_s1 + $0x2db] sm:$0x8] %vm3_vm0, %v1250_v62  }
 0x15f   :  { %3143 = vst.msk [vmem:[%s8093_s1 + $0x31a] sm:$0x10] %vm3_vm0, %v1250_v62   ;;  %3144 = vst.msk [vmem:[%s8093_s1 + $0x359] sm:$0x20] %vm3_vm0, %v1250_v62  }
 0x160   :  { %3145 = vst.msk [vmem:[%s8093_s1 + $0x398] sm:$0x40] %vm3_vm0, %v1250_v62   ;;  %3146 = vst.msk [vmem:[%s8093_s1 + $0x3d7] sm:$0x80] %vm3_vm0, %v1250_v62   ;;  %v2480_v60 = vpop.permute.xlu1 %2479   ;;  %v2459_v61 = vpop.permute.xlu0 %2458  }
 0x161   :  { %3130 = vst.msk [vmem:[%s8093_s1 + $0x1e] sm:$0x1] %vm3_vm0, %v1229_v63   ;;  %3131 = vst.msk [vmem:[%s8093_s1 + $0x5d] sm:$0x2] %vm3_vm0, %v1229_v63  }
 0x162   :  { %3132 = vst.msk [vmem:[%s8093_s1 + $0x9c] sm:$0x4] %vm3_vm0, %v1229_v63   ;;  %3133 = vst.msk [vmem:[%s8093_s1 + $0xdb] sm:$0x8] %vm3_vm0, %v1229_v63  }
 0x163   :  { %3134 = vst.msk [vmem:[%s8093_s1 + $0x11a] sm:$0x10] %vm3_vm0, %v1229_v63   ;;  %3135 = vst.msk [vmem:[%s8093_s1 + $0x159] sm:$0x20] %vm3_vm0, %v1229_v63  }
 0x164   :  { %3136 = vst.msk [vmem:[%s8093_s1 + $0x198] sm:$0x40] %vm3_vm0, %v1229_v63   ;;  %3137 = vst.msk [vmem:[%s8093_s1 + $0x1d7] sm:$0x80] %vm3_vm0, %v1229_v63   ;;  %v2521_v62 = vpop.permute.xlu1 %2520   ;;  %v2500_v63 = vpop.permute.xlu0 %2499  }
 0x165   :  { %3156 = vst.msk [vmem:[%s8093_s1 + $0x21f] sm:$0x1] %vm3_vm0, %v1291_v0   ;;  %3157 = vst.msk [vmem:[%s8093_s1 + $0x25e] sm:$0x2] %vm3_vm0, %v1291_v0  }
 0x166   :  { %3158 = vst.msk [vmem:[%s8093_s1 + $0x29d] sm:$0x4] %vm3_vm0, %v1291_v0   ;;  %3159 = vst.msk [vmem:[%s8093_s1 + $0x2dc] sm:$0x8] %vm3_vm0, %v1291_v0  }
 0x167   :  { %3160 = vst.msk [vmem:[%s8093_s1 + $0x31b] sm:$0x10] %vm3_vm0, %v1291_v0   ;;  %3161 = vst.msk [vmem:[%s8093_s1 + $0x35a] sm:$0x20] %vm3_vm0, %v1291_v0  }
 0x168   :  { %3162 = vst.msk [vmem:[%s8093_s1 + $0x399] sm:$0x40] %vm3_vm0, %v1291_v0   ;;  %3163 = vst.msk [vmem:[%s8093_s1 + $0x3d8] sm:$0x80] %vm3_vm0, %v1291_v0   ;;  %v2562_v0 = vpop.permute.xlu1 %2561  }
 0x169   :  { %3147 = vst.msk [vmem:[%s8093_s1 + $0x1f] sm:$0x1] %vm3_vm0, %v1270_v1   ;;  %3148 = vst.msk [vmem:[%s8093_s1 + $0x5e] sm:$0x2] %vm3_vm0, %v1270_v1  }
 0x16a   :  { %3149 = vst.msk [vmem:[%s8093_s1 + $0x9d] sm:$0x4] %vm3_vm0, %v1270_v1   ;;  %3150 = vst.msk [vmem:[%s8093_s1 + $0xdc] sm:$0x8] %vm3_vm0, %v1270_v1  }
 0x16b   :  { %3151 = vst.msk [vmem:[%s8093_s1 + $0x11b] sm:$0x10] %vm3_vm0, %v1270_v1   ;;  %3152 = vst.msk [vmem:[%s8093_s1 + $0x15a] sm:$0x20] %vm3_vm0, %v1270_v1  }
 0x16c   :  { %3153 = vst.msk [vmem:[%s8093_s1 + $0x199] sm:$0x40] %vm3_vm0, %v1270_v1   ;;  %3154 = vst.msk [vmem:[%s8093_s1 + $0x1d8] sm:$0x80] %vm3_vm0, %v1270_v1   ;;  %v2541_v1 = vpop.permute.xlu0 %2540  }
 0x16d   :  { %4 = vst.msk [vmem:[%s8093_s1] sm:$0x1] %vm3_vm0, %v2_v2   ;;  %2621 = vst.msk [vmem:[%s8093_s1 + $0x3f] sm:$0x2] %vm3_vm0, %v2_v2  }
 0x16e   :  { %2622 = vst.msk [vmem:[%s8093_s1 + $0x7e] sm:$0x4] %vm3_vm0, %v2_v2   ;;  %2623 = vst.msk [vmem:[%s8093_s1 + $0xbd] sm:$0x8] %vm3_vm0, %v2_v2  }
 0x16f   :  { %2624 = vst.msk [vmem:[%s8093_s1 + $0xfc] sm:$0x10] %vm3_vm0, %v2_v2   ;;  %2625 = vst.msk [vmem:[%s8093_s1 + $0x13b] sm:$0x20] %vm3_vm0, %v2_v2  }
 0x170   :  { %2626 = vst.msk [vmem:[%s8093_s1 + $0x17a] sm:$0x40] %vm3_vm0, %v2_v2   ;;  %2627 = vst.msk [vmem:[%s8093_s1 + $0x1b9] sm:$0x80] %vm3_vm0, %v2_v2   ;;  %v2603_v2 = vpop.permute.xlu1 %2602  }
 0x171   :  { %2629 = vst.msk [vmem:[%s8093_s1 + $0x200] sm:$0x1] %vm3_vm0, %v2628_v3   ;;  %2630 = vst.msk [vmem:[%s8093_s1 + $0x23f] sm:$0x2] %vm3_vm0, %v2628_v3  }
 0x172   :  { %2631 = vst.msk [vmem:[%s8093_s1 + $0x27e] sm:$0x4] %vm3_vm0, %v2628_v3   ;;  %2632 = vst.msk [vmem:[%s8093_s1 + $0x2bd] sm:$0x8] %vm3_vm0, %v2628_v3  }
 0x173   :  { %2633 = vst.msk [vmem:[%s8093_s1 + $0x2fc] sm:$0x10] %vm3_vm0, %v2628_v3   ;;  %2634 = vst.msk [vmem:[%s8093_s1 + $0x33b] sm:$0x20] %vm3_vm0, %v2628_v3  }
 0x174   :  { %2635 = vst.msk [vmem:[%s8093_s1 + $0x37a] sm:$0x40] %vm3_vm0, %v2628_v3   ;;  %2636 = vst.msk [vmem:[%s8093_s1 + $0x3b9] sm:$0x80] %vm3_vm0, %v2628_v3   ;;  %v2582_v3 = vpop.permute.xlu0 %2581  }
 0x175   :  { %3173 = vst.msk [vmem:[%s8093_s1 + $0x220] sm:$0x1] %vm3_vm0, %v1332_v4   ;;  %3174 = vst.msk [vmem:[%s8093_s1 + $0x25f] sm:$0x2] %vm3_vm0, %v1332_v4  }
 0x176   :  { %3175 = vst.msk [vmem:[%s8093_s1 + $0x29e] sm:$0x4] %vm3_vm0, %v1332_v4   ;;  %3176 = vst.msk [vmem:[%s8093_s1 + $0x2dd] sm:$0x8] %vm3_vm0, %v1332_v4  }
 0x177   :  { %3177 = vst.msk [vmem:[%s8093_s1 + $0x31c] sm:$0x10] %vm3_vm0, %v1332_v4   ;;  %3178 = vst.msk [vmem:[%s8093_s1 + $0x35b] sm:$0x20] %vm3_vm0, %v1332_v4  }
 0x178   :  { %3179 = vst.msk [vmem:[%s8093_s1 + $0x39a] sm:$0x40] %vm3_vm0, %v1332_v4   ;;  %3180 = vst.msk [vmem:[%s8093_s1 + $0x3d9] sm:$0x80] %vm3_vm0, %v1332_v4  }
 0x179   :  { %3164 = vst.msk [vmem:[%s8093_s1 + $0x20] sm:$0x1] %vm3_vm0, %v1311_v5   ;;  %3165 = vst.msk [vmem:[%s8093_s1 + $0x5f] sm:$0x2] %vm3_vm0, %v1311_v5  }
 0x17a   :  { %3166 = vst.msk [vmem:[%s8093_s1 + $0x9e] sm:$0x4] %vm3_vm0, %v1311_v5   ;;  %3167 = vst.msk [vmem:[%s8093_s1 + $0xdd] sm:$0x8] %vm3_vm0, %v1311_v5  }
 0x17b   :  { %3168 = vst.msk [vmem:[%s8093_s1 + $0x11c] sm:$0x10] %vm3_vm0, %v1311_v5   ;;  %3169 = vst.msk [vmem:[%s8093_s1 + $0x15b] sm:$0x20] %vm3_vm0, %v1311_v5  }
 0x17c   :  { %3170 = vst.msk [vmem:[%s8093_s1 + $0x19a] sm:$0x40] %vm3_vm0, %v1311_v5   ;;  %3171 = vst.msk [vmem:[%s8093_s1 + $0x1d9] sm:$0x80] %vm3_vm0, %v1311_v5  }
 0x17d   :  { %3190 = vst.msk [vmem:[%s8093_s1 + $0x221] sm:$0x1] %vm3_vm0, %v1373_v6   ;;  %3191 = vst.msk [vmem:[%s8093_s1 + $0x260] sm:$0x2] %vm3_vm0, %v1373_v6  }
 0x17e   :  { %3192 = vst.msk [vmem:[%s8093_s1 + $0x29f] sm:$0x4] %vm3_vm0, %v1373_v6   ;;  %3193 = vst.msk [vmem:[%s8093_s1 + $0x2de] sm:$0x8] %vm3_vm0, %v1373_v6  }
 0x17f   :  { %3194 = vst.msk [vmem:[%s8093_s1 + $0x31d] sm:$0x10] %vm3_vm0, %v1373_v6   ;;  %3195 = vst.msk [vmem:[%s8093_s1 + $0x35c] sm:$0x20] %vm3_vm0, %v1373_v6  }
 0x180   :  { %3196 = vst.msk [vmem:[%s8093_s1 + $0x39b] sm:$0x40] %vm3_vm0, %v1373_v6   ;;  %3197 = vst.msk [vmem:[%s8093_s1 + $0x3da] sm:$0x80] %vm3_vm0, %v1373_v6  }
 0x181   :  { %3181 = vst.msk [vmem:[%s8093_s1 + $0x21] sm:$0x1] %vm3_vm0, %v1352_v7   ;;  %3182 = vst.msk [vmem:[%s8093_s1 + $0x60] sm:$0x2] %vm3_vm0, %v1352_v7  }
 0x182   :  { %3183 = vst.msk [vmem:[%s8093_s1 + $0x9f] sm:$0x4] %vm3_vm0, %v1352_v7   ;;  %3184 = vst.msk [vmem:[%s8093_s1 + $0xde] sm:$0x8] %vm3_vm0, %v1352_v7  }
 0x183   :  { %3185 = vst.msk [vmem:[%s8093_s1 + $0x11d] sm:$0x10] %vm3_vm0, %v1352_v7   ;;  %3186 = vst.msk [vmem:[%s8093_s1 + $0x15c] sm:$0x20] %vm3_vm0, %v1352_v7  }
 0x184   :  { %3187 = vst.msk [vmem:[%s8093_s1 + $0x19b] sm:$0x40] %vm3_vm0, %v1352_v7   ;;  %3188 = vst.msk [vmem:[%s8093_s1 + $0x1da] sm:$0x80] %vm3_vm0, %v1352_v7  }
 0x185   :  { %3207 = vst.msk [vmem:[%s8093_s1 + $0x222] sm:$0x1] %vm3_vm0, %v1414_v8   ;;  %3208 = vst.msk [vmem:[%s8093_s1 + $0x261] sm:$0x2] %vm3_vm0, %v1414_v8  }
 0x186   :  { %3209 = vst.msk [vmem:[%s8093_s1 + $0x2a0] sm:$0x4] %vm3_vm0, %v1414_v8   ;;  %3210 = vst.msk [vmem:[%s8093_s1 + $0x2df] sm:$0x8] %vm3_vm0, %v1414_v8  }
 0x187   :  { %3211 = vst.msk [vmem:[%s8093_s1 + $0x31e] sm:$0x10] %vm3_vm0, %v1414_v8   ;;  %3212 = vst.msk [vmem:[%s8093_s1 + $0x35d] sm:$0x20] %vm3_vm0, %v1414_v8  }
 0x188   :  { %3213 = vst.msk [vmem:[%s8093_s1 + $0x39c] sm:$0x40] %vm3_vm0, %v1414_v8   ;;  %3214 = vst.msk [vmem:[%s8093_s1 + $0x3db] sm:$0x80] %vm3_vm0, %v1414_v8  }
 0x189   :  { %3198 = vst.msk [vmem:[%s8093_s1 + $0x22] sm:$0x1] %vm3_vm0, %v1393_v9   ;;  %3199 = vst.msk [vmem:[%s8093_s1 + $0x61] sm:$0x2] %vm3_vm0, %v1393_v9  }
 0x18a   :  { %3200 = vst.msk [vmem:[%s8093_s1 + $0xa0] sm:$0x4] %vm3_vm0, %v1393_v9   ;;  %3201 = vst.msk [vmem:[%s8093_s1 + $0xdf] sm:$0x8] %vm3_vm0, %v1393_v9  }
 0x18b   :  { %3202 = vst.msk [vmem:[%s8093_s1 + $0x11e] sm:$0x10] %vm3_vm0, %v1393_v9   ;;  %3203 = vst.msk [vmem:[%s8093_s1 + $0x15d] sm:$0x20] %vm3_vm0, %v1393_v9  }
 0x18c   :  { %3204 = vst.msk [vmem:[%s8093_s1 + $0x19c] sm:$0x40] %vm3_vm0, %v1393_v9   ;;  %3205 = vst.msk [vmem:[%s8093_s1 + $0x1db] sm:$0x80] %vm3_vm0, %v1393_v9  }
 0x18d   :  { %3224 = vst.msk [vmem:[%s8093_s1 + $0x223] sm:$0x1] %vm3_vm0, %v1455_v10   ;;  %3225 = vst.msk [vmem:[%s8093_s1 + $0x262] sm:$0x2] %vm3_vm0, %v1455_v10  }
 0x18e   :  { %3226 = vst.msk [vmem:[%s8093_s1 + $0x2a1] sm:$0x4] %vm3_vm0, %v1455_v10   ;;  %3227 = vst.msk [vmem:[%s8093_s1 + $0x2e0] sm:$0x8] %vm3_vm0, %v1455_v10  }
 0x18f   :  { %3228 = vst.msk [vmem:[%s8093_s1 + $0x31f] sm:$0x10] %vm3_vm0, %v1455_v10   ;;  %3229 = vst.msk [vmem:[%s8093_s1 + $0x35e] sm:$0x20] %vm3_vm0, %v1455_v10  }
 0x190   :  { %3230 = vst.msk [vmem:[%s8093_s1 + $0x39d] sm:$0x40] %vm3_vm0, %v1455_v10   ;;  %3231 = vst.msk [vmem:[%s8093_s1 + $0x3dc] sm:$0x80] %vm3_vm0, %v1455_v10  }
 0x191   :  { %3215 = vst.msk [vmem:[%s8093_s1 + $0x23] sm:$0x1] %vm3_vm0, %v1434_v11   ;;  %3216 = vst.msk [vmem:[%s8093_s1 + $0x62] sm:$0x2] %vm3_vm0, %v1434_v11  }
 0x192   :  { %3217 = vst.msk [vmem:[%s8093_s1 + $0xa1] sm:$0x4] %vm3_vm0, %v1434_v11   ;;  %3218 = vst.msk [vmem:[%s8093_s1 + $0xe0] sm:$0x8] %vm3_vm0, %v1434_v11  }
 0x193   :  { %3219 = vst.msk [vmem:[%s8093_s1 + $0x11f] sm:$0x10] %vm3_vm0, %v1434_v11   ;;  %3220 = vst.msk [vmem:[%s8093_s1 + $0x15e] sm:$0x20] %vm3_vm0, %v1434_v11  }
 0x194   :  { %3221 = vst.msk [vmem:[%s8093_s1 + $0x19d] sm:$0x40] %vm3_vm0, %v1434_v11   ;;  %3222 = vst.msk [vmem:[%s8093_s1 + $0x1dc] sm:$0x80] %vm3_vm0, %v1434_v11  }
 0x195   :  { %3241 = vst.msk [vmem:[%s8093_s1 + $0x224] sm:$0x1] %vm3_vm0, %v1496_v12   ;;  %3242 = vst.msk [vmem:[%s8093_s1 + $0x263] sm:$0x2] %vm3_vm0, %v1496_v12  }
 0x196   :  { %3243 = vst.msk [vmem:[%s8093_s1 + $0x2a2] sm:$0x4] %vm3_vm0, %v1496_v12   ;;  %3244 = vst.msk [vmem:[%s8093_s1 + $0x2e1] sm:$0x8] %vm3_vm0, %v1496_v12  }
 0x197   :  { %3245 = vst.msk [vmem:[%s8093_s1 + $0x320] sm:$0x10] %vm3_vm0, %v1496_v12   ;;  %3246 = vst.msk [vmem:[%s8093_s1 + $0x35f] sm:$0x20] %vm3_vm0, %v1496_v12  }
 0x198   :  { %3247 = vst.msk [vmem:[%s8093_s1 + $0x39e] sm:$0x40] %vm3_vm0, %v1496_v12   ;;  %3248 = vst.msk [vmem:[%s8093_s1 + $0x3dd] sm:$0x80] %vm3_vm0, %v1496_v12  }
 0x199   :  { %3232 = vst.msk [vmem:[%s8093_s1 + $0x24] sm:$0x1] %vm3_vm0, %v1475_v13   ;;  %3233 = vst.msk [vmem:[%s8093_s1 + $0x63] sm:$0x2] %vm3_vm0, %v1475_v13  }
 0x19a   :  { %3234 = vst.msk [vmem:[%s8093_s1 + $0xa2] sm:$0x4] %vm3_vm0, %v1475_v13   ;;  %3235 = vst.msk [vmem:[%s8093_s1 + $0xe1] sm:$0x8] %vm3_vm0, %v1475_v13  }
 0x19b   :  { %3236 = vst.msk [vmem:[%s8093_s1 + $0x120] sm:$0x10] %vm3_vm0, %v1475_v13   ;;  %3237 = vst.msk [vmem:[%s8093_s1 + $0x15f] sm:$0x20] %vm3_vm0, %v1475_v13  }
 0x19c   :  { %3238 = vst.msk [vmem:[%s8093_s1 + $0x19e] sm:$0x40] %vm3_vm0, %v1475_v13   ;;  %3239 = vst.msk [vmem:[%s8093_s1 + $0x1dd] sm:$0x80] %vm3_vm0, %v1475_v13  }
 0x19d   :  { %3258 = vst.msk [vmem:[%s8093_s1 + $0x225] sm:$0x1] %vm3_vm0, %v1537_v14   ;;  %3259 = vst.msk [vmem:[%s8093_s1 + $0x264] sm:$0x2] %vm3_vm0, %v1537_v14  }
 0x19e   :  { %3260 = vst.msk [vmem:[%s8093_s1 + $0x2a3] sm:$0x4] %vm3_vm0, %v1537_v14   ;;  %3261 = vst.msk [vmem:[%s8093_s1 + $0x2e2] sm:$0x8] %vm3_vm0, %v1537_v14  }
 0x19f   :  { %3262 = vst.msk [vmem:[%s8093_s1 + $0x321] sm:$0x10] %vm3_vm0, %v1537_v14   ;;  %3263 = vst.msk [vmem:[%s8093_s1 + $0x360] sm:$0x20] %vm3_vm0, %v1537_v14  }
 0x1a0   :  { %3264 = vst.msk [vmem:[%s8093_s1 + $0x39f] sm:$0x40] %vm3_vm0, %v1537_v14   ;;  %3265 = vst.msk [vmem:[%s8093_s1 + $0x3de] sm:$0x80] %vm3_vm0, %v1537_v14  }
 0x1a1   :  { %3249 = vst.msk [vmem:[%s8093_s1 + $0x25] sm:$0x1] %vm3_vm0, %v1516_v15   ;;  %3250 = vst.msk [vmem:[%s8093_s1 + $0x64] sm:$0x2] %vm3_vm0, %v1516_v15  }
 0x1a2   :  { %3251 = vst.msk [vmem:[%s8093_s1 + $0xa3] sm:$0x4] %vm3_vm0, %v1516_v15   ;;  %3252 = vst.msk [vmem:[%s8093_s1 + $0xe2] sm:$0x8] %vm3_vm0, %v1516_v15  }
 0x1a3   :  { %3253 = vst.msk [vmem:[%s8093_s1 + $0x121] sm:$0x10] %vm3_vm0, %v1516_v15   ;;  %3254 = vst.msk [vmem:[%s8093_s1 + $0x160] sm:$0x20] %vm3_vm0, %v1516_v15  }
 0x1a4   :  { %3255 = vst.msk [vmem:[%s8093_s1 + $0x19f] sm:$0x40] %vm3_vm0, %v1516_v15   ;;  %3256 = vst.msk [vmem:[%s8093_s1 + $0x1de] sm:$0x80] %vm3_vm0, %v1516_v15  }
 0x1a5   :  { %3275 = vst.msk [vmem:[%s8093_s1 + $0x226] sm:$0x1] %vm3_vm0, %v1578_v16   ;;  %3276 = vst.msk [vmem:[%s8093_s1 + $0x265] sm:$0x2] %vm3_vm0, %v1578_v16  }
 0x1a6   :  { %3277 = vst.msk [vmem:[%s8093_s1 + $0x2a4] sm:$0x4] %vm3_vm0, %v1578_v16   ;;  %3278 = vst.msk [vmem:[%s8093_s1 + $0x2e3] sm:$0x8] %vm3_vm0, %v1578_v16  }
 0x1a7   :  { %3279 = vst.msk [vmem:[%s8093_s1 + $0x322] sm:$0x10] %vm3_vm0, %v1578_v16   ;;  %3280 = vst.msk [vmem:[%s8093_s1 + $0x361] sm:$0x20] %vm3_vm0, %v1578_v16  }
 0x1a8   :  { %3281 = vst.msk [vmem:[%s8093_s1 + $0x3a0] sm:$0x40] %vm3_vm0, %v1578_v16   ;;  %3282 = vst.msk [vmem:[%s8093_s1 + $0x3df] sm:$0x80] %vm3_vm0, %v1578_v16  }
 0x1a9   :  { %3266 = vst.msk [vmem:[%s8093_s1 + $0x26] sm:$0x1] %vm3_vm0, %v1557_v17   ;;  %3267 = vst.msk [vmem:[%s8093_s1 + $0x65] sm:$0x2] %vm3_vm0, %v1557_v17  }
 0x1aa   :  { %3268 = vst.msk [vmem:[%s8093_s1 + $0xa4] sm:$0x4] %vm3_vm0, %v1557_v17   ;;  %3269 = vst.msk [vmem:[%s8093_s1 + $0xe3] sm:$0x8] %vm3_vm0, %v1557_v17  }
 0x1ab   :  { %3270 = vst.msk [vmem:[%s8093_s1 + $0x122] sm:$0x10] %vm3_vm0, %v1557_v17   ;;  %3271 = vst.msk [vmem:[%s8093_s1 + $0x161] sm:$0x20] %vm3_vm0, %v1557_v17  }
 0x1ac   :  { %3272 = vst.msk [vmem:[%s8093_s1 + $0x1a0] sm:$0x40] %vm3_vm0, %v1557_v17   ;;  %3273 = vst.msk [vmem:[%s8093_s1 + $0x1df] sm:$0x80] %vm3_vm0, %v1557_v17  }
 0x1ad   :  { %3292 = vst.msk [vmem:[%s8093_s1 + $0x227] sm:$0x1] %vm3_vm0, %v1619_v18   ;;  %3293 = vst.msk [vmem:[%s8093_s1 + $0x266] sm:$0x2] %vm3_vm0, %v1619_v18  }
 0x1ae   :  { %3294 = vst.msk [vmem:[%s8093_s1 + $0x2a5] sm:$0x4] %vm3_vm0, %v1619_v18   ;;  %3295 = vst.msk [vmem:[%s8093_s1 + $0x2e4] sm:$0x8] %vm3_vm0, %v1619_v18  }
 0x1af   :  { %3296 = vst.msk [vmem:[%s8093_s1 + $0x323] sm:$0x10] %vm3_vm0, %v1619_v18   ;;  %3297 = vst.msk [vmem:[%s8093_s1 + $0x362] sm:$0x20] %vm3_vm0, %v1619_v18  }
 0x1b0   :  { %3298 = vst.msk [vmem:[%s8093_s1 + $0x3a1] sm:$0x40] %vm3_vm0, %v1619_v18   ;;  %3299 = vst.msk [vmem:[%s8093_s1 + $0x3e0] sm:$0x80] %vm3_vm0, %v1619_v18  }
 0x1b1   :  { %3283 = vst.msk [vmem:[%s8093_s1 + $0x27] sm:$0x1] %vm3_vm0, %v1598_v19   ;;  %3284 = vst.msk [vmem:[%s8093_s1 + $0x66] sm:$0x2] %vm3_vm0, %v1598_v19  }
 0x1b2   :  { %3285 = vst.msk [vmem:[%s8093_s1 + $0xa5] sm:$0x4] %vm3_vm0, %v1598_v19   ;;  %3286 = vst.msk [vmem:[%s8093_s1 + $0xe4] sm:$0x8] %vm3_vm0, %v1598_v19  }
 0x1b3   :  { %3287 = vst.msk [vmem:[%s8093_s1 + $0x123] sm:$0x10] %vm3_vm0, %v1598_v19   ;;  %3288 = vst.msk [vmem:[%s8093_s1 + $0x162] sm:$0x20] %vm3_vm0, %v1598_v19  }
 0x1b4   :  { %3289 = vst.msk [vmem:[%s8093_s1 + $0x1a1] sm:$0x40] %vm3_vm0, %v1598_v19   ;;  %3290 = vst.msk [vmem:[%s8093_s1 + $0x1e0] sm:$0x80] %vm3_vm0, %v1598_v19  }
 0x1b5   :  { %3309 = vst.msk [vmem:[%s8093_s1 + $0x228] sm:$0x1] %vm3_vm0, %v1660_v20   ;;  %3310 = vst.msk [vmem:[%s8093_s1 + $0x267] sm:$0x2] %vm3_vm0, %v1660_v20  }
 0x1b6   :  { %3311 = vst.msk [vmem:[%s8093_s1 + $0x2a6] sm:$0x4] %vm3_vm0, %v1660_v20   ;;  %3312 = vst.msk [vmem:[%s8093_s1 + $0x2e5] sm:$0x8] %vm3_vm0, %v1660_v20  }
 0x1b7   :  { %3313 = vst.msk [vmem:[%s8093_s1 + $0x324] sm:$0x10] %vm3_vm0, %v1660_v20   ;;  %3314 = vst.msk [vmem:[%s8093_s1 + $0x363] sm:$0x20] %vm3_vm0, %v1660_v20  }
 0x1b8   :  { %3315 = vst.msk [vmem:[%s8093_s1 + $0x3a2] sm:$0x40] %vm3_vm0, %v1660_v20   ;;  %3316 = vst.msk [vmem:[%s8093_s1 + $0x3e1] sm:$0x80] %vm3_vm0, %v1660_v20  }
 0x1b9   :  { %3300 = vst.msk [vmem:[%s8093_s1 + $0x28] sm:$0x1] %vm3_vm0, %v1639_v21   ;;  %3301 = vst.msk [vmem:[%s8093_s1 + $0x67] sm:$0x2] %vm3_vm0, %v1639_v21  }
 0x1ba   :  { %3302 = vst.msk [vmem:[%s8093_s1 + $0xa6] sm:$0x4] %vm3_vm0, %v1639_v21   ;;  %3303 = vst.msk [vmem:[%s8093_s1 + $0xe5] sm:$0x8] %vm3_vm0, %v1639_v21  }
 0x1bb   :  { %3304 = vst.msk [vmem:[%s8093_s1 + $0x124] sm:$0x10] %vm3_vm0, %v1639_v21   ;;  %3305 = vst.msk [vmem:[%s8093_s1 + $0x163] sm:$0x20] %vm3_vm0, %v1639_v21  }
 0x1bc   :  { %3306 = vst.msk [vmem:[%s8093_s1 + $0x1a2] sm:$0x40] %vm3_vm0, %v1639_v21   ;;  %3307 = vst.msk [vmem:[%s8093_s1 + $0x1e1] sm:$0x80] %vm3_vm0, %v1639_v21  }
 0x1bd   :  { %3326 = vst.msk [vmem:[%s8093_s1 + $0x229] sm:$0x1] %vm3_vm0, %v1701_v22   ;;  %3327 = vst.msk [vmem:[%s8093_s1 + $0x268] sm:$0x2] %vm3_vm0, %v1701_v22  }
 0x1be   :  { %3328 = vst.msk [vmem:[%s8093_s1 + $0x2a7] sm:$0x4] %vm3_vm0, %v1701_v22   ;;  %3329 = vst.msk [vmem:[%s8093_s1 + $0x2e6] sm:$0x8] %vm3_vm0, %v1701_v22  }
 0x1bf   :  { %3330 = vst.msk [vmem:[%s8093_s1 + $0x325] sm:$0x10] %vm3_vm0, %v1701_v22   ;;  %3331 = vst.msk [vmem:[%s8093_s1 + $0x364] sm:$0x20] %vm3_vm0, %v1701_v22  }
 0x1c0   :  { %3332 = vst.msk [vmem:[%s8093_s1 + $0x3a3] sm:$0x40] %vm3_vm0, %v1701_v22   ;;  %3333 = vst.msk [vmem:[%s8093_s1 + $0x3e2] sm:$0x80] %vm3_vm0, %v1701_v22  }
 0x1c1   :  { %3317 = vst.msk [vmem:[%s8093_s1 + $0x29] sm:$0x1] %vm3_vm0, %v1680_v23   ;;  %3318 = vst.msk [vmem:[%s8093_s1 + $0x68] sm:$0x2] %vm3_vm0, %v1680_v23  }
 0x1c2   :  { %3319 = vst.msk [vmem:[%s8093_s1 + $0xa7] sm:$0x4] %vm3_vm0, %v1680_v23   ;;  %3320 = vst.msk [vmem:[%s8093_s1 + $0xe6] sm:$0x8] %vm3_vm0, %v1680_v23  }
 0x1c3   :  { %3321 = vst.msk [vmem:[%s8093_s1 + $0x125] sm:$0x10] %vm3_vm0, %v1680_v23   ;;  %3322 = vst.msk [vmem:[%s8093_s1 + $0x164] sm:$0x20] %vm3_vm0, %v1680_v23  }
 0x1c4   :  { %3323 = vst.msk [vmem:[%s8093_s1 + $0x1a3] sm:$0x40] %vm3_vm0, %v1680_v23   ;;  %3324 = vst.msk [vmem:[%s8093_s1 + $0x1e2] sm:$0x80] %vm3_vm0, %v1680_v23  }
 0x1c5   :  { %3343 = vst.msk [vmem:[%s8093_s1 + $0x22a] sm:$0x1] %vm3_vm0, %v1742_v24   ;;  %3344 = vst.msk [vmem:[%s8093_s1 + $0x269] sm:$0x2] %vm3_vm0, %v1742_v24  }
 0x1c6   :  { %3345 = vst.msk [vmem:[%s8093_s1 + $0x2a8] sm:$0x4] %vm3_vm0, %v1742_v24   ;;  %3346 = vst.msk [vmem:[%s8093_s1 + $0x2e7] sm:$0x8] %vm3_vm0, %v1742_v24  }
 0x1c7   :  { %3347 = vst.msk [vmem:[%s8093_s1 + $0x326] sm:$0x10] %vm3_vm0, %v1742_v24   ;;  %3348 = vst.msk [vmem:[%s8093_s1 + $0x365] sm:$0x20] %vm3_vm0, %v1742_v24  }
 0x1c8   :  { %3349 = vst.msk [vmem:[%s8093_s1 + $0x3a4] sm:$0x40] %vm3_vm0, %v1742_v24   ;;  %3350 = vst.msk [vmem:[%s8093_s1 + $0x3e3] sm:$0x80] %vm3_vm0, %v1742_v24  }
 0x1c9   :  { %3334 = vst.msk [vmem:[%s8093_s1 + $0x2a] sm:$0x1] %vm3_vm0, %v1721_v25   ;;  %3335 = vst.msk [vmem:[%s8093_s1 + $0x69] sm:$0x2] %vm3_vm0, %v1721_v25  }
 0x1ca   :  { %3336 = vst.msk [vmem:[%s8093_s1 + $0xa8] sm:$0x4] %vm3_vm0, %v1721_v25   ;;  %3337 = vst.msk [vmem:[%s8093_s1 + $0xe7] sm:$0x8] %vm3_vm0, %v1721_v25  }
 0x1cb   :  { %3338 = vst.msk [vmem:[%s8093_s1 + $0x126] sm:$0x10] %vm3_vm0, %v1721_v25   ;;  %3339 = vst.msk [vmem:[%s8093_s1 + $0x165] sm:$0x20] %vm3_vm0, %v1721_v25  }
 0x1cc   :  { %3340 = vst.msk [vmem:[%s8093_s1 + $0x1a4] sm:$0x40] %vm3_vm0, %v1721_v25   ;;  %3341 = vst.msk [vmem:[%s8093_s1 + $0x1e3] sm:$0x80] %vm3_vm0, %v1721_v25  }
 0x1cd   :  { %3360 = vst.msk [vmem:[%s8093_s1 + $0x22b] sm:$0x1] %vm3_vm0, %v1783_v26   ;;  %3361 = vst.msk [vmem:[%s8093_s1 + $0x26a] sm:$0x2] %vm3_vm0, %v1783_v26  }
 0x1ce   :  { %3362 = vst.msk [vmem:[%s8093_s1 + $0x2a9] sm:$0x4] %vm3_vm0, %v1783_v26   ;;  %3363 = vst.msk [vmem:[%s8093_s1 + $0x2e8] sm:$0x8] %vm3_vm0, %v1783_v26  }
 0x1cf   :  { %3364 = vst.msk [vmem:[%s8093_s1 + $0x327] sm:$0x10] %vm3_vm0, %v1783_v26   ;;  %3365 = vst.msk [vmem:[%s8093_s1 + $0x366] sm:$0x20] %vm3_vm0, %v1783_v26  }
 0x1d0   :  { %3366 = vst.msk [vmem:[%s8093_s1 + $0x3a5] sm:$0x40] %vm3_vm0, %v1783_v26   ;;  %3367 = vst.msk [vmem:[%s8093_s1 + $0x3e4] sm:$0x80] %vm3_vm0, %v1783_v26  }
 0x1d1   :  { %3351 = vst.msk [vmem:[%s8093_s1 + $0x2b] sm:$0x1] %vm3_vm0, %v1762_v27   ;;  %3352 = vst.msk [vmem:[%s8093_s1 + $0x6a] sm:$0x2] %vm3_vm0, %v1762_v27  }
 0x1d2   :  { %3353 = vst.msk [vmem:[%s8093_s1 + $0xa9] sm:$0x4] %vm3_vm0, %v1762_v27   ;;  %3354 = vst.msk [vmem:[%s8093_s1 + $0xe8] sm:$0x8] %vm3_vm0, %v1762_v27  }
 0x1d3   :  { %3355 = vst.msk [vmem:[%s8093_s1 + $0x127] sm:$0x10] %vm3_vm0, %v1762_v27   ;;  %3356 = vst.msk [vmem:[%s8093_s1 + $0x166] sm:$0x20] %vm3_vm0, %v1762_v27  }
 0x1d4   :  { %3357 = vst.msk [vmem:[%s8093_s1 + $0x1a5] sm:$0x40] %vm3_vm0, %v1762_v27   ;;  %3358 = vst.msk [vmem:[%s8093_s1 + $0x1e4] sm:$0x80] %vm3_vm0, %v1762_v27  }
 0x1d5   :  { %3377 = vst.msk [vmem:[%s8093_s1 + $0x22c] sm:$0x1] %vm3_vm0, %v1824_v28   ;;  %3378 = vst.msk [vmem:[%s8093_s1 + $0x26b] sm:$0x2] %vm3_vm0, %v1824_v28  }
 0x1d6   :  { %3379 = vst.msk [vmem:[%s8093_s1 + $0x2aa] sm:$0x4] %vm3_vm0, %v1824_v28   ;;  %3380 = vst.msk [vmem:[%s8093_s1 + $0x2e9] sm:$0x8] %vm3_vm0, %v1824_v28  }
 0x1d7   :  { %3381 = vst.msk [vmem:[%s8093_s1 + $0x328] sm:$0x10] %vm3_vm0, %v1824_v28   ;;  %3382 = vst.msk [vmem:[%s8093_s1 + $0x367] sm:$0x20] %vm3_vm0, %v1824_v28  }
 0x1d8   :  { %3383 = vst.msk [vmem:[%s8093_s1 + $0x3a6] sm:$0x40] %vm3_vm0, %v1824_v28   ;;  %3384 = vst.msk [vmem:[%s8093_s1 + $0x3e5] sm:$0x80] %vm3_vm0, %v1824_v28  }
 0x1d9   :  { %3368 = vst.msk [vmem:[%s8093_s1 + $0x2c] sm:$0x1] %vm3_vm0, %v1803_v29   ;;  %3369 = vst.msk [vmem:[%s8093_s1 + $0x6b] sm:$0x2] %vm3_vm0, %v1803_v29  }
 0x1da   :  { %3370 = vst.msk [vmem:[%s8093_s1 + $0xaa] sm:$0x4] %vm3_vm0, %v1803_v29   ;;  %3371 = vst.msk [vmem:[%s8093_s1 + $0xe9] sm:$0x8] %vm3_vm0, %v1803_v29  }
 0x1db   :  { %3372 = vst.msk [vmem:[%s8093_s1 + $0x128] sm:$0x10] %vm3_vm0, %v1803_v29   ;;  %3373 = vst.msk [vmem:[%s8093_s1 + $0x167] sm:$0x20] %vm3_vm0, %v1803_v29  }
 0x1dc   :  { %3374 = vst.msk [vmem:[%s8093_s1 + $0x1a6] sm:$0x40] %vm3_vm0, %v1803_v29   ;;  %3375 = vst.msk [vmem:[%s8093_s1 + $0x1e5] sm:$0x80] %vm3_vm0, %v1803_v29  }
 0x1dd   :  { %3394 = vst.msk [vmem:[%s8093_s1 + $0x22d] sm:$0x1] %vm3_vm0, %v1865_v30   ;;  %3395 = vst.msk [vmem:[%s8093_s1 + $0x26c] sm:$0x2] %vm3_vm0, %v1865_v30  }
 0x1de   :  { %3396 = vst.msk [vmem:[%s8093_s1 + $0x2ab] sm:$0x4] %vm3_vm0, %v1865_v30   ;;  %3397 = vst.msk [vmem:[%s8093_s1 + $0x2ea] sm:$0x8] %vm3_vm0, %v1865_v30  }
 0x1df   :  { %3398 = vst.msk [vmem:[%s8093_s1 + $0x329] sm:$0x10] %vm3_vm0, %v1865_v30   ;;  %3399 = vst.msk [vmem:[%s8093_s1 + $0x368] sm:$0x20] %vm3_vm0, %v1865_v30  }
 0x1e0   :  { %3400 = vst.msk [vmem:[%s8093_s1 + $0x3a7] sm:$0x40] %vm3_vm0, %v1865_v30   ;;  %3401 = vst.msk [vmem:[%s8093_s1 + $0x3e6] sm:$0x80] %vm3_vm0, %v1865_v30  }
 0x1e1   :  { %3385 = vst.msk [vmem:[%s8093_s1 + $0x2d] sm:$0x1] %vm3_vm0, %v1844_v31   ;;  %3386 = vst.msk [vmem:[%s8093_s1 + $0x6c] sm:$0x2] %vm3_vm0, %v1844_v31  }
 0x1e2   :  { %3387 = vst.msk [vmem:[%s8093_s1 + $0xab] sm:$0x4] %vm3_vm0, %v1844_v31   ;;  %3388 = vst.msk [vmem:[%s8093_s1 + $0xea] sm:$0x8] %vm3_vm0, %v1844_v31  }
 0x1e3   :  { %3389 = vst.msk [vmem:[%s8093_s1 + $0x129] sm:$0x10] %vm3_vm0, %v1844_v31   ;;  %3390 = vst.msk [vmem:[%s8093_s1 + $0x168] sm:$0x20] %vm3_vm0, %v1844_v31  }
 0x1e4   :  { %3391 = vst.msk [vmem:[%s8093_s1 + $0x1a7] sm:$0x40] %vm3_vm0, %v1844_v31   ;;  %3392 = vst.msk [vmem:[%s8093_s1 + $0x1e6] sm:$0x80] %vm3_vm0, %v1844_v31  }
 0x1e5   :  { %3411 = vst.msk [vmem:[%s8093_s1 + $0x22e] sm:$0x1] %vm3_vm0, %v1906_v32   ;;  %3412 = vst.msk [vmem:[%s8093_s1 + $0x26d] sm:$0x2] %vm3_vm0, %v1906_v32  }
 0x1e6   :  { %3413 = vst.msk [vmem:[%s8093_s1 + $0x2ac] sm:$0x4] %vm3_vm0, %v1906_v32   ;;  %3414 = vst.msk [vmem:[%s8093_s1 + $0x2eb] sm:$0x8] %vm3_vm0, %v1906_v32  }
 0x1e7   :  { %3415 = vst.msk [vmem:[%s8093_s1 + $0x32a] sm:$0x10] %vm3_vm0, %v1906_v32   ;;  %3416 = vst.msk [vmem:[%s8093_s1 + $0x369] sm:$0x20] %vm3_vm0, %v1906_v32  }
 0x1e8   :  { %3417 = vst.msk [vmem:[%s8093_s1 + $0x3a8] sm:$0x40] %vm3_vm0, %v1906_v32   ;;  %3418 = vst.msk [vmem:[%s8093_s1 + $0x3e7] sm:$0x80] %vm3_vm0, %v1906_v32  }
 0x1e9   :  { %3402 = vst.msk [vmem:[%s8093_s1 + $0x2e] sm:$0x1] %vm3_vm0, %v1885_v33   ;;  %3403 = vst.msk [vmem:[%s8093_s1 + $0x6d] sm:$0x2] %vm3_vm0, %v1885_v33  }
 0x1ea   :  { %3404 = vst.msk [vmem:[%s8093_s1 + $0xac] sm:$0x4] %vm3_vm0, %v1885_v33   ;;  %3405 = vst.msk [vmem:[%s8093_s1 + $0xeb] sm:$0x8] %vm3_vm0, %v1885_v33  }
 0x1eb   :  { %3406 = vst.msk [vmem:[%s8093_s1 + $0x12a] sm:$0x10] %vm3_vm0, %v1885_v33   ;;  %3407 = vst.msk [vmem:[%s8093_s1 + $0x169] sm:$0x20] %vm3_vm0, %v1885_v33  }
 0x1ec   :  { %3408 = vst.msk [vmem:[%s8093_s1 + $0x1a8] sm:$0x40] %vm3_vm0, %v1885_v33   ;;  %3409 = vst.msk [vmem:[%s8093_s1 + $0x1e7] sm:$0x80] %vm3_vm0, %v1885_v33  }
 0x1ed   :  { %3428 = vst.msk [vmem:[%s8093_s1 + $0x22f] sm:$0x1] %vm3_vm0, %v1947_v34   ;;  %3429 = vst.msk [vmem:[%s8093_s1 + $0x26e] sm:$0x2] %vm3_vm0, %v1947_v34  }
 0x1ee   :  { %3430 = vst.msk [vmem:[%s8093_s1 + $0x2ad] sm:$0x4] %vm3_vm0, %v1947_v34   ;;  %3431 = vst.msk [vmem:[%s8093_s1 + $0x2ec] sm:$0x8] %vm3_vm0, %v1947_v34  }
 0x1ef   :  { %3432 = vst.msk [vmem:[%s8093_s1 + $0x32b] sm:$0x10] %vm3_vm0, %v1947_v34   ;;  %3433 = vst.msk [vmem:[%s8093_s1 + $0x36a] sm:$0x20] %vm3_vm0, %v1947_v34  }
 0x1f0   :  { %3434 = vst.msk [vmem:[%s8093_s1 + $0x3a9] sm:$0x40] %vm3_vm0, %v1947_v34   ;;  %3435 = vst.msk [vmem:[%s8093_s1 + $0x3e8] sm:$0x80] %vm3_vm0, %v1947_v34  }
 0x1f1   :  { %3419 = vst.msk [vmem:[%s8093_s1 + $0x2f] sm:$0x1] %vm3_vm0, %v1926_v35   ;;  %3420 = vst.msk [vmem:[%s8093_s1 + $0x6e] sm:$0x2] %vm3_vm0, %v1926_v35  }
 0x1f2   :  { %3421 = vst.msk [vmem:[%s8093_s1 + $0xad] sm:$0x4] %vm3_vm0, %v1926_v35   ;;  %3422 = vst.msk [vmem:[%s8093_s1 + $0xec] sm:$0x8] %vm3_vm0, %v1926_v35  }
 0x1f3   :  { %3423 = vst.msk [vmem:[%s8093_s1 + $0x12b] sm:$0x10] %vm3_vm0, %v1926_v35   ;;  %3424 = vst.msk [vmem:[%s8093_s1 + $0x16a] sm:$0x20] %vm3_vm0, %v1926_v35  }
 0x1f4   :  { %3425 = vst.msk [vmem:[%s8093_s1 + $0x1a9] sm:$0x40] %vm3_vm0, %v1926_v35   ;;  %3426 = vst.msk [vmem:[%s8093_s1 + $0x1e8] sm:$0x80] %vm3_vm0, %v1926_v35  }
 0x1f5   :  { %3445 = vst.msk [vmem:[%s8093_s1 + $0x230] sm:$0x1] %vm3_vm0, %v1988_v36   ;;  %3446 = vst.msk [vmem:[%s8093_s1 + $0x26f] sm:$0x2] %vm3_vm0, %v1988_v36  }
 0x1f6   :  { %3447 = vst.msk [vmem:[%s8093_s1 + $0x2ae] sm:$0x4] %vm3_vm0, %v1988_v36   ;;  %3448 = vst.msk [vmem:[%s8093_s1 + $0x2ed] sm:$0x8] %vm3_vm0, %v1988_v36  }
 0x1f7   :  { %3449 = vst.msk [vmem:[%s8093_s1 + $0x32c] sm:$0x10] %vm3_vm0, %v1988_v36   ;;  %3450 = vst.msk [vmem:[%s8093_s1 + $0x36b] sm:$0x20] %vm3_vm0, %v1988_v36  }
 0x1f8   :  { %3451 = vst.msk [vmem:[%s8093_s1 + $0x3aa] sm:$0x40] %vm3_vm0, %v1988_v36   ;;  %3452 = vst.msk [vmem:[%s8093_s1 + $0x3e9] sm:$0x80] %vm3_vm0, %v1988_v36  }
 0x1f9   :  { %3436 = vst.msk [vmem:[%s8093_s1 + $0x30] sm:$0x1] %vm3_vm0, %v1967_v37   ;;  %3437 = vst.msk [vmem:[%s8093_s1 + $0x6f] sm:$0x2] %vm3_vm0, %v1967_v37  }
 0x1fa   :  { %3438 = vst.msk [vmem:[%s8093_s1 + $0xae] sm:$0x4] %vm3_vm0, %v1967_v37   ;;  %3439 = vst.msk [vmem:[%s8093_s1 + $0xed] sm:$0x8] %vm3_vm0, %v1967_v37  }
 0x1fb   :  { %3440 = vst.msk [vmem:[%s8093_s1 + $0x12c] sm:$0x10] %vm3_vm0, %v1967_v37   ;;  %3441 = vst.msk [vmem:[%s8093_s1 + $0x16b] sm:$0x20] %vm3_vm0, %v1967_v37  }
 0x1fc   :  { %3442 = vst.msk [vmem:[%s8093_s1 + $0x1aa] sm:$0x40] %vm3_vm0, %v1967_v37   ;;  %3443 = vst.msk [vmem:[%s8093_s1 + $0x1e9] sm:$0x80] %vm3_vm0, %v1967_v37  }
 0x1fd   :  { %3462 = vst.msk [vmem:[%s8093_s1 + $0x231] sm:$0x1] %vm3_vm0, %v2029_v38   ;;  %3463 = vst.msk [vmem:[%s8093_s1 + $0x270] sm:$0x2] %vm3_vm0, %v2029_v38  }
 0x1fe   :  { %3464 = vst.msk [vmem:[%s8093_s1 + $0x2af] sm:$0x4] %vm3_vm0, %v2029_v38   ;;  %3465 = vst.msk [vmem:[%s8093_s1 + $0x2ee] sm:$0x8] %vm3_vm0, %v2029_v38  }
 0x1ff   :  { %3466 = vst.msk [vmem:[%s8093_s1 + $0x32d] sm:$0x10] %vm3_vm0, %v2029_v38   ;;  %3467 = vst.msk [vmem:[%s8093_s1 + $0x36c] sm:$0x20] %vm3_vm0, %v2029_v38  }
 0x200   :  { %3468 = vst.msk [vmem:[%s8093_s1 + $0x3ab] sm:$0x40] %vm3_vm0, %v2029_v38   ;;  %3469 = vst.msk [vmem:[%s8093_s1 + $0x3ea] sm:$0x80] %vm3_vm0, %v2029_v38  }
 0x201   :  { %3453 = vst.msk [vmem:[%s8093_s1 + $0x31] sm:$0x1] %vm3_vm0, %v2008_v39   ;;  %3454 = vst.msk [vmem:[%s8093_s1 + $0x70] sm:$0x2] %vm3_vm0, %v2008_v39  }
 0x202   :  { %3455 = vst.msk [vmem:[%s8093_s1 + $0xaf] sm:$0x4] %vm3_vm0, %v2008_v39   ;;  %3456 = vst.msk [vmem:[%s8093_s1 + $0xee] sm:$0x8] %vm3_vm0, %v2008_v39  }
 0x203   :  { %3457 = vst.msk [vmem:[%s8093_s1 + $0x12d] sm:$0x10] %vm3_vm0, %v2008_v39   ;;  %3458 = vst.msk [vmem:[%s8093_s1 + $0x16c] sm:$0x20] %vm3_vm0, %v2008_v39  }
 0x204   :  { %3459 = vst.msk [vmem:[%s8093_s1 + $0x1ab] sm:$0x40] %vm3_vm0, %v2008_v39   ;;  %3460 = vst.msk [vmem:[%s8093_s1 + $0x1ea] sm:$0x80] %vm3_vm0, %v2008_v39  }
 0x205   :  { %3479 = vst.msk [vmem:[%s8093_s1 + $0x232] sm:$0x1] %vm3_vm0, %v2070_v40   ;;  %3480 = vst.msk [vmem:[%s8093_s1 + $0x271] sm:$0x2] %vm3_vm0, %v2070_v40  }
 0x206   :  { %3481 = vst.msk [vmem:[%s8093_s1 + $0x2b0] sm:$0x4] %vm3_vm0, %v2070_v40   ;;  %3482 = vst.msk [vmem:[%s8093_s1 + $0x2ef] sm:$0x8] %vm3_vm0, %v2070_v40  }
 0x207   :  { %3483 = vst.msk [vmem:[%s8093_s1 + $0x32e] sm:$0x10] %vm3_vm0, %v2070_v40   ;;  %3484 = vst.msk [vmem:[%s8093_s1 + $0x36d] sm:$0x20] %vm3_vm0, %v2070_v40  }
 0x208   :  { %3485 = vst.msk [vmem:[%s8093_s1 + $0x3ac] sm:$0x40] %vm3_vm0, %v2070_v40   ;;  %3486 = vst.msk [vmem:[%s8093_s1 + $0x3eb] sm:$0x80] %vm3_vm0, %v2070_v40  }
 0x209   :  { %3470 = vst.msk [vmem:[%s8093_s1 + $0x32] sm:$0x1] %vm3_vm0, %v2049_v41   ;;  %3471 = vst.msk [vmem:[%s8093_s1 + $0x71] sm:$0x2] %vm3_vm0, %v2049_v41  }
 0x20a   :  { %3472 = vst.msk [vmem:[%s8093_s1 + $0xb0] sm:$0x4] %vm3_vm0, %v2049_v41   ;;  %3473 = vst.msk [vmem:[%s8093_s1 + $0xef] sm:$0x8] %vm3_vm0, %v2049_v41  }
 0x20b   :  { %3474 = vst.msk [vmem:[%s8093_s1 + $0x12e] sm:$0x10] %vm3_vm0, %v2049_v41   ;;  %3475 = vst.msk [vmem:[%s8093_s1 + $0x16d] sm:$0x20] %vm3_vm0, %v2049_v41  }
 0x20c   :  { %3476 = vst.msk [vmem:[%s8093_s1 + $0x1ac] sm:$0x40] %vm3_vm0, %v2049_v41   ;;  %3477 = vst.msk [vmem:[%s8093_s1 + $0x1eb] sm:$0x80] %vm3_vm0, %v2049_v41  }
 0x20d   :  { %3496 = vst.msk [vmem:[%s8093_s1 + $0x233] sm:$0x1] %vm3_vm0, %v2111_v42   ;;  %3497 = vst.msk [vmem:[%s8093_s1 + $0x272] sm:$0x2] %vm3_vm0, %v2111_v42  }
 0x20e   :  { %3498 = vst.msk [vmem:[%s8093_s1 + $0x2b1] sm:$0x4] %vm3_vm0, %v2111_v42   ;;  %3499 = vst.msk [vmem:[%s8093_s1 + $0x2f0] sm:$0x8] %vm3_vm0, %v2111_v42  }
 0x20f   :  { %3500 = vst.msk [vmem:[%s8093_s1 + $0x32f] sm:$0x10] %vm3_vm0, %v2111_v42   ;;  %3501 = vst.msk [vmem:[%s8093_s1 + $0x36e] sm:$0x20] %vm3_vm0, %v2111_v42  }
 0x210   :  { %3502 = vst.msk [vmem:[%s8093_s1 + $0x3ad] sm:$0x40] %vm3_vm0, %v2111_v42   ;;  %3503 = vst.msk [vmem:[%s8093_s1 + $0x3ec] sm:$0x80] %vm3_vm0, %v2111_v42  }
 0x211   :  { %3487 = vst.msk [vmem:[%s8093_s1 + $0x33] sm:$0x1] %vm3_vm0, %v2090_v43   ;;  %3488 = vst.msk [vmem:[%s8093_s1 + $0x72] sm:$0x2] %vm3_vm0, %v2090_v43  }
 0x212   :  { %3489 = vst.msk [vmem:[%s8093_s1 + $0xb1] sm:$0x4] %vm3_vm0, %v2090_v43   ;;  %3490 = vst.msk [vmem:[%s8093_s1 + $0xf0] sm:$0x8] %vm3_vm0, %v2090_v43  }
 0x213   :  { %3491 = vst.msk [vmem:[%s8093_s1 + $0x12f] sm:$0x10] %vm3_vm0, %v2090_v43   ;;  %3492 = vst.msk [vmem:[%s8093_s1 + $0x16e] sm:$0x20] %vm3_vm0, %v2090_v43  }
 0x214   :  { %3493 = vst.msk [vmem:[%s8093_s1 + $0x1ad] sm:$0x40] %vm3_vm0, %v2090_v43   ;;  %3494 = vst.msk [vmem:[%s8093_s1 + $0x1ec] sm:$0x80] %vm3_vm0, %v2090_v43  }
 0x215   :  { %3513 = vst.msk [vmem:[%s8093_s1 + $0x234] sm:$0x1] %vm3_vm0, %v2152_v44   ;;  %3514 = vst.msk [vmem:[%s8093_s1 + $0x273] sm:$0x2] %vm3_vm0, %v2152_v44  }
 0x216   :  { %3515 = vst.msk [vmem:[%s8093_s1 + $0x2b2] sm:$0x4] %vm3_vm0, %v2152_v44   ;;  %3516 = vst.msk [vmem:[%s8093_s1 + $0x2f1] sm:$0x8] %vm3_vm0, %v2152_v44  }
 0x217   :  { %3517 = vst.msk [vmem:[%s8093_s1 + $0x330] sm:$0x10] %vm3_vm0, %v2152_v44   ;;  %3518 = vst.msk [vmem:[%s8093_s1 + $0x36f] sm:$0x20] %vm3_vm0, %v2152_v44  }
 0x218   :  { %3519 = vst.msk [vmem:[%s8093_s1 + $0x3ae] sm:$0x40] %vm3_vm0, %v2152_v44   ;;  %3520 = vst.msk [vmem:[%s8093_s1 + $0x3ed] sm:$0x80] %vm3_vm0, %v2152_v44  }
 0x219   :  { %3504 = vst.msk [vmem:[%s8093_s1 + $0x34] sm:$0x1] %vm3_vm0, %v2131_v45   ;;  %3505 = vst.msk [vmem:[%s8093_s1 + $0x73] sm:$0x2] %vm3_vm0, %v2131_v45  }
 0x21a   :  { %3506 = vst.msk [vmem:[%s8093_s1 + $0xb2] sm:$0x4] %vm3_vm0, %v2131_v45   ;;  %3507 = vst.msk [vmem:[%s8093_s1 + $0xf1] sm:$0x8] %vm3_vm0, %v2131_v45  }
 0x21b   :  { %3508 = vst.msk [vmem:[%s8093_s1 + $0x130] sm:$0x10] %vm3_vm0, %v2131_v45   ;;  %3509 = vst.msk [vmem:[%s8093_s1 + $0x16f] sm:$0x20] %vm3_vm0, %v2131_v45  }
 0x21c   :  { %3510 = vst.msk [vmem:[%s8093_s1 + $0x1ae] sm:$0x40] %vm3_vm0, %v2131_v45   ;;  %3511 = vst.msk [vmem:[%s8093_s1 + $0x1ed] sm:$0x80] %vm3_vm0, %v2131_v45  }
 0x21d   :  { %3530 = vst.msk [vmem:[%s8093_s1 + $0x235] sm:$0x1] %vm3_vm0, %v2193_v46   ;;  %3531 = vst.msk [vmem:[%s8093_s1 + $0x274] sm:$0x2] %vm3_vm0, %v2193_v46  }
 0x21e   :  { %3532 = vst.msk [vmem:[%s8093_s1 + $0x2b3] sm:$0x4] %vm3_vm0, %v2193_v46   ;;  %3533 = vst.msk [vmem:[%s8093_s1 + $0x2f2] sm:$0x8] %vm3_vm0, %v2193_v46  }
 0x21f   :  { %3534 = vst.msk [vmem:[%s8093_s1 + $0x331] sm:$0x10] %vm3_vm0, %v2193_v46   ;;  %3535 = vst.msk [vmem:[%s8093_s1 + $0x370] sm:$0x20] %vm3_vm0, %v2193_v46  }
 0x220   :  { %3536 = vst.msk [vmem:[%s8093_s1 + $0x3af] sm:$0x40] %vm3_vm0, %v2193_v46   ;;  %3537 = vst.msk [vmem:[%s8093_s1 + $0x3ee] sm:$0x80] %vm3_vm0, %v2193_v46  }
 0x221   :  { %3521 = vst.msk [vmem:[%s8093_s1 + $0x35] sm:$0x1] %vm3_vm0, %v2172_v47   ;;  %3522 = vst.msk [vmem:[%s8093_s1 + $0x74] sm:$0x2] %vm3_vm0, %v2172_v47  }
 0x222   :  { %3523 = vst.msk [vmem:[%s8093_s1 + $0xb3] sm:$0x4] %vm3_vm0, %v2172_v47   ;;  %3524 = vst.msk [vmem:[%s8093_s1 + $0xf2] sm:$0x8] %vm3_vm0, %v2172_v47  }
 0x223   :  { %3525 = vst.msk [vmem:[%s8093_s1 + $0x131] sm:$0x10] %vm3_vm0, %v2172_v47   ;;  %3526 = vst.msk [vmem:[%s8093_s1 + $0x170] sm:$0x20] %vm3_vm0, %v2172_v47  }
 0x224   :  { %3527 = vst.msk [vmem:[%s8093_s1 + $0x1af] sm:$0x40] %vm3_vm0, %v2172_v47   ;;  %3528 = vst.msk [vmem:[%s8093_s1 + $0x1ee] sm:$0x80] %vm3_vm0, %v2172_v47  }
 0x225   :  { %3547 = vst.msk [vmem:[%s8093_s1 + $0x236] sm:$0x1] %vm3_vm0, %v2234_v48   ;;  %3548 = vst.msk [vmem:[%s8093_s1 + $0x275] sm:$0x2] %vm3_vm0, %v2234_v48  }
 0x226   :  { %3549 = vst.msk [vmem:[%s8093_s1 + $0x2b4] sm:$0x4] %vm3_vm0, %v2234_v48   ;;  %3550 = vst.msk [vmem:[%s8093_s1 + $0x2f3] sm:$0x8] %vm3_vm0, %v2234_v48  }
 0x227   :  { %3551 = vst.msk [vmem:[%s8093_s1 + $0x332] sm:$0x10] %vm3_vm0, %v2234_v48   ;;  %3552 = vst.msk [vmem:[%s8093_s1 + $0x371] sm:$0x20] %vm3_vm0, %v2234_v48  }
 0x228   :  { %3553 = vst.msk [vmem:[%s8093_s1 + $0x3b0] sm:$0x40] %vm3_vm0, %v2234_v48   ;;  %3554 = vst.msk [vmem:[%s8093_s1 + $0x3ef] sm:$0x80] %vm3_vm0, %v2234_v48  }
 0x229   :  { %3538 = vst.msk [vmem:[%s8093_s1 + $0x36] sm:$0x1] %vm3_vm0, %v2213_v49   ;;  %3539 = vst.msk [vmem:[%s8093_s1 + $0x75] sm:$0x2] %vm3_vm0, %v2213_v49  }
 0x22a   :  { %3540 = vst.msk [vmem:[%s8093_s1 + $0xb4] sm:$0x4] %vm3_vm0, %v2213_v49   ;;  %3541 = vst.msk [vmem:[%s8093_s1 + $0xf3] sm:$0x8] %vm3_vm0, %v2213_v49  }
 0x22b   :  { %3542 = vst.msk [vmem:[%s8093_s1 + $0x132] sm:$0x10] %vm3_vm0, %v2213_v49   ;;  %3543 = vst.msk [vmem:[%s8093_s1 + $0x171] sm:$0x20] %vm3_vm0, %v2213_v49  }
 0x22c   :  { %3544 = vst.msk [vmem:[%s8093_s1 + $0x1b0] sm:$0x40] %vm3_vm0, %v2213_v49   ;;  %3545 = vst.msk [vmem:[%s8093_s1 + $0x1ef] sm:$0x80] %vm3_vm0, %v2213_v49  }
 0x22d   :  { %3564 = vst.msk [vmem:[%s8093_s1 + $0x237] sm:$0x1] %vm3_vm0, %v2275_v50   ;;  %3565 = vst.msk [vmem:[%s8093_s1 + $0x276] sm:$0x2] %vm3_vm0, %v2275_v50  }
 0x22e   :  { %3566 = vst.msk [vmem:[%s8093_s1 + $0x2b5] sm:$0x4] %vm3_vm0, %v2275_v50   ;;  %3567 = vst.msk [vmem:[%s8093_s1 + $0x2f4] sm:$0x8] %vm3_vm0, %v2275_v50  }
 0x22f   :  { %3568 = vst.msk [vmem:[%s8093_s1 + $0x333] sm:$0x10] %vm3_vm0, %v2275_v50   ;;  %3569 = vst.msk [vmem:[%s8093_s1 + $0x372] sm:$0x20] %vm3_vm0, %v2275_v50  }
 0x230   :  { %3570 = vst.msk [vmem:[%s8093_s1 + $0x3b1] sm:$0x40] %vm3_vm0, %v2275_v50   ;;  %3571 = vst.msk [vmem:[%s8093_s1 + $0x3f0] sm:$0x80] %vm3_vm0, %v2275_v50  }
 0x231   :  { %3555 = vst.msk [vmem:[%s8093_s1 + $0x37] sm:$0x1] %vm3_vm0, %v2254_v51   ;;  %3556 = vst.msk [vmem:[%s8093_s1 + $0x76] sm:$0x2] %vm3_vm0, %v2254_v51  }
 0x232   :  { %3557 = vst.msk [vmem:[%s8093_s1 + $0xb5] sm:$0x4] %vm3_vm0, %v2254_v51   ;;  %3558 = vst.msk [vmem:[%s8093_s1 + $0xf4] sm:$0x8] %vm3_vm0, %v2254_v51  }
 0x233   :  { %3559 = vst.msk [vmem:[%s8093_s1 + $0x133] sm:$0x10] %vm3_vm0, %v2254_v51   ;;  %3560 = vst.msk [vmem:[%s8093_s1 + $0x172] sm:$0x20] %vm3_vm0, %v2254_v51  }
 0x234   :  { %3561 = vst.msk [vmem:[%s8093_s1 + $0x1b1] sm:$0x40] %vm3_vm0, %v2254_v51   ;;  %3562 = vst.msk [vmem:[%s8093_s1 + $0x1f0] sm:$0x80] %vm3_vm0, %v2254_v51  }
 0x235   :  { %3581 = vst.msk [vmem:[%s8093_s1 + $0x238] sm:$0x1] %vm3_vm0, %v2316_v52   ;;  %3582 = vst.msk [vmem:[%s8093_s1 + $0x277] sm:$0x2] %vm3_vm0, %v2316_v52  }
 0x236   :  { %3583 = vst.msk [vmem:[%s8093_s1 + $0x2b6] sm:$0x4] %vm3_vm0, %v2316_v52   ;;  %3584 = vst.msk [vmem:[%s8093_s1 + $0x2f5] sm:$0x8] %vm3_vm0, %v2316_v52  }
 0x237   :  { %3585 = vst.msk [vmem:[%s8093_s1 + $0x334] sm:$0x10] %vm3_vm0, %v2316_v52   ;;  %3586 = vst.msk [vmem:[%s8093_s1 + $0x373] sm:$0x20] %vm3_vm0, %v2316_v52  }
 0x238   :  { %3587 = vst.msk [vmem:[%s8093_s1 + $0x3b2] sm:$0x40] %vm3_vm0, %v2316_v52   ;;  %3588 = vst.msk [vmem:[%s8093_s1 + $0x3f1] sm:$0x80] %vm3_vm0, %v2316_v52  }
 0x239   :  { %3572 = vst.msk [vmem:[%s8093_s1 + $0x38] sm:$0x1] %vm3_vm0, %v2295_v53   ;;  %3573 = vst.msk [vmem:[%s8093_s1 + $0x77] sm:$0x2] %vm3_vm0, %v2295_v53  }
 0x23a   :  { %3574 = vst.msk [vmem:[%s8093_s1 + $0xb6] sm:$0x4] %vm3_vm0, %v2295_v53   ;;  %3575 = vst.msk [vmem:[%s8093_s1 + $0xf5] sm:$0x8] %vm3_vm0, %v2295_v53  }
 0x23b   :  { %3576 = vst.msk [vmem:[%s8093_s1 + $0x134] sm:$0x10] %vm3_vm0, %v2295_v53   ;;  %3577 = vst.msk [vmem:[%s8093_s1 + $0x173] sm:$0x20] %vm3_vm0, %v2295_v53  }
 0x23c   :  { %3578 = vst.msk [vmem:[%s8093_s1 + $0x1b2] sm:$0x40] %vm3_vm0, %v2295_v53   ;;  %3579 = vst.msk [vmem:[%s8093_s1 + $0x1f1] sm:$0x80] %vm3_vm0, %v2295_v53  }
 0x23d   :  { %3598 = vst.msk [vmem:[%s8093_s1 + $0x239] sm:$0x1] %vm3_vm0, %v2357_v54   ;;  %3599 = vst.msk [vmem:[%s8093_s1 + $0x278] sm:$0x2] %vm3_vm0, %v2357_v54  }
 0x23e   :  { %3600 = vst.msk [vmem:[%s8093_s1 + $0x2b7] sm:$0x4] %vm3_vm0, %v2357_v54   ;;  %3601 = vst.msk [vmem:[%s8093_s1 + $0x2f6] sm:$0x8] %vm3_vm0, %v2357_v54  }
 0x23f   :  { %3602 = vst.msk [vmem:[%s8093_s1 + $0x335] sm:$0x10] %vm3_vm0, %v2357_v54   ;;  %3603 = vst.msk [vmem:[%s8093_s1 + $0x374] sm:$0x20] %vm3_vm0, %v2357_v54  }
 0x240   :  { %3604 = vst.msk [vmem:[%s8093_s1 + $0x3b3] sm:$0x40] %vm3_vm0, %v2357_v54   ;;  %3605 = vst.msk [vmem:[%s8093_s1 + $0x3f2] sm:$0x80] %vm3_vm0, %v2357_v54  }
 0x241   :  { %3589 = vst.msk [vmem:[%s8093_s1 + $0x39] sm:$0x1] %vm3_vm0, %v2336_v55   ;;  %3590 = vst.msk [vmem:[%s8093_s1 + $0x78] sm:$0x2] %vm3_vm0, %v2336_v55  }
 0x242   :  { %3591 = vst.msk [vmem:[%s8093_s1 + $0xb7] sm:$0x4] %vm3_vm0, %v2336_v55   ;;  %3592 = vst.msk [vmem:[%s8093_s1 + $0xf6] sm:$0x8] %vm3_vm0, %v2336_v55  }
 0x243   :  { %3593 = vst.msk [vmem:[%s8093_s1 + $0x135] sm:$0x10] %vm3_vm0, %v2336_v55   ;;  %3594 = vst.msk [vmem:[%s8093_s1 + $0x174] sm:$0x20] %vm3_vm0, %v2336_v55  }
 0x244   :  { %3595 = vst.msk [vmem:[%s8093_s1 + $0x1b3] sm:$0x40] %vm3_vm0, %v2336_v55   ;;  %3596 = vst.msk [vmem:[%s8093_s1 + $0x1f2] sm:$0x80] %vm3_vm0, %v2336_v55  }
 0x245   :  { %3615 = vst.msk [vmem:[%s8093_s1 + $0x23a] sm:$0x1] %vm3_vm0, %v2398_v56   ;;  %3616 = vst.msk [vmem:[%s8093_s1 + $0x279] sm:$0x2] %vm3_vm0, %v2398_v56  }
 0x246   :  { %3617 = vst.msk [vmem:[%s8093_s1 + $0x2b8] sm:$0x4] %vm3_vm0, %v2398_v56   ;;  %3618 = vst.msk [vmem:[%s8093_s1 + $0x2f7] sm:$0x8] %vm3_vm0, %v2398_v56  }
 0x247   :  { %3619 = vst.msk [vmem:[%s8093_s1 + $0x336] sm:$0x10] %vm3_vm0, %v2398_v56   ;;  %3620 = vst.msk [vmem:[%s8093_s1 + $0x375] sm:$0x20] %vm3_vm0, %v2398_v56  }
 0x248   :  { %3621 = vst.msk [vmem:[%s8093_s1 + $0x3b4] sm:$0x40] %vm3_vm0, %v2398_v56   ;;  %3622 = vst.msk [vmem:[%s8093_s1 + $0x3f3] sm:$0x80] %vm3_vm0, %v2398_v56  }
 0x249   :  { %3606 = vst.msk [vmem:[%s8093_s1 + $0x3a] sm:$0x1] %vm3_vm0, %v2377_v57   ;;  %3607 = vst.msk [vmem:[%s8093_s1 + $0x79] sm:$0x2] %vm3_vm0, %v2377_v57  }
 0x24a   :  { %3608 = vst.msk [vmem:[%s8093_s1 + $0xb8] sm:$0x4] %vm3_vm0, %v2377_v57   ;;  %3609 = vst.msk [vmem:[%s8093_s1 + $0xf7] sm:$0x8] %vm3_vm0, %v2377_v57  }
 0x24b   :  { %3610 = vst.msk [vmem:[%s8093_s1 + $0x136] sm:$0x10] %vm3_vm0, %v2377_v57   ;;  %3611 = vst.msk [vmem:[%s8093_s1 + $0x175] sm:$0x20] %vm3_vm0, %v2377_v57  }
 0x24c   :  { %3612 = vst.msk [vmem:[%s8093_s1 + $0x1b4] sm:$0x40] %vm3_vm0, %v2377_v57   ;;  %3613 = vst.msk [vmem:[%s8093_s1 + $0x1f3] sm:$0x80] %vm3_vm0, %v2377_v57  }
 0x24d   :  { %3632 = vst.msk [vmem:[%s8093_s1 + $0x23b] sm:$0x1] %vm3_vm0, %v2439_v58   ;;  %3633 = vst.msk [vmem:[%s8093_s1 + $0x27a] sm:$0x2] %vm3_vm0, %v2439_v58  }
 0x24e   :  { %3634 = vst.msk [vmem:[%s8093_s1 + $0x2b9] sm:$0x4] %vm3_vm0, %v2439_v58   ;;  %3635 = vst.msk [vmem:[%s8093_s1 + $0x2f8] sm:$0x8] %vm3_vm0, %v2439_v58  }
 0x24f   :  { %3636 = vst.msk [vmem:[%s8093_s1 + $0x337] sm:$0x10] %vm3_vm0, %v2439_v58   ;;  %3637 = vst.msk [vmem:[%s8093_s1 + $0x376] sm:$0x20] %vm3_vm0, %v2439_v58  }
 0x250   :  { %3638 = vst.msk [vmem:[%s8093_s1 + $0x3b5] sm:$0x40] %vm3_vm0, %v2439_v58   ;;  %3639 = vst.msk [vmem:[%s8093_s1 + $0x3f4] sm:$0x80] %vm3_vm0, %v2439_v58  }
 0x251   :  { %3623 = vst.msk [vmem:[%s8093_s1 + $0x3b] sm:$0x1] %vm3_vm0, %v2418_v59   ;;  %3624 = vst.msk [vmem:[%s8093_s1 + $0x7a] sm:$0x2] %vm3_vm0, %v2418_v59  }
 0x252   :  { %3625 = vst.msk [vmem:[%s8093_s1 + $0xb9] sm:$0x4] %vm3_vm0, %v2418_v59   ;;  %3626 = vst.msk [vmem:[%s8093_s1 + $0xf8] sm:$0x8] %vm3_vm0, %v2418_v59  }
 0x253   :  { %3627 = vst.msk [vmem:[%s8093_s1 + $0x137] sm:$0x10] %vm3_vm0, %v2418_v59   ;;  %3628 = vst.msk [vmem:[%s8093_s1 + $0x176] sm:$0x20] %vm3_vm0, %v2418_v59  }
 0x254   :  { %3629 = vst.msk [vmem:[%s8093_s1 + $0x1b5] sm:$0x40] %vm3_vm0, %v2418_v59   ;;  %3630 = vst.msk [vmem:[%s8093_s1 + $0x1f4] sm:$0x80] %vm3_vm0, %v2418_v59  }
 0x255   :  { %3649 = vst.msk [vmem:[%s8093_s1 + $0x23c] sm:$0x1] %vm3_vm0, %v2480_v60   ;;  %3650 = vst.msk [vmem:[%s8093_s1 + $0x27b] sm:$0x2] %vm3_vm0, %v2480_v60  }
 0x256   :  { %3651 = vst.msk [vmem:[%s8093_s1 + $0x2ba] sm:$0x4] %vm3_vm0, %v2480_v60   ;;  %3652 = vst.msk [vmem:[%s8093_s1 + $0x2f9] sm:$0x8] %vm3_vm0, %v2480_v60  }
 0x257   :  { %3653 = vst.msk [vmem:[%s8093_s1 + $0x338] sm:$0x10] %vm3_vm0, %v2480_v60   ;;  %3654 = vst.msk [vmem:[%s8093_s1 + $0x377] sm:$0x20] %vm3_vm0, %v2480_v60  }
 0x258   :  { %3655 = vst.msk [vmem:[%s8093_s1 + $0x3b6] sm:$0x40] %vm3_vm0, %v2480_v60   ;;  %3656 = vst.msk [vmem:[%s8093_s1 + $0x3f5] sm:$0x80] %vm3_vm0, %v2480_v60  }
 0x259   :  { %3640 = vst.msk [vmem:[%s8093_s1 + $0x3c] sm:$0x1] %vm3_vm0, %v2459_v61   ;;  %3641 = vst.msk [vmem:[%s8093_s1 + $0x7b] sm:$0x2] %vm3_vm0, %v2459_v61  }
 0x25a   :  { %3642 = vst.msk [vmem:[%s8093_s1 + $0xba] sm:$0x4] %vm3_vm0, %v2459_v61   ;;  %3643 = vst.msk [vmem:[%s8093_s1 + $0xf9] sm:$0x8] %vm3_vm0, %v2459_v61  }
 0x25b   :  { %3644 = vst.msk [vmem:[%s8093_s1 + $0x138] sm:$0x10] %vm3_vm0, %v2459_v61   ;;  %3645 = vst.msk [vmem:[%s8093_s1 + $0x177] sm:$0x20] %vm3_vm0, %v2459_v61  }
 0x25c   :  { %3646 = vst.msk [vmem:[%s8093_s1 + $0x1b6] sm:$0x40] %vm3_vm0, %v2459_v61   ;;  %3647 = vst.msk [vmem:[%s8093_s1 + $0x1f5] sm:$0x80] %vm3_vm0, %v2459_v61  }
 0x25d   :  { %3666 = vst.msk [vmem:[%s8093_s1 + $0x23d] sm:$0x1] %vm3_vm0, %v2521_v62   ;;  %3667 = vst.msk [vmem:[%s8093_s1 + $0x27c] sm:$0x2] %vm3_vm0, %v2521_v62  }
 0x25e   :  { %3668 = vst.msk [vmem:[%s8093_s1 + $0x2bb] sm:$0x4] %vm3_vm0, %v2521_v62   ;;  %3669 = vst.msk [vmem:[%s8093_s1 + $0x2fa] sm:$0x8] %vm3_vm0, %v2521_v62  }
 0x25f   :  { %3670 = vst.msk [vmem:[%s8093_s1 + $0x339] sm:$0x10] %vm3_vm0, %v2521_v62   ;;  %3671 = vst.msk [vmem:[%s8093_s1 + $0x378] sm:$0x20] %vm3_vm0, %v2521_v62  }
 0x260   :  { %3672 = vst.msk [vmem:[%s8093_s1 + $0x3b7] sm:$0x40] %vm3_vm0, %v2521_v62   ;;  %3673 = vst.msk [vmem:[%s8093_s1 + $0x3f6] sm:$0x80] %vm3_vm0, %v2521_v62  }
 0x261   :  { %3657 = vst.msk [vmem:[%s8093_s1 + $0x3d] sm:$0x1] %vm3_vm0, %v2500_v63   ;;  %3658 = vst.msk [vmem:[%s8093_s1 + $0x7c] sm:$0x2] %vm3_vm0, %v2500_v63  }
 0x262   :  { %3659 = vst.msk [vmem:[%s8093_s1 + $0xbb] sm:$0x4] %vm3_vm0, %v2500_v63   ;;  %3660 = vst.msk [vmem:[%s8093_s1 + $0xfa] sm:$0x8] %vm3_vm0, %v2500_v63  }
 0x263   :  { %3661 = vst.msk [vmem:[%s8093_s1 + $0x139] sm:$0x10] %vm3_vm0, %v2500_v63   ;;  %3662 = vst.msk [vmem:[%s8093_s1 + $0x178] sm:$0x20] %vm3_vm0, %v2500_v63  }
 0x264   :  { %3663 = vst.msk [vmem:[%s8093_s1 + $0x1b7] sm:$0x40] %vm3_vm0, %v2500_v63   ;;  %3664 = vst.msk [vmem:[%s8093_s1 + $0x1f6] sm:$0x80] %vm3_vm0, %v2500_v63  }
 0x265   :  { %3683 = vst.msk [vmem:[%s8093_s1 + $0x23e] sm:$0x1] %vm3_vm0, %v2562_v0   ;;  %3684 = vst.msk [vmem:[%s8093_s1 + $0x27d] sm:$0x2] %vm3_vm0, %v2562_v0  }
 0x266   :  { %3685 = vst.msk [vmem:[%s8093_s1 + $0x2bc] sm:$0x4] %vm3_vm0, %v2562_v0   ;;  %3686 = vst.msk [vmem:[%s8093_s1 + $0x2fb] sm:$0x8] %vm3_vm0, %v2562_v0  }
 0x267   :  { %3687 = vst.msk [vmem:[%s8093_s1 + $0x33a] sm:$0x10] %vm3_vm0, %v2562_v0   ;;  %3688 = vst.msk [vmem:[%s8093_s1 + $0x379] sm:$0x20] %vm3_vm0, %v2562_v0  }
 0x268   :  { %3689 = vst.msk [vmem:[%s8093_s1 + $0x3b8] sm:$0x40] %vm3_vm0, %v2562_v0   ;;  %3690 = vst.msk [vmem:[%s8093_s1 + $0x3f7] sm:$0x80] %vm3_vm0, %v2562_v0  }
 0x269   :  { %3674 = vst.msk [vmem:[%s8093_s1 + $0x3e] sm:$0x1] %vm3_vm0, %v2541_v1   ;;  %3675 = vst.msk [vmem:[%s8093_s1 + $0x7d] sm:$0x2] %vm3_vm0, %v2541_v1  }
 0x26a   :  { %3676 = vst.msk [vmem:[%s8093_s1 + $0xbc] sm:$0x4] %vm3_vm0, %v2541_v1   ;;  %3677 = vst.msk [vmem:[%s8093_s1 + $0xfb] sm:$0x8] %vm3_vm0, %v2541_v1  }
 0x26b   :  { %3678 = vst.msk [vmem:[%s8093_s1 + $0x13a] sm:$0x10] %vm3_vm0, %v2541_v1   ;;  %3679 = vst.msk [vmem:[%s8093_s1 + $0x179] sm:$0x20] %vm3_vm0, %v2541_v1  }
 0x26c   :  { %3680 = vst.msk [vmem:[%s8093_s1 + $0x1b8] sm:$0x40] %vm3_vm0, %v2541_v1   ;;  %3681 = vst.msk [vmem:[%s8093_s1 + $0x1f7] sm:$0x80] %vm3_vm0, %v2541_v1  }
 0x26d   :  { %3700 = vst.msk [vmem:[%s8093_s1 + $0x23f] sm:$0x1] %vm3_vm0, %v2603_v2   ;;  %3701 = vst.msk [vmem:[%s8093_s1 + $0x27e] sm:$0x2] %vm3_vm0, %v2603_v2  }
 0x26e   :  { %3702 = vst.msk [vmem:[%s8093_s1 + $0x2bd] sm:$0x4] %vm3_vm0, %v2603_v2   ;;  %3703 = vst.msk [vmem:[%s8093_s1 + $0x2fc] sm:$0x8] %vm3_vm0, %v2603_v2  }
 0x26f   :  { %3704 = vst.msk [vmem:[%s8093_s1 + $0x33b] sm:$0x10] %vm3_vm0, %v2603_v2   ;;  %3705 = vst.msk [vmem:[%s8093_s1 + $0x37a] sm:$0x20] %vm3_vm0, %v2603_v2  }
 0x270   :  { %3706 = vst.msk [vmem:[%s8093_s1 + $0x3b9] sm:$0x40] %vm3_vm0, %v2603_v2   ;;  %3707 = vst.msk [vmem:[%s8093_s1 + $0x3f8] sm:$0x80] %vm3_vm0, %v2603_v2  }
 0x271   :  { %3691 = vst.msk [vmem:[%s8093_s1 + $0x3f] sm:$0x1] %vm3_vm0, %v2582_v3   ;;  %3692 = vst.msk [vmem:[%s8093_s1 + $0x7e] sm:$0x2] %vm3_vm0, %v2582_v3  }
 0x272   :  { %3693 = vst.msk [vmem:[%s8093_s1 + $0xbd] sm:$0x4] %vm3_vm0, %v2582_v3   ;;  %3694 = vst.msk [vmem:[%s8093_s1 + $0xfc] sm:$0x8] %vm3_vm0, %v2582_v3  }
 0x273   :  { %3695 = vst.msk [vmem:[%s8093_s1 + $0x13b] sm:$0x10] %vm3_vm0, %v2582_v3   ;;  %3696 = vst.msk [vmem:[%s8093_s1 + $0x17a] sm:$0x20] %vm3_vm0, %v2582_v3  }
 0x274   :  { %3697 = vst.msk [vmem:[%s8093_s1 + $0x1b9] sm:$0x40] %vm3_vm0, %v2582_v3   ;;  %3698 = vst.msk [vmem:[%s8093_s1 + $0x1f8] sm:$0x80] %vm3_vm0, %v2582_v3  }

// kernel: tile.18
= control target key start
LH: loop header
LB: loop body
LE: loop exit
PB: predicated region body
PF: predicated region fallthrough
CT: control target
= control target key end

     0   :  { %s22_s0 = inlined_call_operand.vmem [shape: f32[64], index: 0, kind: input, shape index: {}]   ;;  %s23_s1 = inlined_call_operand.vmem [shape: f32[4,64], index: 1, kind: output, shape index: {}]  }
   0x1   :  { %v4_v0 = vld [vmem:[%s22_s0] ss:$0 sm:$0xff] }
   0x2   :  { %5 = vst [vmem:[%s23_s1] sm:$0xf] %v4_v0 }

// kernel: tile.1
= control target key start
LH: loop header
LB: loop body
LE: loop exit
PB: predicated region body
PF: predicated region fallthrough
CT: control target
= control target key end

     0   :  { %s1090_s8 = smov 125   ;;  %s1091_s9 = smov 126   ;;  %vm7_vm0 = vcmask 7168   ;;  %s2189_s0 = inlined_call_operand.vmem [shape: f32[4,64], index: 0, kind: input, shape index: {}]   ;;  %s2190_s1 = inlined_call_operand.vmem [shape: f32[256,1], index: 1, kind: output, shape index: {}]  }
   0x1   :  { %v4_v0 = vld [vmem:[%s2189_s0] sm:$0xf]  ;;  %s1089_s0 = smov 127   ;;  %s1092_s10 = smov 124  }
   0x2   :  { %5 = vst [vmem:[#allocation0] sm:$0xf] %v4_v0  ;;  %s1093_s11 = smov 123   ;;  %s1094_s12 = smov 122  }
   0x3   :  { %s1095_s13 = smov 121   ;;  %s1096_s14 = smov 120  }
   0x4   :  { %s1097_s15 = smov 119   ;;  %s1098_s16 = smov 118  }
   0x5   :  { %s1099_s17 = smov 117   ;;  %s1100_s18 = smov 116  }
   0x6   :  { %s1101_s19 = smov 115   ;;  %s1102_s20 = smov 114  }
   0x7   :  { %s1103_s21 = smov 113   ;;  %s1104_s22 = smov 112  }
   0x8   :  { %s1105_s23 = smov 111   ;;  %s1106_s24 = smov 110  }
   0x9   :  { %v15_v1 = vld [vmem:[#allocation0] sm:$0xf]   ;;  %s1107_s25 = smov 109   ;;  %s1108_s26 = smov 108  }
   0xa   :  { %v39_v2 = vld [vmem:[#allocation0] sm:$0xf]   ;;  %16 = vrot.lane.b32.xlu0 %v15_v1, %s1089_s0  ;;  %s1109_s27 = smov 107   ;;  %s1110_s28 = smov 106  }
   0xb   :  { %40 = vrot.lane.b32.xlu1 %v39_v2, %s1090_s8  ;;  %v27_v3 = vld [vmem:[#allocation0] sm:$0xf]   ;;  %s1111_s29 = smov 105   ;;  %s1112_s30 = smov 104  }
   0xc   :  { %v51_v4 = vld [vmem:[#allocation0] sm:$0xf]   ;;  %s1113_s2 = smov 103   ;;  %s1114_s3 = smov 102  }
   0xd   :  { %v63_v5 = vld [vmem:[#allocation0] sm:$0xf]   ;;  %s1115_s4 = smov 101   ;;  %s1116_s5 = smov 100  }
   0xe   :  { %28 = vrot.lane.b32.xlu0 %v27_v3, %s1091_s9  ;;  %v75_v6 = vld [vmem:[#allocation0] sm:$0xf]   ;;  %s1117_s6 = smov 99   ;;  %s1118_s7 = smov 98  }
   0xf   :  { %52 = vrot.lane.b32.xlu1 %v51_v4, %s1092_s10  ;;  %v87_v7 = vld [vmem:[#allocation0] sm:$0xf]   ;;  %s1119_s0 = smov 97   ;;  %s1120_s8 = smov 96  }
  0x10   :  { %v99_v8 = vld [vmem:[#allocation0] sm:$0xf]   ;;  %s1121_s9 = smov 95   ;;  %s1122_s10 = smov 94  }
  0x11   :  { %v111_v9 = vld [vmem:[#allocation0] sm:$0xf]  }
  0x12   :  { %64 = vrot.lane.b32.xlu0 %v63_v5, %s1093_s11  ;;  %v123_v10 = vld [vmem:[#allocation0] sm:$0xf]   ;;  %s1123_s11 = smov 93  }
  0x13   :  { %76 = vrot.lane.b32.xlu1 %v75_v6, %s1094_s12  ;;  %v135_v11 = vld [vmem:[#allocation0] sm:$0xf]   ;;  %s1124_s12 = smov 92  }
  0x14   :  { %v147_v12 = vld [vmem:[#allocation0] sm:$0xf]  }
  0x15   :  { %v159_v13 = vld [vmem:[#allocation0] sm:$0xf]  }
  0x16   :  { %88 = vrot.lane.b32.xlu0 %v87_v7, %s1095_s13  ;;  %v171_v14 = vld [vmem:[#allocation0] sm:$0xf]   ;;  %s1125_s13 = smov 91  }
  0x17   :  { %100 = vrot.lane.b32.xlu1 %v99_v8, %s1096_s14  ;;  %v183_v15 = vld [vmem:[#allocation0] sm:$0xf]   ;;  %s1126_s14 = smov 90  }
  0x18   :  { %v195_v16 = vld [vmem:[#allocation0] sm:$0xf]  }
  0x19   :  { %v207_v17 = vld [vmem:[#allocation0] sm:$0xf]  }
  0x1a   :  { %112 = vrot.lane.b32.xlu0 %v111_v9, %s1097_s15  ;;  %v219_v18 = vld [vmem:[#allocation0] sm:$0xf]   ;;  %s1127_s15 = smov 89  }
  0x1b   :  { %124 = vrot.lane.b32.xlu1 %v123_v10, %s1098_s16  ;;  %v231_v19 = vld [vmem:[#allocation0] sm:$0xf]   ;;  %s1128_s16 = smov 88  }
  0x1c   :  { %v243_v20 = vld [vmem:[#allocation0] sm:$0xf]  }
  0x1d   :  { %v255_v21 = vld [vmem:[#allocation0] sm:$0xf]  }
  0x1e   :  { %136 = vrot.lane.b32.xlu0 %v135_v11, %s1099_s17  ;;  %v267_v22 = vld [vmem:[#allocation0] sm:$0xf]   ;;  %s1129_s17 = smov 87  }
  0x1f   :  { %148 = vrot.lane.b32.xlu1 %v147_v12, %s1100_s18  ;;  %v279_v23 = vld [vmem:[#allocation0] sm:$0xf]   ;;  %s1130_s18 = smov 86  }
  0x20   :  { %v291_v24 = vld [vmem:[#allocation0] sm:$0xf]  }
  0x21   :  { %v303_v25 = vld [vmem:[#allocation0] sm:$0xf]  }
  0x22   :  { %160 = vrot.lane.b32.xlu0 %v159_v13, %s1101_s19  ;;  %v315_v26 = vld [vmem:[#allocation0] sm:$0xf]   ;;  %s1131_s19 = smov 85  }
  0x23   :  { %172 = vrot.lane.b32.xlu1 %v171_v14, %s1102_s20  ;;  %v327_v27 = vld [vmem:[#allocation0] sm:$0xf]   ;;  %s1132_s20 = smov 84  }
  0x24   :  { %v339_v28 = vld [vmem:[#allocation0] sm:$0xf]  }
  0x25   :  { %v351_v29 = vld [vmem:[#allocation0] sm:$0xf]  }
  0x26   :  { %184 = vrot.lane.b32.xlu0 %v183_v15, %s1103_s21  ;;  %v363_v30 = vld [vmem:[#allocation0] sm:$0xf]   ;;  %s1133_s21 = smov 83  }
  0x27   :  { %196 = vrot.lane.b32.xlu1 %v195_v16, %s1104_s22  ;;  %v375_v31 = vld [vmem:[#allocation0] sm:$0xf]   ;;  %s1134_s22 = smov 82  }
  0x28   :  { %v387_v32 = vld [vmem:[#allocation0] sm:$0xf]  }
  0x29   :  { %v399_v33 = vld [vmem:[#allocation0] sm:$0xf]  }
  0x2a   :  { %208 = vrot.lane.b32.xlu0 %v207_v17, %s1105_s23  ;;  %v411_v34 = vld [vmem:[#allocation0] sm:$0xf]   ;;  %s1135_s23 = smov 81  }
  0x2b   :  { %220 = vrot.lane.b32.xlu1 %v219_v18, %s1106_s24  ;;  %v423_v35 = vld [vmem:[#allocation0] sm:$0xf]   ;;  %s1136_s24 = smov 80  }
  0x2c   :  { %v435_v36 = vld [vmem:[#allocation0] sm:$0xf]  }
  0x2d   :  { %v447_v37 = vld [vmem:[#allocation0] sm:$0xf]  }
  0x2e   :  { %232 = vrot.lane.b32.xlu0 %v231_v19, %s1107_s25  ;;  %v459_v38 = vld [vmem:[#allocation0] sm:$0xf]   ;;  %s1137_s25 = smov 79  }
  0x2f   :  { %244 = vrot.lane.b32.xlu1 %v243_v20, %s1108_s26  ;;  %v471_v39 = vld [vmem:[#allocation0] sm:$0xf]   ;;  %s1138_s26 = smov 78  }
  0x30   :  { %v483_v40 = vld [vmem:[#allocation0] sm:$0xf]  }
  0x31   :  { %v495_v41 = vld [vmem:[#allocation0] sm:$0xf]  }
  0x32   :  { %256 = vrot.lane.b32.xlu0 %v255_v21, %s1109_s27  ;;  %v507_v42 = vld [vmem:[#allocation0] sm:$0xf]   ;;  %s1139_s27 = smov 77  }
  0x33   :  { %268 = vrot.lane.b32.xlu1 %v267_v22, %s1110_s28  ;;  %v519_v43 = vld [vmem:[#allocation0] sm:$0xf]   ;;  %s1140_s28 = smov 76  }
  0x34   :  { %v531_v44 = vld [vmem:[#allocation0] sm:$0xf]  }
  0x35   :  { %v543_v45 = vld [vmem:[#allocation0] sm:$0xf]  }
  0x36   :  { %280 = vrot.lane.b32.xlu0 %v279_v23, %s1111_s29  ;;  %v555_v46 = vld [vmem:[#allocation0] sm:$0xf]   ;;  %s1141_s29 = smov 75  }
  0x37   :  { %292 = vrot.lane.b32.xlu1 %v291_v24, %s1112_s30  ;;  %v567_v47 = vld [vmem:[#allocation0] sm:$0xf]   ;;  %s1142_s30 = smov 74  }
  0x38   :  { %v579_v48 = vld [vmem:[#allocation0] sm:$0xf]  }
  0x39   :  { %v591_v49 = vld [vmem:[#allocation0] sm:$0xf]  }
  0x3a   :  { %304 = vrot.lane.b32.xlu0 %v303_v25, %s1113_s2  ;;  %v603_v50 = vld [vmem:[#allocation0] sm:$0xf]   ;;  %s1143_s2 = smov 73  }
  0x3b   :  { %316 = vrot.lane.b32.xlu1 %v315_v26, %s1114_s3  ;;  %v615_v51 = vld [vmem:[#allocation0] sm:$0xf]   ;;  %s1144_s3 = smov 72  }
  0x3c   :  { %v627_v52 = vld [vmem:[#allocation0] sm:$0xf]  }
  0x3d   :  { %v639_v53 = vld [vmem:[#allocation0] sm:$0xf]  }
  0x3e   :  { %328 = vrot.lane.b32.xlu0 %v327_v27, %s1115_s4  ;;  %v651_v54 = vld [vmem:[#allocation0] sm:$0xf]  }
  0x3f   :  { %340 = vrot.lane.b32.xlu1 %v339_v28, %s1116_s5  ;;  %v663_v55 = vld [vmem:[#allocation0] sm:$0xf]  }
  0x40   :  { %v675_v56 = vld [vmem:[#allocation0] sm:$0xf]  }
  0x41   :  { %v687_v57 = vld [vmem:[#allocation0] sm:$0xf]  }
  0x42   :  { %352 = vrot.lane.b32.xlu0 %v351_v29, %s1117_s6  ;;  %v699_v58 = vld [vmem:[#allocation0] sm:$0xf]   ;;  %s1151_s6 = smov 65  }
  0x43   :  { %364 = vrot.lane.b32.xlu1 %v363_v30, %s1118_s7  ;;  %v6_v59 = vld [vmem:[#allocation0] sm:$0xf]  }
  0x44   :  { %8 = vst.msk [vmem:[%s2190_s1] sm:$0x1] %vm7_vm0, %v6_v59   ;;  %771 = vst.msk [vmem:[%s2190_s1 + $0x3f] sm:$0x2] %vm7_vm0, %v6_v59   ;;  %v711_v60 = vld [vmem:[#allocation0] sm:$0xf]  }
  0x45   :  { %772 = vst.msk [vmem:[%s2190_s1 + $0x7e] sm:$0x4] %vm7_vm0, %v6_v59   ;;  %773 = vst.msk [vmem:[%s2190_s1 + $0xbd] sm:$0x8] %vm7_vm0, %v6_v59   ;;  %v723_v61 = vld [vmem:[#allocation0] sm:$0xf]  }
  0x46   :  { %376 = vrot.lane.b32.xlu0 %v375_v31, %s1119_s0  ;;  %v735_v0 = vld [vmem:[#allocation0] sm:$0xf]  }
  0x47   :  { %388 = vrot.lane.b32.xlu1 %v387_v32, %s1120_s8  ;;  %v747_v1 = vld [vmem:[#allocation0] sm:$0xf]  }
  0x48   :  { %v759_v4 = vld [vmem:[#allocation0] sm:$0xf]  }
  0x4a   :  { %400 = vrot.lane.b32.xlu0 %v399_v33, %s1121_s9 }
  0x4b   :  { %412 = vrot.lane.b32.xlu1 %v411_v34, %s1122_s10 }
  0x4e   :  { %424 = vrot.lane.b32.xlu0 %v423_v35, %s1123_s11  ;;  %s1145_s11 = smov 71  }
  0x4f   :  { %436 = vrot.lane.b32.xlu1 %v435_v36, %s1124_s12  ;;  %s1146_s12 = smov 70  }
  0x52   :  { %448 = vrot.lane.b32.xlu0 %v447_v37, %s1125_s13 }
  0x53   :  { %460 = vrot.lane.b32.xlu1 %v459_v38, %s1126_s14 }
  0x56   :  { %472 = vrot.lane.b32.xlu0 %v471_v39, %s1127_s15 }
  0x57   :  { %484 = vrot.lane.b32.xlu1 %v483_v40, %s1128_s16 }
  0x5a   :  { %496 = vrot.lane.b32.xlu0 %v495_v41, %s1129_s17  ;;  %s1149_s17 = smov 67  }
  0x5b   :  { %508 = vrot.lane.b32.xlu1 %v507_v42, %s1130_s18  ;;  %s1150_s18 = smov 66  }
  0x5e   :  { %520 = vrot.lane.b32.xlu0 %v519_v43, %s1131_s19 }
  0x5f   :  { %532 = vrot.lane.b32.xlu1 %v531_v44, %s1132_s20 }
  0x62   :  { %544 = vrot.lane.b32.xlu0 %v543_v45, %s1133_s21 }
  0x63   :  { %556 = vrot.lane.b32.xlu1 %v555_v46, %s1134_s22 }
  0x66   :  { %568 = vrot.lane.b32.xlu0 %v567_v47, %s1135_s23 }
  0x67   :  { %580 = vrot.lane.b32.xlu1 %v579_v48, %s1136_s24 }
  0x6a   :  { %592 = vrot.lane.b32.xlu0 %v591_v49, %s1137_s25 }
  0x6b   :  { %604 = vrot.lane.b32.xlu1 %v603_v50, %s1138_s26 }
  0x6e   :  { %616 = vrot.lane.b32.xlu0 %v615_v51, %s1139_s27 }
  0x6f   :  { %628 = vrot.lane.b32.xlu1 %v627_v52, %s1140_s28 }
  0x72   :  { %640 = vrot.lane.b32.xlu0 %v639_v53, %s1141_s29  ;;  %s1147_s29 = smov 69  }
  0x73   :  { %652 = vrot.lane.b32.xlu1 %v651_v54, %s1142_s30  ;;  %s1148_s30 = smov 68  }
  0x76   :  { %664 = vrot.lane.b32.xlu0 %v663_v55, %s1143_s2 }
  0x77   :  { %676 = vrot.lane.b32.xlu1 %v675_v56, %s1144_s3 }
  0x7a   :  { %688 = vrot.lane.b32.xlu0 %v687_v57, %s1145_s11 }
  0x7b   :  { %700 = vrot.lane.b32.xlu1 %v699_v58, %s1146_s12 }
  0x7c   :  { %v17_v62 = vpop.permute.xlu0 %16  }
  0x7d   :  { %v41_v63 = vpop.permute.xlu1 %40   ;;  %774 = vst.msk [vmem:[%s2190_s1 + $0x1] sm:$0x1] %vm7_vm0, %v17_v62   ;;  %775 = vst.msk [vmem:[%s2190_s1 + $0x40] sm:$0x2] %vm7_vm0, %v17_v62  }
  0x7e   :  { %776 = vst.msk [vmem:[%s2190_s1 + $0x7f] sm:$0x4] %vm7_vm0, %v17_v62   ;;  %777 = vst.msk [vmem:[%s2190_s1 + $0xbe] sm:$0x8] %vm7_vm0, %v17_v62   ;;  %712 = vrot.lane.b32.xlu0 %v711_v60, %s1147_s29 }
  0x7f   :  { %782 = vst.msk [vmem:[%s2190_s1 + $0x3] sm:$0x1] %vm7_vm0, %v41_v63   ;;  %783 = vst.msk [vmem:[%s2190_s1 + $0x42] sm:$0x2] %vm7_vm0, %v41_v63   ;;  %724 = vrot.lane.b32.xlu1 %v723_v61, %s1148_s30 }
  0x80   :  { %784 = vst.msk [vmem:[%s2190_s1 + $0x81] sm:$0x4] %vm7_vm0, %v41_v63   ;;  %785 = vst.msk [vmem:[%s2190_s1 + $0xc0] sm:$0x8] %vm7_vm0, %v41_v63   ;;  %v29_v2 = vpop.permute.xlu0 %28  }
  0x81   :  { %v53_v3 = vpop.permute.xlu1 %52   ;;  %778 = vst.msk [vmem:[%s2190_s1 + $0x2] sm:$0x1] %vm7_vm0, %v29_v2   ;;  %779 = vst.msk [vmem:[%s2190_s1 + $0x41] sm:$0x2] %vm7_vm0, %v29_v2  }
  0x82   :  { %780 = vst.msk [vmem:[%s2190_s1 + $0x80] sm:$0x4] %vm7_vm0, %v29_v2   ;;  %781 = vst.msk [vmem:[%s2190_s1 + $0xbf] sm:$0x8] %vm7_vm0, %v29_v2   ;;  %736 = vrot.lane.b32.xlu0 %v735_v0, %s1149_s17 }
  0x83   :  { %786 = vst.msk [vmem:[%s2190_s1 + $0x4] sm:$0x1] %vm7_vm0, %v53_v3   ;;  %787 = vst.msk [vmem:[%s2190_s1 + $0x43] sm:$0x2] %vm7_vm0, %v53_v3   ;;  %748 = vrot.lane.b32.xlu1 %v747_v1, %s1150_s18 }
  0x84   :  { %788 = vst.msk [vmem:[%s2190_s1 + $0x82] sm:$0x4] %vm7_vm0, %v53_v3   ;;  %789 = vst.msk [vmem:[%s2190_s1 + $0xc1] sm:$0x8] %vm7_vm0, %v53_v3   ;;  %v65_v5 = vpop.permute.xlu0 %64  }
  0x85   :  { %v77_v6 = vpop.permute.xlu1 %76   ;;  %790 = vst.msk [vmem:[%s2190_s1 + $0x5] sm:$0x1] %vm7_vm0, %v65_v5   ;;  %791 = vst.msk [vmem:[%s2190_s1 + $0x44] sm:$0x2] %vm7_vm0, %v65_v5  }
  0x86   :  { %792 = vst.msk [vmem:[%s2190_s1 + $0x83] sm:$0x4] %vm7_vm0, %v65_v5   ;;  %793 = vst.msk [vmem:[%s2190_s1 + $0xc2] sm:$0x8] %vm7_vm0, %v65_v5   ;;  %760 = vrot.lane.b32.xlu0 %v759_v4, %s1151_s6 }
  0x87   :  { %794 = vst.msk [vmem:[%s2190_s1 + $0x6] sm:$0x1] %vm7_vm0, %v77_v6   ;;  %795 = vst.msk [vmem:[%s2190_s1 + $0x45] sm:$0x2] %vm7_vm0, %v77_v6  }
  0x88   :  { %796 = vst.msk [vmem:[%s2190_s1 + $0x84] sm:$0x4] %vm7_vm0, %v77_v6   ;;  %797 = vst.msk [vmem:[%s2190_s1 + $0xc3] sm:$0x8] %vm7_vm0, %v77_v6   ;;  %v89_v7 = vpop.permute.xlu0 %88  }
  0x89   :  { %v101_v8 = vpop.permute.xlu1 %100   ;;  %798 = vst.msk [vmem:[%s2190_s1 + $0x7] sm:$0x1] %vm7_vm0, %v89_v7   ;;  %799 = vst.msk [vmem:[%s2190_s1 + $0x46] sm:$0x2] %vm7_vm0, %v89_v7  }
  0x8a   :  { %800 = vst.msk [vmem:[%s2190_s1 + $0x85] sm:$0x4] %vm7_vm0, %v89_v7   ;;  %801 = vst.msk [vmem:[%s2190_s1 + $0xc4] sm:$0x8] %vm7_vm0, %v89_v7  }
  0x8b   :  { %802 = vst.msk [vmem:[%s2190_s1 + $0x8] sm:$0x1] %vm7_vm0, %v101_v8   ;;  %803 = vst.msk [vmem:[%s2190_s1 + $0x47] sm:$0x2] %vm7_vm0, %v101_v8  }
  0x8c   :  { %804 = vst.msk [vmem:[%s2190_s1 + $0x86] sm:$0x4] %vm7_vm0, %v101_v8   ;;  %805 = vst.msk [vmem:[%s2190_s1 + $0xc5] sm:$0x8] %vm7_vm0, %v101_v8   ;;  %v113_v9 = vpop.permute.xlu0 %112  }
  0x8d   :  { %v125_v10 = vpop.permute.xlu1 %124   ;;  %806 = vst.msk [vmem:[%s2190_s1 + $0x9] sm:$0x1] %vm7_vm0, %v113_v9   ;;  %807 = vst.msk [vmem:[%s2190_s1 + $0x48] sm:$0x2] %vm7_vm0, %v113_v9  }
  0x8e   :  { %808 = vst.msk [vmem:[%s2190_s1 + $0x87] sm:$0x4] %vm7_vm0, %v113_v9   ;;  %809 = vst.msk [vmem:[%s2190_s1 + $0xc6] sm:$0x8] %vm7_vm0, %v113_v9  }
  0x8f   :  { %810 = vst.msk [vmem:[%s2190_s1 + $0xa] sm:$0x1] %vm7_vm0, %v125_v10   ;;  %811 = vst.msk [vmem:[%s2190_s1 + $0x49] sm:$0x2] %vm7_vm0, %v125_v10  }
  0x90   :  { %812 = vst.msk [vmem:[%s2190_s1 + $0x88] sm:$0x4] %vm7_vm0, %v125_v10   ;;  %813 = vst.msk [vmem:[%s2190_s1 + $0xc7] sm:$0x8] %vm7_vm0, %v125_v10   ;;  %v137_v11 = vpop.permute.xlu0 %136  }
  0x91   :  { %v149_v12 = vpop.permute.xlu1 %148   ;;  %814 = vst.msk [vmem:[%s2190_s1 + $0xb] sm:$0x1] %vm7_vm0, %v137_v11   ;;  %815 = vst.msk [vmem:[%s2190_s1 + $0x4a] sm:$0x2] %vm7_vm0, %v137_v11  }
  0x92   :  { %816 = vst.msk [vmem:[%s2190_s1 + $0x89] sm:$0x4] %vm7_vm0, %v137_v11   ;;  %817 = vst.msk [vmem:[%s2190_s1 + $0xc8] sm:$0x8] %vm7_vm0, %v137_v11  }
  0x93   :  { %818 = vst.msk [vmem:[%s2190_s1 + $0xc] sm:$0x1] %vm7_vm0, %v149_v12   ;;  %819 = vst.msk [vmem:[%s2190_s1 + $0x4b] sm:$0x2] %vm7_vm0, %v149_v12  }
  0x94   :  { %820 = vst.msk [vmem:[%s2190_s1 + $0x8a] sm:$0x4] %vm7_vm0, %v149_v12   ;;  %821 = vst.msk [vmem:[%s2190_s1 + $0xc9] sm:$0x8] %vm7_vm0, %v149_v12   ;;  %v161_v13 = vpop.permute.xlu0 %160  }
  0x95   :  { %v173_v14 = vpop.permute.xlu1 %172   ;;  %822 = vst.msk [vmem:[%s2190_s1 + $0xd] sm:$0x1] %vm7_vm0, %v161_v13   ;;  %823 = vst.msk [vmem:[%s2190_s1 + $0x4c] sm:$0x2] %vm7_vm0, %v161_v13  }
  0x96   :  { %824 = vst.msk [vmem:[%s2190_s1 + $0x8b] sm:$0x4] %vm7_vm0, %v161_v13   ;;  %825 = vst.msk [vmem:[%s2190_s1 + $0xca] sm:$0x8] %vm7_vm0, %v161_v13  }
  0x97   :  { %826 = vst.msk [vmem:[%s2190_s1 + $0xe] sm:$0x1] %vm7_vm0, %v173_v14   ;;  %827 = vst.msk [vmem:[%s2190_s1 + $0x4d] sm:$0x2] %vm7_vm0, %v173_v14  }
  0x98   :  { %828 = vst.msk [vmem:[%s2190_s1 + $0x8c] sm:$0x4] %vm7_vm0, %v173_v14   ;;  %829 = vst.msk [vmem:[%s2190_s1 + $0xcb] sm:$0x8] %vm7_vm0, %v173_v14   ;;  %v185_v15 = vpop.permute.xlu0 %184  }
  0x99   :  { %v197_v16 = vpop.permute.xlu1 %196   ;;  %830 = vst.msk [vmem:[%s2190_s1 + $0xf] sm:$0x1] %vm7_vm0, %v185_v15   ;;  %831 = vst.msk [vmem:[%s2190_s1 + $0x4e] sm:$0x2] %vm7_vm0, %v185_v15  }
  0x9a   :  { %832 = vst.msk [vmem:[%s2190_s1 + $0x8d] sm:$0x4] %vm7_vm0, %v185_v15   ;;  %833 = vst.msk [vmem:[%s2190_s1 + $0xcc] sm:$0x8] %vm7_vm0, %v185_v15  }
  0x9b   :  { %834 = vst.msk [vmem:[%s2190_s1 + $0x10] sm:$0x1] %vm7_vm0, %v197_v16   ;;  %835 = vst.msk [vmem:[%s2190_s1 + $0x4f] sm:$0x2] %vm7_vm0, %v197_v16  }
  0x9c   :  { %836 = vst.msk [vmem:[%s2190_s1 + $0x8e] sm:$0x4] %vm7_vm0, %v197_v16   ;;  %837 = vst.msk [vmem:[%s2190_s1 + $0xcd] sm:$0x8] %vm7_vm0, %v197_v16   ;;  %v209_v17 = vpop.permute.xlu0 %208  }
  0x9d   :  { %v221_v18 = vpop.permute.xlu1 %220   ;;  %838 = vst.msk [vmem:[%s2190_s1 + $0x11] sm:$0x1] %vm7_vm0, %v209_v17   ;;  %839 = vst.msk [vmem:[%s2190_s1 + $0x50] sm:$0x2] %vm7_vm0, %v209_v17  }
  0x9e   :  { %840 = vst.msk [vmem:[%s2190_s1 + $0x8f] sm:$0x4] %vm7_vm0, %v209_v17   ;;  %841 = vst.msk [vmem:[%s2190_s1 + $0xce] sm:$0x8] %vm7_vm0, %v209_v17  }
  0x9f   :  { %842 = vst.msk [vmem:[%s2190_s1 + $0x12] sm:$0x1] %vm7_vm0, %v221_v18   ;;  %843 = vst.msk [vmem:[%s2190_s1 + $0x51] sm:$0x2] %vm7_vm0, %v221_v18  }
  0xa0   :  { %844 = vst.msk [vmem:[%s2190_s1 + $0x90] sm:$0x4] %vm7_vm0, %v221_v18   ;;  %845 = vst.msk [vmem:[%s2190_s1 + $0xcf] sm:$0x8] %vm7_vm0, %v221_v18   ;;  %v233_v19 = vpop.permute.xlu0 %232  }
  0xa1   :  { %v245_v20 = vpop.permute.xlu1 %244   ;;  %846 = vst.msk [vmem:[%s2190_s1 + $0x13] sm:$0x1] %vm7_vm0, %v233_v19   ;;  %847 = vst.msk [vmem:[%s2190_s1 + $0x52] sm:$0x2] %vm7_vm0, %v233_v19  }
  0xa2   :  { %848 = vst.msk [vmem:[%s2190_s1 + $0x91] sm:$0x4] %vm7_vm0, %v233_v19   ;;  %849 = vst.msk [vmem:[%s2190_s1 + $0xd0] sm:$0x8] %vm7_vm0, %v233_v19  }
  0xa3   :  { %850 = vst.msk [vmem:[%s2190_s1 + $0x14] sm:$0x1] %vm7_vm0, %v245_v20   ;;  %851 = vst.msk [vmem:[%s2190_s1 + $0x53] sm:$0x2] %vm7_vm0, %v245_v20  }
  0xa4   :  { %852 = vst.msk [vmem:[%s2190_s1 + $0x92] sm:$0x4] %vm7_vm0, %v245_v20   ;;  %853 = vst.msk [vmem:[%s2190_s1 + $0xd1] sm:$0x8] %vm7_vm0, %v245_v20   ;;  %v257_v21 = vpop.permute.xlu0 %256  }
  0xa5   :  { %v269_v22 = vpop.permute.xlu1 %268   ;;  %854 = vst.msk [vmem:[%s2190_s1 + $0x15] sm:$0x1] %vm7_vm0, %v257_v21   ;;  %855 = vst.msk [vmem:[%s2190_s1 + $0x54] sm:$0x2] %vm7_vm0, %v257_v21  }
  0xa6   :  { %856 = vst.msk [vmem:[%s2190_s1 + $0x93] sm:$0x4] %vm7_vm0, %v257_v21   ;;  %857 = vst.msk [vmem:[%s2190_s1 + $0xd2] sm:$0x8] %vm7_vm0, %v257_v21  }
  0xa7   :  { %858 = vst.msk [vmem:[%s2190_s1 + $0x16] sm:$0x1] %vm7_vm0, %v269_v22   ;;  %859 = vst.msk [vmem:[%s2190_s1 + $0x55] sm:$0x2] %vm7_vm0, %v269_v22  }
  0xa8   :  { %860 = vst.msk [vmem:[%s2190_s1 + $0x94] sm:$0x4] %vm7_vm0, %v269_v22   ;;  %861 = vst.msk [vmem:[%s2190_s1 + $0xd3] sm:$0x8] %vm7_vm0, %v269_v22   ;;  %v281_v23 = vpop.permute.xlu0 %280  }
  0xa9   :  { %v293_v24 = vpop.permute.xlu1 %292   ;;  %862 = vst.msk [vmem:[%s2190_s1 + $0x17] sm:$0x1] %vm7_vm0, %v281_v23   ;;  %863 = vst.msk [vmem:[%s2190_s1 + $0x56] sm:$0x2] %vm7_vm0, %v281_v23  }
  0xaa   :  { %864 = vst.msk [vmem:[%s2190_s1 + $0x95] sm:$0x4] %vm7_vm0, %v281_v23   ;;  %865 = vst.msk [vmem:[%s2190_s1 + $0xd4] sm:$0x8] %vm7_vm0, %v281_v23  }
  0xab   :  { %866 = vst.msk [vmem:[%s2190_s1 + $0x18] sm:$0x1] %vm7_vm0, %v293_v24   ;;  %867 = vst.msk [vmem:[%s2190_s1 + $0x57] sm:$0x2] %vm7_vm0, %v293_v24  }
  0xac   :  { %868 = vst.msk [vmem:[%s2190_s1 + $0x96] sm:$0x4] %vm7_vm0, %v293_v24   ;;  %869 = vst.msk [vmem:[%s2190_s1 + $0xd5] sm:$0x8] %vm7_vm0, %v293_v24   ;;  %v305_v25 = vpop.permute.xlu0 %304  }
  0xad   :  { %v317_v26 = vpop.permute.xlu1 %316   ;;  %870 = vst.msk [vmem:[%s2190_s1 + $0x19] sm:$0x1] %vm7_vm0, %v305_v25   ;;  %871 = vst.msk [vmem:[%s2190_s1 + $0x58] sm:$0x2] %vm7_vm0, %v305_v25  }
  0xae   :  { %872 = vst.msk [vmem:[%s2190_s1 + $0x97] sm:$0x4] %vm7_vm0, %v305_v25   ;;  %873 = vst.msk [vmem:[%s2190_s1 + $0xd6] sm:$0x8] %vm7_vm0, %v305_v25  }
  0xaf   :  { %874 = vst.msk [vmem:[%s2190_s1 + $0x1a] sm:$0x1] %vm7_vm0, %v317_v26   ;;  %875 = vst.msk [vmem:[%s2190_s1 + $0x59] sm:$0x2] %vm7_vm0, %v317_v26  }
  0xb0   :  { %876 = vst.msk [vmem:[%s2190_s1 + $0x98] sm:$0x4] %vm7_vm0, %v317_v26   ;;  %877 = vst.msk [vmem:[%s2190_s1 + $0xd7] sm:$0x8] %vm7_vm0, %v317_v26   ;;  %v329_v27 = vpop.permute.xlu0 %328  }
  0xb1   :  { %v341_v28 = vpop.permute.xlu1 %340   ;;  %878 = vst.msk [vmem:[%s2190_s1 + $0x1b] sm:$0x1] %vm7_vm0, %v329_v27   ;;  %879 = vst.msk [vmem:[%s2190_s1 + $0x5a] sm:$0x2] %vm7_vm0, %v329_v27  }
  0xb2   :  { %880 = vst.msk [vmem:[%s2190_s1 + $0x99] sm:$0x4] %vm7_vm0, %v329_v27   ;;  %881 = vst.msk [vmem:[%s2190_s1 + $0xd8] sm:$0x8] %vm7_vm0, %v329_v27  }
  0xb3   :  { %882 = vst.msk [vmem:[%s2190_s1 + $0x1c] sm:$0x1] %vm7_vm0, %v341_v28   ;;  %883 = vst.msk [vmem:[%s2190_s1 + $0x5b] sm:$0x2] %vm7_vm0, %v341_v28  }
  0xb4   :  { %884 = vst.msk [vmem:[%s2190_s1 + $0x9a] sm:$0x4] %vm7_vm0, %v341_v28   ;;  %885 = vst.msk [vmem:[%s2190_s1 + $0xd9] sm:$0x8] %vm7_vm0, %v341_v28   ;;  %v353_v29 = vpop.permute.xlu0 %352  }
  0xb5   :  { %v365_v30 = vpop.permute.xlu1 %364   ;;  %886 = vst.msk [vmem:[%s2190_s1 + $0x1d] sm:$0x1] %vm7_vm0, %v353_v29   ;;  %887 = vst.msk [vmem:[%s2190_s1 + $0x5c] sm:$0x2] %vm7_vm0, %v353_v29  }
  0xb6   :  { %888 = vst.msk [vmem:[%s2190_s1 + $0x9b] sm:$0x4] %vm7_vm0, %v353_v29   ;;  %889 = vst.msk [vmem:[%s2190_s1 + $0xda] sm:$0x8] %vm7_vm0, %v353_v29  }
  0xb7   :  { %890 = vst.msk [vmem:[%s2190_s1 + $0x1e] sm:$0x1] %vm7_vm0, %v365_v30   ;;  %891 = vst.msk [vmem:[%s2190_s1 + $0x5d] sm:$0x2] %vm7_vm0, %v365_v30  }
  0xb8   :  { %892 = vst.msk [vmem:[%s2190_s1 + $0x9c] sm:$0x4] %vm7_vm0, %v365_v30   ;;  %893 = vst.msk [vmem:[%s2190_s1 + $0xdb] sm:$0x8] %vm7_vm0, %v365_v30   ;;  %v377_v31 = vpop.permute.xlu0 %376  }
  0xb9   :  { %v389_v32 = vpop.permute.xlu1 %388   ;;  %894 = vst.msk [vmem:[%s2190_s1 + $0x1f] sm:$0x1] %vm7_vm0, %v377_v31   ;;  %895 = vst.msk [vmem:[%s2190_s1 + $0x5e] sm:$0x2] %vm7_vm0, %v377_v31  }
  0xba   :  { %896 = vst.msk [vmem:[%s2190_s1 + $0x9d] sm:$0x4] %vm7_vm0, %v377_v31   ;;  %897 = vst.msk [vmem:[%s2190_s1 + $0xdc] sm:$0x8] %vm7_vm0, %v377_v31  }
  0xbb   :  { %898 = vst.msk [vmem:[%s2190_s1 + $0x20] sm:$0x1] %vm7_vm0, %v389_v32   ;;  %899 = vst.msk [vmem:[%s2190_s1 + $0x5f] sm:$0x2] %vm7_vm0, %v389_v32  }
  0xbc   :  { %900 = vst.msk [vmem:[%s2190_s1 + $0x9e] sm:$0x4] %vm7_vm0, %v389_v32   ;;  %901 = vst.msk [vmem:[%s2190_s1 + $0xdd] sm:$0x8] %vm7_vm0, %v389_v32   ;;  %v401_v33 = vpop.permute.xlu0 %400  }
  0xbd   :  { %v413_v34 = vpop.permute.xlu1 %412   ;;  %902 = vst.msk [vmem:[%s2190_s1 + $0x21] sm:$0x1] %vm7_vm0, %v401_v33   ;;  %903 = vst.msk [vmem:[%s2190_s1 + $0x60] sm:$0x2] %vm7_vm0, %v401_v33  }
  0xbe   :  { %904 = vst.msk [vmem:[%s2190_s1 + $0x9f] sm:$0x4] %vm7_vm0, %v401_v33   ;;  %905 = vst.msk [vmem:[%s2190_s1 + $0xde] sm:$0x8] %vm7_vm0, %v401_v33  }
  0xbf   :  { %906 = vst.msk [vmem:[%s2190_s1 + $0x22] sm:$0x1] %vm7_vm0, %v413_v34   ;;  %907 = vst.msk [vmem:[%s2190_s1 + $0x61] sm:$0x2] %vm7_vm0, %v413_v34  }
  0xc0   :  { %908 = vst.msk [vmem:[%s2190_s1 + $0xa0] sm:$0x4] %vm7_vm0, %v413_v34   ;;  %909 = vst.msk [vmem:[%s2190_s1 + $0xdf] sm:$0x8] %vm7_vm0, %v413_v34   ;;  %v425_v35 = vpop.permute.xlu0 %424  }
  0xc1   :  { %v437_v36 = vpop.permute.xlu1 %436   ;;  %910 = vst.msk [vmem:[%s2190_s1 + $0x23] sm:$0x1] %vm7_vm0, %v425_v35   ;;  %911 = vst.msk [vmem:[%s2190_s1 + $0x62] sm:$0x2] %vm7_vm0, %v425_v35  }
  0xc2   :  { %912 = vst.msk [vmem:[%s2190_s1 + $0xa1] sm:$0x4] %vm7_vm0, %v425_v35   ;;  %913 = vst.msk [vmem:[%s2190_s1 + $0xe0] sm:$0x8] %vm7_vm0, %v425_v35  }
  0xc3   :  { %914 = vst.msk [vmem:[%s2190_s1 + $0x24] sm:$0x1] %vm7_vm0, %v437_v36   ;;  %915 = vst.msk [vmem:[%s2190_s1 + $0x63] sm:$0x2] %vm7_vm0, %v437_v36  }
  0xc4   :  { %916 = vst.msk [vmem:[%s2190_s1 + $0xa2] sm:$0x4] %vm7_vm0, %v437_v36   ;;  %917 = vst.msk [vmem:[%s2190_s1 + $0xe1] sm:$0x8] %vm7_vm0, %v437_v36   ;;  %v449_v37 = vpop.permute.xlu0 %448  }
  0xc5   :  { %v461_v38 = vpop.permute.xlu1 %460   ;;  %918 = vst.msk [vmem:[%s2190_s1 + $0x25] sm:$0x1] %vm7_vm0, %v449_v37   ;;  %919 = vst.msk [vmem:[%s2190_s1 + $0x64] sm:$0x2] %vm7_vm0, %v449_v37  }
  0xc6   :  { %920 = vst.msk [vmem:[%s2190_s1 + $0xa3] sm:$0x4] %vm7_vm0, %v449_v37   ;;  %921 = vst.msk [vmem:[%s2190_s1 + $0xe2] sm:$0x8] %vm7_vm0, %v449_v37  }
  0xc7   :  { %922 = vst.msk [vmem:[%s2190_s1 + $0x26] sm:$0x1] %vm7_vm0, %v461_v38   ;;  %923 = vst.msk [vmem:[%s2190_s1 + $0x65] sm:$0x2] %vm7_vm0, %v461_v38  }
  0xc8   :  { %924 = vst.msk [vmem:[%s2190_s1 + $0xa4] sm:$0x4] %vm7_vm0, %v461_v38   ;;  %925 = vst.msk [vmem:[%s2190_s1 + $0xe3] sm:$0x8] %vm7_vm0, %v461_v38   ;;  %v473_v39 = vpop.permute.xlu0 %472  }
  0xc9   :  { %v485_v40 = vpop.permute.xlu1 %484   ;;  %926 = vst.msk [vmem:[%s2190_s1 + $0x27] sm:$0x1] %vm7_vm0, %v473_v39   ;;  %927 = vst.msk [vmem:[%s2190_s1 + $0x66] sm:$0x2] %vm7_vm0, %v473_v39  }
  0xca   :  { %928 = vst.msk [vmem:[%s2190_s1 + $0xa5] sm:$0x4] %vm7_vm0, %v473_v39   ;;  %929 = vst.msk [vmem:[%s2190_s1 + $0xe4] sm:$0x8] %vm7_vm0, %v473_v39  }
  0xcb   :  { %930 = vst.msk [vmem:[%s2190_s1 + $0x28] sm:$0x1] %vm7_vm0, %v485_v40   ;;  %931 = vst.msk [vmem:[%s2190_s1 + $0x67] sm:$0x2] %vm7_vm0, %v485_v40  }
  0xcc   :  { %932 = vst.msk [vmem:[%s2190_s1 + $0xa6] sm:$0x4] %vm7_vm0, %v485_v40   ;;  %933 = vst.msk [vmem:[%s2190_s1 + $0xe5] sm:$0x8] %vm7_vm0, %v485_v40   ;;  %v497_v41 = vpop.permute.xlu0 %496  }
  0xcd   :  { %v509_v42 = vpop.permute.xlu1 %508   ;;  %934 = vst.msk [vmem:[%s2190_s1 + $0x29] sm:$0x1] %vm7_vm0, %v497_v41   ;;  %935 = vst.msk [vmem:[%s2190_s1 + $0x68] sm:$0x2] %vm7_vm0, %v497_v41  }
  0xce   :  { %936 = vst.msk [vmem:[%s2190_s1 + $0xa7] sm:$0x4] %vm7_vm0, %v497_v41   ;;  %937 = vst.msk [vmem:[%s2190_s1 + $0xe6] sm:$0x8] %vm7_vm0, %v497_v41  }
  0xcf   :  { %938 = vst.msk [vmem:[%s2190_s1 + $0x2a] sm:$0x1] %vm7_vm0, %v509_v42   ;;  %939 = vst.msk [vmem:[%s2190_s1 + $0x69] sm:$0x2] %vm7_vm0, %v509_v42  }
  0xd0   :  { %940 = vst.msk [vmem:[%s2190_s1 + $0xa8] sm:$0x4] %vm7_vm0, %v509_v42   ;;  %941 = vst.msk [vmem:[%s2190_s1 + $0xe7] sm:$0x8] %vm7_vm0, %v509_v42   ;;  %v521_v43 = vpop.permute.xlu0 %520  }
  0xd1   :  { %v533_v44 = vpop.permute.xlu1 %532   ;;  %942 = vst.msk [vmem:[%s2190_s1 + $0x2b] sm:$0x1] %vm7_vm0, %v521_v43   ;;  %943 = vst.msk [vmem:[%s2190_s1 + $0x6a] sm:$0x2] %vm7_vm0, %v521_v43  }
  0xd2   :  { %944 = vst.msk [vmem:[%s2190_s1 + $0xa9] sm:$0x4] %vm7_vm0, %v521_v43   ;;  %945 = vst.msk [vmem:[%s2190_s1 + $0xe8] sm:$0x8] %vm7_vm0, %v521_v43  }
  0xd3   :  { %946 = vst.msk [vmem:[%s2190_s1 + $0x2c] sm:$0x1] %vm7_vm0, %v533_v44   ;;  %947 = vst.msk [vmem:[%s2190_s1 + $0x6b] sm:$0x2] %vm7_vm0, %v533_v44  }
  0xd4   :  { %948 = vst.msk [vmem:[%s2190_s1 + $0xaa] sm:$0x4] %vm7_vm0, %v533_v44   ;;  %949 = vst.msk [vmem:[%s2190_s1 + $0xe9] sm:$0x8] %vm7_vm0, %v533_v44   ;;  %v545_v45 = vpop.permute.xlu0 %544  }
  0xd5   :  { %v557_v46 = vpop.permute.xlu1 %556   ;;  %950 = vst.msk [vmem:[%s2190_s1 + $0x2d] sm:$0x1] %vm7_vm0, %v545_v45   ;;  %951 = vst.msk [vmem:[%s2190_s1 + $0x6c] sm:$0x2] %vm7_vm0, %v545_v45  }
  0xd6   :  { %952 = vst.msk [vmem:[%s2190_s1 + $0xab] sm:$0x4] %vm7_vm0, %v545_v45   ;;  %953 = vst.msk [vmem:[%s2190_s1 + $0xea] sm:$0x8] %vm7_vm0, %v545_v45  }
  0xd7   :  { %954 = vst.msk [vmem:[%s2190_s1 + $0x2e] sm:$0x1] %vm7_vm0, %v557_v46   ;;  %955 = vst.msk [vmem:[%s2190_s1 + $0x6d] sm:$0x2] %vm7_vm0, %v557_v46  }
  0xd8   :  { %956 = vst.msk [vmem:[%s2190_s1 + $0xac] sm:$0x4] %vm7_vm0, %v557_v46   ;;  %957 = vst.msk [vmem:[%s2190_s1 + $0xeb] sm:$0x8] %vm7_vm0, %v557_v46   ;;  %v569_v47 = vpop.permute.xlu0 %568  }
  0xd9   :  { %v581_v48 = vpop.permute.xlu1 %580   ;;  %958 = vst.msk [vmem:[%s2190_s1 + $0x2f] sm:$0x1] %vm7_vm0, %v569_v47   ;;  %959 = vst.msk [vmem:[%s2190_s1 + $0x6e] sm:$0x2] %vm7_vm0, %v569_v47  }
  0xda   :  { %960 = vst.msk [vmem:[%s2190_s1 + $0xad] sm:$0x4] %vm7_vm0, %v569_v47   ;;  %961 = vst.msk [vmem:[%s2190_s1 + $0xec] sm:$0x8] %vm7_vm0, %v569_v47  }
  0xdb   :  { %962 = vst.msk [vmem:[%s2190_s1 + $0x30] sm:$0x1] %vm7_vm0, %v581_v48   ;;  %963 = vst.msk [vmem:[%s2190_s1 + $0x6f] sm:$0x2] %vm7_vm0, %v581_v48  }
  0xdc   :  { %964 = vst.msk [vmem:[%s2190_s1 + $0xae] sm:$0x4] %vm7_vm0, %v581_v48   ;;  %965 = vst.msk [vmem:[%s2190_s1 + $0xed] sm:$0x8] %vm7_vm0, %v581_v48   ;;  %v593_v49 = vpop.permute.xlu0 %592  }
  0xdd   :  { %v605_v50 = vpop.permute.xlu1 %604   ;;  %966 = vst.msk [vmem:[%s2190_s1 + $0x31] sm:$0x1] %vm7_vm0, %v593_v49   ;;  %967 = vst.msk [vmem:[%s2190_s1 + $0x70] sm:$0x2] %vm7_vm0, %v593_v49  }
  0xde   :  { %968 = vst.msk [vmem:[%s2190_s1 + $0xaf] sm:$0x4] %vm7_vm0, %v593_v49   ;;  %969 = vst.msk [vmem:[%s2190_s1 + $0xee] sm:$0x8] %vm7_vm0, %v593_v49  }
  0xdf   :  { %970 = vst.msk [vmem:[%s2190_s1 + $0x32] sm:$0x1] %vm7_vm0, %v605_v50   ;;  %971 = vst.msk [vmem:[%s2190_s1 + $0x71] sm:$0x2] %vm7_vm0, %v605_v50  }
  0xe0   :  { %972 = vst.msk [vmem:[%s2190_s1 + $0xb0] sm:$0x4] %vm7_vm0, %v605_v50   ;;  %973 = vst.msk [vmem:[%s2190_s1 + $0xef] sm:$0x8] %vm7_vm0, %v605_v50   ;;  %v617_v51 = vpop.permute.xlu0 %616  }
  0xe1   :  { %v629_v52 = vpop.permute.xlu1 %628   ;;  %974 = vst.msk [vmem:[%s2190_s1 + $0x33] sm:$0x1] %vm7_vm0, %v617_v51   ;;  %975 = vst.msk [vmem:[%s2190_s1 + $0x72] sm:$0x2] %vm7_vm0, %v617_v51  }
  0xe2   :  { %976 = vst.msk [vmem:[%s2190_s1 + $0xb1] sm:$0x4] %vm7_vm0, %v617_v51   ;;  %977 = vst.msk [vmem:[%s2190_s1 + $0xf0] sm:$0x8] %vm7_vm0, %v617_v51  }
  0xe3   :  { %978 = vst.msk [vmem:[%s2190_s1 + $0x34] sm:$0x1] %vm7_vm0, %v629_v52   ;;  %979 = vst.msk [vmem:[%s2190_s1 + $0x73] sm:$0x2] %vm7_vm0, %v629_v52  }
  0xe4   :  { %980 = vst.msk [vmem:[%s2190_s1 + $0xb2] sm:$0x4] %vm7_vm0, %v629_v52   ;;  %981 = vst.msk [vmem:[%s2190_s1 + $0xf1] sm:$0x8] %vm7_vm0, %v629_v52   ;;  %v641_v53 = vpop.permute.xlu0 %640  }
  0xe5   :  { %v653_v54 = vpop.permute.xlu1 %652   ;;  %982 = vst.msk [vmem:[%s2190_s1 + $0x35] sm:$0x1] %vm7_vm0, %v641_v53   ;;  %983 = vst.msk [vmem:[%s2190_s1 + $0x74] sm:$0x2] %vm7_vm0, %v641_v53  }
  0xe6   :  { %984 = vst.msk [vmem:[%s2190_s1 + $0xb3] sm:$0x4] %vm7_vm0, %v641_v53   ;;  %985 = vst.msk [vmem:[%s2190_s1 + $0xf2] sm:$0x8] %vm7_vm0, %v641_v53  }
  0xe7   :  { %986 = vst.msk [vmem:[%s2190_s1 + $0x36] sm:$0x1] %vm7_vm0, %v653_v54   ;;  %987 = vst.msk [vmem:[%s2190_s1 + $0x75] sm:$0x2] %vm7_vm0, %v653_v54  }
  0xe8   :  { %988 = vst.msk [vmem:[%s2190_s1 + $0xb4] sm:$0x4] %vm7_vm0, %v653_v54   ;;  %989 = vst.msk [vmem:[%s2190_s1 + $0xf3] sm:$0x8] %vm7_vm0, %v653_v54   ;;  %v665_v55 = vpop.permute.xlu0 %664  }
  0xe9   :  { %v677_v56 = vpop.permute.xlu1 %676   ;;  %990 = vst.msk [vmem:[%s2190_s1 + $0x37] sm:$0x1] %vm7_vm0, %v665_v55   ;;  %991 = vst.msk [vmem:[%s2190_s1 + $0x76] sm:$0x2] %vm7_vm0, %v665_v55  }
  0xea   :  { %992 = vst.msk [vmem:[%s2190_s1 + $0xb5] sm:$0x4] %vm7_vm0, %v665_v55   ;;  %993 = vst.msk [vmem:[%s2190_s1 + $0xf4] sm:$0x8] %vm7_vm0, %v665_v55  }
  0xeb   :  { %994 = vst.msk [vmem:[%s2190_s1 + $0x38] sm:$0x1] %vm7_vm0, %v677_v56   ;;  %995 = vst.msk [vmem:[%s2190_s1 + $0x77] sm:$0x2] %vm7_vm0, %v677_v56  }
  0xec   :  { %996 = vst.msk [vmem:[%s2190_s1 + $0xb6] sm:$0x4] %vm7_vm0, %v677_v56   ;;  %997 = vst.msk [vmem:[%s2190_s1 + $0xf5] sm:$0x8] %vm7_vm0, %v677_v56   ;;  %v689_v57 = vpop.permute.xlu0 %688  }
  0xed   :  { %v701_v58 = vpop.permute.xlu1 %700   ;;  %998 = vst.msk [vmem:[%s2190_s1 + $0x39] sm:$0x1] %vm7_vm0, %v689_v57   ;;  %999 = vst.msk [vmem:[%s2190_s1 + $0x78] sm:$0x2] %vm7_vm0, %v689_v57  }
  0xee   :  { %1000 = vst.msk [vmem:[%s2190_s1 + $0xb7] sm:$0x4] %vm7_vm0, %v689_v57   ;;  %1001 = vst.msk [vmem:[%s2190_s1 + $0xf6] sm:$0x8] %vm7_vm0, %v689_v57  }
  0xef   :  { %1002 = vst.msk [vmem:[%s2190_s1 + $0x3a] sm:$0x1] %vm7_vm0, %v701_v58   ;;  %1003 = vst.msk [vmem:[%s2190_s1 + $0x79] sm:$0x2] %vm7_vm0, %v701_v58  }
  0xf0   :  { %1004 = vst.msk [vmem:[%s2190_s1 + $0xb8] sm:$0x4] %vm7_vm0, %v701_v58   ;;  %1005 = vst.msk [vmem:[%s2190_s1 + $0xf7] sm:$0x8] %vm7_vm0, %v701_v58   ;;  %v713_v59 = vpop.permute.xlu0 %712  }
  0xf1   :  { %v725_v60 = vpop.permute.xlu1 %724   ;;  %1006 = vst.msk [vmem:[%s2190_s1 + $0x3b] sm:$0x1] %vm7_vm0, %v713_v59   ;;  %1007 = vst.msk [vmem:[%s2190_s1 + $0x7a] sm:$0x2] %vm7_vm0, %v713_v59  }
  0xf2   :  { %1008 = vst.msk [vmem:[%s2190_s1 + $0xb9] sm:$0x4] %vm7_vm0, %v713_v59   ;;  %1009 = vst.msk [vmem:[%s2190_s1 + $0xf8] sm:$0x8] %vm7_vm0, %v713_v59  }
  0xf3   :  { %1010 = vst.msk [vmem:[%s2190_s1 + $0x3c] sm:$0x1] %vm7_vm0, %v725_v60   ;;  %1011 = vst.msk [vmem:[%s2190_s1 + $0x7b] sm:$0x2] %vm7_vm0, %v725_v60  }
  0xf4   :  { %1012 = vst.msk [vmem:[%s2190_s1 + $0xba] sm:$0x4] %vm7_vm0, %v725_v60   ;;  %1013 = vst.msk [vmem:[%s2190_s1 + $0xf9] sm:$0x8] %vm7_vm0, %v725_v60   ;;  %v737_v61 = vpop.permute.xlu0 %736  }
  0xf5   :  { %v749_v62 = vpop.permute.xlu1 %748   ;;  %1014 = vst.msk [vmem:[%s2190_s1 + $0x3d] sm:$0x1] %vm7_vm0, %v737_v61   ;;  %1015 = vst.msk [vmem:[%s2190_s1 + $0x7c] sm:$0x2] %vm7_vm0, %v737_v61  }
  0xf6   :  { %1016 = vst.msk [vmem:[%s2190_s1 + $0xbb] sm:$0x4] %vm7_vm0, %v737_v61   ;;  %1017 = vst.msk [vmem:[%s2190_s1 + $0xfa] sm:$0x8] %vm7_vm0, %v737_v61  }
  0xf7   :  { %1018 = vst.msk [vmem:[%s2190_s1 + $0x3e] sm:$0x1] %vm7_vm0, %v749_v62   ;;  %1019 = vst.msk [vmem:[%s2190_s1 + $0x7d] sm:$0x2] %vm7_vm0, %v749_v62  }
  0xf8   :  { %1020 = vst.msk [vmem:[%s2190_s1 + $0xbc] sm:$0x4] %vm7_vm0, %v749_v62   ;;  %1021 = vst.msk [vmem:[%s2190_s1 + $0xfb] sm:$0x8] %vm7_vm0, %v749_v62   ;;  %v761_v63 = vpop.permute.xlu0 %760  }
  0xf9   :  { %1022 = vst.msk [vmem:[%s2190_s1 + $0x3f] sm:$0x1] %vm7_vm0, %v761_v63   ;;  %1023 = vst.msk [vmem:[%s2190_s1 + $0x7e] sm:$0x2] %vm7_vm0, %v761_v63  }
  0xfa   :  { %1024 = vst.msk [vmem:[%s2190_s1 + $0xbd] sm:$0x4] %vm7_vm0, %v761_v63   ;;  %1025 = vst.msk [vmem:[%s2190_s1 + $0xfc] sm:$0x8] %vm7_vm0, %v761_v63  }

// kernel: discriminator2_forward.1
= control target key start
LH: loop header
LB: loop body
LE: loop exit
PB: predicated region body
PF: predicated region fallthrough
CT: control target
= control target key end

     0   :  { %v5899_v0 = vmov 0   ;;  %vm1259_vm0 = vcmask 130048   ;;  %vm2445_vm5 = vcmask 261120   ;;  %s8171_s2 = inlined_call_operand.vmem [shape: f32[1024,1], index: 2, kind: input, shape index: {}]   ;;  %s8172_s0 = inlined_call_operand.vmem [shape: bf16[1,16,32], index: 0, kind: input, shape index: {}]   ;;  %s8173_s1 = inlined_call_operand.vmem [shape: bf16[1024,16], index: 1, kind: input, shape index: {}]   ;;  %s8174_s3 = inlined_call_operand.vmem [shape: bf16[256,1024], index: 3, kind: input, shape index: {}]   ;;  %s8175_s8 = inlined_call_operand.<no memory space> [shape: f32[1,1], index: 8, kind: input, shape index: {}]   ;;  %s8176_s4 = inlined_call_operand.vmem [shape: f32[256,1], index: 4, kind: input, shape index: {}]   ;;  %s8177_s6 = inlined_call_operand.vmem [shape: f32[128,1], index: 6, kind: input, shape index: {}]   ;;  %s8178_s7 = inlined_call_operand.vmem [shape: f32[128,1], index: 7, kind: input, shape index: {}]   ;;  %s8179_s5 = inlined_call_operand.vmem [shape: bf16[128,256], index: 5, kind: input, shape index: {}]   ;;  %s8180_s9 = inlined_call_operand.vmem [shape: f32[1,1,32], index: 9, kind: output, shape index: {}]  }
   0x1   :  { %5809 = vset.pattern.permute.xlu1 %v5899_v0  ;;  %5808 = vset.pattern.permute.xlu0 %v5899_v0  ;;  %v181_v1 = vld [vmem:[%s8171_s2 + $0x80] sm:$0xff]  ;;  %v182_v4 = vld [vmem:[%s8171_s2 + $0x88] sm:$0xff]  ;;  %v183_v8 = vld [vmem:[%s8171_s2 + $0x90] sm:$0xff] }
   0x2   :  { %v165_v2 = vld [vmem:[%s8171_s2] sm:$0xff]  ;;  %375 = vperm.xlu0 %5808, %v181_v1   ;;  %v166_v5 = vld [vmem:[%s8171_s2 + $0x8] sm:$0xff]  ;;  %v184_v9 = vld [vmem:[%s8171_s2 + $0x98] sm:$0xff] }
   0x3   :  { %295 = vperm.xlu1 %5809, %v165_v2   ;;  %v5810_v3 = vld [vmem:[%s8172_s0] sm:$0xff]   ;;  %v5812_v7 = vld [vmem:[%s8173_s1 + $0x8] sm:$0xff]   ;;  %v5813_v10 = vld [vmem:[%s8173_s1 + $0x10] sm:$0xff]  }
   0x4   :  { %5675 = vmatprep.subr.bf16.mxu0 %v5810_v3  ;;  %v5811_v6 = vld [vmem:[%s8173_s1] sm:$0xff]   ;;  %5805 = vmatprep.subr.bf16.mxu1 %v5810_v3  ;;  %v167_v11 = vld [vmem:[%s8171_s2 + $0x10] sm:$0xff]  ;;  %v168_v12 = vld [vmem:[%s8171_s2 + $0x18] sm:$0xff] }
   0x5   :  { %5676 = vmatpush3.bf16.msra.mxu0 %v5810_v3  ;;  %5806 = vmatpush3.bf16.msra.mxu1 %v5810_v3  ;;  %v5814_v13 = vld [vmem:[%s8173_s1 + $0x18] sm:$0xff]   ;;  %v5815_v14 = vld [vmem:[%s8173_s1 + $0x20] sm:$0xff]   ;;  %v186_v16 = vld [vmem:[%s8171_s2 + $0xa8] sm:$0xff] }
   0x6   :  { %380 = vperm.xlu0 %5808, %v182_v4   ;;  %5677 = vmatprep.mubr.msk.bf16.mxu0 %vm1259_vm0, %v5811_v6  ;;  %v185_v15 = vld [vmem:[%s8171_s2 + $0xa0] sm:$0xff]  ;;  %v170_v18 = vld [vmem:[%s8171_s2 + $0x28] sm:$0xff]  ;;  %v5817_v20 = vld [vmem:[%s8173_s1 + $0x30] sm:$0xff]  }
   0x7   :  { %300 = vperm.xlu1 %5809, %v166_v5   ;;  %v169_v17 = vld [vmem:[%s8171_s2 + $0x20] sm:$0xff]  ;;  %v5816_v19 = vld [vmem:[%s8173_s1 + $0x28] sm:$0xff]   ;;  %v187_v21 = vld [vmem:[%s8171_s2 + $0xb0] sm:$0xff] }
   0x8   :  { %5678 = vmatmul.mubr.msk.bf16.vlgmr.msra.gmra.mrb[0].mxu0 %vm1259_vm0, %v5812_v7  ;;  %v188_v22 = vld [vmem:[%s8171_s2 + $0xb8] sm:$0xff]  ;;  %v5823_v23 = vld [vmem:[%s8173_s1 + $0x1c0] sm:$0xff]   ;;  %v5824_v24 = vld [vmem:[%s8173_s1 + $0x1c8] sm:$0xff]  }
   0x9   :  { %5681 = vmatprep.mubr.msk.bf16.mxu0 %vm1259_vm0, %v5813_v10  ;;  %5789 = vmatprep.mubr.msk.bf16.mxu1 %vm1259_vm0, %v5823_v23  ;;  %v171_v25 = vld [vmem:[%s8171_s2 + $0x30] sm:$0xff]  ;;  %v172_v26 = vld [vmem:[%s8171_s2 + $0x38] sm:$0xff]  ;;  %v5819_v28 = vld [vmem:[%s8173_s1 + $0x40] sm:$0xff]  }
   0xa   :  { %385 = vperm.xlu0 %5808, %v183_v8   ;;  %5790 = vmatmul.mubr.msk.bf16.vlgmr.msra.gmra.mrb[0].mxu1 %vm1259_vm0, %v5824_v24  ;;  %v5818_v27 = vld [vmem:[%s8173_s1 + $0x38] sm:$0xff]   ;;  %v189_v29 = vld [vmem:[%s8171_s2 + $0xc0] sm:$0xff]  ;;  %v190_v30 = vld [vmem:[%s8171_s2 + $0xc8] sm:$0xff] }
   0xb   :  { %390 = vperm.xlu1 %5809, %v184_v9   ;;  %v173_v31 = vld [vmem:[%s8171_s2 + $0x40] sm:$0xff]  ;;  %v174_v32 = vld [vmem:[%s8171_s2 + $0x48] sm:$0xff]  ;;  %v191_v34 = vld [vmem:[%s8171_s2 + $0xd0] sm:$0xff] }
   0xc   :  { %v5820_v33 = vld [vmem:[%s8173_s1 + $0x48] sm:$0xff]   ;;  %v192_v35 = vld [vmem:[%s8171_s2 + $0xd8] sm:$0xff]  ;;  %v5821_v36 = vld [vmem:[%s8173_s1 + $0x50] sm:$0xff]  }
   0xd   :  { %v5833_v37 = vld [vmem:[%s8173_s1 + $0x1d0] sm:$0xff]   ;;  %v5834_v38 = vld [vmem:[%s8173_s1 + $0x1d8] sm:$0xff]   ;;  %v5825_v42 = vld [vmem:[%s8173_s1 + $0x60] sm:$0xff]  }
   0xe   :  { %305 = vperm.xlu0 %5808, %v167_v11   ;;  %5793 = vmatprep.mubr.msk.bf16.mxu1 %vm1259_vm0, %v5833_v37  ;;  %v175_v39 = vld [vmem:[%s8171_s2 + $0x50] sm:$0xff]  ;;  %v176_v40 = vld [vmem:[%s8171_s2 + $0x58] sm:$0xff]  ;;  %v193_v43 = vld [vmem:[%s8171_s2 + $0xe0] sm:$0xff] }
   0xf   :  { %310 = vperm.xlu1 %5809, %v168_v12   ;;  %v5822_v41 = vld [vmem:[%s8173_s1 + $0x58] sm:$0xff]   ;;  %v194_v44 = vld [vmem:[%s8171_s2 + $0xe8] sm:$0xff]  ;;  %v177_v45 = vld [vmem:[%s8171_s2 + $0x60] sm:$0xff] }
  0x10   :  { %5682 = vmatmul.mubr.msk.bf16.gmra.mrb[4].mxu0 %vm1259_vm0, %v5814_v13  ;;  %v178_v46 = vld [vmem:[%s8171_s2 + $0x68] sm:$0xff]  ;;  %v5827_v48 = vld [vmem:[%s8173_s1 + $0x70] sm:$0xff]   ;;  %v5843_v49 = vld [vmem:[%s8173_s1 + $0x1e0] sm:$0xff]  }
  0x11   :  { %5685 = vmatprep.mubr.msk.bf16.mxu0 %vm1259_vm0, %v5815_v14  ;;  %v5826_v47 = vld [vmem:[%s8173_s1 + $0x68] sm:$0xff]   ;;  %v195_v50 = vld [vmem:[%s8171_s2 + $0xf0] sm:$0xff]  ;;  %v196_v51 = vld [vmem:[%s8171_s2 + $0xf8] sm:$0xff] }
  0x12   :  { %395 = vperm.xlu0 %5808, %v185_v15   ;;  %5794 = vmatmul.mubr.msk.bf16.gmra.mrb[4].mxu1 %vm1259_vm0, %v5834_v38  ;;  %v5844_v52 = vld [vmem:[%s8173_s1 + $0x1e8] sm:$0xff]   ;;  %v179_v53 = vld [vmem:[%s8171_s2 + $0x70] sm:$0xff]  ;;  %v180_v54 = vld [vmem:[%s8171_s2 + $0x78] sm:$0xff] }
  0x13   :  { %400 = vperm.xlu1 %5809, %v186_v16   ;;  %5797 = vmatprep.mubr.msk.bf16.mxu1 %vm1259_vm0, %v5843_v49  ;;  %v5828_v55 = vld [vmem:[%s8173_s1 + $0x78] sm:$0xff]   ;;  %v5829_v56 = vld [vmem:[%s8173_s1 + $0x80] sm:$0xff]   ;;  %v214_v58 = vld [vmem:[%s8171_s2 + $0x188] sm:$0xff] }
  0x14   :  { %v213_v57 = vld [vmem:[%s8171_s2 + $0x180] sm:$0xff]  ;;  %v198_v60 = vld [vmem:[%s8171_s2 + $0x108] sm:$0xff]  ;;  %v5831_v62 = vld [vmem:[%s8173_s1 + $0x90] sm:$0xff]  }
  0x15   :  { %v197_v59 = vld [vmem:[%s8171_s2 + $0x100] sm:$0xff]  ;;  %v5830_v61 = vld [vmem:[%s8173_s1 + $0x88] sm:$0xff]   ;;  %v5853_v63 = vld [vmem:[%s8173_s1 + $0x1f0] sm:$0xff]  }
  0x16   :  { %315 = vperm.xlu0 %5808, %v169_v17   ;;  %v215_v0 = vld [vmem:[%s8171_s2 + $0x190] sm:$0xff]  ;;  %v5854_v1 = vld [vmem:[%s8173_s1 + $0x1f8] sm:$0xff]   ;;  %v5835_v6 = vld [vmem:[%s8173_s1 + $0xa0] sm:$0xff]  }
  0x17   :  { %320 = vperm.xlu1 %5809, %v170_v18   ;;  %v216_v2 = vld [vmem:[%s8171_s2 + $0x198] sm:$0xff]  ;;  %v199_v3 = vld [vmem:[%s8171_s2 + $0x110] sm:$0xff]  ;;  %v217_v7 = vld [vmem:[%s8171_s2 + $0x1a0] sm:$0xff] }
  0x18   :  { %5686 = vmatmul.mubr.msk.bf16.gmra.mrb[8].mxu0 %vm1259_vm0, %v5816_v19  ;;  %v200_v4 = vld [vmem:[%s8171_s2 + $0x118] sm:$0xff]  ;;  %v218_v8 = vld [vmem:[%s8171_s2 + $0x1a8] sm:$0xff]  ;;  %v201_v9 = vld [vmem:[%s8171_s2 + $0x120] sm:$0xff] }
  0x19   :  { %5689 = vmatprep.mubr.msk.bf16.mxu0 %vm1259_vm0, %v5817_v20  ;;  %v5832_v5 = vld [vmem:[%s8173_s1 + $0x98] sm:$0xff]   ;;  %v202_v10 = vld [vmem:[%s8171_s2 + $0x128] sm:$0xff]  ;;  %v5837_v12 = vld [vmem:[%s8173_s1 + $0xb0] sm:$0xff]  }
  0x1a   :  { %405 = vperm.xlu0 %5808, %v187_v21   ;;  %5798 = vmatmul.mubr.msk.bf16.gmra.mrb[8].mxu1 %vm1259_vm0, %v5844_v52  ;;  %v5836_v11 = vld [vmem:[%s8173_s1 + $0xa8] sm:$0xff]   ;;  %v219_v13 = vld [vmem:[%s8171_s2 + $0x1b0] sm:$0xff]  ;;  %v220_v14 = vld [vmem:[%s8171_s2 + $0x1b8] sm:$0xff] }
  0x1b   :  { %410 = vperm.xlu1 %5809, %v188_v22   ;;  %5801 = vmatprep.mubr.msk.bf16.mxu1 %vm1259_vm0, %v5853_v63  ;;  %v203_v15 = vld [vmem:[%s8171_s2 + $0x130] sm:$0xff]  ;;  %v204_v16 = vld [vmem:[%s8171_s2 + $0x138] sm:$0xff]  ;;  %v5839_v18 = vld [vmem:[%s8173_s1 + $0xc0] sm:$0xff]  }
  0x1c   :  { %v5838_v17 = vld [vmem:[%s8173_s1 + $0xb8] sm:$0xff]   ;;  %v221_v19 = vld [vmem:[%s8171_s2 + $0x1c0] sm:$0xff]  ;;  %v222_v20 = vld [vmem:[%s8171_s2 + $0x1c8] sm:$0xff] }
  0x1d   :  { %v205_v21 = vld [vmem:[%s8171_s2 + $0x140] sm:$0xff]  ;;  %v206_v22 = vld [vmem:[%s8171_s2 + $0x148] sm:$0xff]  ;;  %v5841_v24 = vld [vmem:[%s8173_s1 + $0xd0] sm:$0xff]  }
  0x1e   :  { %325 = vperm.xlu0 %5808, %v171_v25   ;;  %v5840_v23 = vld [vmem:[%s8173_s1 + $0xc8] sm:$0xff]   ;;  %v223_v25 = vld [vmem:[%s8171_s2 + $0x1d0] sm:$0xff]  ;;  %v228_v38 = vld [vmem:[%s8171_s2 + $0x1f8] sm:$0xff] }
  0x1f   :  { %330 = vperm.xlu1 %5809, %v172_v26   ;;  %v224_v26 = vld [vmem:[%s8171_s2 + $0x1d8] sm:$0xff]  ;;  %v227_v37 = vld [vmem:[%s8171_s2 + $0x1f0] sm:$0xff]  ;;  %v5850_v49 = vld [vmem:[%s8173_s1 + $0x108] sm:$0xff]  }
  0x20   :  { %5690 = vmatmul.mubr.msk.bf16.gmra.mrb[12].mxu0 %vm1259_vm0, %v5818_v27  ;;  %v207_v27 = vld [vmem:[%s8171_s2 + $0x150] sm:$0xff] }
  0x21   :  { %5693 = vmatprep.mubr.msk.bf16.mxu0 %vm1259_vm0, %v5819_v28  ;;  %v208_v28 = vld [vmem:[%s8171_s2 + $0x158] sm:$0xff]  ;;  %v5851_v52 = vld [vmem:[%s8173_s1 + $0x110] sm:$0xff]  }
  0x22   :  { %415 = vperm.xlu0 %5808, %v189_v29   ;;  %5802 = vmatmul.mubr.msk.bf16.gmra.mrb[12].mxu1 %vm1259_vm0, %v5854_v1  ;;  %v5842_v29 = vld [vmem:[%s8173_s1 + $0xd8] sm:$0xff]   ;;  %v247_v63 = vld [vmem:[%s8171_s2 + $0x290] sm:$0xff] }
  0x23   :  { %420 = vperm.xlu1 %5809, %v190_v30   ;;  %v5845_v30 = vld [vmem:[%s8173_s1 + $0xe0] sm:$0xff]  }
  0x26   :  { %335 = vperm.xlu0 %5808, %v173_v31   ;;  %v225_v31 = vld [vmem:[%s8171_s2 + $0x1e0] sm:$0xff] }
  0x27   :  { %340 = vperm.xlu1 %5809, %v174_v32   ;;  %v226_v32 = vld [vmem:[%s8171_s2 + $0x1e8] sm:$0xff] }
  0x28   :  { %5694 = vmatmul.mubr.msk.bf16.gmra.mrb[16].mxu0 %vm1259_vm0, %v5820_v33  ;;  %v209_v33 = vld [vmem:[%s8171_s2 + $0x160] sm:$0xff] }
  0x29   :  { %5697 = vmatprep.mubr.msk.bf16.mxu0 %vm1259_vm0, %v5821_v36  ;;  %v5847_v36 = vld [vmem:[%s8173_s1 + $0xf0] sm:$0xff]  }
  0x2a   :  { %425 = vperm.xlu0 %5808, %v191_v34   ;;  %v210_v34 = vld [vmem:[%s8171_s2 + $0x168] sm:$0xff] }
  0x2b   :  { %430 = vperm.xlu1 %5809, %v192_v35   ;;  %v5846_v35 = vld [vmem:[%s8173_s1 + $0xe8] sm:$0xff]  }
  0x2e   :  { %345 = vperm.xlu0 %5808, %v175_v39   ;;  %v211_v39 = vld [vmem:[%s8171_s2 + $0x170] sm:$0xff] }
  0x2f   :  { %350 = vperm.xlu1 %5809, %v176_v40   ;;  %v212_v40 = vld [vmem:[%s8171_s2 + $0x178] sm:$0xff] }
  0x30   :  { %5698 = vmatmul.mubr.msk.bf16.gmra.mrb[20].mxu0 %vm1259_vm0, %v5822_v41  ;;  %v5848_v41 = vld [vmem:[%s8173_s1 + $0xf8] sm:$0xff]  }
  0x31   :  { %5701 = vmatprep.mubr.msk.bf16.mxu0 %vm1259_vm0, %v5825_v42  ;;  %v5849_v42 = vld [vmem:[%s8173_s1 + $0x100] sm:$0xff]  }
  0x32   :  { %435 = vperm.xlu0 %5808, %v193_v43   ;;  %v245_v43 = vld [vmem:[%s8171_s2 + $0x280] sm:$0xff] }
  0x33   :  { %440 = vperm.xlu1 %5809, %v194_v44   ;;  %v246_v44 = vld [vmem:[%s8171_s2 + $0x288] sm:$0xff] }
  0x36   :  { %355 = vperm.xlu0 %5808, %v177_v45  }
  0x37   :  { %360 = vperm.xlu1 %5809, %v178_v46  }
  0x38   :  { %5702 = vmatmul.mubr.msk.bf16.gmra.mrb[24].mxu0 %vm1259_vm0, %v5826_v47  ;;  %v229_v47 = vld [vmem:[%s8171_s2 + $0x200] sm:$0xff] }
  0x39   :  { %5705 = vmatprep.mubr.msk.bf16.mxu0 %vm1259_vm0, %v5827_v48  ;;  %v230_v48 = vld [vmem:[%s8171_s2 + $0x208] sm:$0xff] }
  0x3a   :  { %445 = vperm.xlu0 %5808, %v195_v50  }
  0x3b   :  { %450 = vperm.xlu1 %5809, %v196_v51  }
  0x3e   :  { %365 = vperm.xlu0 %5808, %v179_v53   ;;  %v277_v53 = vld [vmem:[%s8171_s2 + $0x380] sm:$0xff] }
  0x3f   :  { %370 = vperm.xlu1 %5809, %v180_v54   ;;  %v278_v54 = vld [vmem:[%s8171_s2 + $0x388] sm:$0xff] }
  0x40   :  { %5706 = vmatmul.mubr.msk.bf16.gmra.mrb[28].mxu0 %vm1259_vm0, %v5828_v55 }
  0x41   :  { %5709 = vmatprep.mubr.msk.bf16.mxu0 %vm1259_vm0, %v5829_v56 }
  0x42   :  { %535 = vperm.xlu0 %5808, %v213_v57   ;;  %v261_v57 = vld [vmem:[%s8171_s2 + $0x300] sm:$0xff] }
  0x43   :  { %540 = vperm.xlu1 %5809, %v214_v58   ;;  %v262_v58 = vld [vmem:[%s8171_s2 + $0x308] sm:$0xff] }
  0x46   :  { %455 = vperm.xlu0 %5808, %v197_v59   ;;  %v5852_v59 = vld [vmem:[%s8173_s1 + $0x118] sm:$0xff]  }
  0x47   :  { %460 = vperm.xlu1 %5809, %v198_v60  }
  0x48   :  { %5710 = vmatmul.mubr.msk.bf16.gmra.mrb[32].mxu0 %vm1259_vm0, %v5830_v61 }
  0x49   :  { %5713 = vmatprep.mubr.msk.bf16.mxu0 %vm1259_vm0, %v5831_v62  ;;  %v5855_v62 = vld [vmem:[%s8173_s1 + $0x120] sm:$0xff]  }
  0x4a   :  { %545 = vperm.xlu0 %5808, %v215_v0   ;;  %v248_v0 = vld [vmem:[%s8171_s2 + $0x298] sm:$0xff] }
  0x4b   :  { %550 = vperm.xlu1 %5809, %v216_v2  }
  0x4e   :  { %465 = vperm.xlu0 %5808, %v199_v3   ;;  %v231_v3 = vld [vmem:[%s8171_s2 + $0x210] sm:$0xff] }
  0x4f   :  { %470 = vperm.xlu1 %5809, %v200_v4   ;;  %v232_v4 = vld [vmem:[%s8171_s2 + $0x218] sm:$0xff] }
  0x50   :  { %5714 = vmatmul.mubr.msk.bf16.gmra.mrb[36].mxu0 %vm1259_vm0, %v5832_v5  ;;  %v5856_v5 = vld [vmem:[%s8173_s1 + $0x128] sm:$0xff]  }
  0x51   :  { %5717 = vmatprep.mubr.msk.bf16.mxu0 %vm1259_vm0, %v5835_v6 }
  0x52   :  { %555 = vperm.xlu0 %5808, %v217_v7  }
  0x53   :  { %560 = vperm.xlu1 %5809, %v218_v8   ;;  %v5857_v8 = vld [vmem:[%s8173_s1 + $0x130] sm:$0xff]  }
  0x56   :  { %475 = vperm.xlu0 %5808, %v201_v9   ;;  %v279_v9 = vld [vmem:[%s8171_s2 + $0x390] sm:$0xff] }
  0x57   :  { %480 = vperm.xlu1 %5809, %v202_v10   ;;  %v280_v10 = vld [vmem:[%s8171_s2 + $0x398] sm:$0xff] }
  0x58   :  { %5718 = vmatmul.mubr.msk.bf16.gmra.mrb[40].mxu0 %vm1259_vm0, %v5836_v11 }
  0x59   :  { %5721 = vmatprep.mubr.msk.bf16.mxu0 %vm1259_vm0, %v5837_v12 }
  0x5a   :  { %565 = vperm.xlu0 %5808, %v219_v13   ;;  %v263_v13 = vld [vmem:[%s8171_s2 + $0x310] sm:$0xff] }
  0x5b   :  { %570 = vperm.xlu1 %5809, %v220_v14   ;;  %v264_v14 = vld [vmem:[%s8171_s2 + $0x318] sm:$0xff] }
  0x5e   :  { %485 = vperm.xlu0 %5808, %v203_v15   ;;  %v5858_v15 = vld [vmem:[%s8173_s1 + $0x138] sm:$0xff]  }
  0x5f   :  { %490 = vperm.xlu1 %5809, %v204_v16  }
  0x60   :  { %5722 = vmatmul.mubr.msk.bf16.gmra.mrb[44].mxu0 %vm1259_vm0, %v5838_v17 }
  0x61   :  { %5725 = vmatprep.mubr.msk.bf16.mxu0 %vm1259_vm0, %v5839_v18  ;;  %v5859_v18 = vld [vmem:[%s8173_s1 + $0x140] sm:$0xff]  }
  0x62   :  { %575 = vperm.xlu0 %5808, %v221_v19   ;;  %v249_v19 = vld [vmem:[%s8171_s2 + $0x2a0] sm:$0xff] }
  0x63   :  { %580 = vperm.xlu1 %5809, %v222_v20   ;;  %v250_v20 = vld [vmem:[%s8171_s2 + $0x2a8] sm:$0xff] }
  0x66   :  { %495 = vperm.xlu0 %5808, %v205_v21  }
  0x67   :  { %500 = vperm.xlu1 %5809, %v206_v22  }
  0x68   :  { %5726 = vmatmul.mubr.msk.bf16.gmra.mrb[48].mxu0 %vm1259_vm0, %v5840_v23  ;;  %v233_v23 = vld [vmem:[%s8171_s2 + $0x220] sm:$0xff] }
  0x69   :  { %5729 = vmatprep.mubr.msk.bf16.mxu0 %vm1259_vm0, %v5841_v24  ;;  %v234_v24 = vld [vmem:[%s8171_s2 + $0x228] sm:$0xff] }
  0x6a   :  { %585 = vperm.xlu0 %5808, %v223_v25   ;;  %v5860_v25 = vld [vmem:[%s8173_s1 + $0x148] sm:$0xff]  }
  0x6b   :  { %590 = vperm.xlu1 %5809, %v224_v26  }
  0x6e   :  { %505 = vperm.xlu0 %5808, %v207_v27  }
  0x6f   :  { %510 = vperm.xlu1 %5809, %v208_v28   ;;  %v5861_v28 = vld [vmem:[%s8173_s1 + $0x150] sm:$0xff]  }
  0x70   :  { %5730 = vmatmul.mubr.msk.bf16.gmra.mrb[52].mxu0 %vm1259_vm0, %v5842_v29  ;;  %v281_v29 = vld [vmem:[%s8171_s2 + $0x3a0] sm:$0xff] }
  0x71   :  { %5733 = vmatprep.mubr.msk.bf16.mxu0 %vm1259_vm0, %v5845_v30  ;;  %v282_v30 = vld [vmem:[%s8171_s2 + $0x3a8] sm:$0xff] }
  0x72   :  { %595 = vperm.xlu0 %5808, %v225_v31  }
  0x73   :  { %600 = vperm.xlu1 %5809, %v226_v32  }
  0x76   :  { %515 = vperm.xlu0 %5808, %v209_v33   ;;  %v265_v33 = vld [vmem:[%s8171_s2 + $0x320] sm:$0xff] }
  0x77   :  { %520 = vperm.xlu1 %5809, %v210_v34   ;;  %v266_v34 = vld [vmem:[%s8171_s2 + $0x328] sm:$0xff] }
  0x78   :  { %5734 = vmatmul.mubr.msk.bf16.gmra.mrb[56].mxu0 %vm1259_vm0, %v5846_v35  ;;  %v6468_v35 = vld [vmem:[%s8174_s3] sm:$0xff] }
  0x79   :  { %5737 = vmatprep.mubr.msk.bf16.mxu0 %vm1259_vm0, %v5847_v36  ;;  %v5862_v36 = vld [vmem:[%s8173_s1 + $0x158] sm:$0xff]  }
  0x7a   :  { %605 = vperm.xlu0 %5808, %v227_v37   ;;  %v6476_v37 = vld [vmem:[%s8174_s3 + $0x20] sm:$0xff] }
  0x7b   :  { %610 = vperm.xlu1 %5809, %v228_v38  }
  0x7e   :  { %525 = vperm.xlu0 %5808, %v211_v39  }
  0x7f   :  { %530 = vperm.xlu1 %5809, %v212_v40   ;;  %v5863_v40 = vld [vmem:[%s8173_s1 + $0x160] sm:$0xff]  }
  0x80   :  { %5738 = vmatmul.mubr.msk.bf16.gmra.mrb[60].mxu0 %vm1259_vm0, %v5848_v41 }
  0x81   :  { %v6314_v45 = vpop.permute.xlu0 %375  ;;  %5741 = vmatprep.mubr.msk.bf16.mxu0 %vm1259_vm0, %v5849_v42  ;;  %v4955_v42 = vcombine.high %v6468_v35, %v6476_v37 }
  0x82   :  { %v6316_v46 = vpop.permute.xlu1 %295  ;;  %695 = vperm.xlu0 %5808, %v245_v43   ;;  %v251_v43 = vld [vmem:[%s8171_s2 + $0x2b0] sm:$0xff] }
  0x83   :  { %700 = vperm.xlu1 %5809, %v246_v44   ;;  %v252_v44 = vld [vmem:[%s8171_s2 + $0x2b8] sm:$0xff]  ;;  %3566 = vmatprep.mubr.bf16.mxu1 %v4955_v42 }
  0x84   :  { %v5870_v42 = vld [vmem:[%s8173_s1 + $0x198] sm:$0xff]  }
  0x85   :  { %v6328_v50 = vpop.permute.xlu0 %380 }
  0x86   :  { %v6330_v51 = vpop.permute.xlu1 %300  ;;  %615 = vperm.xlu0 %5808, %v229_v47  }
  0x87   :  { %620 = vperm.xlu1 %5809, %v230_v48  }
  0x88   :  { %5742 = vmatmul.mubr.msk.bf16.gmra.mrb[64].mxu0 %vm1259_vm0, %v5850_v49  ;;  %v235_v49 = vld [vmem:[%s8171_s2 + $0x230] sm:$0xff] }
  0x89   :  { %v6342_v55 = vpop.permute.xlu0 %385  ;;  %5745 = vmatprep.mubr.msk.bf16.mxu0 %vm1259_vm0, %v5851_v52  ;;  %v236_v52 = vld [vmem:[%s8171_s2 + $0x238] sm:$0xff] }
  0x8a   :  { %v6344_v56 = vpop.permute.xlu1 %390  ;;  %855 = vperm.xlu0 %5808, %v277_v53   ;;  %v5864_v53 = vld [vmem:[%s8173_s1 + $0x168] sm:$0xff]  }
  0x8b   :  { %860 = vperm.xlu1 %5809, %v278_v54  }
  0x8d   :  { %v6356_v60 = vpop.permute.xlu0 %305 }
  0x8e   :  { %v6358_v61 = vpop.permute.xlu1 %310  ;;  %775 = vperm.xlu0 %5808, %v261_v57  }
  0x8f   :  { %780 = vperm.xlu1 %5809, %v262_v58   ;;  %v5865_v58 = vld [vmem:[%s8173_s1 + $0x170] sm:$0xff]  }
  0x90   :  { %5746 = vmatmul.mubr.msk.bf16.gmra.mrb[68].mxu0 %vm1259_vm0, %v5852_v59  ;;  %v283_v59 = vld [vmem:[%s8171_s2 + $0x3b0] sm:$0xff] }
  0x91   :  { %v6370_v1 = vpop.permute.xlu0 %395  ;;  %5749 = vmatprep.mubr.msk.bf16.mxu0 %vm1259_vm0, %v5855_v62  ;;  %v284_v62 = vld [vmem:[%s8171_s2 + $0x3b8] sm:$0xff] }
  0x92   :  { %v6372_v2 = vpop.permute.xlu1 %400  ;;  %705 = vperm.xlu0 %5808, %v247_v63  }
  0x93   :  { %710 = vperm.xlu1 %5809, %v248_v0  }
  0x95   :  { %v6384_v6 = vpop.permute.xlu0 %315 }
  0x96   :  { %v6386_v7 = vpop.permute.xlu1 %320  ;;  %625 = vperm.xlu0 %5808, %v231_v3   ;;  %v267_v3 = vld [vmem:[%s8171_s2 + $0x330] sm:$0xff] }
  0x97   :  { %630 = vperm.xlu1 %5809, %v232_v4   ;;  %v268_v4 = vld [vmem:[%s8171_s2 + $0x338] sm:$0xff] }
  0x98   :  { %5750 = vmatmul.mubr.msk.bf16.gmra.mrb[72].mxu0 %vm1259_vm0, %v5856_v5  ;;  %v5866_v5 = vld [vmem:[%s8173_s1 + $0x178] sm:$0xff]  }
  0x99   :  { %v6398_v11 = vpop.permute.xlu0 %405  ;;  %5753 = vmatprep.mubr.msk.bf16.mxu0 %vm1259_vm0, %v5857_v8 }
  0x9a   :  { %v6400_v12 = vpop.permute.xlu1 %410  ;;  %865 = vperm.xlu0 %5808, %v279_v9  }
  0x9b   :  { %870 = vperm.xlu1 %5809, %v280_v10   ;;  %v5867_v10 = vld [vmem:[%s8173_s1 + $0x180] sm:$0xff]  }
  0x9d   :  { %v6412_v16 = vpop.permute.xlu0 %325 }
  0x9e   :  { %v6414_v17 = vpop.permute.xlu1 %330  ;;  %785 = vperm.xlu0 %5808, %v263_v13   ;;  %v253_v13 = vld [vmem:[%s8171_s2 + $0x2c0] sm:$0xff] }
  0x9f   :  { %790 = vperm.xlu1 %5809, %v264_v14   ;;  %v254_v14 = vld [vmem:[%s8171_s2 + $0x2c8] sm:$0xff] }
  0xa0   :  { %5754 = vmatmul.mubr.msk.bf16.gmra.mrb[76].mxu0 %vm1259_vm0, %v5858_v15 }
  0xa1   :  { %v6426_v21 = vpop.permute.xlu0 %415  ;;  %5757 = vmatprep.mubr.msk.bf16.mxu0 %vm1259_vm0, %v5859_v18 }
  0xa2   :  { %v6428_v22 = vpop.permute.xlu1 %420  ;;  %715 = vperm.xlu0 %5808, %v249_v19   ;;  %v237_v19 = vld [vmem:[%s8171_s2 + $0x240] sm:$0xff] }
  0xa3   :  { %720 = vperm.xlu1 %5809, %v250_v20   ;;  %v238_v20 = vld [vmem:[%s8171_s2 + $0x248] sm:$0xff] }
  0xa5   :  { %v6440_v26 = vpop.permute.xlu0 %335 }
  0xa6   :  { %v6442_v27 = vpop.permute.xlu1 %340  ;;  %635 = vperm.xlu0 %5808, %v233_v23   ;;  %v5868_v23 = vld [vmem:[%s8173_s1 + $0x188] sm:$0xff]  }
  0xa7   :  { %640 = vperm.xlu1 %5809, %v234_v24  }
  0xa8   :  { %5758 = vmatmul.mubr.msk.bf16.gmra.mrb[80].mxu0 %vm1259_vm0, %v5860_v25 }
  0xa9   :  { %v6454_v31 = vpop.permute.xlu0 %425  ;;  %5761 = vmatprep.mubr.msk.bf16.mxu0 %vm1259_vm0, %v5861_v28  ;;  %v5869_v28 = vld [vmem:[%s8173_s1 + $0x190] sm:$0xff]  }
  0xaa   :  { %v6456_v32 = vpop.permute.xlu1 %430  ;;  %875 = vperm.xlu0 %5808, %v281_v29   ;;  %v285_v29 = vld [vmem:[%s8171_s2 + $0x3c0] sm:$0xff] }
  0xab   :  { %880 = vperm.xlu1 %5809, %v282_v30   ;;  %v286_v30 = vld [vmem:[%s8171_s2 + $0x3c8] sm:$0xff] }
  0xad   :  { %v6478_v38 = vpop.permute.xlu0 %345 }
  0xae   :  { %v6480_v39 = vpop.permute.xlu1 %350  ;;  %795 = vperm.xlu0 %5808, %v265_v33  }
  0xaf   :  { %800 = vperm.xlu1 %5809, %v266_v34  }
  0xb0   :  { %5762 = vmatmul.mubr.msk.bf16.gmra.mrb[84].mxu0 %vm1259_vm0, %v5862_v36  ;;  %v269_v36 = vld [vmem:[%s8171_s2 + $0x340] sm:$0xff] }
  0xb1   :  { %v6496_v47 = vpop.permute.xlu0 %435  ;;  %5765 = vmatprep.mubr.msk.bf16.mxu0 %vm1259_vm0, %v5863_v40  ;;  %v270_v40 = vld [vmem:[%s8171_s2 + $0x348] sm:$0xff] }
  0xb2   :  { %v6498_v48 = vpop.permute.xlu1 %440  ;;  %725 = vperm.xlu0 %5808, %v251_v43  }
  0xb3   :  { %730 = vperm.xlu1 %5809, %v252_v44  }
  0xb5   :  { %v6510_v54 = vpop.permute.xlu0 %355 }
  0xb6   :  { %v6512_v57 = vpop.permute.xlu1 %360  ;;  %645 = vperm.xlu0 %5808, %v235_v49   ;;  %v5871_v49 = vld [vmem:[%s8173_s1 + $0x1a0] sm:$0xff]  }
  0xb7   :  { %650 = vperm.xlu1 %5809, %v236_v52   ;;  %v255_v52 = vld [vmem:[%s8171_s2 + $0x2d0] sm:$0xff] }
  0xb8   :  { %5766 = vmatmul.mubr.msk.bf16.gmra.mrb[88].mxu0 %vm1259_vm0, %v5864_v53  ;;  %v256_v53 = vld [vmem:[%s8171_s2 + $0x2d8] sm:$0xff] }
  0xb9   :  { %v6524_v63 = vpop.permute.xlu0 %445  ;;  %5769 = vmatprep.mubr.msk.bf16.mxu0 %vm1259_vm0, %v5865_v58 }
  0xba   :  { %v6526_v0 = vpop.permute.xlu1 %450  ;;  %885 = vperm.xlu0 %5808, %v283_v59  }
  0xbb   :  { %890 = vperm.xlu1 %5809, %v284_v62   ;;  %v239_v62 = vld [vmem:[%s8171_s2 + $0x250] sm:$0xff] }
  0xbd   :  { %v6538_v8 = vpop.permute.xlu0 %365 }
  0xbe   :  { %v6540_v9 = vpop.permute.xlu1 %370  ;;  %805 = vperm.xlu0 %5808, %v267_v3   ;;  %v240_v3 = vld [vmem:[%s8171_s2 + $0x258] sm:$0xff] }
  0xbf   :  { %810 = vperm.xlu1 %5809, %v268_v4   ;;  %v5872_v4 = vld [vmem:[%s8173_s1 + $0x1a8] sm:$0xff]  }
  0xc0   :  { %5770 = vmatmul.mubr.msk.bf16.gmra.mrb[92].mxu0 %vm1259_vm0, %v5866_v5 }
  0xc1   :  { %v6552_v15 = vpop.permute.xlu0 %535  ;;  %5773 = vmatprep.mubr.msk.bf16.mxu0 %vm1259_vm0, %v5867_v10 }
  0xc2   :  { %v6554_v18 = vpop.permute.xlu1 %540  ;;  %735 = vperm.xlu0 %5808, %v253_v13   ;;  %v5873_v13 = vld [vmem:[%s8173_s1 + $0x1b0] sm:$0xff]  }
  0xc3   :  { %740 = vperm.xlu1 %5809, %v254_v14   ;;  %v287_v14 = vld [vmem:[%s8171_s2 + $0x3d0] sm:$0xff] }
  0xc5   :  { %v6566_v24 = vpop.permute.xlu0 %455 }
  0xc6   :  { %v6568_v25 = vpop.permute.xlu1 %460  ;;  %655 = vperm.xlu0 %5808, %v237_v19   ;;  %v288_v19 = vld [vmem:[%s8171_s2 + $0x3d8] sm:$0xff] }
  0xc7   :  { %660 = vperm.xlu1 %5809, %v238_v20  }
  0xc8   :  { %5774 = vmatmul.mubr.msk.bf16.gmra.mrb[96].mxu0 %vm1259_vm0, %v5868_v23 }
  0xc9   :  { %v6580_v33 = vpop.permute.xlu0 %545  ;;  %5777 = vmatprep.mubr.msk.bf16.mxu0 %vm1259_vm0, %v5869_v28 }
  0xca   :  { %v6582_v34 = vpop.permute.xlu1 %550  ;;  %895 = vperm.xlu0 %5808, %v285_v29   ;;  %v271_v29 = vld [vmem:[%s8171_s2 + $0x350] sm:$0xff] }
  0xcb   :  { %900 = vperm.xlu1 %5809, %v286_v30   ;;  %v272_v30 = vld [vmem:[%s8171_s2 + $0x358] sm:$0xff] }
  0xcd   :  { %v6594_v43 = vpop.permute.xlu0 %465 }
  0xce   :  { %v6596_v44 = vpop.permute.xlu1 %470  ;;  %815 = vperm.xlu0 %5808, %v269_v36  }
  0xcf   :  { %820 = vperm.xlu1 %5809, %v270_v40  }
  0xd0   :  { %5778 = vmatmul.mubr.msk.bf16.gmra.mrb[100].mxu0 %vm1259_vm0, %v5870_v42  ;;  %v5874_v42 = vld [vmem:[%s8173_s1 + $0x1b8] sm:$0xff]  }
  0xd1   :  { %v6608_v58 = vpop.permute.xlu0 %555  ;;  %5781 = vmatprep.mubr.msk.bf16.mxu0 %vm1259_vm0, %v5871_v49 }
  0xd2   :  { %8181 = vst [vmem:[#allocation5_spill] sm:$0xff] %v6608_v58  ;;  %v6610_v59 = vpop.permute.xlu1 %560  ;;  %745 = vperm.xlu0 %5808, %v255_v52  }
  0xd3   :  { %8182 = vst [vmem:[#allocation6_spill] sm:$0xff] %v6610_v59  ;;  %750 = vperm.xlu1 %5809, %v256_v53  }
  0xd5   :  { %v6622_v5 = vpop.permute.xlu0 %475 }
  0xd6   :  { %v6624_v10 = vpop.permute.xlu1 %480  ;;  %665 = vperm.xlu0 %5808, %v239_v62  }
  0xd7   :  { %670 = vperm.xlu1 %5809, %v240_v3  }
  0xd8   :  { %5782 = vmatmul.mubr.msk.bf16.gmra.mrb[104].mxu0 %vm1259_vm0, %v5872_v4 }
  0xd9   :  { %v6636_v20 = vpop.permute.xlu0 %565  ;;  %5785 = vmatprep.mubr.msk.bf16.mxu0 %vm1259_vm0, %v5873_v13 }
  0xda   :  { %v6638_v23 = vpop.permute.xlu1 %570  ;;  %905 = vperm.xlu0 %5808, %v287_v14   ;;  %v258_v14 = vld [vmem:[%s8171_s2 + $0x2e8] sm:$0xff] }
  0xdb   :  { %8183 = vst [vmem:[#allocation7_spill] sm:$0xff] %v6638_v23  ;;  %910 = vperm.xlu1 %5809, %v288_v19   ;;  %v5679_v28 = vpop.f32.mrb[0].mxu0 }
  0xdc   :  { %v1495_v36 = vadd.f32 %v5679_v28, %v6356_v60  ;;  %v1486_v40 = vpop.f32.mrb[1].mxu0  ;;  %v257_v60 = vld [vmem:[%s8171_s2 + $0x2e0] sm:$0xff] }
  0xdd   :  { %v1487_v49 = vadd.f32 %v1486_v40, %v6316_v46  ;;  %v6652_v52 = vpop.permute.xlu0 %485  ;;  %v5680_v62 = vpop.f32.mrb[2].mxu0 }
  0xde   :  { %v6654_v53 = vpop.permute.xlu1 %490  ;;  %825 = vperm.xlu0 %5808, %v271_v29   ;;  %v2127_v3 = vmul.f32 0.2, %v1495_v36  ;;  %v1498_v4 = vadd.f32 %v5680_v62, %v6358_v61  ;;  %v1489_v13 = vpop.f32.mrb[3].mxu0  ;;  %vm1999_vm1 = vcmp.ge.f32.partialorder %v1495_v36, 0.0 }
  0xdf   :  { %830 = vperm.xlu1 %5809, %v272_v30   ;;  %v2125_v46 = vmul.f32 0.2, %v1487_v49  ;;  %v1490_v19 = vadd.f32 %v1489_v13, %v6330_v51  ;;  %vm1997_vm2 = vcmp.ge.f32.partialorder %v1487_v49, 0.0  ;;  %v241_v51 = vld [vmem:[%s8171_s2 + $0x260] sm:$0xff] }
  0xe0   :  { %5786 = vmatmul.mubr.msk.bf16.gmra.mrb[108].mxu0 %vm1259_vm0, %v5874_v42  ;;  %vm2000_vm3 = vcmp.ge.f32.partialorder %v1498_v4, 0.0  ;;  %v2128_v28 = vmul.f32 0.2, %v1498_v4  ;;  %v2255_v40 = vsel %vm1999_vm1, %v1495_v36, %v2127_v3  ;;  %v242_v42 = vld [vmem:[%s8171_s2 + $0x268] sm:$0xff] }
  0xe1   :  { %v6665_v29 = vpop.permute.xlu0 %575  ;;  %vm1998_vm4 = vcmp.ge.f32.partialorder %v1490_v19, 0.0  ;;  %v2126_v30 = vmul.f32 0.2, %v1490_v19  ;;  %v2253_v13 = vsel %vm1997_vm2, %v1487_v49, %v2125_v46 }
  0xe2   :  { %8184 = vst [vmem:[#allocation8_spill] sm:$0xff] %v6665_v29  ;;  %v6667_v61 = vpop.permute.xlu1 %580  ;;  %755 = vperm.xlu0 %5808, %v257_v60   ;;  %v2256_v62 = vsel %vm2000_vm3, %v1498_v4, %v2128_v28 }
  0xe3   :  { %8185 = vst [vmem:[#allocation9_spill] sm:$0xff] %v6667_v61  ;;  %760 = vperm.xlu1 %5809, %v258_v14   ;;  %v5683_v41 = vpop.f32.mrb[4].mxu0  ;;  %v2382_v29 = vpack.c.bf16 %v2256_v62, %v2255_v40  ;;  %v2254_v59 = vsel %vm1998_vm4, %v1490_v19, %v2126_v30 }
  0xe4   :  { %v1511_v61 = vadd.f32 %v5683_v41, %v6412_v16  ;;  %v1502_v23 = vpop.f32.mrb[5].mxu0  ;;  %v2381_v60 = vpack.c.bf16 %v2254_v59, %v2253_v13  ;;  %v289_v16 = vld [vmem:[%s8171_s2 + $0x3e0] sm:$0xff] }
  0xe5   :  { %v1503_v36 = vadd.f32 %v1502_v23, %v6384_v6  ;;  %v6677_v3 = vpop.permute.xlu0 %495  ;;  %2447 = vst.msk [vmem:[#allocation2 + $0x8] sm:$0xff] %vm2445_vm5, %v2382_v29  ;;  %v5684_v14 = vpop.f32.mrb[6].mxu0  ;;  %v290_v6 = vld [vmem:[%s8171_s2 + $0x3e8] sm:$0xff] }
  0xe6   :  { %v6679_v4 = vpop.permute.xlu1 %500  ;;  %675 = vperm.xlu0 %5808, %v241_v51   ;;  %2446 = vst.msk [vmem:[#allocation2] sm:$0xff] %vm2445_vm5, %v2381_v60  ;;  %v2131_v49 = vmul.f32 0.2, %v1511_v61  ;;  %v1514_v46 = vadd.f32 %v5684_v14, %v6414_v17  ;;  %v1505_v19 = vpop.f32.mrb[7].mxu0  ;;  %vm2003_vm6 = vcmp.ge.f32.partialorder %v1511_v61, 0.0  ;;  %v273_v51 = vld [vmem:[%s8171_s2 + $0x360] sm:$0xff] }
  0xe7   :  { %680 = vperm.xlu1 %5809, %v242_v42   ;;  %v2129_v41 = vmul.f32 0.2, %v1503_v36  ;;  %v1506_v59 = vadd.f32 %v1505_v19, %v6386_v7  ;;  %vm2001_vm7 = vcmp.ge.f32.partialorder %v1503_v36, 0.0  ;;  %v274_v7 = vld [vmem:[%s8171_s2 + $0x368] sm:$0xff] }
  0xe8   :  { %vm2004_vm8 = vcmp.ge.f32.partialorder %v1514_v46, 0.0  ;;  %v2132_v23 = vmul.f32 0.2, %v1514_v46  ;;  %v2259_v30 = vsel %vm2003_vm6, %v1511_v61, %v2131_v49 }
  0xe9   :  { %v6691_v28 = vpop.permute.xlu0 %585  ;;  %vm2002_vm9 = vcmp.ge.f32.partialorder %v1506_v59, 0.0  ;;  %v2130_v17 = vmul.f32 0.2, %v1506_v59  ;;  %v2257_v42 = vsel %vm2001_vm7, %v1503_v36, %v2129_v41 }
  0xea   :  { %8186 = vst [vmem:[#allocation10_spill] sm:$0xff] %v6691_v28  ;;  %v6693_v29 = vpop.permute.xlu1 %590  ;;  %915 = vperm.xlu0 %5808, %v289_v16   ;;  %v2260_v40 = vsel %vm2004_vm8, %v1514_v46, %v2132_v23 }
  0xeb   :  { %8187 = vst [vmem:[#allocation11_spill] sm:$0xff] %v6693_v29  ;;  %920 = vperm.xlu1 %5809, %v290_v6   ;;  %v5687_v62 = vpop.f32.mrb[8].mxu0  ;;  %v2384_v13 = vpack.c.bf16 %v2260_v40, %v2259_v30  ;;  %v2258_v60 = vsel %vm2002_vm9, %v1506_v59, %v2130_v17  ;;  %v6708_v6 = vpop.f32.mrb[0].mxu1  ;;  %v260_v59 = vld [vmem:[%s8171_s2 + $0x2f8] sm:$0xff] }
  0xec   :  { %v1527_v14 = vadd.f32 %v5687_v62, %v6478_v38  ;;  %v1518_v19 = vpop.f32.mrb[9].mxu0  ;;  %v2383_v29 = vpack.c.bf16 %v2258_v60, %v2257_v42  ;;  %v6718_v23 = vpop.f32.mrb[1].mxu1 }
  0xed   :  { %v1519_v16 = vadd.f32 %v1518_v19, %v6440_v26  ;;  %v6703_v61 = vpop.permute.xlu0 %505  ;;  %2449 = vst.msk [vmem:[#allocation2 + $0x18] sm:$0xff] %vm2445_vm5, %v2384_v13  ;;  %v5688_v46 = vpop.f32.mrb[10].mxu0  ;;  %v259_v26 = vld [vmem:[%s8171_s2 + $0x2f0] sm:$0xff]  ;;  %v244_v19 = vld [vmem:[%s8171_s2 + $0x278] sm:$0xff] }
  0xee   :  { %v6705_v49 = vpop.permute.xlu1 %510  ;;  %835 = vperm.xlu0 %5808, %v273_v51   ;;  %2448 = vst.msk [vmem:[#allocation2 + $0x10] sm:$0xff] %vm2445_vm5, %v2383_v29  ;;  %v2135_v36 = vmul.f32 0.2, %v1527_v14  ;;  %v1530_v38 = vadd.f32 %v5688_v46, %v6480_v39  ;;  %v1521_v41 = vpop.f32.mrb[11].mxu0  ;;  %vm2007_vm10 = vcmp.ge.f32.partialorder %v1527_v14, 0.0 }
  0xef   :  { %840 = vperm.xlu1 %5809, %v274_v7   ;;  %v2133_v17 = vmul.f32 0.2, %v1519_v16  ;;  %v1522_v30 = vadd.f32 %v1521_v41, %v6442_v27  ;;  %v6721_v40 = vpop.f32.mrb[2].mxu1  ;;  %vm2005_vm11 = vcmp.ge.f32.partialorder %v1519_v16, 0.0  ;;  %v243_v27 = vld [vmem:[%s8171_s2 + $0x270] sm:$0xff] }
  0xf0   :  { %vm2008_vm12 = vcmp.ge.f32.partialorder %v1530_v38, 0.0  ;;  %v2136_v39 = vmul.f32 0.2, %v1530_v38  ;;  %v6727_v7 = vpop.f32.mrb[3].mxu1  ;;  %v2263_v42 = vsel %vm2007_vm10, %v1527_v14, %v2135_v36 }
  0xf1   :  { %v6723_v29 = vpop.permute.xlu0 %595  ;;  %vm2006_vm13 = vcmp.ge.f32.partialorder %v1522_v30, 0.0  ;;  %v2134_v51 = vmul.f32 0.2, %v1522_v30  ;;  %v2261_v46 = vsel %vm2005_vm11, %v1519_v16, %v2133_v17 }
  0xf2   :  { %8188 = vst [vmem:[#allocation12_spill] sm:$0xff] %v6723_v29  ;;  %v6725_v62 = vpop.permute.xlu1 %600  ;;  %765 = vperm.xlu0 %5808, %v259_v26   ;;  %v2264_v13 = vsel %vm2008_vm12, %v1530_v38, %v2136_v39 }
  0xf3   :  { %8189 = vst [vmem:[#allocation13_spill] sm:$0xff] %v6725_v62  ;;  %770 = vperm.xlu1 %5809, %v260_v59   ;;  %v5691_v60 = vpop.f32.mrb[12].mxu0  ;;  %v2386_v41 = vpack.c.bf16 %v2264_v13, %v2263_v42  ;;  %v2262_v62 = vsel %vm2006_vm13, %v1522_v30, %v2134_v51 }
  0xf4   :  { %v1543_v29 = vadd.f32 %v5691_v60, %v6538_v8  ;;  %v1534_v26 = vpop.f32.mrb[13].mxu0  ;;  %v2385_v59 = vpack.c.bf16 %v2262_v62, %v2261_v46  ;;  %v291_v8 = vld [vmem:[%s8171_s2 + $0x3f0] sm:$0xff] }
  0xf5   :  { %v1535_v28 = vadd.f32 %v1534_v26, %v6510_v54  ;;  %v6737_v14 = vpop.permute.xlu0 %515  ;;  %2451 = vst.msk [vmem:[#allocation2 + $0x28] sm:$0xff] %vm2445_vm5, %v2386_v41  ;;  %v5692_v38 = vpop.f32.mrb[14].mxu0  ;;  %v292_v54 = vld [vmem:[%s8171_s2 + $0x3f8] sm:$0xff]  ;;  %v275_v46 = vld [vmem:[%s8171_s2 + $0x370] sm:$0xff]  ;;  %v14_v41 = vstv %s8175_s8 }
  0xf6   :  { %v6739_v36 = vpop.permute.xlu1 %520  ;;  %685 = vperm.xlu0 %5808, %v243_v27   ;;  %2450 = vst.msk [vmem:[#allocation2 + $0x20] sm:$0xff] %vm2445_vm5, %v2385_v59  ;;  %v2139_v16 = vmul.f32 0.2, %v1543_v29  ;;  %v1546_v17 = vadd.f32 %v5692_v38, %v6540_v9  ;;  %v1537_v30 = vpop.f32.mrb[15].mxu0  ;;  %vm2011_vm14 = vcmp.ge.f32.partialorder %v1543_v29, 0.0 }
  0xf7   :  { %690 = vperm.xlu1 %5809, %v244_v19   ;;  %v2137_v39 = vmul.f32 0.2, %v1535_v28  ;;  %v1538_v62 = vadd.f32 %v1537_v30, %v6512_v57  ;;  %vm2009_vm15 = vcmp.ge.f32.partialorder %v1535_v28, 0.0  ;;  %v276_v57 = vld [vmem:[%s8171_s2 + $0x378] sm:$0xff]  ;;  %15 = vst [vmem:[#allocation4] sm:$0x1] %v14_v41 }
  0xf8   :  { %vm2012_vm0 = vcmp.ge.f32.partialorder %v1546_v17, 0.0  ;;  %v2140_v51 = vmul.f32 0.2, %v1546_v17  ;;  %v2267_v60 = vsel %vm2011_vm14, %v1543_v29, %v2139_v16 }
  0xf9   :  { %v6751_v42 = vpop.permute.xlu0 %605  ;;  %vm2010_vm1 = vcmp.ge.f32.partialorder %v1538_v62, 0.0  ;;  %v2138_v9 = vmul.f32 0.2, %v1538_v62  ;;  %v2265_v26 = vsel %vm2009_vm15, %v1535_v28, %v2137_v39 }
  0xfa   :  { %8190 = vst [vmem:[#allocation14_spill] sm:$0xff] %v6751_v42  ;;  %v6753_v13 = vpop.permute.xlu1 %610  ;;  %925 = vperm.xlu0 %5808, %v291_v8   ;;  %v2268_v27 = vsel %vm2012_vm0, %v1546_v17, %v2140_v51  ;;  %v6766_v17 = vpop.f32.mrb[4].mxu1 }
  0xfb   :  { %8191 = vst [vmem:[#allocation15_spill] sm:$0xff] %v6753_v13  ;;  %930 = vperm.xlu1 %5809, %v292_v54   ;;  %v5695_v19 = vpop.f32.mrb[16].mxu0  ;;  %v2388_v59 = vpack.c.bf16 %v2268_v27, %v2267_v60  ;;  %v2266_v38 = vsel %vm2010_vm1, %v1538_v62, %v2138_v9  ;;  %v6774_v28 = vpop.f32.mrb[5].mxu1  ;;  %v2719_v9 = vld [vmem:[%s8176_s4 + $0x88] sm:$0xff] }
  0xfc   :  { %v1559_v29 = vadd.f32 %v5695_v19, %v6342_v55  ;;  %v1550_v16 = vpop.f32.mrb[17].mxu0  ;;  %v2387_v30 = vpack.c.bf16 %v2266_v38, %v2265_v26  ;;  %v6784_v60 = vpop.f32.mrb[6].mxu1 }
  0xfd   :  { %v1551_v8 = vadd.f32 %v1550_v16, %v6314_v45  ;;  %v6769_v54 = vpop.permute.xlu0 %525  ;;  %2453 = vst.msk [vmem:[#allocation2 + $0x38] sm:$0xff] %vm2445_vm5, %v2388_v59  ;;  %v5696_v13 = vpop.f32.mrb[18].mxu0  ;;  %v2718_v45 = vld [vmem:[%s8176_s4 + $0x80] sm:$0xff]  ;;  %v2703_v16 = vld [vmem:[%s8176_s4 + $0x8] sm:$0xff] }
  0xfe   :  { %v6771_v51 = vpop.permute.xlu1 %530  ;;  %845 = vperm.xlu0 %5808, %v275_v46   ;;  %2452 = vst.msk [vmem:[#allocation2 + $0x30] sm:$0xff] %vm2445_vm5, %v2387_v30  ;;  %v2143_v55 = vmul.f32 0.2, %v1559_v29  ;;  %v1562_v39 = vadd.f32 %v5696_v13, %v6344_v56  ;;  %v1553_v62 = vpop.f32.mrb[19].mxu0  ;;  %vm2015_vm2 = vcmp.ge.f32.partialorder %v1559_v29, 0.0 }
  0xff   :  { %850 = vperm.xlu1 %5809, %v276_v57   ;;  %v2141_v27 = vmul.f32 0.2, %v1551_v8  ;;  %v1554_v19 = vadd.f32 %v1553_v62, %v6328_v50  ;;  %v6787_v46 = vpop.f32.mrb[7].mxu1  ;;  %vm2013_vm3 = vcmp.ge.f32.partialorder %v1551_v8, 0.0  ;;  %v2702_v50 = vld [vmem:[%s8176_s4] sm:$0xff] }
 0x100   :  { %vm2016_vm4 = vcmp.ge.f32.partialorder %v1562_v39, 0.0  ;;  %v2144_v56 = vmul.f32 0.2, %v1562_v39  ;;  %v2271_v26 = vsel %vm2015_vm2, %v1559_v29, %v2143_v55 }
 0x101   :  { %v6789_v13 = vpop.permute.xlu0 %695  ;;  %vm2014_vm6 = vcmp.ge.f32.partialorder %v1554_v19, 0.0  ;;  %v2142_v41 = vmul.f32 0.2, %v1554_v19  ;;  %v2269_v30 = vsel %vm2013_vm3, %v1551_v8, %v2141_v27  ;;  %v2720_v8 = vld [vmem:[%s8176_s4 + $0x90] sm:$0xff] }
 0x102   :  { %8192 = vst [vmem:[#allocation16_spill] sm:$0xff] %v6789_v13  ;;  %v6791_v57 = vpop.permute.xlu1 %700  ;;  %2816 = vperm.xlu0 %5808, %v2718_v45   ;;  %v2272_v59 = vsel %vm2016_vm4, %v1562_v39, %v2144_v56 }
 0x103   :  { %8193 = vst [vmem:[#allocation17_spill] sm:$0xff] %v6791_v57  ;;  %2821 = vperm.xlu1 %5809, %v2719_v9   ;;  %v5699_v38 = vpop.f32.mrb[20].mxu0  ;;  %v2390_v62 = vpack.c.bf16 %v2272_v59, %v2271_v26  ;;  %v2270_v13 = vsel %vm2014_vm6, %v1554_v19, %v2142_v41 }
 0x104   :  { %v1575_v57 = vadd.f32 %v5699_v38, %v6398_v11  ;;  %v1566_v42 = vpop.f32.mrb[21].mxu0  ;;  %v2389_v58 = vpack.c.bf16 %v2270_v13, %v2269_v30  ;;  %v2705_v30 = vld [vmem:[%s8176_s4 + $0x18] sm:$0xff] }
 0x105   :  { %v1567_v45 = vadd.f32 %v1566_v42, %v6370_v1  ;;  %v6801_v29 = vpop.permute.xlu0 %615  ;;  %2455 = vst.msk [vmem:[#allocation2 + $0x48] sm:$0xff] %vm2445_vm5, %v2390_v62  ;;  %v5700_v39 = vpop.f32.mrb[22].mxu0  ;;  %v2721_v42 = vld [vmem:[%s8176_s4 + $0x98] sm:$0xff] }
 0x106   :  { %v6803_v55 = vpop.permute.xlu1 %620  ;;  %2736 = vperm.xlu0 %5808, %v2702_v50   ;;  %2454 = vst.msk [vmem:[#allocation2 + $0x40] sm:$0xff] %vm2445_vm5, %v2389_v58  ;;  %v2147_v11 = vmul.f32 0.2, %v1575_v57  ;;  %v1578_v27 = vadd.f32 %v5700_v39, %v6400_v12  ;;  %v1569_v1 = vpop.f32.mrb[23].mxu0  ;;  %vm2019_vm7 = vcmp.ge.f32.partialorder %v1575_v57, 0.0 }
 0x107   :  { %2741 = vperm.xlu1 %5809, %v2703_v16   ;;  %v2145_v9 = vmul.f32 0.2, %v1567_v45  ;;  %vm2017_vm8 = vcmp.ge.f32.partialorder %v1567_v45, 0.0  ;;  %v1570_v19 = vadd.f32 %v1569_v1, %v6372_v2  ;;  %v2704_v2 = vld [vmem:[%s8176_s4 + $0x10] sm:$0xff] }
 0x108   :  { %vm2020_vm9 = vcmp.ge.f32.partialorder %v1578_v27, 0.0  ;;  %v2148_v56 = vmul.f32 0.2, %v1578_v27  ;;  %v2275_v12 = vsel %vm2019_vm7, %v1575_v57, %v2147_v11 }
 0x109   :  { %v856_v13 = vpop.permute.xlu0 %855  ;;  %vm2018_vm10 = vcmp.ge.f32.partialorder %v1570_v19, 0.0  ;;  %v2146_v26 = vmul.f32 0.2, %v1570_v19  ;;  %v2273_v38 = vsel %vm2017_vm8, %v1567_v45, %v2145_v9 }
 0x10a   :  { %v861_v41 = vpop.permute.xlu1 %860  ;;  %v1935_v58 = vadd.f32 %v6718_v23, %v856_v13  ;;  %2826 = vperm.xlu0 %5808, %v2720_v8   ;;  %v2276_v50 = vsel %vm2020_vm9, %v1578_v27, %v2148_v56  ;;  %v2722_v13 = vld [vmem:[%s8176_s4 + $0xa0] sm:$0xff] }
 0x10b   :  { %v1938_v59 = vadd.f32 %v6727_v7, %v861_v41  ;;  %2831 = vperm.xlu1 %5809, %v2721_v42   ;;  %v5703_v16 = vpop.f32.mrb[24].mxu0  ;;  %v2392_v62 = vpack.c.bf16 %v2276_v50, %v2275_v12  ;;  %v2274_v39 = vsel %vm2018_vm10, %v1570_v19, %v2146_v26  ;;  %v6823_v7 = vpop.f32.mrb[8].mxu1 }
 0x10c   :  { %vm2109_vm11 = vcmp.ge.f32.partialorder %v1935_v58, 0.0  ;;  %v2237_v23 = vmul.f32 0.2, %v1935_v58  ;;  %v1582_v1 = vpop.f32.mrb[25].mxu0  ;;  %v2391_v8 = vpack.c.bf16 %v2274_v39, %v2273_v38  ;;  %v1591_v45 = vadd.f32 %v5703_v16, %v6454_v31  ;;  %v6835_v41 = vpop.f32.mrb[9].mxu1 }
 0x10d   :  { %vm2110_vm12 = vcmp.ge.f32.partialorder %v1938_v59, 0.0  ;;  %v2238_v57 = vmul.f32 0.2, %v1938_v59  ;;  %v6826_v11 = vpop.permute.xlu0 %775  ;;  %2457 = vst.msk [vmem:[#allocation2 + $0x58] sm:$0xff] %vm2445_vm5, %v2392_v62  ;;  %v1583_v42 = vadd.f32 %v1582_v1, %v6426_v21  ;;  %v5704_v19 = vpop.f32.mrb[26].mxu0  ;;  %v2646_v56 = vld [vmem:[#allocation2 + $0x40] sm:$0xff] }
 0x10e   :  { %v6828_v9 = vpop.permute.xlu1 %780  ;;  %v2365_v27 = vsel %vm2109_vm11, %v1935_v58, %v2237_v23  ;;  %2746 = vperm.xlu0 %5808, %v2704_v2   ;;  %2456 = vst.msk [vmem:[#allocation2 + $0x50] sm:$0xff] %vm2445_vm5, %v2391_v8  ;;  %v2151_v26 = vmul.f32 0.2, %v1591_v45  ;;  %v1594_v12 = vadd.f32 %v5704_v19, %v6456_v32  ;;  %v1585_v38 = vpop.f32.mrb[27].mxu0  ;;  %5163 = vmatprep.subr.bf16.mxu1 %v2646_v56  ;;  %v2638_v58 = vld [vmem:[#allocation2] sm:$0xff]  ;;  %v2723_v21 = vld [vmem:[%s8176_s4 + $0xa8] sm:$0xff] }
 0x10f   :  { %2751 = vperm.xlu1 %5809, %v2705_v30   ;;  %v2366_v31 = vsel %vm2110_vm12, %v1938_v59, %v2238_v57  ;;  %v6842_v50 = vpop.f32.mrb[10].mxu1  ;;  %vm2023_vm13 = vcmp.ge.f32.partialorder %v1591_v45, 0.0  ;;  %v2149_v2 = vmul.f32 0.2, %v1583_v42  ;;  %v1586_v30 = vadd.f32 %v1585_v38, %v6428_v22  ;;  %5164 = vmatpush3.bf16.msra.mxu1 %v2638_v58  ;;  %v2647_v62 = vld [vmem:[#allocation2 + $0x48] sm:$0xff]  ;;  %v2706_v19 = vld [vmem:[%s8176_s4 + $0x20] sm:$0xff] }
 0x110   :  { %v2437_v16 = vpack.c.bf16 %v2366_v31, %v2365_v27  ;;  %v6845_v59 = vpop.f32.mrb[11].mxu1  ;;  %vm2021_vm14 = vcmp.ge.f32.partialorder %v1583_v42, 0.0  ;;  %vm2024_vm15 = vcmp.ge.f32.partialorder %v1594_v12, 0.0  ;;  %v2152_v32 = vmul.f32 0.2, %v1594_v12  ;;  %5165 = vmatprep.subr.bf16.mxu1 %v2647_v62  ;;  %v2639_v27 = vld [vmem:[#allocation2 + $0x8] sm:$0xff] }
 0x111   :  { %v6847_v39 = vpop.permute.xlu0 %705  ;;  %vm2022_vm0 = vcmp.ge.f32.partialorder %v1586_v30, 0.0  ;;  %v2150_v1 = vmul.f32 0.2, %v1586_v30  ;;  %v2279_v22 = vsel %vm2023_vm13, %v1591_v45, %v2151_v26  ;;  %v2707_v56 = vld [vmem:[%s8176_s4 + $0x28] sm:$0xff]  ;;  %v2277_v31 = vsel %vm2021_vm14, %v1583_v42, %v2149_v2  ;;  %v2724_v42 = vld [vmem:[%s8176_s4 + $0xb0] sm:$0xff] }
 0x112   :  { %v6849_v23 = vpop.permute.xlu1 %710  ;;  %2502 = vst.msk [vmem:[#allocation2 + $0x1c0] sm:$0xff] %vm2445_vm5, %v2437_v16  ;;  %2836 = vperm.xlu0 %5808, %v2722_v13   ;;  %v2280_v8 = vsel %vm2024_vm15, %v1594_v12, %v2152_v32 }
 0x113   :  { %2841 = vperm.xlu1 %5809, %v2723_v21   ;;  %v5707_v57 = vpop.f32.mrb[28].mxu0  ;;  %v2394_v38 = vpack.c.bf16 %v2280_v8, %v2279_v22  ;;  %v2278_v58 = vsel %vm2022_vm0, %v1586_v30, %v2150_v1  ;;  %5166 = vmatpush3.bf16.msra.mxu1 %v2639_v27  ;;  %v2640_v22 = vld [vmem:[#allocation2 + $0x10] sm:$0xff] }
 0x114   :  { %v1607_v13 = vadd.f32 %v5707_v57, %v6524_v63  ;;  %v1598_v21 = vpop.f32.mrb[29].mxu0  ;;  %v2393_v45 = vpack.c.bf16 %v2278_v58, %v2277_v31  ;;  %v2725_v63 = vld [vmem:[%s8176_s4 + $0xb8] sm:$0xff] }
 0x115   :  { %v1599_v26 = vadd.f32 %v1598_v21, %v6496_v47  ;;  %v6862_v12 = vpop.permute.xlu0 %625  ;;  %2459 = vst.msk [vmem:[#allocation2 + $0x68] sm:$0xff] %vm2445_vm5, %v2394_v38  ;;  %v5708_v62 = vpop.f32.mrb[30].mxu0  ;;  %v2648_v32 = vld [vmem:[#allocation2 + $0x50] sm:$0xff]  ;;  %v2649_v57 = vld [vmem:[#allocation2 + $0x58] sm:$0xff] }
 0x116   :  { %v6864_v16 = vpop.permute.xlu1 %630  ;;  %2756 = vperm.xlu0 %5808, %v2706_v19   ;;  %2458 = vst.msk [vmem:[#allocation2 + $0x60] sm:$0xff] %vm2445_vm5, %v2393_v45  ;;  %v2155_v47 = vmul.f32 0.2, %v1607_v13  ;;  %v1610_v30 = vadd.f32 %v5708_v62, %v6526_v0  ;;  %v1601_v1 = vpop.f32.mrb[31].mxu0  ;;  %5167 = vmatprep.subr.bf16.mxu1 %v2648_v32  ;;  %vm2027_vm1 = vcmp.ge.f32.partialorder %v1607_v13, 0.0  ;;  %v2641_v62 = vld [vmem:[#allocation2 + $0x18] sm:$0xff] }
 0x117   :  { %2761 = vperm.xlu1 %5809, %v2707_v56   ;;  %v2153_v2 = vmul.f32 0.2, %v1599_v26  ;;  %vm2025_vm2 = vcmp.ge.f32.partialorder %v1599_v26, 0.0  ;;  %v1602_v8 = vadd.f32 %v1601_v1, %v6498_v48  ;;  %5168 = vmatpush3.bf16.msra.mxu1 %v2640_v22  ;;  %v2708_v32 = vld [vmem:[%s8176_s4 + $0x30] sm:$0xff]  ;;  %v2709_v1 = vld [vmem:[%s8176_s4 + $0x38] sm:$0xff] }
 0x118   :  { %vm2028_vm3 = vcmp.ge.f32.partialorder %v1610_v30, 0.0  ;;  %v2156_v27 = vmul.f32 0.2, %v1610_v30  ;;  %5169 = vmatprep.subr.bf16.mxu1 %v2649_v57  ;;  %v2283_v58 = vsel %vm2027_vm1, %v1607_v13, %v2155_v47 }
 0x119   :  { %v866_v19 = vpop.permute.xlu0 %865  ;;  %vm2026_vm4 = vcmp.ge.f32.partialorder %v1602_v8, 0.0  ;;  %v2154_v31 = vmul.f32 0.2, %v1602_v8  ;;  %v2281_v21 = vsel %vm2025_vm2, %v1599_v26, %v2153_v2 }
 0x11a   :  { %v871_v56 = vpop.permute.xlu1 %870  ;;  %v1943_v38 = vadd.f32 %v6708_v6, %v866_v19  ;;  %2846 = vperm.xlu0 %5808, %v2724_v42   ;;  %v2284_v48 = vsel %vm2028_vm3, %v1610_v30, %v2156_v27  ;;  %v6886_v6 = vpop.f32.mrb[12].mxu1 }
 0x11b   :  { %v1946_v0 = vadd.f32 %v6721_v40, %v871_v56  ;;  %2851 = vperm.xlu1 %5809, %v2725_v63   ;;  %v5711_v45 = vpop.f32.mrb[32].mxu0  ;;  %v2396_v40 = vpack.c.bf16 %v2284_v48, %v2283_v58  ;;  %v2282_v42 = vsel %vm2026_vm4, %v1602_v8, %v2154_v31  ;;  %5170 = vmatpush3.bf16.msra.mxu1 %v2641_v62  ;;  %v6888_v26 = vpop.f32.mrb[13].mxu1  ;;  %v2726_v31 = vld [vmem:[%s8176_s4 + $0xc0] sm:$0xff] }
 0x11c   :  { %vm2111_vm6 = vcmp.ge.f32.partialorder %v1943_v38, 0.0  ;;  %v2239_v63 = vmul.f32 0.2, %v1943_v38  ;;  %v1614_v13 = vpop.f32.mrb[33].mxu0  ;;  %v2395_v47 = vpack.c.bf16 %v2282_v42, %v2281_v21  ;;  %v1623_v30 = vadd.f32 %v5711_v45, %v6594_v43  ;;  %v6900_v58 = vpop.f32.mrb[14].mxu1  ;;  %v2651_v42 = vld [vmem:[#allocation2 + $0x68] sm:$0xff] }
 0x11d   :  { %vm2112_vm7 = vcmp.ge.f32.partialorder %v1946_v0, 0.0  ;;  %v2240_v2 = vmul.f32 0.2, %v1946_v0  ;;  %v6891_v22 = vpop.permute.xlu0 %785  ;;  %2461 = vst.msk [vmem:[#allocation2 + $0x78] sm:$0xff] %vm2445_vm5, %v2396_v40  ;;  %v1615_v8 = vadd.f32 %v1614_v13, %v6566_v24  ;;  %v5712_v19 = vpop.f32.mrb[34].mxu0  ;;  %v2650_v56 = vld [vmem:[#allocation2 + $0x60] sm:$0xff] }
 0x11e   :  { %v6893_v57 = vpop.permute.xlu1 %790  ;;  %v2367_v27 = vsel %vm2111_vm6, %v1943_v38, %v2239_v63  ;;  %2766 = vperm.xlu0 %5808, %v2708_v32   ;;  %2460 = vst.msk [vmem:[#allocation2 + $0x70] sm:$0xff] %vm2445_vm5, %v2395_v47  ;;  %v2159_v21 = vmul.f32 0.2, %v1623_v30  ;;  %v1626_v48 = vadd.f32 %v5712_v19, %v6596_v44  ;;  %v1617_v45 = vpop.f32.mrb[35].mxu0  ;;  %5171 = vmatprep.subr.bf16.mxu1 %v2650_v56  ;;  %v2642_v38 = vld [vmem:[#allocation2 + $0x20] sm:$0xff]  ;;  %v2727_v24 = vld [vmem:[%s8176_s4 + $0xc8] sm:$0xff] }
 0x11f   :  { %2771 = vperm.xlu1 %5809, %v2709_v1   ;;  %v2368_v43 = vsel %vm2112_vm7, %v1946_v0, %v2240_v2  ;;  %v6907_v62 = vpop.f32.mrb[15].mxu1  ;;  %vm2031_vm8 = vcmp.ge.f32.partialorder %v1623_v30, 0.0  ;;  %v2157_v1 = vmul.f32 0.2, %v1615_v8  ;;  %v1618_v40 = vadd.f32 %v1617_v45, %v6568_v25  ;;  %5172 = vmatpush3.bf16.msra.mxu1 %v2642_v38  ;;  %v2710_v19 = vld [vmem:[%s8176_s4 + $0x40] sm:$0xff]  ;;  %v2711_v56 = vld [vmem:[%s8176_s4 + $0x48] sm:$0xff] }
 0x120   :  { %v2438_v32 = vpack.c.bf16 %v2368_v43, %v2367_v27  ;;  %vm2029_vm9 = vcmp.ge.f32.partialorder %v1615_v8, 0.0  ;;  %vm2032_vm10 = vcmp.ge.f32.partialorder %v1626_v48, 0.0  ;;  %v2160_v0 = vmul.f32 0.2, %v1626_v48  ;;  %5173 = vmatprep.subr.bf16.mxu1 %v2651_v42  ;;  %v2643_v27 = vld [vmem:[#allocation2 + $0x28] sm:$0xff] }
 0x121   :  { %v6910_v44 = vpop.permute.xlu0 %715  ;;  %vm2030_vm11 = vcmp.ge.f32.partialorder %v1618_v40, 0.0  ;;  %v2158_v13 = vmul.f32 0.2, %v1618_v40  ;;  %v2287_v47 = vsel %vm2031_vm8, %v1623_v30, %v2159_v21  ;;  %v2285_v43 = vsel %vm2029_vm9, %v1615_v8, %v2157_v1  ;;  %v2728_v8 = vld [vmem:[%s8176_s4 + $0xd0] sm:$0xff] }
 0x122   :  { %v6912_v63 = vpop.permute.xlu1 %720  ;;  %2503 = vst.msk [vmem:[#allocation2 + $0x1c8] sm:$0xff] %vm2445_vm5, %v2438_v32  ;;  %2856 = vperm.xlu0 %5808, %v2726_v31   ;;  %v2288_v2 = vsel %vm2032_vm10, %v1626_v48, %v2160_v0 }
 0x123   :  { %2861 = vperm.xlu1 %5809, %v2727_v24   ;;  %v5715_v25 = vpop.f32.mrb[36].mxu0  ;;  %v2398_v45 = vpack.c.bf16 %v2288_v2, %v2287_v47  ;;  %v2286_v38 = vsel %vm2030_vm11, %v1618_v40, %v2158_v13  ;;  %5174 = vmatpush3.bf16.msra.mxu1 %v2643_v27  ;;  %v2644_v47 = vld [vmem:[#allocation2 + $0x30] sm:$0xff]  ;;  %v6942_v27 = vld [vmem:[%s8174_s3 + $0x40] sm:$0xff] }
 0x124   :  { %v1639_v31 = vadd.f32 %v5715_v25, %v6652_v52  ;;  %v1630_v24 = vpop.f32.mrb[37].mxu0  ;;  %v2397_v30 = vpack.c.bf16 %v2286_v38, %v2285_v43  ;;  %v2729_v52 = vld [vmem:[%s8176_s4 + $0xd8] sm:$0xff] }
 0x125   :  { %v1631_v21 = vadd.f32 %v1630_v24, %v6622_v5  ;;  %v6925_v48 = vpop.permute.xlu0 %635  ;;  %2463 = vst.msk [vmem:[#allocation2 + $0x88] sm:$0xff] %vm2445_vm5, %v2398_v45  ;;  %v5716_v42 = vpop.f32.mrb[38].mxu0  ;;  %v2652_v0 = vld [vmem:[#allocation2 + $0x70] sm:$0xff]  ;;  %v2653_v25 = vld [vmem:[#allocation2 + $0x78] sm:$0xff] }
 0x126   :  { %v6927_v32 = vpop.permute.xlu1 %640  ;;  %2776 = vperm.xlu0 %5808, %v2710_v19   ;;  %2462 = vst.msk [vmem:[#allocation2 + $0x80] sm:$0xff] %vm2445_vm5, %v2397_v30  ;;  %v2163_v5 = vmul.f32 0.2, %v1639_v31  ;;  %v1642_v40 = vadd.f32 %v5716_v42, %v6654_v53  ;;  %v1633_v13 = vpop.f32.mrb[39].mxu0  ;;  %5175 = vmatprep.subr.bf16.mxu1 %v2652_v0  ;;  %vm2035_vm12 = vcmp.ge.f32.partialorder %v1639_v31, 0.0  ;;  %v6947_v19 = vld [vmem:[%s8174_s3 + $0x60] sm:$0xff] }
 0x127   :  { %2781 = vperm.xlu1 %5809, %v2711_v56   ;;  %v2161_v1 = vmul.f32 0.2, %v1631_v21  ;;  %vm2033_vm13 = vcmp.ge.f32.partialorder %v1631_v21, 0.0  ;;  %v1634_v2 = vadd.f32 %v1633_v13, %v6624_v10  ;;  %5176 = vmatpush3.bf16.msra.mxu1 %v2644_v47  ;;  %v2645_v13 = vld [vmem:[#allocation2 + $0x38] sm:$0xff]  ;;  %v2712_v47 = vld [vmem:[%s8176_s4 + $0x50] sm:$0xff] }
 0x128   :  { %vm2036_vm14 = vcmp.ge.f32.partialorder %v1642_v40, 0.0  ;;  %v2164_v53 = vmul.f32 0.2, %v1642_v40  ;;  %5177 = vmatprep.subr.bf16.mxu1 %v2653_v25  ;;  %v2291_v24 = vsel %vm2035_vm12, %v1639_v31, %v2163_v5  ;;  %v2713_v25 = vld [vmem:[%s8176_s4 + $0x58] sm:$0xff] }
 0x129   :  { %v876_v56 = vpop.permute.xlu0 %875  ;;  %vm2034_vm15 = vcmp.ge.f32.partialorder %v1634_v2, 0.0  ;;  %v2162_v45 = vmul.f32 0.2, %v1634_v2  ;;  %v2289_v30 = vsel %vm2033_vm13, %v1631_v21, %v2161_v1 }
 0x12a   :  { %v881_v43 = vpop.permute.xlu1 %880  ;;  %v1951_v10 = vadd.f32 %v6774_v28, %v876_v56  ;;  %2866 = vperm.xlu0 %5808, %v2728_v8   ;;  %v2292_v42 = vsel %vm2036_vm14, %v1642_v40, %v2164_v53  ;;  %v4963_v28 = vcombine.high %v6942_v27, %v6947_v19 }
 0x12b   :  { %v1954_v38 = vadd.f32 %v6787_v46, %v881_v43  ;;  %2871 = vperm.xlu1 %5809, %v2729_v52   ;;  %v5719_v0 = vpop.f32.mrb[40].mxu0  ;;  %v2400_v46 = vpack.c.bf16 %v2292_v42, %v2291_v24  ;;  %v2290_v8 = vsel %vm2034_vm15, %v1634_v2, %v2162_v45  ;;  %5178 = vmatpush3.bf16.msra.mxu1 %v2645_v13  ;;  %v2730_v2 = vld [vmem:[%s8176_s4 + $0xe0] sm:$0xff] }
 0x12c   :  { %vm2113_vm0 = vcmp.ge.f32.partialorder %v1951_v10, 0.0  ;;  %v2241_v31 = vmul.f32 0.2, %v1951_v10  ;;  %v1646_v21 = vpop.f32.mrb[41].mxu0  ;;  %v2399_v52 = vpack.c.bf16 %v2290_v8, %v2289_v30  ;;  %v1655_v1 = vadd.f32 %v5719_v0, %v6703_v61 }
 0x12d   :  { %vm2114_vm1 = vcmp.ge.f32.partialorder %v1954_v38, 0.0  ;;  %v2242_v5 = vmul.f32 0.2, %v1954_v38  ;;  %v6962_v40 = vpop.permute.xlu0 %795  ;;  %2465 = vst.msk [vmem:[#allocation2 + $0x98] sm:$0xff] %vm2445_vm5, %v2400_v46  ;;  %v1647_v43 = vadd.f32 %v1646_v21, %v6677_v3  ;;  %v5720_v24 = vpop.f32.mrb[42].mxu0  ;;  %v8194_v0 = vcombine.low %v6468_v35, %v6476_v37  ;;  %v2731_v3 = vld [vmem:[%s8176_s4 + $0xe8] sm:$0xff] }
 0x12e   :  { %v6964_v53 = vpop.permute.xlu1 %800  ;;  %v2369_v56 = vsel %vm2113_vm0, %v1951_v10, %v2241_v31  ;;  %2786 = vperm.xlu0 %5808, %v2712_v47   ;;  %2464 = vst.msk [vmem:[#allocation2 + $0x90] sm:$0xff] %vm2445_vm5, %v2399_v52  ;;  %v2167_v61 = vmul.f32 0.2, %v1655_v1  ;;  %v1658_v30 = vadd.f32 %v5720_v24, %v6705_v49  ;;  %v1649_v42 = vpop.f32.mrb[43].mxu0  ;;  %v6982_v10 = vld [vmem:[%s8174_s3 + $0x10] sm:$0xff]  ;;  %vm2039_vm2 = vcmp.ge.f32.partialorder %v1655_v1, 0.0 }
 0x12f   :  { %2791 = vperm.xlu1 %5809, %v2713_v25   ;;  %v2370_v45 = vsel %vm2114_vm1, %v1954_v38, %v2242_v5  ;;  %3567 = vmatmul.mubr.bf16.vlgmr.msra.gmra.mrb[16].mxu1 %v8194_v0  ;;  %v6987_v38 = vld [vmem:[%s8174_s3 + $0x30] sm:$0xff]  ;;  %v2165_v13 = vmul.f32 0.2, %v1647_v43  ;;  %v1650_v35 = vadd.f32 %v1649_v42, %v6679_v4  ;;  %v6993_v37 = vld [vmem:[%s8174_s3 + $0x80] sm:$0xff]  ;;  %vm2037_vm3 = vcmp.ge.f32.partialorder %v1647_v43, 0.0  ;;  %v2715_v24 = vld [vmem:[%s8176_s4 + $0x68] sm:$0xff] }
 0x130   :  { %v2439_v49 = vpack.c.bf16 %v2370_v45, %v2369_v56  ;;  %3574 = vmatprep.mubr.bf16.mxu1 %v4963_v28  ;;  %v6998_v47 = vld [vmem:[%s8174_s3 + $0xa0] sm:$0xff]  ;;  %vm2040_vm4 = vcmp.ge.f32.partialorder %v1658_v30, 0.0  ;;  %v2168_v25 = vmul.f32 0.2, %v1658_v30  ;;  %v4962_v28 = vcombine.low %v6942_v27, %v6947_v19 }
 0x131   :  { %v7000_v46 = vpop.permute.xlu0 %725  ;;  %vm2038_vm6 = vcmp.ge.f32.partialorder %v1650_v35, 0.0  ;;  %v2166_v4 = vmul.f32 0.2, %v1650_v35  ;;  %v2295_v21 = vsel %vm2039_vm2, %v1655_v1, %v2167_v61  ;;  %v2714_v56 = vld [vmem:[%s8176_s4 + $0x60] sm:$0xff]  ;;  %v4959_v27 = vcombine.high %v6982_v10, %v6987_v38 }
 0x132   :  { %v7002_v8 = vpop.permute.xlu1 %730  ;;  %2504 = vst.msk [vmem:[#allocation2 + $0x1d0] sm:$0xff] %vm2445_vm5, %v2439_v49  ;;  %2876 = vperm.xlu0 %5808, %v2730_v2   ;;  %v2296_v52 = vsel %vm2040_vm4, %v1658_v30, %v2168_v25  ;;  %v4971_v2 = vcombine.high %v6993_v37, %v6998_v47  ;;  %v2293_v19 = vsel %vm2037_vm3, %v1647_v43, %v2165_v13  ;;  %v2732_v43 = vld [vmem:[%s8176_s4 + $0xf0] sm:$0xff] }
 0x133   :  { %2881 = vperm.xlu1 %5809, %v2731_v3   ;;  %v5723_v5 = vpop.f32.mrb[44].mxu0  ;;  %v2402_v45 = vpack.c.bf16 %v2296_v52, %v2295_v21  ;;  %v2294_v1 = vsel %vm2038_vm6, %v1650_v35, %v2166_v4  ;;  %3888 = vmatprep.mubr.bf16.mxu0 %v4959_v27  ;;  %v2733_v4 = vld [vmem:[%s8176_s4 + $0xf8] sm:$0xff]  ;;  %v7040_v52 = vld [vmem:[%s8174_s3 + $0xc0] sm:$0xff] }
 0x134   :  { %v1671_v61 = vadd.f32 %v5723_v5, %v6769_v54  ;;  %v1662_v30 = vpop.f32.mrb[45].mxu0  ;;  %v2401_v42 = vpack.c.bf16 %v2294_v1, %v2293_v19 }
 0x135   :  { %v1663_v0 = vadd.f32 %v1662_v30, %v6737_v14  ;;  %v7023_v3 = vpop.permute.xlu0 %645  ;;  %2467 = vst.msk [vmem:[#allocation2 + $0xa8] sm:$0xff] %vm2445_vm5, %v2402_v45  ;;  %v5724_v25 = vpop.f32.mrb[46].mxu0 }
 0x136   :  { %v7025_v49 = vpop.permute.xlu1 %650  ;;  %2796 = vperm.xlu0 %5808, %v2714_v56   ;;  %2466 = vst.msk [vmem:[#allocation2 + $0xa0] sm:$0xff] %vm2445_vm5, %v2401_v42  ;;  %v2171_v54 = vmul.f32 0.2, %v1671_v61  ;;  %v1674_v14 = vadd.f32 %v5724_v25, %v6771_v51  ;;  %v1665_v35 = vpop.f32.mrb[47].mxu0  ;;  %vm2043_vm7 = vcmp.ge.f32.partialorder %v1671_v61, 0.0  ;;  %v7045_v51 = vld [vmem:[%s8174_s3 + $0xe0] sm:$0xff] }
 0x137   :  { %2801 = vperm.xlu1 %5809, %v2715_v24   ;;  %v2169_v13 = vmul.f32 0.2, %v1663_v0  ;;  %3575 = vmatmul.mubr.bf16.gmra.mrb[20].mxu1 %v4962_v28  ;;  %vm2041_vm8 = vcmp.ge.f32.partialorder %v1663_v0, 0.0  ;;  %v1666_v21 = vadd.f32 %v1665_v35, %v6739_v36  ;;  %v4970_v24 = vcombine.low %v6993_v37, %v6998_v47  ;;  %v2716_v42 = vld [vmem:[%s8176_s4 + $0x70] sm:$0xff]  ;;  %v2717_v37 = vld [vmem:[%s8176_s4 + $0x78] sm:$0xff] }
 0x138   :  { %3582 = vmatprep.mubr.bf16.mxu1 %v4971_v2  ;;  %vm2044_vm9 = vcmp.ge.f32.partialorder %v1674_v14, 0.0  ;;  %v2172_v28 = vmul.f32 0.2, %v1674_v14  ;;  %v2299_v19 = vsel %vm2043_vm7, %v1671_v61, %v2171_v54 }
 0x139   :  { %v886_v5 = vpop.permute.xlu0 %885  ;;  %vm2042_vm10 = vcmp.ge.f32.partialorder %v1666_v21, 0.0  ;;  %v2170_v36 = vmul.f32 0.2, %v1666_v21  ;;  %v2297_v45 = vsel %vm2041_vm8, %v1663_v0, %v2169_v13 }
 0x13a   :  { %v891_v56 = vpop.permute.xlu1 %890  ;;  %v1959_v2 = vadd.f32 %v6766_v17, %v886_v5  ;;  %2886 = vperm.xlu0 %5808, %v2732_v43   ;;  %v2300_v1 = vsel %vm2044_vm9, %v1674_v14, %v2172_v28  ;;  %v4979_v17 = vcombine.high %v7040_v52, %v7045_v51 }
 0x13b   :  { %v1962_v27 = vadd.f32 %v6784_v60, %v891_v56  ;;  %2891 = vperm.xlu1 %5809, %v2733_v4   ;;  %v5727_v30 = vpop.f32.mrb[48].mxu0  ;;  %v2404_v60 = vpack.c.bf16 %v2300_v1, %v2299_v19  ;;  %v2298_v47 = vsel %vm2042_vm10, %v1666_v21, %v2170_v36 }
 0x13c   :  { %vm2115_vm11 = vcmp.ge.f32.partialorder %v1959_v2, 0.0  ;;  %v2243_v25 = vmul.f32 0.2, %v1959_v2  ;;  %v1678_v61 = vpop.f32.mrb[49].mxu0  ;;  %v2403_v43 = vpack.c.bf16 %v2298_v47, %v2297_v45  ;;  %v1687_v54 = vadd.f32 %v5727_v30, %v6580_v33  ;;  %v4338_v33 = vld [vmem:[%s8177_s6] sm:$0xff]  ;;  %v4341_v47 = vld [vmem:[%s8177_s6 + $0x18] sm:$0xff] }
 0x13d   :  { %vm2116_vm12 = vcmp.ge.f32.partialorder %v1962_v27, 0.0  ;;  %v2244_v0 = vmul.f32 0.2, %v1962_v27  ;;  %v7062_v13 = vpop.permute.xlu0 %805  ;;  %2469 = vst.msk [vmem:[#allocation2 + $0xb8] sm:$0xff] %vm2445_vm5, %v2404_v60  ;;  %v1679_v4 = vadd.f32 %v1678_v61, %v6552_v15  ;;  %v5728_v28 = vpop.f32.mrb[50].mxu0  ;;  %v4340_v60 = vld [vmem:[%s8177_s6 + $0x10] sm:$0xff] }
 0x13e   :  { %v7064_v14 = vpop.permute.xlu1 %810  ;;  %v2371_v35 = vsel %vm2115_vm11, %v1959_v2, %v2243_v25  ;;  %2806 = vperm.xlu0 %5808, %v2716_v42   ;;  %2468 = vst.msk [vmem:[#allocation2 + $0xb0] sm:$0xff] %vm2445_vm5, %v2403_v43  ;;  %v2175_v5 = vmul.f32 0.2, %v1687_v54  ;;  %v1690_v56 = vadd.f32 %v5728_v28, %v6582_v34  ;;  %v1681_v36 = vpop.f32.mrb[51].mxu0  ;;  %v4339_v2 = vld [vmem:[%s8177_s6 + $0x8] sm:$0xff]  ;;  %vm2047_vm13 = vcmp.ge.f32.partialorder %v1687_v54, 0.0 }
 0x13f   :  { %2811 = vperm.xlu1 %5809, %v2717_v37   ;;  %v2372_v21 = vsel %vm2116_vm12, %v1962_v27, %v2244_v0  ;;  %3583 = vmatmul.mubr.bf16.gmra.mrb[24].mxu1 %v4970_v24  ;;  %v2173_v19 = vmul.f32 0.2, %v1679_v4  ;;  %v1682_v45 = vadd.f32 %v1681_v36, %v6554_v18  ;;  %v7080_v34 = vld [vmem:[%s8174_s3 + $0x100] sm:$0xff]  ;;  %vm2045_vm14 = vcmp.ge.f32.partialorder %v1679_v4, 0.0 }
 0x140   :  { %v2440_v15 = vpack.c.bf16 %v2372_v21, %v2371_v35  ;;  %3590 = vmatprep.mubr.bf16.mxu1 %v4979_v17  ;;  %v7085_v24 = vld [vmem:[%s8174_s3 + $0x120] sm:$0xff]  ;;  %vm2048_vm15 = vcmp.ge.f32.partialorder %v1690_v56, 0.0  ;;  %v2176_v27 = vmul.f32 0.2, %v1690_v56  ;;  %v2303_v42 = vsel %vm2047_vm13, %v1687_v54, %v2175_v5 }
 0x141   :  { %v7087_v1 = vpop.permute.xlu0 %735  ;;  %vm2046_vm0 = vcmp.ge.f32.partialorder %v1682_v45, 0.0  ;;  %v2174_v18 = vmul.f32 0.2, %v1682_v45  ;;  %v4978_v25 = vcombine.low %v7040_v52, %v7045_v51  ;;  %v4987_v61 = vcombine.high %v7080_v34, %v7085_v24  ;;  %v8195_v5 = vld [vmem:[#allocation5_spill] sm:$0xff] }
 0x142   :  { %v7089_v30 = vpop.permute.xlu1 %740  ;;  %2505 = vst.msk [vmem:[#allocation2 + $0x1d8] sm:$0xff] %vm2445_vm5, %v2440_v15  ;;  %4356 = vperm.xlu0 %5808, %v4338_v33   ;;  %v2304_v37 = vsel %vm2048_vm15, %v1690_v56, %v2176_v27  ;;  %v2301_v43 = vsel %vm2045_vm14, %v1679_v4, %v2173_v19  ;;  %v4342_v51 = vld [vmem:[%s8177_s6 + $0x20] sm:$0xff]  ;;  %v8197_v27 = vld [vmem:[#allocation6_spill] sm:$0xff] }
 0x143   :  { %4361 = vperm.xlu1 %5809, %v4339_v2   ;;  %v5731_v17 = vpop.f32.mrb[52].mxu0  ;;  %v2406_v0 = vpack.c.bf16 %v2304_v37, %v2303_v42  ;;  %v2302_v54 = vsel %vm2046_vm0, %v1682_v45, %v2174_v18  ;;  %v8196_v2 = vld [vmem:[#allocation7_spill] sm:$0xff]  ;;  %v4659_v45 = vld [vmem:[%s8178_s7] sm:$0xff] }
 0x144   :  { %v1703_v35 = vadd.f32 %v5731_v17, %v6636_v20  ;;  %v1694_v28 = vpop.f32.mrb[53].mxu0  ;;  %v2405_v21 = vpack.c.bf16 %v2302_v54, %v2301_v43  ;;  %v7123_v42 = vld [vmem:[%s8174_s3 + $0x140] sm:$0xff] }
 0x145   :  { %v1695_v56 = vadd.f32 %v1694_v28, %v8195_v5  ;;  %v7106_v36 = vpop.permute.xlu0 %655  ;;  %2471 = vst.msk [vmem:[#allocation2 + $0xc8] sm:$0xff] %vm2445_vm5, %v2406_v0  ;;  %v5732_v52 = vpop.f32.mrb[54].mxu0  ;;  %v7128_v37 = vld [vmem:[%s8174_s3 + $0x160] sm:$0xff] }
 0x146   :  { %v7108_v33 = vpop.permute.xlu1 %660  ;;  %4366 = vperm.xlu0 %5808, %v4340_v60   ;;  %2470 = vst.msk [vmem:[#allocation2 + $0xc0] sm:$0xff] %vm2445_vm5, %v2405_v21  ;;  %v2179_v20 = vmul.f32 0.2, %v1703_v35  ;;  %v1706_v15 = vadd.f32 %v5732_v52, %v8196_v2  ;;  %v1697_v19 = vpop.f32.mrb[55].mxu0  ;;  %vm2051_vm1 = vcmp.ge.f32.partialorder %v1703_v35, 0.0  ;;  %v4660_v52 = vld [vmem:[%s8178_s7 + $0x8] sm:$0xff] }
 0x147   :  { %4371 = vperm.xlu1 %5809, %v4341_v47   ;;  %v2177_v4 = vmul.f32 0.2, %v1695_v56  ;;  %3591 = vmatmul.mubr.bf16.gmra.mrb[28].mxu1 %v4978_v25  ;;  %vm2049_vm2 = vcmp.ge.f32.partialorder %v1695_v56, 0.0  ;;  %v1698_v18 = vadd.f32 %v1697_v19, %v8197_v27  ;;  %v4986_v25 = vcombine.low %v7080_v34, %v7085_v24  ;;  %v4661_v34 = vld [vmem:[%s8178_s7 + $0x10] sm:$0xff]  ;;  %v8200_v27 = vld [vmem:[#allocation8_spill] sm:$0xff] }
 0x148   :  { %3598 = vmatprep.mubr.bf16.mxu1 %v4987_v61  ;;  %vm2052_vm3 = vcmp.ge.f32.partialorder %v1706_v15, 0.0  ;;  %v2180_v17 = vmul.f32 0.2, %v1706_v15  ;;  %v2307_v54 = vsel %vm2051_vm1, %v1703_v35, %v2179_v20 }
 0x149   :  { %v896_v60 = vpop.permute.xlu0 %895  ;;  %vm2050_vm4 = vcmp.ge.f32.partialorder %v1698_v18, 0.0  ;;  %v2178_v43 = vmul.f32 0.2, %v1698_v18  ;;  %v2305_v28 = vsel %vm2049_vm2, %v1695_v56, %v2177_v4  ;;  %v8198_v4 = vld [vmem:[#allocation10_spill] sm:$0xff] }
 0x14a   :  { %v901_v47 = vpop.permute.xlu1 %900  ;;  %v1967_v61 = vadd.f32 %v6835_v41, %v896_v60  ;;  %4376 = vperm.xlu0 %5808, %v4342_v51   ;;  %v2308_v21 = vsel %vm2052_vm3, %v1706_v15, %v2180_v17  ;;  %v4995_v41 = vcombine.high %v7123_v42, %v7128_v37 }
 0x14b   :  { %v1970_v0 = vadd.f32 %v6845_v59, %v901_v47  ;;  %4677 = vperm.xlu1 %5809, %v4659_v45   ;;  %v5735_v5 = vpop.f32.mrb[56].mxu0  ;;  %v2408_v59 = vpack.c.bf16 %v2308_v21, %v2307_v54  ;;  %v2306_v24 = vsel %vm2050_vm4, %v1698_v18, %v2178_v43  ;;  %v8201_v54 = vld [vmem:[#allocation11_spill] sm:$0xff] }
 0x14c   :  { %vm2117_vm6 = vcmp.ge.f32.partialorder %v1967_v61, 0.0  ;;  %v2245_v51 = vmul.f32 0.2, %v1967_v61  ;;  %v1710_v35 = vpop.f32.mrb[57].mxu0  ;;  %v2407_v20 = vpack.c.bf16 %v2306_v24, %v2305_v28  ;;  %v1719_v2 = vadd.f32 %v5735_v5, %v8198_v4  ;;  %v2654_v5 = vld [vmem:[#allocation2 + $0x80] sm:$0xff] }
 0x14d   :  { %vm2118_vm7 = vcmp.ge.f32.partialorder %v1970_v0, 0.0  ;;  %v2246_v56 = vmul.f32 0.2, %v1970_v0  ;;  %v7145_v15 = vpop.permute.xlu0 %815  ;;  %2473 = vst.msk [vmem:[#allocation2 + $0xd8] sm:$0xff] %vm2445_vm5, %v2408_v59  ;;  %v1711_v17 = vadd.f32 %v1710_v35, %v8200_v27  ;;  %v5736_v60 = vpop.f32.mrb[58].mxu0  ;;  %v2662_v18 = vld [vmem:[#allocation2 + $0xc0] sm:$0xff] }
 0x14e   :  { %v7147_v19 = vpop.permute.xlu1 %820  ;;  %v2373_v45 = vsel %vm2117_vm6, %v1967_v61, %v2245_v51  ;;  %4682 = vperm.xlu0 %5808, %v4660_v52   ;;  %2472 = vst.msk [vmem:[#allocation2 + $0xd0] sm:$0xff] %vm2445_vm5, %v2407_v20  ;;  %v2183_v43 = vmul.f32 0.2, %v1719_v2  ;;  %v1722_v28 = vadd.f32 %v5736_v60, %v8201_v54  ;;  %v1713_v21 = vpop.f32.mrb[59].mxu0  ;;  %5275 = vmatprep.subr.bf16.mxu1 %v2662_v18  ;;  %v4343_v61 = vld [vmem:[%s8177_s6 + $0x28] sm:$0xff]  ;;  %v4662_v52 = vld [vmem:[%s8178_s7 + $0x18] sm:$0xff] }
 0x14f   :  { %8199 = vst [vmem:[#allocation5_spill] sm:$0xff] %v7147_v19  ;;  %4687 = vperm.xlu1 %5809, %v4661_v34   ;;  %v2374_v47 = vsel %vm2118_vm7, %v1970_v0, %v2246_v56  ;;  %3599 = vmatmul.mubr.bf16.gmra.mrb[32].mxu1 %v4986_v25  ;;  %vm2055_vm8 = vcmp.ge.f32.partialorder %v1719_v2, 0.0  ;;  %v2181_v59 = vmul.f32 0.2, %v1711_v17  ;;  %v8202_v24 = vld [vmem:[#allocation9_spill] sm:$0xff]  ;;  %vm2053_vm9 = vcmp.ge.f32.partialorder %v1711_v17, 0.0 }
 0x150   :  { %v2441_v34 = vpack.c.bf16 %v2374_v47, %v2373_v45  ;;  %v1714_v0 = vadd.f32 %v1713_v21, %v8202_v24  ;;  %5276 = vmatpush3.bf16.msra.mxu1 %v2654_v5  ;;  %v2663_v51 = vld [vmem:[#allocation2 + $0xc8] sm:$0xff]  ;;  %3606 = vmatprep.mubr.bf16.mxu1 %v4995_v41  ;;  %v7163_v25 = vld [vmem:[%s8174_s3 + $0x180] sm:$0xff]  ;;  %vm2056_vm10 = vcmp.ge.f32.partialorder %v1722_v28, 0.0  ;;  %v2184_v20 = vmul.f32 0.2, %v1722_v28  ;;  %v4344_v47 = vld [vmem:[%s8177_s6 + $0x30] sm:$0xff] }
 0x151   :  { %v7168_v35 = vld [vmem:[%s8174_s3 + $0x1a0] sm:$0xff]  ;;  %5277 = vmatprep.subr.bf16.mxu1 %v2663_v51  ;;  %v7170_v56 = vpop.permute.xlu0 %745  ;;  %v2311_v45 = vsel %vm2055_vm8, %v1719_v2, %v2183_v43  ;;  %v2655_v18 = vld [vmem:[#allocation2 + $0x88] sm:$0xff]  ;;  %v4994_v21 = vcombine.low %v7123_v42, %v7128_v37 }
 0x152   :  { %v7172_v4 = vpop.permute.xlu1 %750  ;;  %2506 = vst.msk [vmem:[#allocation2 + $0x1e0] sm:$0xff] %vm2445_vm5, %v2441_v34  ;;  %vm2054_vm11 = vcmp.ge.f32.partialorder %v1714_v0, 0.0  ;;  %v2182_v41 = vmul.f32 0.2, %v1714_v0  ;;  %4381 = vperm.xlu0 %5808, %v4343_v61   ;;  %v2312_v27 = vsel %vm2056_vm10, %v1722_v28, %v2184_v20  ;;  %v4663_v54 = vld [vmem:[%s8178_s7 + $0x20] sm:$0xff]  ;;  %v5003_v5 = vcombine.high %v7163_v25, %v7168_v35  ;;  %v8203_v28 = vld [vmem:[#allocation14_spill] sm:$0xff] }
 0x153   :  { %4692 = vperm.xlu1 %5809, %v4662_v52   ;;  %v5739_v60 = vpop.f32.mrb[60].mxu0  ;;  %v2309_v61 = vsel %vm2053_vm9, %v1711_v17, %v2181_v59  ;;  %v2410_v2 = vpack.c.bf16 %v2312_v27, %v2311_v45  ;;  %v8204_v51 = vld [vmem:[#allocation12_spill] sm:$0xff]  ;;  %v4664_v59 = vld [vmem:[%s8178_s7 + $0x28] sm:$0xff]  ;;  %v8205_v45 = vld [vmem:[#allocation15_spill] sm:$0xff] }
 0x154   :  { %v2310_v43 = vsel %vm2054_vm11, %v1714_v0, %v2182_v41  ;;  %v1735_v52 = vadd.f32 %v5739_v60, %v8203_v28  ;;  %5278 = vmatpush3.bf16.msra.mxu1 %v2655_v18  ;;  %v1726_v34 = vpop.f32.mrb[61].mxu0  ;;  %v4345_v17 = vld [vmem:[%s8177_s6 + $0x38] sm:$0xff]  ;;  %v2656_v18 = vld [vmem:[#allocation2 + $0x90] sm:$0xff] }
 0x155   :  { %v2409_v24 = vpack.c.bf16 %v2310_v43, %v2309_v61  ;;  %v1727_v20 = vadd.f32 %v1726_v34, %v8204_v51  ;;  %v7189_v31 = vpop.permute.xlu0 %665  ;;  %2475 = vst.msk [vmem:[#allocation2 + $0xe8] sm:$0xff] %vm2445_vm5, %v2410_v2  ;;  %v5740_v42 = vpop.f32.mrb[62].mxu0  ;;  %v2664_v37 = vld [vmem:[#allocation2 + $0xd0] sm:$0xff]  ;;  %v2665_v61 = vld [vmem:[#allocation2 + $0xd8] sm:$0xff]  ;;  %v7206_v2 = vld [vmem:[%s8174_s3 + $0x1c0] sm:$0xff] }
 0x156   :  { %v7191_v19 = vpop.permute.xlu1 %670  ;;  %4386 = vperm.xlu0 %5808, %v4344_v47   ;;  %v2187_v0 = vmul.f32 0.2, %v1735_v52  ;;  %v1738_v27 = vadd.f32 %v5740_v42, %v8205_v45  ;;  %v1729_v60 = vpop.f32.mrb[63].mxu0  ;;  %5279 = vmatprep.subr.bf16.mxu1 %v2664_v37  ;;  %vm2059_vm12 = vcmp.ge.f32.partialorder %v1735_v52, 0.0  ;;  %v8206_v47 = vld [vmem:[#allocation13_spill] sm:$0xff] }
 0x157   :  { %4697 = vperm.xlu1 %5809, %v4663_v54   ;;  %2474 = vst.msk [vmem:[#allocation2 + $0xe0] sm:$0xff] %vm2445_vm5, %v2409_v24  ;;  %v2185_v41 = vmul.f32 0.2, %v1727_v20  ;;  %3607 = vmatmul.mubr.bf16.gmra.mrb[36].mxu1 %v4994_v21  ;;  %vm2057_vm13 = vcmp.ge.f32.partialorder %v1727_v20, 0.0  ;;  %v1730_v54 = vadd.f32 %v1729_v60, %v8206_v47  ;;  %v7211_v43 = vld [vmem:[%s8174_s3 + $0x1e0] sm:$0xff]  ;;  %v5002_v24 = vcombine.low %v7163_v25, %v7168_v35  ;;  %v2657_v47 = vld [vmem:[#allocation2 + $0x98] sm:$0xff] }
 0x158   :  { %5280 = vmatpush3.bf16.msra.mxu1 %v2656_v18  ;;  %3614 = vmatprep.mubr.bf16.mxu1 %v5003_v5  ;;  %vm2060_vm14 = vcmp.ge.f32.partialorder %v1738_v27, 0.0  ;;  %v2188_v21 = vmul.f32 0.2, %v1738_v27  ;;  %v2315_v37 = vsel %vm2059_vm12, %v1735_v52, %v2187_v0  ;;  %v4665_v25 = vld [vmem:[%s8178_s7 + $0x30] sm:$0xff] }
 0x159   :  { %5281 = vmatprep.subr.bf16.mxu1 %v2665_v61  ;;  %v906_v28 = vpop.permute.xlu0 %905  ;;  %vm2058_vm15 = vcmp.ge.f32.partialorder %v1730_v54, 0.0  ;;  %v2186_v5 = vmul.f32 0.2, %v1730_v54  ;;  %v2313_v45 = vsel %vm2057_vm13, %v1727_v20, %v2185_v41  ;;  %v4346_v61 = vld [vmem:[%s8177_s6 + $0x40] sm:$0xff] }
 0x15a   :  { %v911_v34 = vpop.permute.xlu1 %910  ;;  %v1975_v51 = vadd.f32 %v6823_v7, %v906_v28  ;;  %4391 = vperm.xlu0 %5808, %v4345_v17   ;;  %v2316_v60 = vsel %vm2060_vm14, %v1738_v27, %v2188_v21  ;;  %v5011_v7 = vcombine.high %v7206_v2, %v7211_v43 }
 0x15b   :  { %v1978_v42 = vadd.f32 %v6842_v50, %v911_v34  ;;  %4702 = vperm.xlu1 %5809, %v4664_v59   ;;  %v5743_v18 = vpop.f32.mrb[64].mxu0  ;;  %v2412_v50 = vpack.c.bf16 %v2316_v60, %v2315_v37  ;;  %v2314_v35 = vsel %vm2058_vm15, %v1730_v54, %v2186_v5  ;;  %v2658_v60 = vld [vmem:[#allocation2 + $0xa0] sm:$0xff] }
 0x15c   :  { %vm2119_vm0 = vcmp.ge.f32.partialorder %v1975_v51, 0.0  ;;  %v2247_v52 = vmul.f32 0.2, %v1975_v51  ;;  %5282 = vmatpush3.bf16.msra.mxu1 %v2657_v47  ;;  %v1742_v20 = vpop.f32.mrb[65].mxu0  ;;  %v2411_v17 = vpack.c.bf16 %v2314_v35, %v2313_v45  ;;  %v1751_v0 = vadd.f32 %v5743_v18, %v6862_v12 }
 0x15d   :  { %vm2120_vm1 = vcmp.ge.f32.partialorder %v1978_v42, 0.0  ;;  %v2248_v59 = vmul.f32 0.2, %v1978_v42  ;;  %v7228_v41 = vpop.permute.xlu0 %825  ;;  %2477 = vst.msk [vmem:[#allocation2 + $0xf8] sm:$0xff] %vm2445_vm5, %v2412_v50  ;;  %v1743_v28 = vadd.f32 %v1742_v20, %v6801_v29  ;;  %v5744_v34 = vpop.f32.mrb[66].mxu0  ;;  %v4666_v29 = vld [vmem:[%s8178_s7 + $0x38] sm:$0xff] }
 0x15e   :  { %v7230_v27 = vpop.permute.xlu1 %830  ;;  %v2375_v21 = vsel %vm2119_vm0, %v1975_v51, %v2247_v52  ;;  %4396 = vperm.xlu0 %5808, %v4346_v61   ;;  %v2666_v54 = vld [vmem:[#allocation2 + $0xe0] sm:$0xff]  ;;  %2476 = vst.msk [vmem:[#allocation2 + $0xf0] sm:$0xff] %vm2445_vm5, %v2411_v17  ;;  %v2191_v37 = vmul.f32 0.2, %v1751_v0  ;;  %v1754_v45 = vadd.f32 %v5744_v34, %v6864_v16  ;;  %v1745_v12 = vpop.f32.mrb[67].mxu0  ;;  %v4347_v51 = vld [vmem:[%s8177_s6 + $0x48] sm:$0xff]  ;;  %v5010_v34 = vcombine.low %v7206_v2, %v7211_v43 }
 0x15f   :  { %4707 = vperm.xlu1 %5809, %v4665_v25   ;;  %v2376_v5 = vsel %vm2120_vm1, %v1978_v42, %v2248_v59  ;;  %3615 = vmatmul.mubr.bf16.gmra.mrb[40].mxu1 %v5002_v24  ;;  %vm2063_vm2 = vcmp.ge.f32.partialorder %v1751_v0, 0.0  ;;  %v2189_v47 = vmul.f32 0.2, %v1743_v28  ;;  %v1746_v42 = vadd.f32 %v1745_v12, %v6803_v55  ;;  %v2667_v61 = vld [vmem:[#allocation2 + $0xe8] sm:$0xff]  ;;  %v7246_v16 = vld [vmem:[%s8174_s3 + $0x200] sm:$0xff]  ;;  %v4348_v59 = vld [vmem:[%s8177_s6 + $0x50] sm:$0xff] }
 0x160   :  { %5283 = vmatprep.subr.bf16.mxu1 %v2666_v54  ;;  %v2442_v18 = vpack.c.bf16 %v2376_v5, %v2375_v21  ;;  %3622 = vmatprep.mubr.bf16.mxu1 %v5011_v7  ;;  %v7251_v24 = vld [vmem:[%s8174_s3 + $0x220] sm:$0xff]  ;;  %vm2061_vm3 = vcmp.ge.f32.partialorder %v1743_v28, 0.0  ;;  %vm2064_vm4 = vcmp.ge.f32.partialorder %v1754_v45, 0.0  ;;  %v2192_v25 = vmul.f32 0.2, %v1754_v45  ;;  %v2659_v17 = vld [vmem:[#allocation2 + $0xa8] sm:$0xff] }
 0x161   :  { %5284 = vmatpush3.bf16.msra.mxu1 %v2658_v60  ;;  %v7253_v50 = vpop.permute.xlu0 %755  ;;  %vm2062_vm6 = vcmp.ge.f32.partialorder %v1746_v42, 0.0  ;;  %v2190_v7 = vmul.f32 0.2, %v1746_v42  ;;  %v2319_v35 = vsel %vm2063_vm2, %v1751_v0, %v2191_v37  ;;  %v4667_v21 = vld [vmem:[%s8178_s7 + $0x40] sm:$0xff]  ;;  %v5019_v54 = vcombine.high %v7246_v16, %v7251_v24 }
 0x162   :  { %5285 = vmatprep.subr.bf16.mxu1 %v2667_v61  ;;  %v7255_v55 = vpop.permute.xlu1 %760  ;;  %2507 = vst.msk [vmem:[#allocation2 + $0x1e8] sm:$0xff] %vm2445_vm5, %v2442_v18  ;;  %4401 = vperm.xlu0 %5808, %v4347_v51   ;;  %v2320_v52 = vsel %vm2064_vm4, %v1754_v45, %v2192_v25  ;;  %v2317_v5 = vsel %vm2061_vm3, %v1743_v28, %v2189_v47  ;;  %v4349_v28 = vld [vmem:[%s8177_s6 + $0x58] sm:$0xff]  ;;  %v2660_v25 = vld [vmem:[#allocation2 + $0xb0] sm:$0xff] }
 0x163   :  { %4712 = vperm.xlu1 %5809, %v4666_v29   ;;  %v5747_v20 = vpop.f32.mrb[68].mxu0  ;;  %v2414_v0 = vpack.c.bf16 %v2320_v52, %v2319_v35  ;;  %v2318_v37 = vsel %vm2062_vm6, %v1746_v42, %v2190_v7  ;;  %v7289_v52 = vld [vmem:[%s8174_s3 + $0x240] sm:$0xff] }
 0x164   :  { %v1767_v45 = vadd.f32 %v5747_v20, %v7023_v3  ;;  %v1758_v12 = vpop.f32.mrb[69].mxu0  ;;  %v2413_v60 = vpack.c.bf16 %v2318_v37, %v2317_v5  ;;  %v4668_v3 = vld [vmem:[%s8178_s7 + $0x48] sm:$0xff]  ;;  %v2669_v35 = vld [vmem:[#allocation2 + $0xf8] sm:$0xff] }
 0x165   :  { %5286 = vmatpush3.bf16.msra.mxu1 %v2659_v17  ;;  %v1759_v51 = vadd.f32 %v1758_v12, %v6925_v48  ;;  %v7272_v29 = vpop.permute.xlu0 %675  ;;  %2479 = vst.msk [vmem:[#allocation2 + $0x108] sm:$0xff] %vm2445_vm5, %v2414_v0  ;;  %v5748_v2 = vpop.f32.mrb[70].mxu0  ;;  %v2668_v43 = vld [vmem:[#allocation2 + $0xf0] sm:$0xff] }
 0x166   :  { %v7274_v18 = vpop.permute.xlu1 %680  ;;  %4406 = vperm.xlu0 %5808, %v4348_v59   ;;  %2478 = vst.msk [vmem:[#allocation2 + $0x100] sm:$0xff] %vm2445_vm5, %v2413_v60  ;;  %v2195_v48 = vmul.f32 0.2, %v1767_v45  ;;  %v1770_v42 = vadd.f32 %v5748_v2, %v7025_v49  ;;  %v1761_v61 = vpop.f32.mrb[71].mxu0  ;;  %5287 = vmatprep.subr.bf16.mxu1 %v2668_v43  ;;  %vm2067_vm7 = vcmp.ge.f32.partialorder %v1767_v45, 0.0  ;;  %v7294_v49 = vld [vmem:[%s8174_s3 + $0x260] sm:$0xff] }
 0x167   :  { %4717 = vperm.xlu1 %5809, %v4667_v21   ;;  %v2193_v47 = vmul.f32 0.2, %v1759_v51  ;;  %3623 = vmatmul.mubr.bf16.gmra.mrb[44].mxu1 %v5010_v34  ;;  %vm2065_vm8 = vcmp.ge.f32.partialorder %v1759_v51, 0.0  ;;  %v1762_v7 = vadd.f32 %v1761_v61, %v6927_v32  ;;  %v5018_v32 = vcombine.low %v7246_v16, %v7251_v24  ;;  %v2661_v60 = vld [vmem:[#allocation2 + $0xb8] sm:$0xff]  ;;  %v4350_v2 = vld [vmem:[%s8177_s6 + $0x60] sm:$0xff]  ;;  %v4669_v16 = vld [vmem:[%s8178_s7 + $0x50] sm:$0xff] }
 0x168   :  { %3630 = vmatprep.mubr.bf16.mxu1 %v5019_v54  ;;  %vm2068_vm9 = vcmp.ge.f32.partialorder %v1770_v42, 0.0  ;;  %v2196_v20 = vmul.f32 0.2, %v1770_v42  ;;  %v2323_v5 = vsel %vm2067_vm7, %v1767_v45, %v2195_v48  ;;  %v2694_v43 = vld [vmem:[#allocation2 + $0x1c0] sm:$0xff] }
 0x169   :  { %5288 = vmatpush3.bf16.msra.mxu1 %v2660_v25  ;;  %v916_v17 = vpop.permute.xlu0 %915  ;;  %vm2066_vm10 = vcmp.ge.f32.partialorder %v1762_v7, 0.0  ;;  %v2194_v21 = vmul.f32 0.2, %v1762_v7  ;;  %v2321_v0 = vsel %vm2065_vm8, %v1759_v51, %v2193_v47 }
 0x16a   :  { %5289 = vmatprep.subr.bf16.mxu1 %v2669_v35  ;;  %v921_v59 = vpop.permute.xlu1 %920  ;;  %v1983_v34 = vadd.f32 %v6888_v26, %v916_v17  ;;  %4411 = vperm.xlu0 %5808, %v4349_v28   ;;  %v2324_v37 = vsel %vm2068_vm9, %v1770_v42, %v2196_v20  ;;  %v5027_v26 = vcombine.high %v7289_v52, %v7294_v49 }
 0x16b   :  { %v1986_v54 = vadd.f32 %v6907_v62, %v921_v59  ;;  %4722 = vperm.xlu1 %5809, %v4668_v3   ;;  %v5751_v12 = vpop.f32.mrb[72].mxu0  ;;  %v2416_v62 = vpack.c.bf16 %v2324_v37, %v2323_v5  ;;  %v2322_v24 = vsel %vm2066_vm10, %v1762_v7, %v2194_v21  ;;  %v4351_v59 = vld [vmem:[%s8177_s6 + $0x68] sm:$0xff]  ;;  %v4670_v21 = vld [vmem:[%s8178_s7 + $0x58] sm:$0xff]  ;;  %v7338_v37 = vld [vmem:[%s8174_s3 + $0x2a0] sm:$0xff] }
 0x16c   :  { %vm2121_vm11 = vcmp.ge.f32.partialorder %v1983_v34, 0.0  ;;  %v2249_v45 = vmul.f32 0.2, %v1983_v34  ;;  %v1774_v51 = vpop.f32.mrb[73].mxu0  ;;  %v2415_v28 = vpack.c.bf16 %v2322_v24, %v2321_v0  ;;  %v1783_v48 = vadd.f32 %v5751_v12, %v7189_v31  ;;  %v7333_v0 = vld [vmem:[%s8174_s3 + $0x280] sm:$0xff] }
 0x16d   :  { %5290 = vmatpush3.bf16.msra.mxu1 %v2661_v60  ;;  %vm2122_vm12 = vcmp.ge.f32.partialorder %v1986_v54, 0.0  ;;  %v2250_v3 = vmul.f32 0.2, %v1986_v54  ;;  %v7311_v47 = vpop.permute.xlu0 %835  ;;  %2481 = vst.msk [vmem:[#allocation2 + $0x118] sm:$0xff] %vm2445_vm5, %v2416_v62  ;;  %v1775_v25 = vadd.f32 %v1774_v51, %v7106_v36  ;;  %v5752_v7 = vpop.f32.mrb[74].mxu0  ;;  %v5026_v62 = vcombine.low %v7289_v52, %v7294_v49 }
 0x16e   :  { %5499 = vmatprep.subr.bf16.mxu1 %v2694_v43  ;;  %v7313_v42 = vpop.permute.xlu1 %840  ;;  %v2377_v61 = vsel %vm2121_vm11, %v1983_v34, %v2249_v45  ;;  %4416 = vperm.xlu0 %5808, %v4350_v2   ;;  %2480 = vst.msk [vmem:[#allocation2 + $0x110] sm:$0xff] %vm2445_vm5, %v2415_v28  ;;  %v2199_v20 = vmul.f32 0.2, %v1783_v48  ;;  %v1786_v17 = vadd.f32 %v5752_v7, %v7191_v19  ;;  %v1777_v31 = vpop.f32.mrb[75].mxu0  ;;  %vm2071_vm13 = vcmp.ge.f32.partialorder %v1783_v48, 0.0 }
 0x16f   :  { %4727 = vperm.xlu1 %5809, %v4669_v16   ;;  %v2378_v35 = vsel %vm2122_vm12, %v1986_v54, %v2250_v3  ;;  %3631 = vmatmul.mubr.bf16.gmra.mrb[48].mxu1 %v5018_v32  ;;  %v2197_v34 = vmul.f32 0.2, %v1775_v25  ;;  %v1778_v5 = vadd.f32 %v1777_v31, %v7108_v33  ;;  %vm2069_vm14 = vcmp.ge.f32.partialorder %v1775_v25, 0.0  ;;  %v4352_v16 = vld [vmem:[%s8177_s6 + $0x70] sm:$0xff] }
 0x170   :  { %v2443_v36 = vpack.c.bf16 %v2378_v35, %v2377_v61  ;;  %3638 = vmatprep.mubr.bf16.mxu1 %v5027_v26  ;;  %vm2072_vm15 = vcmp.ge.f32.partialorder %v1786_v17, 0.0  ;;  %v2200_v54 = vmul.f32 0.2, %v1786_v17  ;;  %v2327_v12 = vsel %vm2071_vm13, %v1783_v48, %v2199_v20  ;;  %v4671_v26 = vld [vmem:[%s8178_s7 + $0x60] sm:$0xff] }
 0x171   :  { %v7326_v19 = vpop.permute.xlu0 %765  ;;  %vm2070_vm0 = vcmp.ge.f32.partialorder %v1778_v5, 0.0  ;;  %v2198_v33 = vmul.f32 0.2, %v1778_v5  ;;  %v2325_v24 = vsel %vm2069_vm14, %v1775_v25, %v2197_v34  ;;  %v5035_v28 = vcombine.high %v7333_v0, %v7338_v37 }
 0x172   :  { %v7328_v32 = vpop.permute.xlu1 %770  ;;  %2508 = vst.msk [vmem:[#allocation2 + $0x1f0] sm:$0xff] %vm2445_vm5, %v2443_v36  ;;  %4421 = vperm.xlu0 %5808, %v4351_v59   ;;  %v2328_v60 = vsel %vm2072_vm15, %v1786_v17, %v2200_v54  ;;  %v4353_v17 = vld [vmem:[%s8177_s6 + $0x78] sm:$0xff]  ;;  %v7371_v36 = vld [vmem:[%s8174_s3 + $0x2e0] sm:$0xff] }
 0x173   :  { %4732 = vperm.xlu1 %5809, %v4670_v21   ;;  %v5755_v2 = vpop.f32.mrb[76].mxu0  ;;  %v2418_v45 = vpack.c.bf16 %v2328_v60, %v2327_v12  ;;  %v2326_v51 = vsel %vm2070_vm0, %v1778_v5, %v2198_v33  ;;  %v7366_v21 = vld [vmem:[%s8174_s3 + $0x2c0] sm:$0xff]  ;;  %v5034_v33 = vcombine.low %v7333_v0, %v7338_v37  ;;  %v4674_v0 = vld [vmem:[%s8178_s7 + $0x78] sm:$0xff] }
 0x174   :  { %v1790_v43 = vpop.f32.mrb[77].mxu0  ;;  %v2417_v3 = vpack.c.bf16 %v2326_v51, %v2325_v24  ;;  %v4673_v24 = vld [vmem:[%s8178_s7 + $0x70] sm:$0xff]  ;;  %v5043_v37 = vcombine.high %v7366_v21, %v7371_v36 }
 0x175   :  { %v1791_v48 = vadd.f32 %v1790_v43, %v7272_v29  ;;  %v686_v61 = vpop.permute.xlu0 %685  ;;  %2483 = vst.msk [vmem:[#allocation2 + $0x128] sm:$0xff] %vm2445_vm5, %v2418_v45  ;;  %v5756_v20 = vpop.f32.mrb[78].mxu0  ;;  %v4672_v29 = vld [vmem:[%s8178_s7 + $0x68] sm:$0xff] }
 0x176   :  { %v691_v7 = vpop.permute.xlu1 %690  ;;  %v1799_v35 = vadd.f32 %v5755_v2, %v686_v61  ;;  %4426 = vperm.xlu0 %5808, %v4352_v16   ;;  %2482 = vst.msk [vmem:[#allocation2 + $0x120] sm:$0xff] %vm2445_vm5, %v2417_v3  ;;  %v1793_v25 = vpop.f32.mrb[79].mxu0  ;;  %v8207_v61 = vld [vmem:[#allocation16_spill] sm:$0xff] }
 0x177   :  { %4737 = vperm.xlu1 %5809, %v4671_v26   ;;  %v2201_v52 = vmul.f32 0.2, %v1791_v48  ;;  %v1802_v49 = vadd.f32 %v5756_v20, %v691_v7  ;;  %3639 = vmatmul.mubr.bf16.gmra.mrb[52].mxu1 %v5026_v62  ;;  %vm2073_vm1 = vcmp.ge.f32.partialorder %v1791_v48, 0.0  ;;  %v1794_v59 = vadd.f32 %v1793_v25, %v7274_v18 }
 0x178   :  { %vm2075_vm2 = vcmp.ge.f32.partialorder %v1799_v35, 0.0  ;;  %v2203_v31 = vmul.f32 0.2, %v1799_v35  ;;  %3646 = vmatprep.mubr.bf16.mxu1 %v5035_v28 }
 0x179   :  { %vm2076_vm3 = vcmp.ge.f32.partialorder %v1802_v49, 0.0  ;;  %v2204_v34 = vmul.f32 0.2, %v1802_v49  ;;  %v926_v5 = vpop.permute.xlu0 %925  ;;  %vm2074_vm4 = vcmp.ge.f32.partialorder %v1794_v59, 0.0  ;;  %v2202_v18 = vmul.f32 0.2, %v1794_v59 }
 0x17a   :  { %v931_v54 = vpop.permute.xlu1 %930  ;;  %v2331_v12 = vsel %vm2075_vm2, %v1799_v35, %v2203_v31  ;;  %v1991_v60 = vadd.f32 %v6886_v6, %v926_v5  ;;  %4431 = vperm.xlu0 %5808, %v4353_v17   ;;  %v2329_v2 = vsel %vm2073_vm1, %v1791_v48, %v2201_v52  ;;  %v4808_v17 = vld [vmem:[#allocation4] sm:$0x1]  ;;  %v8208_v31 = vld [vmem:[#allocation17_spill] sm:$0xff] }
 0x17b   :  { %4742 = vperm.xlu1 %5809, %v4672_v29   ;;  %v2332_v16 = vsel %vm2076_vm3, %v1802_v49, %v2204_v34  ;;  %v1994_v26 = vadd.f32 %v6900_v58, %v931_v54  ;;  %v5759_v62 = vpop.f32.mrb[80].mxu0  ;;  %v2330_v45 = vsel %vm2074_vm4, %v1794_v59, %v2202_v18  ;;  %v2606_v34 = vld [vmem:[%s8174_s3 + $0x300] sm:$0xff] }
 0x17c   :  { %v2420_v6 = vpack.c.bf16 %v2332_v16, %v2331_v12  ;;  %vm2123_vm6 = vcmp.ge.f32.partialorder %v1991_v60, 0.0  ;;  %v2251_v51 = vmul.f32 0.2, %v1991_v60  ;;  %v1806_v43 = vpop.f32.mrb[81].mxu0  ;;  %v2419_v28 = vpack.c.bf16 %v2330_v45, %v2329_v2  ;;  %v2610_v5 = vld [vmem:[%s8174_s3 + $0x320] sm:$0xff] }
 0x17d   :  { %vm2124_vm7 = vcmp.ge.f32.partialorder %v1994_v26, 0.0  ;;  %v2252_v58 = vmul.f32 0.2, %v1994_v26  ;;  %v1815_v3 = vadd.f32 %v5759_v62, %v6847_v39  ;;  %v1807_v7 = vadd.f32 %v1806_v43, %v8207_v61  ;;  %v5760_v35 = vpop.f32.mrb[82].mxu0 }
 0x17e   :  { %2485 = vst.msk [vmem:[#allocation2 + $0x138] sm:$0xff] %vm2445_vm5, %v2420_v6  ;;  %v2379_v48 = vsel %vm2123_vm6, %v1991_v60, %v2251_v51  ;;  %4747 = vperm.xlu0 %5808, %v4673_v24   ;;  %2484 = vst.msk [vmem:[#allocation2 + $0x130] sm:$0xff] %vm2445_vm5, %v2419_v28  ;;  %v1818_v49 = vadd.f32 %v5760_v35, %v6849_v23  ;;  %v1809_v25 = vpop.f32.mrb[83].mxu0  ;;  %v5042_v60 = vcombine.low %v7366_v21, %v7371_v36 }
 0x17f   :  { %4752 = vperm.xlu1 %5809, %v4674_v0   ;;  %v2380_v20 = vsel %vm2124_vm7, %v1994_v26, %v2252_v58  ;;  %v2207_v52 = vmul.f32 0.2, %v1815_v3  ;;  %3647 = vmatmul.mubr.bf16.gmra.mrb[56].mxu1 %v5034_v33  ;;  %vm2079_vm8 = vcmp.ge.f32.partialorder %v1815_v3, 0.0  ;;  %v2205_v39 = vmul.f32 0.2, %v1807_v7 }
 0x180   :  { %v2444_v29 = vpack.c.bf16 %v2380_v20, %v2379_v48  ;;  %v1810_v59 = vadd.f32 %v1809_v25, %v8208_v31  ;;  %3654 = vmatprep.mubr.bf16.mxu1 %v5043_v37  ;;  %vm2077_vm9 = vcmp.ge.f32.partialorder %v1807_v7, 0.0  ;;  %vm2080_vm10 = vcmp.ge.f32.partialorder %v1818_v49, 0.0 }
 0x181   :  { %v2208_v23 = vmul.f32 0.2, %v1818_v49  ;;  %v2335_v33 = vsel %vm2079_vm8, %v1815_v3, %v2207_v52  ;;  %v5051_v2 = vcombine.high %v2606_v34, %v2610_v5  ;;  %v2333_v16 = vsel %vm2077_vm9, %v1807_v7, %v2205_v39 }
 0x182   :  { %2509 = vst.msk [vmem:[#allocation2 + $0x1f8] sm:$0xff] %vm2445_vm5, %v2444_v29  ;;  %vm2078_vm11 = vcmp.ge.f32.partialorder %v1810_v59, 0.0  ;;  %v2206_v54 = vmul.f32 0.2, %v1810_v59  ;;  %4811 = vperm.xlu0 %5808, %v4808_v17  }
 0x183   :  { %v2336_v12 = vsel %vm2080_vm10, %v1818_v49, %v2208_v23  ;;  %v5763_v18 = vpop.f32.mrb[84].mxu0  ;;  %v2670_v23 = vld [vmem:[#allocation2 + $0x100] sm:$0xff] }
 0x184   :  { %v2422_v26 = vpack.c.bf16 %v2336_v12, %v2335_v33  ;;  %v2334_v62 = vsel %vm2078_vm11, %v1810_v59, %v2206_v54  ;;  %v1831_v24 = vadd.f32 %v5763_v18, %v7000_v46  ;;  %v1822_v0 = vpop.f32.mrb[85].mxu0  ;;  %v7410_v46 = vld [vmem:[%s8174_s3 + $0x340] sm:$0xff] }
 0x185   :  { %v2421_v37 = vpack.c.bf16 %v2334_v62, %v2333_v16  ;;  %v1823_v6 = vadd.f32 %v1822_v0, %v6910_v44  ;;  %v5764_v45 = vpop.f32.mrb[86].mxu0  ;;  %v7415_v44 = vld [vmem:[%s8174_s3 + $0x360] sm:$0xff]  ;;  %v2671_v16 = vld [vmem:[#allocation2 + $0x108] sm:$0xff] }
 0x186   :  { %2487 = vst.msk [vmem:[#allocation2 + $0x148] sm:$0xff] %vm2445_vm5, %v2422_v26  ;;  %v2211_v51 = vmul.f32 0.2, %v1831_v24  ;;  %v1834_v43 = vadd.f32 %v5764_v45, %v7002_v8  ;;  %v1825_v28 = vpop.f32.mrb[87].mxu0  ;;  %vm2083_vm12 = vcmp.ge.f32.partialorder %v1831_v24, 0.0  ;;  %v5059_v7 = vcombine.high %v7410_v46, %v7415_v44 }
 0x187   :  { %2486 = vst.msk [vmem:[#allocation2 + $0x140] sm:$0xff] %vm2445_vm5, %v2421_v37  ;;  %3655 = vmatmul.mubr.bf16.gmra.mrb[60].mxu1 %v5042_v60  ;;  %v2209_v21 = vmul.f32 0.2, %v1823_v6  ;;  %v1826_v36 = vadd.f32 %v1825_v28, %v6912_v63  ;;  %vm2081_vm13 = vcmp.ge.f32.partialorder %v1823_v6, 0.0  ;;  %v5050_v63 = vcombine.low %v2606_v34, %v2610_v5 }
 0x188   :  { %3662 = vmatprep.mubr.bf16.mxu1 %v5051_v2  ;;  %vm2084_vm14 = vcmp.ge.f32.partialorder %v1834_v43, 0.0  ;;  %v2212_v8 = vmul.f32 0.2, %v1834_v43  ;;  %v2339_v3 = vsel %vm2083_vm12, %v1831_v24, %v2211_v51  ;;  %v5058_v26 = vcombine.low %v7410_v46, %v7415_v44 }
 0x189   :  { %vm2082_vm15 = vcmp.ge.f32.partialorder %v1826_v36, 0.0  ;;  %v2210_v58 = vmul.f32 0.2, %v1826_v36  ;;  %v2337_v35 = vsel %vm2081_vm13, %v1823_v6, %v2209_v21 }
 0x18a   :  { %v2340_v48 = vsel %vm2084_vm14, %v1834_v43, %v2212_v8  ;;  %v2672_v8 = vld [vmem:[#allocation2 + $0x110] sm:$0xff] }
 0x18b   :  { %v5767_v61 = vpop.f32.mrb[88].mxu0  ;;  %v2424_v20 = vpack.c.bf16 %v2340_v48, %v2339_v3  ;;  %v2338_v52 = vsel %vm2082_vm15, %v1826_v36, %v2210_v58 }
 0x18c   :  { %v1847_v49 = vadd.f32 %v5767_v61, %v7170_v56  ;;  %v1838_v25 = vpop.f32.mrb[89].mxu0  ;;  %v2423_v17 = vpack.c.bf16 %v2338_v52, %v2337_v35  ;;  %v2673_v35 = vld [vmem:[#allocation2 + $0x118] sm:$0xff] }
 0x18d   :  { %v1839_v29 = vadd.f32 %v1838_v25, %v7087_v1  ;;  %2489 = vst.msk [vmem:[#allocation2 + $0x158] sm:$0xff] %vm2445_vm5, %v2424_v20  ;;  %v5768_v39 = vpop.f32.mrb[90].mxu0  ;;  %v2679_v33 = vld [vmem:[#allocation2 + $0x148] sm:$0xff]  ;;  %v7428_v1 = vld [vmem:[%s8174_s3 + $0x380] sm:$0xff] }
 0x18e   :  { %v2678_v31 = vld [vmem:[#allocation2 + $0x140] sm:$0xff]  ;;  %2488 = vst.msk [vmem:[#allocation2 + $0x150] sm:$0xff] %vm2445_vm5, %v2423_v17  ;;  %v2215_v59 = vmul.f32 0.2, %v1847_v49  ;;  %v1850_v34 = vadd.f32 %v5768_v39, %v7172_v4  ;;  %v1841_v5 = vpop.f32.mrb[91].mxu0  ;;  %vm2087_vm0 = vcmp.ge.f32.partialorder %v1847_v49, 0.0 }
 0x18f   :  { %3663 = vmatmul.mubr.bf16.gmra.mrb[64].mxu1 %v5050_v63  ;;  %5387 = vmatprep.subr.bf16.mxu0 %v2678_v31  ;;  %v2213_v54 = vmul.f32 0.2, %v1839_v29  ;;  %v1842_v56 = vadd.f32 %v1841_v5, %v7089_v30  ;;  %v7433_v4 = vld [vmem:[%s8174_s3 + $0x3a0] sm:$0xff]  ;;  %vm2085_vm1 = vcmp.ge.f32.partialorder %v1839_v29, 0.0 }
 0x190   :  { %5388 = vmatpush3.bf16.msra.mxu0 %v2670_v23  ;;  %3670 = vmatprep.mubr.bf16.mxu1 %v5059_v7  ;;  %vm2088_vm2 = vcmp.ge.f32.partialorder %v1850_v34, 0.0  ;;  %v2216_v12 = vmul.f32 0.2, %v1850_v34  ;;  %v2343_v30 = vsel %vm2087_vm0, %v1847_v49, %v2215_v59  ;;  %v5067_v62 = vcombine.high %v7428_v1, %v7433_v4 }
 0x191   :  { %5389 = vmatprep.subr.bf16.mxu0 %v2679_v33  ;;  %vm2086_vm3 = vcmp.ge.f32.partialorder %v1842_v56, 0.0  ;;  %v2214_v18 = vmul.f32 0.2, %v1842_v56  ;;  %v2341_v24 = vsel %vm2085_vm1, %v1839_v29, %v2213_v54  ;;  %v5066_v20 = vcombine.low %v7428_v1, %v7433_v4  ;;  %v2674_v33 = vld [vmem:[#allocation2 + $0x120] sm:$0xff] }
 0x192   :  { %v2344_v60 = vsel %vm2088_vm2, %v1850_v34, %v2216_v12 }
 0x193   :  { %v5771_v2 = vpop.f32.mrb[92].mxu0  ;;  %v2426_v0 = vpack.c.bf16 %v2344_v60, %v2343_v30  ;;  %v2342_v37 = vsel %vm2086_vm3, %v1842_v56, %v2214_v18 }
 0x194   :  { %v1863_v6 = vadd.f32 %v5771_v2, %v7326_v19  ;;  %5390 = vmatpush3.bf16.msra.mxu0 %v2671_v16  ;;  %v1854_v45 = vpop.f32.mrb[93].mxu0  ;;  %v2425_v51 = vpack.c.bf16 %v2342_v37, %v2341_v24  ;;  %v2681_v3 = vld [vmem:[#allocation2 + $0x158] sm:$0xff]  ;;  %v2675_v2 = vld [vmem:[#allocation2 + $0x128] sm:$0xff] }
 0x195   :  { %v1855_v43 = vadd.f32 %v1854_v45, %v7253_v50  ;;  %2491 = vst.msk [vmem:[#allocation2 + $0x168] sm:$0xff] %vm2445_vm5, %v2426_v0  ;;  %v5772_v28 = vpop.f32.mrb[94].mxu0  ;;  %v2680_v21 = vld [vmem:[#allocation2 + $0x150] sm:$0xff]  ;;  %v7448_v50 = vld [vmem:[%s8174_s3 + $0x3c0] sm:$0xff] }
 0x196   :  { %2490 = vst.msk [vmem:[#allocation2 + $0x160] sm:$0xff] %vm2445_vm5, %v2425_v51  ;;  %v2219_v36 = vmul.f32 0.2, %v1863_v6  ;;  %v1866_v46 = vadd.f32 %v5772_v28, %v7328_v32  ;;  %v1857_v44 = vpop.f32.mrb[95].mxu0  ;;  %5391 = vmatprep.subr.bf16.mxu0 %v2680_v21  ;;  %vm2091_vm4 = vcmp.ge.f32.partialorder %v1863_v6, 0.0  ;;  %v7453_v32 = vld [vmem:[%s8174_s3 + $0x3e0] sm:$0xff] }
 0x197   :  { %3671 = vmatmul.mubr.bf16.gmra.mrb[68].mxu1 %v5058_v26  ;;  %v2217_v19 = vmul.f32 0.2, %v1855_v43  ;;  %v1858_v58 = vadd.f32 %v1857_v44, %v7255_v55  ;;  %vm2089_vm6 = vcmp.ge.f32.partialorder %v1855_v43, 0.0  ;;  %v5075_v52 = vcombine.high %v7448_v50, %v7453_v32  ;;  %v2676_v44 = vld [vmem:[#allocation2 + $0x130] sm:$0xff] }
 0x198   :  { %5392 = vmatpush3.bf16.msra.mxu0 %v2672_v8  ;;  %3678 = vmatprep.mubr.bf16.mxu1 %v5067_v62  ;;  %vm2092_vm7 = vcmp.ge.f32.partialorder %v1866_v46, 0.0  ;;  %v2220_v48 = vmul.f32 0.2, %v1866_v46  ;;  %v2347_v55 = vsel %vm2091_vm4, %v1863_v6, %v2219_v36  ;;  %v5074_v16 = vcombine.low %v7448_v50, %v7453_v32  ;;  %v7503_v50 = vld [vmem:[%s8174_s3 + $0x70] sm:$0xff] }
 0x199   :  { %5393 = vmatprep.subr.bf16.mxu0 %v2681_v3  ;;  %vm2090_vm8 = vcmp.ge.f32.partialorder %v1858_v58, 0.0  ;;  %v2218_v61 = vmul.f32 0.2, %v1858_v58  ;;  %v2345_v49 = vsel %vm2089_vm6, %v1855_v43, %v2217_v19 }
 0x19a   :  { %v2348_v63 = vsel %vm2092_vm7, %v1866_v46, %v2220_v48 }
 0x19b   :  { %v5775_v7 = vpop.f32.mrb[96].mxu0  ;;  %v2428_v25 = vpack.c.bf16 %v2348_v63, %v2347_v55  ;;  %v2346_v17 = vsel %vm2090_vm8, %v1858_v58, %v2218_v61  ;;  %v2677_v55 = vld [vmem:[#allocation2 + $0x138] sm:$0xff] }
 0x19c   :  { %v1879_v29 = vadd.f32 %v5775_v7, %v6891_v22  ;;  %5394 = vmatpush3.bf16.msra.mxu0 %v2673_v35  ;;  %v1870_v39 = vpop.f32.mrb[97].mxu0  ;;  %v2427_v31 = vpack.c.bf16 %v2346_v17, %v2345_v49  ;;  %v2683_v4 = vld [vmem:[#allocation2 + $0x168] sm:$0xff] }
 0x19d   :  { %v1871_v59 = vadd.f32 %v1870_v39, %v6826_v11  ;;  %2493 = vst.msk [vmem:[#allocation2 + $0x178] sm:$0xff] %vm2445_vm5, %v2428_v25  ;;  %v5776_v34 = vpop.f32.mrb[98].mxu0  ;;  %v2682_v5 = vld [vmem:[#allocation2 + $0x160] sm:$0xff]  ;;  %v7468_v11 = vld [vmem:[%s8174_s3 + $0x8] sm:$0xff] }
 0x19e   :  { %2492 = vst.msk [vmem:[#allocation2 + $0x170] sm:$0xff] %vm2445_vm5, %v2427_v31  ;;  %v2223_v23 = vmul.f32 0.2, %v1879_v29  ;;  %v1882_v54 = vadd.f32 %v5776_v34, %v6893_v57  ;;  %v1873_v56 = vpop.f32.mrb[99].mxu0  ;;  %5395 = vmatprep.subr.bf16.mxu0 %v2682_v5  ;;  %vm2095_vm9 = vcmp.ge.f32.partialorder %v1879_v29, 0.0  ;;  %v7473_v57 = vld [vmem:[%s8174_s3 + $0x28] sm:$0xff] }
 0x19f   :  { %3679 = vmatmul.mubr.bf16.gmra.mrb[72].mxu1 %v5066_v20  ;;  %v2221_v22 = vmul.f32 0.2, %v1871_v59  ;;  %v1874_v1 = vadd.f32 %v1873_v56, %v6828_v9  ;;  %vm2093_vm10 = vcmp.ge.f32.partialorder %v1871_v59, 0.0  ;;  %v4957_v26 = vcombine.high %v7468_v11, %v7473_v57 }
 0x1a0   :  { %5396 = vmatpush3.bf16.msra.mxu0 %v2674_v33  ;;  %3686 = vmatprep.mubr.bf16.mxu1 %v5075_v52  ;;  %vm2096_vm11 = vcmp.ge.f32.partialorder %v1882_v54, 0.0  ;;  %v2224_v12 = vmul.f32 0.2, %v1882_v54  ;;  %v2351_v9 = vsel %vm2095_vm9, %v1879_v29, %v2223_v23  ;;  %v4956_v63 = vcombine.low %v7468_v11, %v7473_v57  ;;  %v2695_v33 = vld [vmem:[#allocation2 + $0x1c8] sm:$0xff]  ;;  %v7541_v11 = vld [vmem:[%s8174_s3 + $0xb0] sm:$0xff]  ;;  %v846_v57 = vpop.permute.xlu0 %845 }
 0x1a1   :  { %5397 = vmatprep.subr.bf16.mxu0 %v2683_v4  ;;  %vm2094_vm12 = vcmp.ge.f32.partialorder %v1874_v1, 0.0  ;;  %v2222_v18 = vmul.f32 0.2, %v1874_v1  ;;  %v2349_v62 = vsel %vm2093_vm10, %v1871_v59, %v2221_v22  ;;  %v7524_v22 = vld [vmem:[%s8174_s3 + $0x88] sm:$0xff]  ;;  %v7536_v4 = vld [vmem:[%s8174_s3 + $0x90] sm:$0xff] }
 0x1a2   :  { %v2352_v30 = vsel %vm2096_vm11, %v1882_v54, %v2224_v12  ;;  %v8210_v54 = vld [vmem:[#allocation5_spill] sm:$0xff] }
 0x1a3   :  { %v5779_v60 = vpop.f32.mrb[100].mxu0  ;;  %v2430_v24 = vpack.c.bf16 %v2352_v30, %v2351_v9  ;;  %v2350_v0 = vsel %vm2094_vm12, %v1874_v1, %v2222_v18 }
 0x1a4   :  { %v1895_v37 = vadd.f32 %v5779_v60, %v7062_v13  ;;  %5398 = vmatpush3.bf16.msra.mxu0 %v2675_v2  ;;  %v1886_v6 = vpop.f32.mrb[101].mxu0  ;;  %v2429_v45 = vpack.c.bf16 %v2350_v0, %v2349_v62  ;;  %v2685_v19 = vld [vmem:[#allocation2 + $0x178] sm:$0xff]  ;;  %v2696_v0 = vld [vmem:[#allocation2 + $0x1d0] sm:$0xff] }
 0x1a5   :  { %v1887_v51 = vadd.f32 %v1886_v6, %v6962_v40  ;;  %2495 = vst.msk [vmem:[#allocation2 + $0x188] sm:$0xff] %vm2445_vm5, %v2430_v24  ;;  %v5780_v43 = vpop.f32.mrb[102].mxu0  ;;  %v2684_v28 = vld [vmem:[#allocation2 + $0x170] sm:$0xff]  ;;  %v7488_v40 = vld [vmem:[%s8174_s3 + $0x48] sm:$0xff] }
 0x1a6   :  { %2494 = vst.msk [vmem:[#allocation2 + $0x180] sm:$0xff] %vm2445_vm5, %v2429_v45  ;;  %v2227_v21 = vmul.f32 0.2, %v1895_v37  ;;  %v1898_v36 = vadd.f32 %v5780_v43, %v7064_v14  ;;  %v1889_v46 = vpop.f32.mrb[103].mxu0  ;;  %5399 = vmatprep.subr.bf16.mxu0 %v2684_v28  ;;  %vm2099_vm13 = vcmp.ge.f32.partialorder %v1895_v37, 0.0  ;;  %v7493_v14 = vld [vmem:[%s8174_s3 + $0x68] sm:$0xff]  ;;  %v851_v43 = vpop.permute.xlu1 %850 }
 0x1a7   :  { %3687 = vmatmul.mubr.bf16.gmra.mrb[76].mxu1 %v5074_v16  ;;  %v2225_v13 = vmul.f32 0.2, %v1887_v51  ;;  %v1890_v8 = vadd.f32 %v1889_v46, %v6964_v53  ;;  %vm2097_vm14 = vcmp.ge.f32.partialorder %v1887_v51, 0.0  ;;  %v7498_v53 = vld [vmem:[%s8174_s3 + $0x50] sm:$0xff]  ;;  %v4965_v7 = vcombine.high %v7488_v40, %v7493_v14 }
 0x1a8   :  { %5400 = vmatpush3.bf16.msra.mxu0 %v2676_v44  ;;  %3727 = vmatprep.mubr.bf16.mxu1 %v4957_v26  ;;  %vm2100_vm15 = vcmp.ge.f32.partialorder %v1898_v36, 0.0  ;;  %v2228_v58 = vmul.f32 0.2, %v1898_v36  ;;  %v2355_v32 = vsel %vm2099_vm13, %v1895_v37, %v2227_v21  ;;  %v4967_v39 = vcombine.high %v7498_v53, %v7503_v50 }
 0x1a9   :  { %5401 = vmatprep.subr.bf16.mxu0 %v2685_v19  ;;  %vm2098_vm0 = vcmp.ge.f32.partialorder %v1890_v8, 0.0  ;;  %v2226_v3 = vmul.f32 0.2, %v1890_v8  ;;  %v2353_v35 = vsel %vm2097_vm14, %v1887_v51, %v2225_v13  ;;  %v4964_v1 = vcombine.low %v7488_v40, %v7493_v14  ;;  %v2535_v40 = vld [vmem:[%s8174_s3 + $0xc8] sm:$0xff] }
 0x1aa   :  { %v2356_v48 = vsel %vm2100_vm15, %v1898_v36, %v2228_v58  ;;  %v4966_v60 = vcombine.low %v7498_v53, %v7503_v50  ;;  %v4975_v51 = vcombine.high %v7536_v4, %v7541_v11  ;;  %v2539_v14 = vld [vmem:[%s8174_s3 + $0xe8] sm:$0xff] }
 0x1ab   :  { %v5783_v61 = vpop.f32.mrb[104].mxu0  ;;  %v2432_v20 = vpack.c.bf16 %v2356_v48, %v2355_v32  ;;  %v2354_v52 = vsel %vm2098_vm0, %v1890_v8, %v2226_v3  ;;  %v2540_v3 = vld [vmem:[%s8174_s3 + $0xf0] sm:$0xff] }
 0x1ac   :  { %v1911_v49 = vadd.f32 %v5783_v61, %v7228_v41  ;;  %5402 = vmatpush3.bf16.msra.mxu0 %v2677_v55  ;;  %v1902_v25 = vpop.f32.mrb[105].mxu0  ;;  %v2431_v17 = vpack.c.bf16 %v2354_v52, %v2353_v35  ;;  %v8209_v41 = vcombine.low %v6982_v10, %v6987_v38  ;;  %v2687_v9 = vld [vmem:[#allocation2 + $0x188] sm:$0xff]  ;;  %v4974_v61 = vcombine.low %v7536_v4, %v7541_v11  ;;  %v2698_v35 = vld [vmem:[#allocation2 + $0x1e0] sm:$0xff] }
 0x1ad   :  { %v1903_v29 = vadd.f32 %v1902_v25, %v7145_v15  ;;  %2497 = vst.msk [vmem:[#allocation2 + $0x198] sm:$0xff] %vm2445_vm5, %v2432_v20  ;;  %v5784_v31 = vpop.f32.mrb[106].mxu0  ;;  %v2686_v59 = vld [vmem:[#allocation2 + $0x180] sm:$0xff]  ;;  %v4981_v20 = vcombine.high %v2535_v40, %v2539_v14 }
 0x1ae   :  { %2496 = vst.msk [vmem:[#allocation2 + $0x190] sm:$0xff] %vm2445_vm5, %v2431_v17  ;;  %v2231_v34 = vmul.f32 0.2, %v1911_v49  ;;  %v1914_v5 = vadd.f32 %v5784_v31, %v7230_v27  ;;  %v1905_v23 = vpop.f32.mrb[107].mxu0  ;;  %vm2103_vm1 = vcmp.ge.f32.partialorder %v1911_v49, 0.0  ;;  %v7529_v27 = vld [vmem:[%s8174_s3 + $0xa8] sm:$0xff] }
 0x1af   :  { %3728 = vmatmul.mubr.bf16.vlgmr.msra.gmra.mrb[80].mxu1 %v4956_v63  ;;  %3889 = vmatmul.mubr.bf16.vlgmr.msra.gmra.mrb[112].mxu0 %v8209_v41  ;;  %v2229_v15 = vmul.f32 0.2, %v1903_v29  ;;  %v1906_v56 = vadd.f32 %v1905_v23, %v8210_v54  ;;  %vm2101_vm2 = vcmp.ge.f32.partialorder %v1903_v29, 0.0  ;;  %v4973_v2 = vcombine.high %v7524_v22, %v7529_v27  ;;  %v2699_v17 = vld [vmem:[#allocation2 + $0x1e8] sm:$0xff]  ;;  %v2544_v31 = vld [vmem:[%s8174_s3 + $0x110] sm:$0xff] }
 0x1b0   :  { %5500 = vmatpush3.bf16.msra.mxu1 %v2686_v59  ;;  %3735 = vmatprep.mubr.bf16.mxu1 %v4965_v7  ;;  %vm2104_vm3 = vcmp.ge.f32.partialorder %v1914_v5, 0.0  ;;  %v2232_v10 = vmul.f32 0.2, %v1914_v5  ;;  %v2359_v12 = vsel %vm2103_vm1, %v1911_v49, %v2231_v34  ;;  %v4972_v48 = vcombine.low %v7524_v22, %v7529_v27  ;;  %v2548_v59 = vld [vmem:[%s8174_s3 + $0x130] sm:$0xff]  ;;  %v2551_v22 = vld [vmem:[%s8174_s3 + $0x148] sm:$0xff] }
 0x1b1   :  { %5501 = vmatprep.subr.bf16.mxu1 %v2695_v33  ;;  %3896 = vmatprep.mubr.bf16.mxu0 %v4967_v39  ;;  %vm2102_vm4 = vcmp.ge.f32.partialorder %v1906_v56, 0.0  ;;  %v2230_v38 = vmul.f32 0.2, %v1906_v56  ;;  %v2357_v16 = vsel %vm2101_vm2, %v1903_v29, %v2229_v15  ;;  %v2543_v29 = vld [vmem:[%s8174_s3 + $0x108] sm:$0xff]  ;;  %v2700_v41 = vld [vmem:[#allocation2 + $0x1f0] sm:$0xff]  ;;  %v4991_v54 = vcombine.high %v2544_v31, %v2548_v59  ;;  %v2701_v33 = vld [vmem:[#allocation2 + $0x1f8] sm:$0xff] }
 0x1b2   :  { %v2360_v18 = vsel %vm2104_vm3, %v1914_v5, %v2232_v10  ;;  %v2547_v39 = vld [vmem:[%s8174_s3 + $0x128] sm:$0xff]  ;;  %v4980_v5 = vcombine.low %v2535_v40, %v2539_v14  ;;  %v2552_v10 = vld [vmem:[%s8174_s3 + $0x150] sm:$0xff]  ;;  %v4990_v11 = vcombine.low %v2544_v31, %v2548_v59 }
 0x1b3   :  { %v5787_v30 = vpop.f32.mrb[108].mxu0  ;;  %v2434_v26 = vpack.c.bf16 %v2360_v18, %v2359_v12  ;;  %v2358_v62 = vsel %vm2102_vm4, %v1906_v56, %v2230_v38  ;;  %v4989_v15 = vcombine.high %v2543_v29, %v2547_v39  ;;  %v2555_v27 = vld [vmem:[%s8174_s3 + $0x168] sm:$0xff]  ;;  %v2556_v38 = vld [vmem:[%s8174_s3 + $0x170] sm:$0xff]  ;;  %v4988_v4 = vcombine.low %v2543_v29, %v2547_v39 }
 0x1b4   :  { %5502 = vmatpush3.bf16.msra.mxu1 %v2687_v9  ;;  %v1927_v24 = vadd.f32 %v5787_v30, %v846_v57  ;;  %v1918_v37 = vpop.f32.mrb[109].mxu0  ;;  %v2433_v6 = vpack.c.bf16 %v2358_v62, %v2357_v16  ;;  %v2689_v32 = vld [vmem:[#allocation2 + $0x198] sm:$0xff]  ;;  %v4997_v57 = vcombine.high %v2551_v22, %v2555_v27  ;;  %v4999_v12 = vcombine.high %v2552_v10, %v2556_v38  ;;  %v2559_v18 = vld [vmem:[%s8174_s3 + $0x188] sm:$0xff]  ;;  %v2560_v30 = vld [vmem:[%s8174_s3 + $0x190] sm:$0xff] }
 0x1b5   :  { %5503 = vmatprep.subr.bf16.mxu1 %v2696_v0  ;;  %v1919_v45 = vadd.f32 %v1918_v37, %v7311_v47  ;;  %2499 = vst.msk [vmem:[#allocation2 + $0x1a8] sm:$0xff] %vm2445_vm5, %v2434_v26  ;;  %v5788_v28 = vpop.f32.mrb[110].mxu0  ;;  %v2688_v21 = vld [vmem:[#allocation2 + $0x190] sm:$0xff]  ;;  %v2697_v47 = vld [vmem:[#allocation2 + $0x1d8] sm:$0xff]  ;;  %v2563_v9 = vld [vmem:[%s8174_s3 + $0x1a8] sm:$0xff]  ;;  %v4998_v16 = vcombine.low %v2552_v10, %v2556_v38 }
 0x1b6   :  { %2498 = vst.msk [vmem:[#allocation2 + $0x1a0] sm:$0xff] %vm2445_vm5, %v2433_v6  ;;  %v2235_v36 = vmul.f32 0.2, %v1927_v24  ;;  %v1930_v46 = vadd.f32 %v5788_v28, %v851_v43  ;;  %v1921_v44 = vpop.f32.mrb[111].mxu0  ;;  %vm2107_vm6 = vcmp.ge.f32.partialorder %v1927_v24, 0.0  ;;  %v5005_v26 = vcombine.high %v2559_v18, %v2563_v9  ;;  %v2571_v0 = vld [vmem:[%s8174_s3 + $0x1e8] sm:$0xff] }
 0x1b7   :  { %3736 = vmatmul.mubr.bf16.gmra.mrb[84].mxu1 %v4964_v1  ;;  %3897 = vmatmul.mubr.bf16.gmra.mrb[116].mxu0 %v4966_v60  ;;  %v2233_v13 = vmul.f32 0.2, %v1919_v45  ;;  %v1922_v8 = vadd.f32 %v1921_v44, %v7313_v42  ;;  %vm2105_vm7 = vcmp.ge.f32.partialorder %v1919_v45, 0.0  ;;  %v2536_v42 = vld [vmem:[%s8174_s3 + $0xd0] sm:$0xff]  ;;  %v2583_v40 = vld [vmem:[%s8174_s3 + $0x248] sm:$0xff] }
 0x1b8   :  { %5504 = vmatpush3.bf16.msra.mxu1 %v2688_v21  ;;  %3743 = vmatprep.mubr.bf16.mxu1 %v4973_v2  ;;  %vm2108_vm8 = vcmp.ge.f32.partialorder %v1930_v46, 0.0  ;;  %v2236_v19 = vmul.f32 0.2, %v1930_v46  ;;  %v2363_v53 = vsel %vm2107_vm6, %v1927_v24, %v2235_v36  ;;  %v4983_v49 = vcombine.high %v2536_v42, %v2540_v3  ;;  %v2564_v60 = vld [vmem:[%s8174_s3 + $0x1b0] sm:$0xff]  ;;  %v2567_v24 = vld [vmem:[%s8174_s3 + $0x1c8] sm:$0xff] }
 0x1b9   :  { %5505 = vmatprep.subr.bf16.mxu1 %v2697_v47  ;;  %3904 = vmatprep.mubr.bf16.mxu0 %v4975_v51  ;;  %vm2106_vm9 = vcmp.ge.f32.partialorder %v1922_v8, 0.0  ;;  %v2234_v58 = vmul.f32 0.2, %v1922_v8  ;;  %v2361_v55 = vsel %vm2105_vm7, %v1919_v45, %v2233_v13  ;;  %v4982_v23 = vcombine.low %v2536_v42, %v2540_v3  ;;  %v2568_v37 = vld [vmem:[%s8174_s3 + $0x1d0] sm:$0xff]  ;;  %v2575_v21 = vld [vmem:[%s8174_s3 + $0x208] sm:$0xff] }
 0x1ba   :  { %v2364_v50 = vsel %vm2108_vm8, %v1930_v46, %v2236_v19  ;;  %v4996_v2 = vcombine.low %v2551_v22, %v2555_v27  ;;  %v5007_v62 = vcombine.high %v2560_v30, %v2564_v60  ;;  %v2572_v6 = vld [vmem:[%s8174_s3 + $0x1f0] sm:$0xff]  ;;  %v5004_v45 = vcombine.low %v2559_v18, %v2563_v9  ;;  %v2579_v36 = vld [vmem:[%s8174_s3 + $0x228] sm:$0xff] }
 0x1bb   :  { %v2436_v63 = vpack.c.bf16 %v2364_v50, %v2363_v53  ;;  %v2362_v7 = vsel %vm2106_vm9, %v1922_v8, %v2234_v58  ;;  %v5006_v51 = vcombine.low %v2560_v30, %v2564_v60  ;;  %v5013_v43 = vcombine.high %v2567_v24, %v2571_v0  ;;  %v2576_v46 = vld [vmem:[%s8174_s3 + $0x210] sm:$0xff]  ;;  %v2587_v14 = vld [vmem:[%s8174_s3 + $0x268] sm:$0xff] }
 0x1bc   :  { %5506 = vmatpush3.bf16.msra.mxu1 %v2689_v32  ;;  %v2435_v52 = vpack.c.bf16 %v2362_v7, %v2361_v55  ;;  %v2691_v34 = vld [vmem:[#allocation2 + $0x1a8] sm:$0xff]  ;;  %v5015_v28 = vcombine.high %v2568_v37, %v2572_v6  ;;  %v2580_v44 = vld [vmem:[%s8174_s3 + $0x230] sm:$0xff]  ;;  %v5012_v13 = vcombine.low %v2567_v24, %v2571_v0  ;;  %v5014_v8 = vcombine.low %v2568_v37, %v2572_v6 }
 0x1bd   :  { %5507 = vmatprep.subr.bf16.mxu1 %v2698_v35  ;;  %2501 = vst.msk [vmem:[#allocation2 + $0x1b8] sm:$0xff] %vm2445_vm5, %v2436_v63  ;;  %v2690_v25 = vld [vmem:[#allocation2 + $0x1a0] sm:$0xff]  ;;  %v5021_v47 = vcombine.high %v2575_v21, %v2579_v36  ;;  %v5023_v19 = vcombine.high %v2576_v46, %v2580_v44  ;;  %v2584_v58 = vld [vmem:[%s8174_s3 + $0x250] sm:$0xff]  ;;  %v5020_v3 = vcombine.low %v2575_v21, %v2579_v36 }
 0x1be   :  { %2500 = vst.msk [vmem:[#allocation2 + $0x1b0] sm:$0xff] %vm2445_vm5, %v2435_v52  ;;  %v2588_v42 = vld [vmem:[%s8174_s3 + $0x270] sm:$0xff]  ;;  %v5022_v53 = vcombine.low %v2576_v46, %v2580_v44  ;;  %v5029_v50 = vcombine.high %v2583_v40, %v2587_v14  ;;  %v5028_v7 = vcombine.low %v2583_v40, %v2587_v14 }
 0x1bf   :  { %3744 = vmatmul.mubr.bf16.gmra.mrb[88].mxu1 %v4972_v48  ;;  %3905 = vmatmul.mubr.bf16.gmra.mrb[120].mxu0 %v4974_v61  ;;  %v5031_v32 = vcombine.high %v2584_v58, %v2588_v42  ;;  %v2591_v48 = vld [vmem:[%s8174_s3 + $0x288] sm:$0xff]  ;;  %v2592_v55 = vld [vmem:[%s8174_s3 + $0x290] sm:$0xff]  ;;  %v5030_v35 = vcombine.low %v2584_v58, %v2588_v42 }
 0x1c0   :  { %5508 = vmatpush3.bf16.msra.mxu1 %v2690_v25  ;;  %3751 = vmatprep.mubr.bf16.mxu1 %v4981_v20  ;;  %v2595_v61 = vld [vmem:[%s8174_s3 + $0x2a8] sm:$0xff]  ;;  %v2596_v63 = vld [vmem:[%s8174_s3 + $0x2b0] sm:$0xff] }
 0x1c1   :  { %5509 = vmatprep.subr.bf16.mxu1 %v2699_v17  ;;  %3912 = vmatprep.mubr.bf16.mxu0 %v4983_v49  ;;  %v5037_v20 = vcombine.high %v2591_v48, %v2595_v61  ;;  %v5039_v52 = vcombine.high %v2592_v55, %v2596_v63  ;;  %v2599_v49 = vld [vmem:[%s8174_s3 + $0x2c8] sm:$0xff]  ;;  %v2600_v17 = vld [vmem:[%s8174_s3 + $0x2d0] sm:$0xff]  ;;  %v5036_v39 = vcombine.low %v2591_v48, %v2595_v61 }
 0x1c2   :  { %v2603_v25 = vld [vmem:[%s8174_s3 + $0x2e8] sm:$0xff]  ;;  %v2604_v29 = vld [vmem:[%s8174_s3 + $0x2f0] sm:$0xff]  ;;  %v5038_v31 = vcombine.low %v2592_v55, %v2596_v63 }
 0x1c3   :  { %v5045_v59 = vcombine.high %v2599_v49, %v2603_v25  ;;  %v5046_v22 = vcombine.low %v2600_v17, %v2604_v29  ;;  %v2616_v18 = vld [vmem:[%s8174_s3 + $0x350] sm:$0xff]  ;;  %v2631_v58 = vld [vmem:[%s8174_s3 + $0x3c8] sm:$0xff] }
 0x1c4   :  { %5510 = vmatpush3.bf16.msra.mxu1 %v2691_v34  ;;  %v2693_v1 = vld [vmem:[#allocation2 + $0x1b8] sm:$0xff]  ;;  %v5047_v34 = vcombine.high %v2600_v17, %v2604_v29  ;;  %v2620_v9 = vld [vmem:[%s8174_s3 + $0x370] sm:$0xff]  ;;  %v2635_v42 = vld [vmem:[%s8174_s3 + $0x3e8] sm:$0xff] }
 0x1c5   :  { %5511 = vmatprep.subr.bf16.mxu1 %v2700_v41  ;;  %v2692_v56 = vld [vmem:[#allocation2 + $0x1b0] sm:$0xff]  ;;  %v5063_v0 = vcombine.high %v2616_v18, %v2620_v9  ;;  %v5062_v44 = vcombine.low %v2616_v18, %v2620_v9  ;;  %v2533_v18 = vld [vmem:[%s8174_s3 + $0xb8] sm:$0xff] }
 0x1c6   :  { %v2608_v41 = vld [vmem:[%s8174_s3 + $0x310] sm:$0xff] }
 0x1c7   :  { %3752 = vmatmul.mubr.bf16.gmra.mrb[92].mxu1 %v4980_v5  ;;  %3913 = vmatmul.mubr.bf16.gmra.mrb[124].mxu0 %v4982_v23  ;;  %v2607_v5 = vld [vmem:[%s8174_s3 + $0x308] sm:$0xff] }
 0x1c8   :  { %5512 = vmatpush3.bf16.msra.mxu1 %v2692_v56  ;;  %3759 = vmatprep.mubr.bf16.mxu1 %v4989_v15  ;;  %v2611_v23 = vld [vmem:[%s8174_s3 + $0x328] sm:$0xff]  ;;  %v2612_v15 = vld [vmem:[%s8174_s3 + $0x330] sm:$0xff] }
 0x1c9   :  { %5513 = vmatprep.subr.bf16.mxu1 %v2701_v33  ;;  %3920 = vmatprep.mubr.bf16.mxu0 %v4991_v54  ;;  %v5044_v33 = vcombine.low %v2599_v49, %v2603_v25  ;;  %v5053_v38 = vcombine.high %v2607_v5, %v2611_v23  ;;  %v2513_v49 = vld [vmem:[%s8174_s3 + $0x18] sm:$0xff] }
 0x1ca   :  { %v2517_v25 = vld [vmem:[%s8174_s3 + $0x38] sm:$0xff] }
 0x1cc   :  { %5514 = vmatpush3.bf16.msra.mxu1 %v2693_v1  ;;  %v5055_v1 = vcombine.high %v2608_v41, %v2612_v15 }
 0x1cf   :  { %3760 = vmatmul.mubr.bf16.gmra.mrb[96].mxu1 %v4988_v4  ;;  %3921 = vmatmul.mubr.bf16.gmra.mrb[128].mxu0 %v4990_v11 }
 0x1d0   :  { %3767 = vmatprep.mubr.bf16.mxu1 %v4997_v57  ;;  %3928 = vmatprep.mubr.bf16.mxu0 %v4999_v12  ;;  %v2615_v57 = vld [vmem:[%s8174_s3 + $0x348] sm:$0xff] }
 0x1d1   :  { %v2619_v12 = vld [vmem:[%s8174_s3 + $0x368] sm:$0xff] }
 0x1d2   :  { %v5061_v24 = vcombine.high %v2615_v57, %v2619_v12  ;;  %v5060_v46 = vcombine.low %v2615_v57, %v2619_v12  ;;  %v2529_v12 = vld [vmem:[%s8174_s3 + $0x98] sm:$0xff] }
 0x1d7   :  { %3768 = vmatmul.mubr.bf16.gmra.mrb[100].mxu1 %v4996_v2  ;;  %3929 = vmatmul.mubr.bf16.gmra.mrb[132].mxu0 %v4998_v16  ;;  %v5052_v2 = vcombine.low %v2607_v5, %v2611_v23  ;;  %v5054_v16 = vcombine.low %v2608_v41, %v2612_v15  ;;  %v4961_v5 = vcombine.high %v2513_v49, %v2517_v25  ;;  %v2521_v15 = vld [vmem:[%s8174_s3 + $0x58] sm:$0xff] }
 0x1d8   :  { %3775 = vmatprep.mubr.bf16.mxu1 %v5005_v26  ;;  %3936 = vmatprep.mubr.bf16.mxu0 %v5007_v62 }
 0x1df   :  { %3776 = vmatmul.mubr.bf16.gmra.mrb[104].mxu1 %v5004_v45  ;;  %3937 = vmatmul.mubr.bf16.gmra.mrb[136].mxu0 %v5006_v51  ;;  %v2623_v45 = vld [vmem:[%s8174_s3 + $0x388] sm:$0xff] }
 0x1e0   :  { %3783 = vmatprep.mubr.bf16.mxu1 %v5013_v43  ;;  %3944 = vmatprep.mubr.bf16.mxu0 %v5015_v28  ;;  %v2627_v51 = vld [vmem:[%s8174_s3 + $0x3a8] sm:$0xff]  ;;  %v2624_v43 = vld [vmem:[%s8174_s3 + $0x390] sm:$0xff] }
 0x1e1   :  { %v2628_v28 = vld [vmem:[%s8174_s3 + $0x3b0] sm:$0xff]  ;;  %v5068_v48 = vcombine.low %v2623_v45, %v2627_v51 }
 0x1e2   :  { %v5070_v61 = vcombine.low %v2624_v43, %v2628_v28 }
 0x1e7   :  { %3784 = vmatmul.mubr.bf16.gmra.mrb[108].mxu1 %v5012_v13  ;;  %3945 = vmatmul.mubr.bf16.gmra.mrb[140].mxu0 %v5014_v8 }
 0x1e8   :  { %3791 = vmatprep.mubr.bf16.mxu1 %v5021_v47  ;;  %3952 = vmatprep.mubr.bf16.mxu0 %v5023_v19  ;;  %v5069_v47 = vcombine.high %v2623_v45, %v2627_v51  ;;  %v5071_v19 = vcombine.high %v2624_v43, %v2628_v28  ;;  %v2541_v45 = vld [vmem:[%s8174_s3 + $0xf8] sm:$0xff]  ;;  %v4976_v28 = vcombine.low %v2529_v12, %v2533_v18 }
 0x1ef   :  { %3792 = vmatmul.mubr.bf16.gmra.mrb[112].mxu1 %v5020_v3  ;;  %3953 = vmatmul.mubr.bf16.gmra.mrb[144].mxu0 %v5022_v53  ;;  %v2632_v3 = vld [vmem:[%s8174_s3 + $0x3d0] sm:$0xff] }
 0x1f0   :  { %3799 = vmatprep.mubr.bf16.mxu1 %v5029_v50  ;;  %3960 = vmatprep.mubr.bf16.mxu0 %v5031_v32  ;;  %v2636_v53 = vld [vmem:[%s8174_s3 + $0x3f0] sm:$0xff] }
 0x1f7   :  { %3800 = vmatmul.mubr.bf16.gmra.mrb[116].mxu1 %v5028_v7  ;;  %3961 = vmatmul.mubr.bf16.gmra.mrb[148].mxu0 %v5030_v35  ;;  %v5077_v7 = vcombine.high %v2631_v58, %v2635_v42  ;;  %v5079_v35 = vcombine.high %v2632_v3, %v2636_v53 }
 0x1f8   :  { %3807 = vmatprep.mubr.bf16.mxu1 %v5037_v20  ;;  %3968 = vmatprep.mubr.bf16.mxu0 %v5039_v52 }
 0x1ff   :  { %3808 = vmatmul.mubr.bf16.gmra.mrb[120].mxu1 %v5036_v39  ;;  %3969 = vmatmul.mubr.bf16.gmra.mrb[152].mxu0 %v5038_v31  ;;  %v5076_v39 = vcombine.low %v2631_v58, %v2635_v42  ;;  %v5078_v31 = vcombine.low %v2632_v3, %v2636_v53 }
 0x200   :  { %3815 = vmatprep.mubr.bf16.mxu1 %v5045_v59  ;;  %3976 = vmatprep.mubr.bf16.mxu0 %v5047_v34 }
 0x202   :  { %v5179_v54 = vpop.f32.mrb[16].mxu1 }
 0x203   :  { %v5180_v56 = vpop.f32.mrb[17].mxu1 }
 0x204   :  { %v7683_v27 = vadd.f32 %v5180_v56, %v5179_v54  ;;  %v5182_v10 = vpop.f32.mrb[18].mxu1  ;;  %v2525_v54 = vld [vmem:[%s8174_s3 + $0x78] sm:$0xff] }
 0x205   :  { %v5183_v4 = vpop.f32.mrb[19].mxu1 }
 0x206   :  { %v7685_v11 = vadd.f32 %v5183_v4, %v5182_v10 }
 0x207   :  { %3816 = vmatmul.mubr.bf16.gmra.mrb[124].mxu1 %v5044_v33  ;;  %3977 = vmatmul.mubr.bf16.gmra.mrb[156].mxu0 %v5046_v22  ;;  %v4960_v22 = vcombine.low %v2513_v49, %v2517_v25 }
 0x208   :  { %3823 = vmatprep.mubr.bf16.mxu1 %v5053_v38  ;;  %3984 = vmatprep.mubr.bf16.mxu0 %v5055_v1  ;;  %v4969_v1 = vcombine.high %v2521_v15, %v2525_v54 }
 0x20a   :  { %v5185_v30 = vpop.f32.mrb[20].mxu1 }
 0x20b   :  { %v5186_v60 = vpop.f32.mrb[21].mxu1 }
 0x20c   :  { %v7699_v26 = vadd.f32 %v5186_v60, %v5185_v30  ;;  %v5188_v62 = vpop.f32.mrb[22].mxu1  ;;  %v4968_v60 = vcombine.low %v2521_v15, %v2525_v54 }
 0x20d   :  { %v5189_v37 = vpop.f32.mrb[23].mxu1 }
 0x20e   :  { %v7701_v6 = vadd.f32 %v5189_v37, %v5188_v62  ;;  %v4977_v62 = vcombine.high %v2529_v12, %v2533_v18  ;;  %v2537_v37 = vld [vmem:[%s8174_s3 + $0xd8] sm:$0xff] }
 0x20f   :  { %3824 = vmatmul.mubr.bf16.gmra.mrb[128].mxu1 %v5052_v2  ;;  %3985 = vmatmul.mubr.bf16.gmra.mrb[160].mxu0 %v5054_v16  ;;  %v4984_v42 = vcombine.low %v2537_v37, %v2541_v45 }
 0x210   :  { %3831 = vmatprep.mubr.bf16.mxu1 %v5061_v24  ;;  %3992 = vmatprep.mubr.bf16.mxu0 %v5063_v0 }
 0x212   :  { %v5191_v21 = vpop.f32.mrb[24].mxu1 }
 0x213   :  { %v5192_v36 = vpop.f32.mrb[25].mxu1 }
 0x214   :  { %v7715_v13 = vadd.f32 %v5192_v36, %v5191_v21  ;;  %v5194_v8 = vpop.f32.mrb[26].mxu1 }
 0x215   :  { %v5195_v40 = vpop.f32.mrb[27].mxu1 }
 0x216   :  { %v7717_v14 = vadd.f32 %v5195_v40, %v5194_v8 }
 0x217   :  { %3832 = vmatmul.mubr.bf16.gmra.mrb[132].mxu1 %v5060_v46  ;;  %3993 = vmatmul.mubr.bf16.gmra.mrb[164].mxu0 %v5062_v44  ;;  %v4985_v46 = vcombine.high %v2537_v37, %v2541_v45 }
 0x218   :  { %3839 = vmatprep.mubr.bf16.mxu1 %v5069_v47  ;;  %4000 = vmatprep.mubr.bf16.mxu0 %v5071_v19  ;;  %v2545_v47 = vld [vmem:[%s8174_s3 + $0x118] sm:$0xff] }
 0x219   :  { %v2549_v19 = vld [vmem:[%s8174_s3 + $0x138] sm:$0xff] }
 0x21a   :  { %v5197_v50 = vpop.f32.mrb[28].mxu1 }
 0x21b   :  { %v5198_v32 = vpop.f32.mrb[29].mxu1 }
 0x21c   :  { %v7731_v55 = vadd.f32 %v5198_v32, %v5197_v50  ;;  %v5200_v63 = vpop.f32.mrb[30].mxu1  ;;  %v4993_v50 = vcombine.high %v2545_v47, %v2549_v19 }
 0x21d   :  { %v5201_v20 = vpop.f32.mrb[31].mxu1 }
 0x21e   :  { %v7733_v52 = vadd.f32 %v5201_v20, %v5200_v63  ;;  %v2557_v63 = vld [vmem:[%s8174_s3 + $0x178] sm:$0xff]  ;;  %v4992_v20 = vcombine.low %v2545_v47, %v2549_v19 }
 0x21f   :  { %3840 = vmatmul.mubr.bf16.gmra.mrb[136].mxu1 %v5068_v48  ;;  %4001 = vmatmul.mubr.bf16.gmra.mrb[168].mxu0 %v5070_v61  ;;  %v2553_v61 = vld [vmem:[%s8174_s3 + $0x158] sm:$0xff] }
 0x220   :  { %3847 = vmatprep.mubr.bf16.mxu1 %v5077_v7  ;;  %4008 = vmatprep.mubr.bf16.mxu0 %v5079_v35 }
 0x222   :  { %v5203_v17 = vpop.f32.mrb[32].mxu1 }
 0x223   :  { %v5204_v29 = vpop.f32.mrb[33].mxu1 }
 0x224   :  { %v7741_v59 = vadd.f32 %v5204_v29, %v5203_v17  ;;  %v5206_v34 = vpop.f32.mrb[34].mxu1  ;;  %v5001_v17 = vcombine.high %v2553_v61, %v2557_v63 }
 0x225   :  { %v5207_v23 = vpop.f32.mrb[35].mxu1 }
 0x226   :  { %v7743_v41 = vadd.f32 %v5207_v23, %v5206_v34  ;;  %v7797_v34 = vpop.permute.xlu1 %2821  ;;  %v2565_v23 = vld [vmem:[%s8174_s3 + $0x1b8] sm:$0xff] }
 0x227   :  { %3848 = vmatmul.mubr.bf16.gmra.mrb[140].mxu1 %v5076_v39  ;;  %4009 = vmatmul.mubr.bf16.gmra.mrb[172].mxu0 %v5078_v31  ;;  %v7795_v31 = vpop.permute.xlu0 %2816 }
 0x228   :  { %4049 = vmatprep.mubr.bf16.mxu1 %v4961_v5  ;;  %v2561_v5 = vld [vmem:[%s8174_s3 + $0x198] sm:$0xff] }
 0x22a   :  { %v5209_v56 = vpop.f32.mrb[36].mxu1  ;;  %v7811_v18 = vpop.permute.xlu1 %2741 }
 0x22b   :  { %v5210_v33 = vpop.f32.mrb[37].mxu1 }
 0x22c   :  { %v7751_v10 = vadd.f32 %v5210_v33, %v5209_v56  ;;  %v5212_v38 = vpop.f32.mrb[38].mxu1  ;;  %v5000_v56 = vcombine.low %v2553_v61, %v2557_v63 }
 0x22d   :  { %v5213_v4 = vpop.f32.mrb[39].mxu1 }
 0x22e   :  { %v7753_v57 = vadd.f32 %v5213_v4, %v5212_v38  ;;  %v5009_v38 = vcombine.high %v2561_v5, %v2565_v23  ;;  %v7807_v4 = vpop.permute.xlu0 %2736 }
 0x22f   :  { %4050 = vmatmul.mubr.bf16.vlgmr.msra.gmra.mrb[144].mxu1 %v4960_v22 }
 0x230   :  { %4057 = vmatprep.mubr.bf16.mxu1 %v4969_v1 }
 0x232   :  { %v5215_v9 = vpop.f32.mrb[40].mxu1 }
 0x233   :  { %v5216_v30 = vpop.f32.mrb[41].mxu1 }
 0x234   :  { %v7761_v2 = vadd.f32 %v5216_v30, %v5215_v9  ;;  %v5218_v16 = vpop.f32.mrb[42].mxu1  ;;  %v2569_v9 = vld [vmem:[%s8174_s3 + $0x1d8] sm:$0xff] }
 0x235   :  { %v5219_v24 = vpop.f32.mrb[43].mxu1  ;;  %v2573_v30 = vld [vmem:[%s8174_s3 + $0x1f8] sm:$0xff] }
 0x236   :  { %v7763_v0 = vadd.f32 %v5219_v24, %v5218_v16  ;;  %v7819_v24 = vpop.permute.xlu0 %2826 }
 0x237   :  { %4058 = vmatmul.mubr.bf16.gmra.mrb[148].mxu1 %v4968_v60 }
 0x238   :  { %4065 = vmatprep.mubr.bf16.mxu1 %v4977_v62  ;;  %v5008_v62 = vcombine.low %v2561_v5, %v2565_v23 }
 0x23a   :  { %v5221_v51 = vpop.f32.mrb[44].mxu1  ;;  %v7833_v47 = vpop.permute.xlu0 %2746 }
 0x23b   :  { %v5222_v43 = vpop.f32.mrb[45].mxu1 }
 0x23c   :  { %v7771_v21 = vadd.f32 %v5222_v43, %v5221_v51  ;;  %v5224_v36 = vpop.f32.mrb[46].mxu1  ;;  %v5017_v51 = vcombine.high %v2569_v9, %v2573_v30  ;;  %v7823_v43 = vpop.permute.xlu1 %2831 }
 0x23d   :  { %v5225_v44 = vpop.f32.mrb[47].mxu1 }
 0x23e   :  { %v7773_v8 = vadd.f32 %v5225_v44, %v5224_v36  ;;  %v2581_v44 = vld [vmem:[%s8174_s3 + $0x238] sm:$0xff] }
 0x23f   :  { %4066 = vmatmul.mubr.bf16.gmra.mrb[152].mxu1 %v4976_v28 }
 0x240   :  { %4073 = vmatprep.mubr.bf16.mxu1 %v4985_v46  ;;  %v2577_v46 = vld [vmem:[%s8174_s3 + $0x218] sm:$0xff] }
 0x241   :  { %v5024_v5 = vcombine.low %v2577_v46, %v2581_v44 }
 0x242   :  { %v5227_v40 = vpop.f32.mrb[48].mxu1 }
 0x243   :  { %v5228_v58 = vpop.f32.mrb[49].mxu1 }
 0x244   :  { %v7781_v3 = vadd.f32 %v5228_v58, %v5227_v40  ;;  %v5230_v53 = vpop.f32.mrb[50].mxu1  ;;  %v7835_v40 = vpop.permute.xlu1 %2751 }
 0x245   :  { %v5231_v32 = vpop.f32.mrb[51].mxu1 }
 0x246   :  { %v7783_v48 = vadd.f32 %v5231_v32, %v5230_v53  ;;  %v5025_v32 = vcombine.high %v2577_v46, %v2581_v44 }
 0x247   :  { %4074 = vmatmul.mubr.bf16.gmra.mrb[156].mxu1 %v4984_v42  ;;  %v5016_v42 = vcombine.low %v2569_v9, %v2573_v30  ;;  %v2593_v9 = vld [vmem:[%s8174_s3 + $0x298] sm:$0xff] }
 0x248   :  { %4081 = vmatprep.mubr.bf16.mxu1 %v4993_v50  ;;  %v2597_v30 = vld [vmem:[%s8174_s3 + $0x2b8] sm:$0xff] }
 0x249   :  { %v5041_v46 = vcombine.high %v2593_v9, %v2597_v30 }
 0x24a   :  { %v5233_v7 = vpop.f32.mrb[52].mxu1 }
 0x24b   :  { %v5234_v35 = vpop.f32.mrb[53].mxu1 }
 0x24c   :  { %v7791_v49 = vadd.f32 %v5234_v35, %v5233_v7  ;;  %v5236_v25 = vpop.f32.mrb[54].mxu1  ;;  %v7841_v7 = vpop.permute.xlu0 %2836 }
 0x24d   :  { %v5237_v29 = vpop.f32.mrb[55].mxu1  ;;  %v7843_v35 = vpop.permute.xlu1 %2841 }
 0x24e   :  { %v7793_v39 = vadd.f32 %v5237_v29, %v5236_v25  ;;  %v2589_v25 = vld [vmem:[%s8174_s3 + $0x278] sm:$0xff] }
 0x24f   :  { %4082 = vmatmul.mubr.bf16.gmra.mrb[160].mxu1 %v4992_v20  ;;  %v2585_v20 = vld [vmem:[%s8174_s3 + $0x258] sm:$0xff] }
 0x250   :  { %4089 = vmatprep.mubr.bf16.mxu1 %v5001_v17 }
 0x252   :  { %v5239_v15 = vpop.f32.mrb[56].mxu1 }
 0x253   :  { %v5240_v54 = vpop.f32.mrb[57].mxu1 }
 0x254   :  { %v7805_v33 = vadd.f32 %v5240_v54, %v5239_v15  ;;  %v5242_v22 = vpop.f32.mrb[58].mxu1  ;;  %v5033_v54 = vcombine.high %v2585_v20, %v2589_v25 }
 0x255   :  { %v5243_v1 = vpop.f32.mrb[59].mxu1 }
 0x256   :  { %v7809_v12 = vadd.f32 %v5243_v1, %v5242_v22  ;;  %v7853_v22 = vpop.permute.xlu0 %2756  ;;  %v7857_v1 = vpop.permute.xlu1 %2761 }
 0x257   :  { %4090 = vmatmul.mubr.bf16.gmra.mrb[164].mxu1 %v5000_v56 }
 0x258   :  { %4097 = vmatprep.mubr.bf16.mxu1 %v5009_v38 }
 0x25a   :  { %v5245_v60 = vpop.f32.mrb[60].mxu1  ;;  %v7869_v44 = vpop.permute.xlu1 %2851 }
 0x25b   :  { %v5246_v16 = vpop.f32.mrb[61].mxu1 }
 0x25c   :  { %v7821_v37 = vadd.f32 %v5246_v16, %v5245_v60  ;;  %v5248_v45 = vpop.f32.mrb[62].mxu1 }
 0x25d   :  { %v5249_v28 = vpop.f32.mrb[63].mxu1 }
 0x25e   :  { %v7825_v36 = vadd.f32 %v5249_v28, %v5248_v45  ;;  %v7865_v45 = vpop.permute.xlu0 %2846 }
 0x25f   :  { %4098 = vmatmul.mubr.bf16.gmra.mrb[168].mxu1 %v5008_v62  ;;  %v5032_v62 = vcombine.low %v2585_v20, %v2589_v25  ;;  %v7881_v20 = vpop.permute.xlu1 %2771 }
 0x260   :  { %4105 = vmatprep.mubr.bf16.mxu1 %v5017_v51 }
 0x262   :  { %v5251_v19 = vpop.f32.mrb[64].mxu1 }
 0x263   :  { %v5252_v58 = vpop.f32.mrb[65].mxu1 }
 0x264   :  { %v7837_v53 = vadd.f32 %v5252_v58, %v5251_v19  ;;  %v5254_v50 = vpop.f32.mrb[66].mxu1 }
 0x265   :  { %v5255_v61 = vpop.f32.mrb[67].mxu1 }
 0x266   :  { %8211 = vst [vmem:[#allocation7_spill] sm:$0xff] %v7837_v53  ;;  %v7839_v63 = vadd.f32 %v5255_v61, %v5254_v50  ;;  %v2605_v50 = vld [vmem:[%s8174_s3 + $0x2f8] sm:$0xff] }
 0x267   :  { %4106 = vmatmul.mubr.bf16.gmra.mrb[172].mxu1 %v5016_v42  ;;  %v2601_v42 = vld [vmem:[%s8174_s3 + $0x2d8] sm:$0xff] }
 0x268   :  { %8212 = vst [vmem:[#allocation6_spill] sm:$0xff] %v7839_v63  ;;  %4113 = vmatprep.mubr.bf16.mxu1 %v5025_v32  ;;  %v7879_v32 = vpop.permute.xlu0 %2766 }
 0x26a   :  { %v5257_v17 = vpop.f32.mrb[68].mxu1 }
 0x26b   :  { %v5258_v29 = vpop.f32.mrb[69].mxu1 }
 0x26c   :  { %v7851_v23 = vadd.f32 %v5258_v29, %v5257_v17  ;;  %v5260_v15 = vpop.f32.mrb[70].mxu1  ;;  %v5040_v17 = vcombine.low %v2593_v9, %v2597_v30  ;;  %v2613_v9 = vld [vmem:[%s8174_s3 + $0x338] sm:$0xff] }
 0x26d   :  { %v5261_v56 = vpop.f32.mrb[71].mxu1 }
 0x26e   :  { %8213 = vst [vmem:[#allocation10_spill] sm:$0xff] %v7851_v23  ;;  %v7855_v38 = vadd.f32 %v5261_v56, %v5260_v15  ;;  %v5049_v15 = vcombine.high %v2601_v42, %v2605_v50 }
 0x26f   :  { %4114 = vmatmul.mubr.bf16.gmra.mrb[176].mxu1 %v5024_v5 }
 0x270   :  { %8214 = vst [vmem:[#allocation8_spill] sm:$0xff] %v7855_v38  ;;  %4121 = vmatprep.mubr.bf16.mxu1 %v5033_v54 }
 0x272   :  { %v5263_v60 = vpop.f32.mrb[72].mxu1 }
 0x273   :  { %v5264_v16 = vpop.f32.mrb[73].mxu1 }
 0x274   :  { %v7867_v51 = vadd.f32 %v5264_v16, %v5263_v60  ;;  %v5266_v28 = vpop.f32.mrb[74].mxu1  ;;  %v7887_v60 = vpop.permute.xlu0 %2856 }
 0x275   :  { %v5267_v19 = vpop.f32.mrb[75].mxu1  ;;  %v7889_v16 = vpop.permute.xlu1 %2861 }
 0x276   :  { %8215 = vst [vmem:[#allocation11_spill] sm:$0xff] %v7867_v51  ;;  %v7871_v58 = vadd.f32 %v5267_v19, %v5266_v28  ;;  %8219 = vst [vmem:[#allocation15_spill] sm:$0xff] %v7889_v16  ;;  %v3572_v51 = vadd.f32 %v7685_v11, %v7811_v18  ;;  %v2621_v11 = vld [vmem:[%s8174_s3 + $0x378] sm:$0xff] }
 0x277   :  { %4122 = vmatmul.mubr.bf16.gmra.mrb[180].mxu1 %v5032_v62  ;;  %v2609_v62 = vld [vmem:[%s8174_s3 + $0x318] sm:$0xff] }
 0x278   :  { %8216 = vst [vmem:[#allocation9_spill] sm:$0xff] %v7871_v58  ;;  %4129 = vmatprep.mubr.bf16.mxu1 %v5041_v46 }
 0x27a   :  { %v5269_v61 = vpop.f32.mrb[76].mxu1 }
 0x27b   :  { %v5270_v25 = vpop.f32.mrb[77].mxu1 }
 0x27c   :  { %v7883_v29 = vadd.f32 %v5270_v25, %v5269_v61  ;;  %v5272_v5 = vpop.f32.mrb[78].mxu1  ;;  %v5048_v61 = vcombine.low %v2601_v42, %v2605_v50  ;;  %v3569_v25 = vadd.f32 %v7683_v27, %v7807_v4  ;;  %v7903_v42 = vpop.permute.xlu0 %2776  ;;  %v2617_v4 = vld [vmem:[%s8174_s3 + $0x358] sm:$0xff] }
 0x27d   :  { %v5273_v54 = vpop.f32.mrb[79].mxu1  ;;  %v7905_v27 = vpop.permute.xlu1 %2781 }
 0x27e   :  { %8217 = vst [vmem:[#allocation14_spill] sm:$0xff] %v7883_v29  ;;  %v7885_v56 = vadd.f32 %v5273_v54, %v5272_v5 }
 0x27f   :  { %4130 = vmatmul.mubr.bf16.gmra.mrb[184].mxu1 %v5040_v17 }
 0x280   :  { %8218 = vst [vmem:[#allocation12_spill] sm:$0xff] %v7885_v56  ;;  %4137 = vmatprep.mubr.bf16.mxu1 %v5049_v15  ;;  %v5057_v56 = vcombine.high %v2609_v62, %v2613_v9 }
 0x282   :  { %v5291_v30 = vpop.f32.mrb[80].mxu1  ;;  %v5403_v28 = vpop.f32.mrb[112].mxu0 }
 0x283   :  { %v5292_v46 = vpop.f32.mrb[81].mxu1  ;;  %v5404_v19 = vpop.f32.mrb[113].mxu0 }
 0x284   :  { %v5293_v17 = vadd.f32 %v5292_v46, %v5291_v30  ;;  %v5294_v5 = vpop.f32.mrb[82].mxu1  ;;  %v5405_v15 = vadd.f32 %v5404_v19, %v5403_v28  ;;  %v5406_v54 = vpop.f32.mrb[114].mxu0  ;;  %v5065_v19 = vcombine.high %v2617_v4, %v2621_v11 }
 0x285   :  { %v5295_v29 = vpop.f32.mrb[83].mxu1  ;;  %v5407_v58 = vpop.f32.mrb[115].mxu0 }
 0x286   :  { %v3730_v38 = vadd.f32 %v5293_v17, %v3569_v25  ;;  %v5296_v23 = vadd.f32 %v5295_v29, %v5294_v5  ;;  %v5408_v63 = vadd.f32 %v5407_v58, %v5406_v54  ;;  %v3577_v29 = vadd.f32 %v7699_v26, %v7833_v47  ;;  %v7923_v26 = vpop.permute.xlu1 %2871  ;;  %v2625_v47 = vld [vmem:[%s8174_s3 + $0x398] sm:$0xff] }
 0x287   :  { %4138 = vmatmul.mubr.bf16.gmra.mrb[188].mxu1 %v5048_v61  ;;  %v3580_v17 = vadd.f32 %v7701_v6, %v7835_v40  ;;  %v2629_v6 = vld [vmem:[%s8174_s3 + $0x3b8] sm:$0xff] }
 0x288   :  { %v3733_v16 = vadd.f32 %v5296_v23, %v3572_v51  ;;  %v7901_v53 = vadd.f32 %v5405_v15, %v3730_v38  ;;  %4145 = vmatprep.mubr.bf16.mxu1 %v5057_v56  ;;  %v5056_v51 = vcombine.low %v2609_v62, %v2613_v9  ;;  %v7921_v62 = vpop.permute.xlu0 %2866 }
 0x28a   :  { %v7913_v18 = vadd.f32 %v5408_v63, %v3733_v16  ;;  %v5297_v58 = vpop.f32.mrb[84].mxu1  ;;  %v5409_v50 = vpop.f32.mrb[116].mxu0 }
 0x28b   :  { %v5298_v23 = vpop.f32.mrb[85].mxu1  ;;  %v5410_v38 = vpop.f32.mrb[117].mxu0 }
 0x28c   :  { %v5299_v56 = vadd.f32 %v5298_v23, %v5297_v58  ;;  %v5300_v30 = vpop.f32.mrb[86].mxu1  ;;  %v5411_v28 = vadd.f32 %v5410_v38, %v5409_v50  ;;  %v5412_v46 = vpop.f32.mrb[118].mxu0  ;;  %v5064_v38 = vcombine.low %v2617_v4, %v2621_v11  ;;  %v2637_v11 = vld [vmem:[%s8174_s3 + $0x3f8] sm:$0xff] }
 0x28d   :  { %v5301_v61 = vpop.f32.mrb[87].mxu1  ;;  %v5413_v25 = vpop.f32.mrb[119].mxu0 }
 0x28e   :  { %v3738_v63 = vadd.f32 %v5299_v56, %v3577_v29  ;;  %v5302_v16 = vadd.f32 %v5301_v61, %v5300_v30  ;;  %v5414_v5 = vadd.f32 %v5413_v25, %v5412_v46  ;;  %v5073_v46 = vcombine.high %v2625_v47, %v2629_v6  ;;  %v2787_v4 = vpop.permute.xlu0 %2786 }
 0x28f   :  { %4146 = vmatmul.mubr.bf16.gmra.mrb[192].mxu1 %v5056_v51  ;;  %v3585_v51 = vadd.f32 %v7715_v13, %v7853_v22  ;;  %v3588_v25 = vadd.f32 %v7717_v14, %v7857_v1  ;;  %v2792_v13 = vpop.permute.xlu1 %2791  ;;  %v2633_v22 = vld [vmem:[%s8174_s3 + $0x3d8] sm:$0xff] }
 0x290   :  { %v3741_v15 = vadd.f32 %v5302_v16, %v3580_v17  ;;  %v7919_v54 = vadd.f32 %v5411_v28, %v3738_v63  ;;  %4153 = vmatprep.mubr.bf16.mxu1 %v5065_v19 }
 0x292   :  { %v7931_v40 = vadd.f32 %v5414_v5, %v3741_v15  ;;  %v5303_v9 = vpop.f32.mrb[88].mxu1  ;;  %v5415_v58 = vpop.f32.mrb[120].mxu0 }
 0x293   :  { %v5304_v50 = vpop.f32.mrb[89].mxu1  ;;  %v5416_v23 = vpop.f32.mrb[121].mxu0 }
 0x294   :  { %v5305_v29 = vadd.f32 %v5304_v50, %v5303_v9  ;;  %v5306_v56 = vpop.f32.mrb[90].mxu1  ;;  %v5417_v30 = vadd.f32 %v5416_v23, %v5415_v58  ;;  %v5418_v28 = vpop.f32.mrb[122].mxu0  ;;  %v5072_v23 = vcombine.low %v2625_v47, %v2629_v6 }
 0x295   :  { %v5307_v19 = vpop.f32.mrb[91].mxu1  ;;  %v5419_v61 = vpop.f32.mrb[123].mxu0 }
 0x296   :  { %v3746_v17 = vadd.f32 %v5305_v29, %v3585_v51  ;;  %v5308_v63 = vadd.f32 %v5307_v19, %v5306_v56  ;;  %v5420_v16 = vadd.f32 %v5419_v61, %v5418_v28  ;;  %v5081_v28 = vcombine.high %v2633_v22, %v2637_v11  ;;  %v7953_v47 = vpop.permute.xlu0 %2876 }
 0x297   :  { %4154 = vmatmul.mubr.bf16.gmra.mrb[196].mxu1 %v5064_v38  ;;  %v3593_v38 = vadd.f32 %v7731_v55, %v7879_v32  ;;  %v3596_v61 = vadd.f32 %v7733_v52, %v7881_v20  ;;  %v7955_v55 = vpop.permute.xlu1 %2881  ;;  %v3601_v52 = vadd.f32 %v7741_v59, %v7903_v42 }
 0x298   :  { %v3749_v5 = vadd.f32 %v5308_v63, %v3588_v25  ;;  %v7937_v15 = vadd.f32 %v5417_v30, %v3746_v17  ;;  %4161 = vmatprep.mubr.bf16.mxu1 %v5073_v46 }
 0x29a   :  { %v7945_v9 = vadd.f32 %v5420_v16, %v3749_v5  ;;  %v5309_v14 = vpop.f32.mrb[92].mxu1  ;;  %v5421_v1 = vpop.f32.mrb[124].mxu0 }
 0x29b   :  { %v5310_v58 = vpop.f32.mrb[93].mxu1  ;;  %v5422_v50 = vpop.f32.mrb[125].mxu0 }
 0x29c   :  { %v5311_v51 = vadd.f32 %v5310_v58, %v5309_v14  ;;  %v5312_v29 = vpop.f32.mrb[94].mxu1  ;;  %v5423_v56 = vadd.f32 %v5422_v50, %v5421_v1  ;;  %v5424_v30 = vpop.f32.mrb[126].mxu0  ;;  %v5080_v50 = vcombine.low %v2633_v22, %v2637_v11 }
 0x29d   :  { %v5313_v46 = vpop.f32.mrb[95].mxu1  ;;  %v5425_v19 = vpop.f32.mrb[127].mxu0 }
 0x29e   :  { %v3754_v25 = vadd.f32 %v5311_v51, %v3593_v38  ;;  %v5314_v17 = vadd.f32 %v5313_v46, %v5312_v29  ;;  %v5426_v63 = vadd.f32 %v5425_v19, %v5424_v30  ;;  %v3604_v30 = vadd.f32 %v7743_v41, %v7905_v27  ;;  %v2797_v22 = vpop.permute.xlu0 %2796  ;;  %v2802_v11 = vpop.permute.xlu1 %2801 }
 0x29f   :  { %4162 = vmatmul.mubr.bf16.gmra.mrb[200].mxu1 %v5072_v23 }
 0x2a0   :  { %v3757_v16 = vadd.f32 %v5314_v17, %v3596_v61  ;;  %v7951_v5 = vadd.f32 %v5423_v56, %v3754_v25  ;;  %4169 = vmatprep.mubr.bf16.mxu1 %v5081_v28 }
 0x2a2   :  { %v7957_v32 = vadd.f32 %v5426_v63, %v3757_v16  ;;  %v5315_v6 = vpop.f32.mrb[96].mxu1  ;;  %v5427_v14 = vpop.f32.mrb[128].mxu0 }
 0x2a3   :  { %v5316_v1 = vpop.f32.mrb[97].mxu1  ;;  %v5428_v58 = vpop.f32.mrb[129].mxu0 }
 0x2a4   :  { %v5317_v20 = vadd.f32 %v5316_v1, %v5315_v6  ;;  %v5318_v23 = vpop.f32.mrb[98].mxu1  ;;  %v5429_v38 = vadd.f32 %v5428_v58, %v5427_v14  ;;  %v5430_v51 = vpop.f32.mrb[130].mxu0  ;;  %v3609_v6 = vadd.f32 %v7751_v10, %v2787_v4 }
 0x2a5   :  { %v5319_v29 = vpop.f32.mrb[99].mxu1  ;;  %v5431_v56 = vpop.f32.mrb[131].mxu0 }
 0x2a6   :  { %v3762_v28 = vadd.f32 %v5317_v20, %v3601_v52  ;;  %v5320_v46 = vadd.f32 %v5319_v29, %v5318_v23  ;;  %v5432_v19 = vadd.f32 %v5431_v56, %v5430_v51  ;;  %v7971_v56 = vpop.permute.xlu0 %2886 }
 0x2a7   :  { %4170 = vmatmul.mubr.bf16.gmra.mrb[204].mxu1 %v5080_v50  ;;  %v3612_v50 = vadd.f32 %v7753_v57, %v2792_v13 }
 0x2a8   :  { %v3765_v61 = vadd.f32 %v5320_v46, %v3604_v30  ;;  %v7963_v25 = vadd.f32 %v5429_v38, %v3762_v28  ;;  %v7973_v30 = vpop.permute.xlu1 %2891 }
 0x2aa   :  { %v7965_v17 = vadd.f32 %v5432_v19, %v3765_v61  ;;  %v5321_v59 = vpop.f32.mrb[100].mxu1  ;;  %v5433_v42 = vpop.f32.mrb[132].mxu0  ;;  %v3617_v61 = vadd.f32 %v7761_v2, %v2797_v22 }
 0x2ab   :  { %v5322_v63 = vpop.f32.mrb[101].mxu1  ;;  %v5434_v16 = vpop.f32.mrb[133].mxu0 }
 0x2ac   :  { %v5323_v14 = vadd.f32 %v5322_v63, %v5321_v59  ;;  %v5324_v1 = vpop.f32.mrb[102].mxu1  ;;  %v5435_v41 = vadd.f32 %v5434_v16, %v5433_v42  ;;  %v5436_v27 = vpop.f32.mrb[134].mxu0 }
 0x2ad   :  { %v5325_v58 = vpop.f32.mrb[103].mxu1  ;;  %v5437_v52 = vpop.f32.mrb[135].mxu0 }
 0x2ae   :  { %v3770_v20 = vadd.f32 %v5323_v14, %v3609_v6  ;;  %v5326_v23 = vadd.f32 %v5325_v58, %v5324_v1  ;;  %v5438_v38 = vadd.f32 %v5437_v52, %v5436_v27  ;;  %v3620_v6 = vadd.f32 %v7763_v0, %v2802_v11  ;;  %v2807_v52 = vpop.permute.xlu0 %2806 }
 0x2b0   :  { %v3773_v51 = vadd.f32 %v5326_v23, %v3612_v50  ;;  %v7969_v29 = vadd.f32 %v5435_v41, %v3770_v20  ;;  %v2812_v50 = vpop.permute.xlu1 %2811 }
 0x2b2   :  { %v7975_v28 = vadd.f32 %v5438_v38, %v3773_v51  ;;  %v5327_v10 = vpop.f32.mrb[104].mxu1  ;;  %v5439_v4 = vpop.f32.mrb[136].mxu0  ;;  %v3625_v51 = vadd.f32 %v7771_v21, %v2807_v52 }
 0x2b3   :  { %v5328_v46 = vpop.f32.mrb[105].mxu1  ;;  %v5440_v19 = vpop.f32.mrb[137].mxu0 }
 0x2b4   :  { %v5329_v59 = vadd.f32 %v5328_v46, %v5327_v10  ;;  %v5330_v57 = vpop.f32.mrb[106].mxu1  ;;  %v5441_v13 = vadd.f32 %v5440_v19, %v5439_v4  ;;  %v5442_v42 = vpop.f32.mrb[138].mxu0 }
 0x2b5   :  { %v5331_v63 = vpop.f32.mrb[107].mxu1  ;;  %v5443_v16 = vpop.f32.mrb[139].mxu0 }
 0x2b6   :  { %v3778_v14 = vadd.f32 %v5329_v59, %v3617_v61  ;;  %v5332_v1 = vadd.f32 %v5331_v63, %v5330_v57  ;;  %v5444_v41 = vadd.f32 %v5443_v16, %v5442_v42  ;;  %v3628_v61 = vadd.f32 %v7773_v8, %v2812_v50 }
 0x2b8   :  { %v3781_v27 = vadd.f32 %v5332_v1, %v3620_v6  ;;  %v7979_v58 = vadd.f32 %v5441_v13, %v3778_v14 }
 0x2ba   :  { %v7981_v20 = vadd.f32 %v5444_v41, %v3781_v27  ;;  %v5333_v23 = vpop.f32.mrb[108].mxu1  ;;  %v5445_v2 = vpop.f32.mrb[140].mxu0  ;;  %v3633_v41 = vadd.f32 %v7781_v3, %v7795_v31 }
 0x2bb   :  { %v5334_v22 = vpop.f32.mrb[109].mxu1  ;;  %v5446_v38 = vpop.f32.mrb[141].mxu0 }
 0x2bc   :  { %v5335_v10 = vadd.f32 %v5334_v22, %v5333_v23  ;;  %v5336_v4 = vpop.f32.mrb[110].mxu1  ;;  %v5447_v46 = vadd.f32 %v5446_v38, %v5445_v2  ;;  %v5448_v0 = vpop.f32.mrb[142].mxu0  ;;  %v3636_v22 = vadd.f32 %v7783_v48, %v7797_v34 }
 0x2bd   :  { %v5337_v11 = vpop.f32.mrb[111].mxu1  ;;  %v5449_v19 = vpop.f32.mrb[143].mxu0 }
 0x2be   :  { %v3786_v59 = vadd.f32 %v5335_v10, %v3625_v51  ;;  %v5338_v57 = vadd.f32 %v5337_v11, %v5336_v4  ;;  %v5450_v13 = vadd.f32 %v5449_v19, %v5448_v0 }
 0x2c0   :  { %v3789_v42 = vadd.f32 %v5338_v57, %v3628_v61  ;;  %v7985_v63 = vadd.f32 %v5447_v46, %v3786_v59  ;;  %v3641_v61 = vadd.f32 %v7791_v49, %v7819_v24 }
 0x2c2   :  { %v7987_v16 = vadd.f32 %v5450_v13, %v3789_v42  ;;  %v5339_v6 = vpop.f32.mrb[112].mxu1  ;;  %v5451_v14 = vpop.f32.mrb[144].mxu0 }
 0x2c3   :  { %v5340_v1 = vpop.f32.mrb[113].mxu1  ;;  %v5452_v21 = vpop.f32.mrb[145].mxu0 }
 0x2c4   :  { %v5341_v27 = vadd.f32 %v5340_v1, %v5339_v6  ;;  %v5342_v52 = vpop.f32.mrb[114].mxu1  ;;  %v5453_v23 = vadd.f32 %v5452_v21, %v5451_v14  ;;  %v5454_v2 = vpop.f32.mrb[146].mxu0  ;;  %v3644_v6 = vadd.f32 %v7793_v39, %v7823_v43 }
 0x2c5   :  { %v5343_v8 = vpop.f32.mrb[115].mxu1  ;;  %v5455_v50 = vpop.f32.mrb[147].mxu0 }
 0x2c6   :  { %v3794_v38 = vadd.f32 %v5341_v27, %v3633_v41  ;;  %v5344_v51 = vadd.f32 %v5343_v8, %v5342_v52  ;;  %v5456_v10 = vadd.f32 %v5455_v50, %v5454_v2  ;;  %v3649_v8 = vadd.f32 %v7805_v33, %v7841_v7 }
 0x2c8   :  { %v3797_v4 = vadd.f32 %v5344_v51, %v3636_v22  ;;  %v7993_v46 = vadd.f32 %v5453_v23, %v3794_v38 }
 0x2ca   :  { %v7995_v0 = vadd.f32 %v5456_v10, %v3797_v4  ;;  %v5345_v11 = vpop.f32.mrb[116].mxu1  ;;  %v5457_v19 = vpop.f32.mrb[148].mxu0  ;;  %v3652_v10 = vadd.f32 %v7809_v12, %v7843_v35 }
 0x2cb   :  { %v5346_v3 = vpop.f32.mrb[117].mxu1  ;;  %v5458_v31 = vpop.f32.mrb[149].mxu0 }
 0x2cc   :  { %v5347_v59 = vadd.f32 %v5346_v3, %v5345_v11  ;;  %v5348_v57 = vpop.f32.mrb[118].mxu1  ;;  %v5459_v13 = vadd.f32 %v5458_v31, %v5457_v19  ;;  %v5460_v42 = vpop.f32.mrb[150].mxu0 }
 0x2cd   :  { %v5349_v48 = vpop.f32.mrb[119].mxu1  ;;  %v5461_v34 = vpop.f32.mrb[151].mxu0 }
 0x2ce   :  { %v3802_v14 = vadd.f32 %v5347_v59, %v3641_v61  ;;  %v5350_v1 = vadd.f32 %v5349_v48, %v5348_v57  ;;  %v5462_v21 = vadd.f32 %v5461_v34, %v5460_v42 }
 0x2d0   :  { %v3805_v41 = vadd.f32 %v5350_v1, %v3644_v6  ;;  %v8001_v27 = vadd.f32 %v5459_v13, %v3802_v14  ;;  %v3657_v13 = vadd.f32 %v7821_v37, %v7865_v45  ;;  %v3660_v14 = vadd.f32 %v7825_v36, %v7869_v44 }
 0x2d2   :  { %v8003_v52 = vadd.f32 %v5462_v21, %v3805_v41  ;;  %v5351_v23 = vpop.f32.mrb[120].mxu1  ;;  %v5463_v2 = vpop.f32.mrb[152].mxu0 }
 0x2d3   :  { %v5352_v49 = vpop.f32.mrb[121].mxu1  ;;  %v5464_v24 = vpop.f32.mrb[153].mxu0 }
 0x2d4   :  { %v5353_v50 = vadd.f32 %v5352_v49, %v5351_v23  ;;  %v5354_v22 = vpop.f32.mrb[122].mxu1  ;;  %v5465_v38 = vadd.f32 %v5464_v24, %v5463_v2  ;;  %v5466_v51 = vpop.f32.mrb[154].mxu0 }
 0x2d5   :  { %v5355_v39 = vpop.f32.mrb[123].mxu1  ;;  %v5467_v43 = vpop.f32.mrb[155].mxu0 }
 0x2d6   :  { %v3810_v4 = vadd.f32 %v5353_v50, %v3649_v8  ;;  %v5356_v11 = vadd.f32 %v5355_v39, %v5354_v22  ;;  %v5468_v19 = vadd.f32 %v5467_v43, %v5466_v51  ;;  %v8220_v50 = vld [vmem:[#allocation7_spill] sm:$0xff] }
 0x2d7   :  { %v3665_v22 = vadd.f32 %v8220_v50, %v7887_v60 }
 0x2d8   :  { %v3813_v3 = vadd.f32 %v5356_v11, %v3652_v10  ;;  %v8009_v31 = vadd.f32 %v5465_v38, %v3810_v4  ;;  %v8221_v10 = vld [vmem:[#allocation15_spill] sm:$0xff]  ;;  %v8222_v4 = vld [vmem:[#allocation6_spill] sm:$0xff] }
 0x2d9   :  { %v3668_v11 = vadd.f32 %v8222_v4, %v8221_v10 }
 0x2da   :  { %v8011_v61 = vadd.f32 %v5468_v19, %v3813_v3  ;;  %v5357_v59 = vpop.f32.mrb[124].mxu1  ;;  %v5469_v57 = vpop.f32.mrb[156].mxu0 }
 0x2db   :  { %v5358_v33 = vpop.f32.mrb[125].mxu1  ;;  %v5470_v7 = vpop.f32.mrb[157].mxu0 }
 0x2dc   :  { %v5359_v42 = vadd.f32 %v5358_v33, %v5357_v59  ;;  %v5360_v48 = vpop.f32.mrb[126].mxu1  ;;  %v5471_v34 = vadd.f32 %v5470_v7, %v5469_v57  ;;  %v5472_v6 = vpop.f32.mrb[158].mxu0 }
 0x2dd   :  { %v5361_v12 = vpop.f32.mrb[127].mxu1  ;;  %v5473_v35 = vpop.f32.mrb[159].mxu0 }
 0x2de   :  { %v3818_v1 = vadd.f32 %v5359_v42, %v3657_v13  ;;  %v5362_v21 = vadd.f32 %v5361_v12, %v5360_v48  ;;  %v5474_v41 = vadd.f32 %v5473_v35, %v5472_v6 }
 0x2e0   :  { %v3821_v23 = vadd.f32 %v5362_v21, %v3660_v14  ;;  %v8017_v2 = vadd.f32 %v5471_v34, %v3818_v1  ;;  %v8223_v34 = vld [vmem:[#allocation10_spill] sm:$0xff] }
 0x2e1   :  { %v3673_v6 = vadd.f32 %v8223_v34, %v7921_v62 }
 0x2e2   :  { %v8019_v49 = vadd.f32 %v5474_v41, %v3821_v23  ;;  %v5363_v24 = vpop.f32.mrb[128].mxu1  ;;  %v5475_v8 = vpop.f32.mrb[160].mxu0  ;;  %v8224_v23 = vld [vmem:[#allocation8_spill] sm:$0xff] }
 0x2e3   :  { %v5364_v37 = vpop.f32.mrb[129].mxu1  ;;  %v5476_v45 = vpop.f32.mrb[161].mxu0 }
 0x2e4   :  { %v5365_v38 = vadd.f32 %v5364_v37, %v5363_v24  ;;  %v5366_v51 = vpop.f32.mrb[130].mxu1  ;;  %v5477_v39 = vadd.f32 %v5476_v45, %v5475_v8  ;;  %v5478_v43 = vpop.f32.mrb[162].mxu0  ;;  %v3676_v24 = vadd.f32 %v8224_v23, %v7923_v26 }
 0x2e5   :  { %v5367_v36 = vpop.f32.mrb[131].mxu1  ;;  %v5479_v44 = vpop.f32.mrb[163].mxu0 }
 0x2e6   :  { %v3826_v19 = vadd.f32 %v5365_v38, %v3665_v22  ;;  %v5368_v3 = vadd.f32 %v5367_v36, %v5366_v51  ;;  %v5480_v59 = vadd.f32 %v5479_v44, %v5478_v43  ;;  %v8225_v36 = vld [vmem:[#allocation11_spill] sm:$0xff] }
 0x2e7   :  { %v3681_v44 = vadd.f32 %v8225_v36, %v7953_v47 }
 0x2e8   :  { %v3829_v57 = vadd.f32 %v5368_v3, %v3668_v11  ;;  %v8025_v33 = vadd.f32 %v5477_v39, %v3826_v19 }
 0x2ea   :  { %v8027_v7 = vadd.f32 %v5480_v59, %v3829_v57  ;;  %v5369_v13 = vpop.f32.mrb[132].mxu1  ;;  %v5481_v42 = vpop.f32.mrb[164].mxu0  ;;  %v8226_v59 = vld [vmem:[#allocation9_spill] sm:$0xff] }
 0x2eb   :  { %v5370_v60 = vpop.f32.mrb[133].mxu1  ;;  %v5482_v48 = vpop.f32.mrb[165].mxu0  ;;  %v3684_v57 = vadd.f32 %v8226_v59, %v7955_v55 }
 0x2ec   :  { %v5371_v12 = vadd.f32 %v5370_v60, %v5369_v13  ;;  %v5372_v35 = vpop.f32.mrb[134].mxu1  ;;  %v5483_v14 = vadd.f32 %v5482_v48, %v5481_v42  ;;  %v5484_v1 = vpop.f32.mrb[166].mxu0 }
 0x2ed   :  { %v5373_v21 = vpop.f32.mrb[135].mxu1  ;;  %v5485_v41 = vpop.f32.mrb[167].mxu0 }
 0x2ee   :  { %v3834_v8 = vadd.f32 %v5371_v12, %v3673_v6  ;;  %v5374_v37 = vadd.f32 %v5373_v21, %v5372_v35  ;;  %v5486_v45 = vadd.f32 %v5485_v41, %v5484_v1  ;;  %v8227_v1 = vld [vmem:[#allocation14_spill] sm:$0xff] }
 0x2ef   :  { %v3689_v21 = vadd.f32 %v8227_v1, %v7971_v56 }
 0x2f0   :  { %v3837_v50 = vadd.f32 %v5374_v37, %v3676_v24  ;;  %v8033_v22 = vadd.f32 %v5483_v14, %v3834_v8 }
 0x2f2   :  { %v8035_v38 = vadd.f32 %v5486_v45, %v3837_v50  ;;  %v5375_v51 = vpop.f32.mrb[136].mxu1  ;;  %v5487_v39 = vpop.f32.mrb[168].mxu0  ;;  %v8228_v45 = vld [vmem:[#allocation12_spill] sm:$0xff] }
 0x2f3   :  { %v5376_v62 = vpop.f32.mrb[137].mxu1  ;;  %v5488_v43 = vpop.f32.mrb[169].mxu0  ;;  %v3692_v50 = vadd.f32 %v8228_v45, %v7973_v30 }
 0x2f4   :  { %v5377_v10 = vadd.f32 %v5376_v62, %v5375_v51  ;;  %v5378_v4 = vpop.f32.mrb[138].mxu1  ;;  %v5489_v11 = vadd.f32 %v5488_v43, %v5487_v39  ;;  %v5490_v19 = vpop.f32.mrb[170].mxu0 }
 0x2f5   :  { %v5379_v26 = vpop.f32.mrb[139].mxu1  ;;  %v5491_v3 = vpop.f32.mrb[171].mxu0 }
 0x2f6   :  { %v3842_v13 = vadd.f32 %v5377_v10, %v3681_v44  ;;  %v5380_v42 = vadd.f32 %v5379_v26, %v5378_v4  ;;  %v5492_v60 = vadd.f32 %v5491_v3, %v5490_v19 }
 0x2f8   :  { %v3845_v48 = vadd.f32 %v5380_v42, %v3684_v57  ;;  %v8041_v34 = vadd.f32 %v5489_v11, %v3842_v13 }
 0x2fa   :  { %v8043_v6 = vadd.f32 %v5492_v60, %v3845_v48  ;;  %v5381_v12 = vpop.f32.mrb[140].mxu1  ;;  %v5493_v35 = vpop.f32.mrb[172].mxu0 }
 0x2fb   :  { %v5382_v47 = vpop.f32.mrb[141].mxu1  ;;  %v5494_v14 = vpop.f32.mrb[173].mxu0 }
 0x2fc   :  { %v5383_v41 = vadd.f32 %v5382_v47, %v5381_v12  ;;  %v5384_v23 = vpop.f32.mrb[142].mxu1  ;;  %v5495_v24 = vadd.f32 %v5494_v14, %v5493_v35  ;;  %v5496_v8 = vpop.f32.mrb[174].mxu0 }
 0x2fd   :  { %v5385_v55 = vpop.f32.mrb[143].mxu1  ;;  %v5497_v37 = vpop.f32.mrb[175].mxu0 }
 0x2fe   :  { %v3850_v51 = vadd.f32 %v5383_v41, %v3689_v21  ;;  %v5386_v39 = vadd.f32 %v5385_v55, %v5384_v23  ;;  %v5498_v62 = vadd.f32 %v5497_v37, %v5496_v8 }
 0x300   :  { %v3853_v43 = vadd.f32 %v5386_v39, %v3692_v50  ;;  %v8049_v36 = vadd.f32 %v5495_v24, %v3850_v51  ;;  %v5877_v24 = vld [vmem:[%s8179_s5 + $0x4] ss:$8 sps:$4 sm:$0xff]  }
 0x301   :  { %4546 = vmatprep.mubr.bf16.mxu0 %v5877_v24 }
 0x302   :  { %v8051_v44 = vadd.f32 %v5498_v62, %v3853_v43  ;;  %v5515_v10 = vpop.f32.mrb[144].mxu1 }
 0x303   :  { %v5516_v4 = vpop.f32.mrb[145].mxu1 }
 0x304   :  { %v5517_v56 = vadd.f32 %v5516_v4, %v5515_v10  ;;  %v5518_v11 = vpop.f32.mrb[146].mxu1 }
 0x305   :  { %v5519_v19 = vpop.f32.mrb[147].mxu1 }
 0x306   :  { %v4052_v26 = vadd.f32 %v5517_v56, %v7901_v53  ;;  %v5520_v3 = vadd.f32 %v5519_v19, %v5518_v11 }
 0x308   :  { %v4210_v59 = vmul.f32 0.2, %v4052_v26  ;;  %v4055_v57 = vadd.f32 %v5520_v3, %v7913_v18  ;;  %vm4178_vm10 = vcmp.ge.f32.partialorder %v4052_v26, 0.0 }
 0x30a   :  { %vm4179_vm11 = vcmp.ge.f32.partialorder %v4055_v57, 0.0  ;;  %v4211_v30 = vmul.f32 0.2, %v4055_v57  ;;  %v5521_v13 = vpop.f32.mrb[148].mxu1  ;;  %v4242_v60 = vsel %vm4178_vm10, %v4052_v26, %v4210_v59 }
 0x30b   :  { %v5522_v42 = vpop.f32.mrb[149].mxu1 }
 0x30c   :  { %v4243_v48 = vsel %vm4179_vm11, %v4055_v57, %v4211_v30  ;;  %v5523_v12 = vadd.f32 %v5522_v42, %v5521_v13  ;;  %v5524_v35 = vpop.f32.mrb[150].mxu1 }
 0x30d   :  { %v4274_v47 = vpack.c.bf16 %v4243_v48, %v4242_v60  ;;  %v5525_v14 = vpop.f32.mrb[151].mxu1 }
 0x30e   :  { %v4060_v1 = vadd.f32 %v5523_v12, %v7919_v54  ;;  %v5526_v21 = vadd.f32 %v5525_v14, %v5524_v35 }
 0x30f   :  { %4290 = vst.msk [vmem:[#allocation3] sm:$0xff] %vm2445_vm5, %v4274_v47 }
 0x310   :  { %v4212_v53 = vmul.f32 0.2, %v4060_v1  ;;  %v4063_v41 = vadd.f32 %v5526_v21, %v7931_v40  ;;  %vm4180_vm12 = vcmp.ge.f32.partialorder %v4060_v1, 0.0 }
 0x312   :  { %vm4181_vm13 = vcmp.ge.f32.partialorder %v4063_v41, 0.0  ;;  %v4213_v18 = vmul.f32 0.2, %v4063_v41  ;;  %v5527_v23 = vpop.f32.mrb[152].mxu1  ;;  %v4244_v55 = vsel %vm4180_vm12, %v4060_v1, %v4212_v53 }
 0x313   :  { %v5528_v8 = vpop.f32.mrb[153].mxu1 }
 0x314   :  { %v4245_v37 = vsel %vm4181_vm13, %v4063_v41, %v4213_v18  ;;  %v5529_v45 = vadd.f32 %v5528_v8, %v5527_v23  ;;  %v5530_v50 = vpop.f32.mrb[154].mxu1 }
 0x315   :  { %v4275_v54 = vpack.c.bf16 %v4245_v37, %v4244_v55  ;;  %v5531_v51 = vpop.f32.mrb[155].mxu1 }
 0x316   :  { %v4068_v39 = vadd.f32 %v5529_v45, %v7937_v15  ;;  %v5532_v62 = vadd.f32 %v5531_v51, %v5530_v50 }
 0x317   :  { %4291 = vst.msk [vmem:[#allocation3 + $0x8] sm:$0xff] %vm2445_vm5, %v4275_v54 }
 0x318   :  { %v4214_v40 = vmul.f32 0.2, %v4068_v39  ;;  %v4071_v43 = vadd.f32 %v5532_v62, %v7945_v9  ;;  %vm4182_vm14 = vcmp.ge.f32.partialorder %v4068_v39, 0.0 }
 0x31a   :  { %vm4183_vm15 = vcmp.ge.f32.partialorder %v4071_v43, 0.0  ;;  %v4215_v10 = vmul.f32 0.2, %v4071_v43  ;;  %v5533_v4 = vpop.f32.mrb[156].mxu1  ;;  %v4246_v11 = vsel %vm4182_vm14, %v4068_v39, %v4214_v40 }
 0x31b   :  { %v5534_v56 = vpop.f32.mrb[157].mxu1 }
 0x31c   :  { %v4247_v19 = vsel %vm4183_vm15, %v4071_v43, %v4215_v10  ;;  %v5535_v26 = vadd.f32 %v5534_v56, %v5533_v4  ;;  %v5536_v3 = vpop.f32.mrb[158].mxu1 }
 0x31d   :  { %v4276_v59 = vpack.c.bf16 %v4247_v19, %v4246_v11  ;;  %v5537_v57 = vpop.f32.mrb[159].mxu1 }
 0x31e   :  { %v4076_v30 = vadd.f32 %v5535_v26, %v7951_v5  ;;  %v5538_v15 = vadd.f32 %v5537_v57, %v5536_v3 }
 0x31f   :  { %4292 = vst.msk [vmem:[#allocation3 + $0x10] sm:$0xff] %vm2445_vm5, %v4276_v59 }
 0x320   :  { %v4216_v13 = vmul.f32 0.2, %v4076_v30  ;;  %v4079_v42 = vadd.f32 %v5538_v15, %v7957_v32  ;;  %vm4184_vm0 = vcmp.ge.f32.partialorder %v4076_v30, 0.0 }
 0x322   :  { %vm4185_vm1 = vcmp.ge.f32.partialorder %v4079_v42, 0.0  ;;  %v4217_v9 = vmul.f32 0.2, %v4079_v42  ;;  %v5539_v60 = vpop.f32.mrb[160].mxu1  ;;  %v4248_v12 = vsel %vm4184_vm0, %v4076_v30, %v4216_v13 }
 0x323   :  { %v5540_v48 = vpop.f32.mrb[161].mxu1 }
 0x324   :  { %v4249_v35 = vsel %vm4185_vm1, %v4079_v42, %v4217_v9  ;;  %v5541_v47 = vadd.f32 %v5540_v48, %v5539_v60  ;;  %v5542_v14 = vpop.f32.mrb[162].mxu1 }
 0x325   :  { %v4277_v1 = vpack.c.bf16 %v4249_v35, %v4248_v12  ;;  %v5543_v21 = vpop.f32.mrb[163].mxu1 }
 0x326   :  { %v4084_v53 = vadd.f32 %v5541_v47, %v7963_v25  ;;  %v5544_v5 = vadd.f32 %v5543_v21, %v5542_v14 }
 0x327   :  { %4293 = vst.msk [vmem:[#allocation3 + $0x18] sm:$0xff] %vm2445_vm5, %v4277_v1 }
 0x328   :  { %v4218_v41 = vmul.f32 0.2, %v4084_v53  ;;  %v4087_v18 = vadd.f32 %v5544_v5, %v7965_v17  ;;  %vm4186_vm2 = vcmp.ge.f32.partialorder %v4084_v53, 0.0 }
 0x32a   :  { %vm4187_vm3 = vcmp.ge.f32.partialorder %v4087_v18, 0.0  ;;  %v4219_v32 = vmul.f32 0.2, %v4087_v18  ;;  %v5545_v23 = vpop.f32.mrb[164].mxu1  ;;  %v4250_v8 = vsel %vm4186_vm2, %v4084_v53, %v4218_v41 }
 0x32b   :  { %v5546_v24 = vpop.f32.mrb[165].mxu1 }
 0x32c   :  { %v4251_v55 = vsel %vm4187_vm3, %v4087_v18, %v4219_v32  ;;  %v5547_v37 = vadd.f32 %v5546_v24, %v5545_v23  ;;  %v5548_v45 = vpop.f32.mrb[166].mxu1 }
 0x32d   :  { %v4278_v50 = vpack.c.bf16 %v4251_v55, %v4250_v8  ;;  %v5549_v54 = vpop.f32.mrb[167].mxu1 }
 0x32e   :  { %v4092_v51 = vadd.f32 %v5547_v37, %v7969_v29  ;;  %v5550_v25 = vadd.f32 %v5549_v54, %v5548_v45 }
 0x32f   :  { %4294 = vst.msk [vmem:[#allocation3 + $0x20] sm:$0xff] %vm2445_vm5, %v4278_v50 }
 0x330   :  { %v4220_v39 = vmul.f32 0.2, %v4092_v51  ;;  %v4095_v62 = vadd.f32 %v5550_v25, %v7975_v28  ;;  %vm4188_vm4 = vcmp.ge.f32.partialorder %v4092_v51, 0.0 }
 0x332   :  { %vm4189_vm6 = vcmp.ge.f32.partialorder %v4095_v62, 0.0  ;;  %v4221_v17 = vmul.f32 0.2, %v4095_v62  ;;  %v5551_v40 = vpop.f32.mrb[168].mxu1  ;;  %v4252_v10 = vsel %vm4188_vm4, %v4092_v51, %v4220_v39 }
 0x333   :  { %v5552_v43 = vpop.f32.mrb[169].mxu1 }
 0x334   :  { %v4253_v4 = vsel %vm4189_vm6, %v4095_v62, %v4221_v17  ;;  %v5553_v56 = vadd.f32 %v5552_v43, %v5551_v40  ;;  %v5554_v11 = vpop.f32.mrb[170].mxu1 }
 0x335   :  { %v4279_v19 = vpack.c.bf16 %v4253_v4, %v4252_v10  ;;  %v5555_v26 = vpop.f32.mrb[171].mxu1 }
 0x336   :  { %v4100_v3 = vadd.f32 %v5553_v56, %v7979_v58  ;;  %v5556_v29 = vadd.f32 %v5555_v26, %v5554_v11 }
 0x337   :  { %4295 = vst.msk [vmem:[#allocation3 + $0x28] sm:$0xff] %vm2445_vm5, %v4279_v19 }
 0x338   :  { %v4222_v59 = vmul.f32 0.2, %v4100_v3  ;;  %v4103_v57 = vadd.f32 %v5556_v29, %v7981_v20  ;;  %vm4190_vm7 = vcmp.ge.f32.partialorder %v4100_v3, 0.0 }
 0x33a   :  { %vm4191_vm8 = vcmp.ge.f32.partialorder %v4103_v57, 0.0  ;;  %v4223_v28 = vmul.f32 0.2, %v4103_v57  ;;  %v5557_v30 = vpop.f32.mrb[172].mxu1  ;;  %v4254_v13 = vsel %vm4190_vm7, %v4100_v3, %v4222_v59 }
 0x33b   :  { %v5558_v15 = vpop.f32.mrb[173].mxu1 }
 0x33c   :  { %v4255_v42 = vsel %vm4191_vm8, %v4103_v57, %v4223_v28  ;;  %v5559_v9 = vadd.f32 %v5558_v15, %v5557_v30  ;;  %v5560_v60 = vpop.f32.mrb[174].mxu1  ;;  %v4322_v28 = vld [vmem:[#allocation3] sm:$0xff] }
 0x33d   :  { %v4280_v48 = vpack.c.bf16 %v4255_v42, %v4254_v13  ;;  %v5561_v12 = vpop.f32.mrb[175].mxu1 }
 0x33e   :  { %v4108_v35 = vadd.f32 %v5559_v9, %v7985_v63  ;;  %v5562_v58 = vadd.f32 %v5561_v12, %v5560_v60 }
 0x33f   :  { %4296 = vst.msk [vmem:[#allocation3 + $0x30] sm:$0xff] %vm2445_vm5, %v4280_v48 }
 0x340   :  { %v4224_v47 = vmul.f32 0.2, %v4108_v35  ;;  %v4111_v14 = vadd.f32 %v5562_v58, %v7987_v16  ;;  %vm4192_vm9 = vcmp.ge.f32.partialorder %v4108_v35, 0.0 }
 0x342   :  { %vm4193_vm10 = vcmp.ge.f32.partialorder %v4111_v14, 0.0  ;;  %v4225_v20 = vmul.f32 0.2, %v4111_v14  ;;  %v5563_v1 = vpop.f32.mrb[176].mxu1  ;;  %v4256_v53 = vsel %vm4192_vm9, %v4108_v35, %v4224_v47 }
 0x343   :  { %v5564_v21 = vpop.f32.mrb[177].mxu1 }
 0x344   :  { %v4257_v5 = vsel %vm4193_vm10, %v4111_v14, %v4225_v20  ;;  %v5565_v41 = vadd.f32 %v5564_v21, %v5563_v1  ;;  %v5566_v18 = vpop.f32.mrb[178].mxu1 }
 0x345   :  { %v4281_v32 = vpack.c.bf16 %v4257_v5, %v4256_v53  ;;  %v5567_v23 = vpop.f32.mrb[179].mxu1 }
 0x346   :  { %v4116_v24 = vadd.f32 %v5565_v41, %v7993_v46  ;;  %v5568_v63 = vadd.f32 %v5567_v23, %v5566_v18 }
 0x347   :  { %4297 = vst.msk [vmem:[#allocation3 + $0x38] sm:$0xff] %vm2445_vm5, %v4281_v32 }
 0x348   :  { %v4226_v8 = vmul.f32 0.2, %v4116_v24  ;;  %v4119_v55 = vadd.f32 %v5568_v63, %v7995_v0  ;;  %vm4194_vm11 = vcmp.ge.f32.partialorder %v4116_v24, 0.0 }
 0x34a   :  { %vm4195_vm12 = vcmp.ge.f32.partialorder %v4119_v55, 0.0  ;;  %v4227_v16 = vmul.f32 0.2, %v4119_v55  ;;  %v5569_v37 = vpop.f32.mrb[180].mxu1  ;;  %v4258_v50 = vsel %vm4194_vm11, %v4116_v24, %v4226_v8 }
 0x34b   :  { %v5570_v45 = vpop.f32.mrb[181].mxu1 }
 0x34c   :  { %v4259_v54 = vsel %vm4195_vm12, %v4119_v55, %v4227_v16  ;;  %v5571_v51 = vadd.f32 %v5570_v45, %v5569_v37  ;;  %v5572_v25 = vpop.f32.mrb[182].mxu1 }
 0x34d   :  { %v4282_v39 = vpack.c.bf16 %v4259_v54, %v4258_v50  ;;  %v5573_v62 = vpop.f32.mrb[183].mxu1 }
 0x34e   :  { %v4124_v17 = vadd.f32 %v5571_v51, %v8001_v27  ;;  %v5574_v46 = vadd.f32 %v5573_v62, %v5572_v25 }
 0x34f   :  { %4298 = vst.msk [vmem:[#allocation3 + $0x40] sm:$0xff] %vm2445_vm5, %v4282_v39 }
 0x350   :  { %v4228_v40 = vmul.f32 0.2, %v4124_v17  ;;  %v4127_v43 = vadd.f32 %v5574_v46, %v8003_v52  ;;  %vm4196_vm13 = vcmp.ge.f32.partialorder %v4124_v17, 0.0 }
 0x352   :  { %vm4197_vm14 = vcmp.ge.f32.partialorder %v4127_v43, 0.0  ;;  %v4229_v0 = vmul.f32 0.2, %v4127_v43  ;;  %v5575_v10 = vpop.f32.mrb[184].mxu1  ;;  %v4260_v56 = vsel %vm4196_vm13, %v4124_v17, %v4228_v40 }
 0x353   :  { %v5576_v4 = vpop.f32.mrb[185].mxu1 }
 0x354   :  { %v4261_v11 = vsel %vm4197_vm14, %v4127_v43, %v4229_v0  ;;  %v5577_v19 = vadd.f32 %v5576_v4, %v5575_v10  ;;  %v5578_v26 = vpop.f32.mrb[186].mxu1 }
 0x355   :  { %v4283_v3 = vpack.c.bf16 %v4261_v11, %v4260_v56  ;;  %v5579_v29 = vpop.f32.mrb[187].mxu1 }
 0x356   :  { %v4132_v59 = vadd.f32 %v5577_v19, %v8009_v31  ;;  %v5580_v27 = vadd.f32 %v5579_v29, %v5578_v26  ;;  %v4330_v57 = vld [vmem:[#allocation3 + $0x40] sm:$0xff] }
 0x357   :  { %4299 = vst.msk [vmem:[#allocation3 + $0x48] sm:$0xff] %vm2445_vm5, %v4283_v3  ;;  %5611 = vmatprep.subr.bf16.mxu0 %v4330_v57 }
 0x358   :  { %v4230_v52 = vmul.f32 0.2, %v4132_v59  ;;  %v4135_v30 = vadd.f32 %v5580_v27, %v8011_v61  ;;  %5612 = vmatpush3.bf16.msra.mxu0 %v4322_v28  ;;  %vm4198_vm15 = vcmp.ge.f32.partialorder %v4132_v59, 0.0  ;;  %v4323_v61 = vld [vmem:[#allocation3 + $0x8] sm:$0xff] }
 0x35a   :  { %vm4199_vm0 = vcmp.ge.f32.partialorder %v4135_v30, 0.0  ;;  %v4231_v15 = vmul.f32 0.2, %v4135_v30  ;;  %v5581_v13 = vpop.f32.mrb[188].mxu1  ;;  %v4262_v9 = vsel %vm4198_vm15, %v4132_v59, %v4230_v52 }
 0x35b   :  { %v5582_v42 = vpop.f32.mrb[189].mxu1 }
 0x35c   :  { %v4263_v60 = vsel %vm4199_vm0, %v4135_v30, %v4231_v15  ;;  %v5583_v48 = vadd.f32 %v5582_v42, %v5581_v13  ;;  %v5584_v12 = vpop.f32.mrb[190].mxu1 }
 0x35d   :  { %v4284_v31 = vpack.c.bf16 %v4263_v60, %v4262_v9  ;;  %v5585_v35 = vpop.f32.mrb[191].mxu1 }
 0x35e   :  { %v4140_v58 = vadd.f32 %v5583_v48, %v8017_v2  ;;  %v5586_v47 = vadd.f32 %v5585_v35, %v5584_v12  ;;  %v4331_v14 = vld [vmem:[#allocation3 + $0x48] sm:$0xff] }
 0x35f   :  { %4300 = vst.msk [vmem:[#allocation3 + $0x50] sm:$0xff] %vm2445_vm5, %v4284_v31  ;;  %5613 = vmatprep.subr.bf16.mxu0 %v4331_v14 }
 0x360   :  { %v4232_v20 = vmul.f32 0.2, %v4140_v58  ;;  %v4143_v1 = vadd.f32 %v5586_v47, %v8019_v49  ;;  %5614 = vmatpush3.bf16.msra.mxu0 %v4323_v61  ;;  %vm4200_vm1 = vcmp.ge.f32.partialorder %v4140_v58, 0.0  ;;  %v4324_v49 = vld [vmem:[#allocation3 + $0x10] sm:$0xff] }
 0x362   :  { %vm4201_vm2 = vcmp.ge.f32.partialorder %v4143_v1, 0.0  ;;  %v4233_v21 = vmul.f32 0.2, %v4143_v1  ;;  %v5587_v53 = vpop.f32.mrb[192].mxu1  ;;  %v4264_v41 = vsel %vm4200_vm1, %v4140_v58, %v4232_v20 }
 0x363   :  { %v5588_v5 = vpop.f32.mrb[193].mxu1 }
 0x364   :  { %v4265_v18 = vsel %vm4201_vm2, %v4143_v1, %v4233_v21  ;;  %v5589_v32 = vadd.f32 %v5588_v5, %v5587_v53  ;;  %v5590_v23 = vpop.f32.mrb[194].mxu1 }
 0x365   :  { %v4285_v2 = vpack.c.bf16 %v4265_v18, %v4264_v41  ;;  %v5591_v24 = vpop.f32.mrb[195].mxu1  ;;  %v4329_v18 = vld [vmem:[#allocation3 + $0x38] sm:$0xff] }
 0x366   :  { %v4148_v63 = vadd.f32 %v5589_v32, %v8025_v33  ;;  %v5592_v8 = vadd.f32 %v5591_v24, %v5590_v23  ;;  %v4332_v55 = vld [vmem:[#allocation3 + $0x50] sm:$0xff]  ;;  %v5883_v24 = vld [vmem:[%s8179_s5 + $0x20] ss:$8 sps:$4 sm:$0xff]  }
 0x367   :  { %4301 = vst.msk [vmem:[#allocation3 + $0x58] sm:$0xff] %vm2445_vm5, %v4285_v2  ;;  %5615 = vmatprep.subr.bf16.mxu0 %v4332_v55  ;;  %v5878_v32 = vld [vmem:[%s8179_s5 + $0x14] ss:$8 sps:$4 sm:$0xff]   ;;  %v5880_v23 = vld [vmem:[%s8179_s5 + $0x10] ss:$8 sps:$4 sm:$0xff]  }
 0x368   :  { %v4234_v16 = vmul.f32 0.2, %v4148_v63  ;;  %v4151_v37 = vadd.f32 %v5592_v8, %v8027_v7  ;;  %5616 = vmatpush3.bf16.msra.mxu0 %v4324_v49  ;;  %vm4202_vm3 = vcmp.ge.f32.partialorder %v4148_v63, 0.0  ;;  %v4325_v7 = vld [vmem:[#allocation3 + $0x18] sm:$0xff]  ;;  %v5881_v2 = vld [vmem:[%s8179_s5 + $0x24] ss:$8 sps:$4 sm:$0xff]  }
 0x369   :  { %v5886_v8 = vld [vmem:[%s8179_s5 + $0x30] ss:$8 sps:$4 sm:$0xff]   ;;  %v5887_v55 = vld [vmem:[%s8179_s5 + $0x44] ss:$8 sps:$4 sm:$0xff]   ;;  %v5889_v49 = vld [vmem:[%s8179_s5 + $0x40] ss:$8 sps:$4 sm:$0xff]  }
 0x36a   :  { %vm4203_vm4 = vcmp.ge.f32.partialorder %v4151_v37, 0.0  ;;  %v4235_v45 = vmul.f32 0.2, %v4151_v37  ;;  %v5593_v50 = vpop.f32.mrb[196].mxu1  ;;  %v4266_v51 = vsel %vm4202_vm3, %v4148_v63, %v4234_v16  ;;  %v5884_v63 = vld [vmem:[%s8179_s5 + $0x34] ss:$8 sps:$4 sm:$0xff]  }
 0x36b   :  { %v5594_v54 = vpop.f32.mrb[197].mxu1  ;;  %v5890_v16 = vld [vmem:[%s8179_s5 + $0x54] ss:$8 sps:$4 sm:$0xff]  }
 0x36c   :  { %v4267_v25 = vsel %vm4203_vm4, %v4151_v37, %v4235_v45  ;;  %v5595_v39 = vadd.f32 %v5594_v54, %v5593_v50  ;;  %v5596_v62 = vpop.f32.mrb[198].mxu1  ;;  %v5892_v37 = vld [vmem:[%s8179_s5 + $0x50] ss:$8 sps:$4 sm:$0xff]   ;;  %v5893_v45 = vld [vmem:[%s8179_s5 + $0x64] ss:$8 sps:$4 sm:$0xff]  }
 0x36d   :  { %v4286_v33 = vpack.c.bf16 %v4267_v25, %v4266_v51  ;;  %v5597_v17 = vpop.f32.mrb[199].mxu1  ;;  %v5895_v50 = vld [vmem:[%s8179_s5 + $0x60] ss:$8 sps:$4 sm:$0xff]   ;;  %v5896_v54 = vld [vmem:[%s8179_s5 + $0x74] ss:$8 sps:$4 sm:$0xff]   ;;  %v4357_v25 = vpop.permute.xlu0 %4356 }
 0x36e   :  { %v4156_v46 = vadd.f32 %v5595_v39, %v8033_v22  ;;  %v5598_v40 = vadd.f32 %v5597_v17, %v5596_v62  ;;  %v4333_v43 = vld [vmem:[#allocation3 + $0x58] sm:$0xff]  ;;  %v4362_v39 = vpop.permute.xlu1 %4361 }
 0x36f   :  { %4302 = vst.msk [vmem:[#allocation3 + $0x60] sm:$0xff] %vm2445_vm5, %v4286_v33  ;;  %5617 = vmatprep.subr.bf16.mxu0 %v4333_v43  ;;  %v5898_v51 = vld [vmem:[%s8179_s5 + $0x70] ss:$8 sps:$4 sm:$0xff]  }
 0x370   :  { %v4236_v0 = vmul.f32 0.2, %v4156_v46  ;;  %v4159_v10 = vadd.f32 %v5598_v40, %v8035_v38  ;;  %5618 = vmatpush3.bf16.msra.mxu0 %v4325_v7  ;;  %vm4204_vm6 = vcmp.ge.f32.partialorder %v4156_v46, 0.0  ;;  %v4326_v38 = vld [vmem:[#allocation3 + $0x20] sm:$0xff] }
 0x371   :  { %v4367_v62 = vpop.permute.xlu0 %4366 }
 0x372   :  { %vm4205_vm7 = vcmp.ge.f32.partialorder %v4159_v10, 0.0  ;;  %v4237_v4 = vmul.f32 0.2, %v4159_v10  ;;  %v5599_v56 = vpop.f32.mrb[200].mxu1  ;;  %v4268_v19 = vsel %vm4204_vm6, %v4156_v46, %v4236_v0  ;;  %v4372_v33 = vpop.permute.xlu1 %4371 }
 0x373   :  { %v5600_v11 = vpop.f32.mrb[201].mxu1 }
 0x374   :  { %v4269_v26 = vsel %vm4205_vm7, %v4159_v10, %v4237_v4  ;;  %v5601_v3 = vadd.f32 %v5600_v11, %v5599_v56  ;;  %v5602_v29 = vpop.f32.mrb[202].mxu1 }
 0x375   :  { %v4287_v22 = vpack.c.bf16 %v4269_v26, %v4268_v19  ;;  %v5603_v59 = vpop.f32.mrb[203].mxu1  ;;  %v4377_v17 = vpop.permute.xlu0 %4376 }
 0x376   :  { %v4164_v27 = vadd.f32 %v5601_v3, %v8041_v34  ;;  %v5604_v57 = vadd.f32 %v5603_v59, %v5602_v29  ;;  %v4334_v28 = vld [vmem:[#allocation3 + $0x60] sm:$0xff]  ;;  %v4678_v46 = vpop.permute.xlu1 %4677 }
 0x377   :  { %4303 = vst.msk [vmem:[#allocation3 + $0x68] sm:$0xff] %vm2445_vm5, %v4287_v22  ;;  %5619 = vmatprep.subr.bf16.mxu0 %v4334_v28 }
 0x378   :  { %v4238_v52 = vmul.f32 0.2, %v4164_v27  ;;  %v4167_v30 = vadd.f32 %v5604_v57, %v8043_v6  ;;  %5620 = vmatpush3.bf16.msra.mxu0 %v4326_v38  ;;  %vm4206_vm8 = vcmp.ge.f32.partialorder %v4164_v27, 0.0  ;;  %v4327_v6 = vld [vmem:[#allocation3 + $0x28] sm:$0xff] }
 0x379   :  { %v4683_v40 = vpop.permute.xlu0 %4682 }
 0x37a   :  { %vm4207_vm9 = vcmp.ge.f32.partialorder %v4167_v30, 0.0  ;;  %v4239_v15 = vmul.f32 0.2, %v4167_v30  ;;  %v5605_v13 = vpop.f32.mrb[204].mxu1  ;;  %v4270_v9 = vsel %vm4206_vm8, %v4164_v27, %v4238_v52  ;;  %v4688_v43 = vpop.permute.xlu1 %4687 }
 0x37b   :  { %v5606_v42 = vpop.f32.mrb[205].mxu1 }
 0x37c   :  { %v4271_v60 = vsel %vm4207_vm9, %v4167_v30, %v4239_v15  ;;  %v5607_v48 = vadd.f32 %v5606_v42, %v5605_v13  ;;  %v5608_v12 = vpop.f32.mrb[206].mxu1 }
 0x37d   :  { %v4288_v34 = vpack.c.bf16 %v4271_v60, %v4270_v9  ;;  %v5609_v31 = vpop.f32.mrb[207].mxu1  ;;  %v4382_v7 = vpop.permute.xlu0 %4381 }
 0x37e   :  { %v4172_v35 = vadd.f32 %v5607_v48, %v8049_v36  ;;  %v5610_v58 = vadd.f32 %v5609_v31, %v5608_v12  ;;  %v4335_v47 = vld [vmem:[#allocation3 + $0x68] sm:$0xff]  ;;  %v4328_v36 = vld [vmem:[#allocation3 + $0x30] sm:$0xff]  ;;  %v4693_v0 = vpop.permute.xlu1 %4692 }
 0x37f   :  { %4304 = vst.msk [vmem:[#allocation3 + $0x70] sm:$0xff] %vm2445_vm5, %v4288_v34  ;;  %5621 = vmatprep.subr.bf16.mxu0 %v4335_v47 }
 0x380   :  { %v4240_v14 = vmul.f32 0.2, %v4172_v35  ;;  %v4175_v61 = vadd.f32 %v5610_v58, %v8051_v44  ;;  %5622 = vmatpush3.bf16.msra.mxu0 %v4327_v6  ;;  %vm4208_vm10 = vcmp.ge.f32.partialorder %v4172_v35, 0.0  ;;  %v5875_v44 = vld [vmem:[%s8179_s5] ss:$8 sps:$4 sm:$0xff]  }
 0x381   :  { %v8149_v19 = vpop.permute.xlu0 %4386 }
 0x382   :  { %vm4209_vm11 = vcmp.ge.f32.partialorder %v4175_v61, 0.0  ;;  %v4241_v20 = vmul.f32 0.2, %v4175_v61  ;;  %v4272_v1 = vsel %vm4208_vm10, %v4172_v35, %v4240_v14  ;;  %v4698_v3 = vpop.permute.xlu1 %4697 }
 0x384   :  { %v4273_v21 = vsel %vm4209_vm11, %v4175_v61, %v4241_v20 }
 0x385   :  { %v4289_v53 = vpack.c.bf16 %v4273_v21, %v4272_v1  ;;  %v4392_v52 = vpop.permute.xlu0 %4391 }
 0x386   :  { %v4336_v5 = vld [vmem:[#allocation3 + $0x70] sm:$0xff]  ;;  %v4703_v13 = vpop.permute.xlu1 %4702 }
 0x387   :  { %4305 = vst.msk [vmem:[#allocation3 + $0x78] sm:$0xff] %vm2445_vm5, %v4289_v53  ;;  %5623 = vmatprep.subr.bf16.mxu0 %v4336_v5 }
 0x388   :  { %5624 = vmatpush3.bf16.msra.mxu0 %v4328_v36 }
 0x389   :  { %v4397_v61 = vpop.permute.xlu0 %4396 }
 0x38a   :  { %v4708_v20 = vpop.permute.xlu1 %4707 }
 0x38e   :  { %v4337_v41 = vld [vmem:[#allocation3 + $0x78] sm:$0xff] }
 0x38f   :  { %5625 = vmatprep.subr.bf16.mxu0 %v4337_v41 }
 0x390   :  { %5626 = vmatpush3.bf16.msra.mxu0 %v4329_v18 }
 0x393   :  { %4547 = vmatmul.mubr.bf16.vlgmr.msra.gmra.mrb[176].mxu0 %v5875_v44 }
 0x394   :  { %4554 = vmatprep.mubr.bf16.mxu0 %v5878_v32 }
 0x39b   :  { %4555 = vmatmul.mubr.bf16.gmra.mrb[180].mxu0 %v5880_v23 }
 0x39c   :  { %4562 = vmatprep.mubr.bf16.mxu0 %v5881_v2 }
 0x3a3   :  { %4563 = vmatmul.mubr.bf16.gmra.mrb[184].mxu0 %v5883_v24 }
 0x3a4   :  { %4570 = vmatprep.mubr.bf16.mxu0 %v5884_v63 }
 0x3ab   :  { %4571 = vmatmul.mubr.bf16.gmra.mrb[188].mxu0 %v5886_v8 }
 0x3ac   :  { %4578 = vmatprep.mubr.bf16.mxu0 %v5887_v55  ;;  %v4402_v55 = vpop.permute.xlu0 %4401 }
 0x3b3   :  { %4579 = vmatmul.mubr.bf16.gmra.mrb[192].mxu0 %v5889_v49 }
 0x3b4   :  { %4586 = vmatprep.mubr.bf16.mxu0 %v5890_v16  ;;  %v4713_v16 = vpop.permute.xlu1 %4712 }
 0x3bb   :  { %4587 = vmatmul.mubr.bf16.gmra.mrb[196].mxu0 %v5892_v37 }
 0x3bc   :  { %4594 = vmatprep.mubr.bf16.mxu0 %v5893_v45 }
 0x3c3   :  { %4595 = vmatmul.mubr.bf16.gmra.mrb[200].mxu0 %v5895_v50 }
 0x3c4   :  { %4602 = vmatprep.mubr.bf16.mxu0 %v5896_v54 }
 0x3cb   :  { %4603 = vmatmul.mubr.bf16.gmra.mrb[204].mxu0 %v5898_v51 }
 0x466   :  { %v5627_v10 = vpop.f32.mrb[176].mxu0 }
 0x467   :  { %v5628_v4 = vpop.f32.mrb[177].mxu0 }
 0x468   :  { %v5629_v56 = vadd.f32 %v5628_v4, %v5627_v10  ;;  %v5630_v11 = vpop.f32.mrb[178].mxu0  ;;  %v4718_v4 = vpop.permute.xlu1 %4717 }
 0x469   :  { %v5631_v26 = vpop.f32.mrb[179].mxu0 }
 0x46a   :  { %v4549_v29 = vadd.f32 %v5629_v56, %v4357_v25  ;;  %v5632_v22 = vadd.f32 %v5631_v26, %v5630_v11 }
 0x46c   :  { %vm4611_vm12 = vcmp.ge.f32.partialorder %v4549_v29, 0.0  ;;  %v4627_v59 = vmul.f32 0.2, %v4549_v29  ;;  %v4552_v27 = vadd.f32 %v5632_v22, %v4362_v39 }
 0x46e   :  { %v4643_v57 = vsel %vm4611_vm12, %v4549_v29, %v4627_v59  ;;  %vm4612_vm13 = vcmp.ge.f32.partialorder %v4552_v27, 0.0  ;;  %v4628_v28 = vmul.f32 0.2, %v4552_v27  ;;  %v5633_v38 = vpop.f32.mrb[180].mxu0 }
 0x46f   :  { %v4755_v30 = vmul.f32 %v4678_v46, %v4643_v57  ;;  %v5634_v15 = vpop.f32.mrb[181].mxu0 }
 0x470   :  { %v4644_v42 = vsel %vm4612_vm13, %v4552_v27, %v4628_v28  ;;  %v5635_v9 = vadd.f32 %v5634_v15, %v5633_v38  ;;  %v5636_v60 = vpop.f32.mrb[182].mxu0  ;;  %v4723_v15 = vpop.permute.xlu1 %4722  ;;  %vm4819_vm13 = vcmask 253952  }
 0x471   :  { %v4756_v48 = vmul.f32 %v4683_v40, %v4644_v42  ;;  %v5637_v12 = vpop.f32.mrb[183].mxu0  ;;  %v4771_v35 = vsel %vm2445_vm5, %v4755_v30, 0.0 }
 0x472   :  { %v4557_v34 = vadd.f32 %v5635_v9, %v4367_v62  ;;  %v5638_v31 = vadd.f32 %v5637_v12, %v5636_v60 }
 0x473   :  { %v4772_v58 = vsel %vm2445_vm5, %v4756_v48, 0.0 }
 0x474   :  { %v4773_v47 = vadd.f32 %v4772_v58, %v4771_v35  ;;  %vm4613_vm14 = vcmp.ge.f32.partialorder %v4557_v34, 0.0  ;;  %v4629_v6 = vmul.f32 0.2, %v4557_v34  ;;  %v4560_v14 = vadd.f32 %v5638_v31, %v4372_v33 }
 0x476   :  { %v4645_v1 = vsel %vm4613_vm14, %v4557_v34, %v4629_v6  ;;  %vm4614_vm15 = vcmp.ge.f32.partialorder %v4560_v14, 0.0  ;;  %v4630_v21 = vmul.f32 0.2, %v4560_v14  ;;  %v5639_v53 = vpop.f32.mrb[184].mxu0 }
 0x477   :  { %v4757_v5 = vmul.f32 %v4688_v43, %v4645_v1  ;;  %v5640_v36 = vpop.f32.mrb[185].mxu0  ;;  %v4407_v43 = vpop.permute.xlu0 %4406 }
 0x478   :  { %v4646_v41 = vsel %vm4614_vm15, %v4560_v14, %v4630_v21  ;;  %v5641_v18 = vadd.f32 %v5640_v36, %v5639_v53  ;;  %v5642_v44 = vpop.f32.mrb[186].mxu0  ;;  %v4728_v14 = vpop.permute.xlu1 %4727 }
 0x479   :  { %v4774_v32 = vsel %vm2445_vm5, %v4757_v5, 0.0  ;;  %v4758_v23 = vmul.f32 %v4693_v0, %v4646_v41  ;;  %v5643_v2 = vpop.f32.mrb[187].mxu0 }
 0x47a   :  { %v4775_v24 = vadd.f32 %v4774_v32, %v4773_v47  ;;  %v4565_v63 = vadd.f32 %v5641_v18, %v4377_v17  ;;  %v5644_v8 = vadd.f32 %v5643_v2, %v5642_v44 }
 0x47b   :  { %v4776_v49 = vsel %vm2445_vm5, %v4758_v23, 0.0  ;;  %v4412_v28 = vpop.permute.xlu0 %4411 }
 0x47c   :  { %v4777_v37 = vadd.f32 %v4776_v49, %v4775_v24  ;;  %vm4615_vm0 = vcmp.ge.f32.partialorder %v4565_v63, 0.0  ;;  %v4631_v45 = vmul.f32 0.2, %v4565_v63  ;;  %v4568_v50 = vadd.f32 %v5644_v8, %v4382_v7 }
 0x47e   :  { %v4647_v54 = vsel %vm4615_vm0, %v4565_v63, %v4631_v45  ;;  %vm4616_vm1 = vcmp.ge.f32.partialorder %v4568_v50, 0.0  ;;  %v4632_v51 = vmul.f32 0.2, %v4568_v50  ;;  %v5645_v25 = vpop.f32.mrb[188].mxu0 }
 0x47f   :  { %v4759_v39 = vmul.f32 %v4698_v3, %v4647_v54  ;;  %v5646_v62 = vpop.f32.mrb[189].mxu0  ;;  %v4417_v6 = vpop.permute.xlu0 %4416 }
 0x480   :  { %v4648_v33 = vsel %vm4616_vm1, %v4568_v50, %v4632_v51  ;;  %v5647_v46 = vadd.f32 %v5646_v62, %v5645_v25  ;;  %v5648_v40 = vpop.f32.mrb[190].mxu0 }
 0x481   :  { %v4778_v17 = vsel %vm2445_vm5, %v4759_v39, 0.0  ;;  %v4760_v0 = vmul.f32 %v4703_v13, %v4648_v33  ;;  %v5649_v10 = vpop.f32.mrb[191].mxu0 }
 0x482   :  { %v4779_v56 = vadd.f32 %v4778_v17, %v4777_v37  ;;  %v4573_v11 = vadd.f32 %v5647_v46, %v8149_v19  ;;  %v5650_v26 = vadd.f32 %v5649_v10, %v5648_v40 }
 0x483   :  { %v4780_v7 = vsel %vm2445_vm5, %v4760_v0, 0.0  ;;  %v4422_v63 = vpop.permute.xlu0 %4421 }
 0x484   :  { %v4781_v29 = vadd.f32 %v4780_v7, %v4779_v56  ;;  %vm4617_vm2 = vcmp.ge.f32.partialorder %v4573_v11, 0.0  ;;  %v4633_v22 = vmul.f32 0.2, %v4573_v11  ;;  %v4576_v3 = vadd.f32 %v5650_v26, %v4392_v52 }
 0x486   :  { %v4649_v59 = vsel %vm4617_vm2, %v4573_v11, %v4633_v22  ;;  %vm4618_vm3 = vcmp.ge.f32.partialorder %v4576_v3, 0.0  ;;  %v4634_v27 = vmul.f32 0.2, %v4576_v3  ;;  %v5651_v57 = vpop.f32.mrb[192].mxu0 }
 0x487   :  { %v4761_v38 = vmul.f32 %v4708_v20, %v4649_v59  ;;  %v5652_v30 = vpop.f32.mrb[193].mxu0  ;;  %v4427_v46 = vpop.permute.xlu0 %4426 }
 0x488   :  { %v4650_v13 = vsel %vm4618_vm3, %v4576_v3, %v4634_v27  ;;  %v5653_v42 = vadd.f32 %v5652_v30, %v5651_v57  ;;  %v5654_v9 = vpop.f32.mrb[194].mxu0 }
 0x489   :  { %v4782_v19 = vsel %vm2445_vm5, %v4761_v38, 0.0  ;;  %v4762_v60 = vmul.f32 %v4713_v16, %v4650_v13  ;;  %v5655_v48 = vpop.f32.mrb[195].mxu0 }
 0x48a   :  { %v4783_v12 = vadd.f32 %v4782_v19, %v4781_v29  ;;  %v4581_v34 = vadd.f32 %v5653_v42, %v4397_v61  ;;  %v5656_v31 = vadd.f32 %v5655_v48, %v5654_v9 }
 0x48b   :  { %v4784_v52 = vsel %vm2445_vm5, %v4762_v60, 0.0  ;;  %v4432_v27 = vpop.permute.xlu0 %4431 }
 0x48c   :  { %v4785_v35 = vadd.f32 %v4784_v52, %v4783_v12  ;;  %vm4619_vm4 = vcmp.ge.f32.partialorder %v4581_v34, 0.0  ;;  %v4635_v58 = vmul.f32 0.2, %v4581_v34  ;;  %v4584_v47 = vadd.f32 %v5656_v31, %v4402_v55  ;;  %v4733_v55 = vpop.permute.xlu1 %4732 }
 0x48e   :  { %v4651_v20 = vsel %vm4619_vm4, %v4581_v34, %v4635_v58  ;;  %vm4620_vm6 = vcmp.ge.f32.partialorder %v4584_v47, 0.0  ;;  %v4636_v1 = vmul.f32 0.2, %v4584_v47  ;;  %v5657_v21 = vpop.f32.mrb[196].mxu0 }
 0x48f   :  { %v4763_v53 = vmul.f32 %v4718_v4, %v4651_v20  ;;  %v5658_v5 = vpop.f32.mrb[197].mxu0  ;;  %v4748_v58 = vpop.permute.xlu0 %4747 }
 0x490   :  { %v4652_v36 = vsel %vm4620_vm6, %v4584_v47, %v4636_v1  ;;  %v5659_v41 = vadd.f32 %v5658_v5, %v5657_v21  ;;  %v5660_v18 = vpop.f32.mrb[198].mxu0  ;;  %v4738_v0 = vpop.permute.xlu1 %4737 }
 0x491   :  { %v4786_v61 = vsel %vm2445_vm5, %v4763_v53, 0.0  ;;  %v4764_v44 = vmul.f32 %v4723_v15, %v4652_v36  ;;  %v5661_v32 = vpop.f32.mrb[199].mxu0 }
 0x492   :  { %v4787_v23 = vadd.f32 %v4786_v61, %v4785_v35  ;;  %v4589_v2 = vadd.f32 %v5659_v41, %v4407_v43  ;;  %v5662_v24 = vadd.f32 %v5661_v32, %v5660_v18  ;;  %v4814_v41 = vlaneseq }
 0x493   :  { %v4788_v8 = vsel %vm2445_vm5, %v4764_v44, 0.0 }
 0x494   :  { %v4789_v49 = vadd.f32 %v4788_v8, %v4787_v23  ;;  %vm4621_vm7 = vcmp.ge.f32.partialorder %v4589_v2, 0.0  ;;  %v4637_v16 = vmul.f32 0.2, %v4589_v2  ;;  %v4592_v37 = vadd.f32 %v5662_v24, %v4412_v28  ;;  %v4743_v38 = vpop.permute.xlu1 %4742 }
 0x495   :  { %v4815_v44 = vshrl.u32 %v4814_v41, 7 }
 0x496   :  { %v4653_v45 = vsel %vm4621_vm7, %v4589_v2, %v4637_v16  ;;  %vm4622_vm8 = vcmp.ge.f32.partialorder %v4592_v37, 0.0  ;;  %v4638_v50 = vmul.f32 0.2, %v4592_v37  ;;  %v5663_v54 = vpop.f32.mrb[200].mxu0 }
 0x497   :  { %v4765_v51 = vmul.f32 %v4728_v14, %v4653_v45  ;;  %v5664_v25 = vpop.f32.mrb[201].mxu0  ;;  %v4816_v2 = vsub.s32 0, %v4815_v44 }
 0x498   :  { %v4654_v39 = vsel %vm4622_vm8, %v4592_v37, %v4638_v50  ;;  %v5665_v62 = vadd.f32 %v5664_v25, %v5663_v54  ;;  %v5666_v33 = vpop.f32.mrb[202].mxu0  ;;  %v4753_v20 = vpop.permute.xlu1 %4752 }
 0x499   :  { %v4790_v40 = vsel %vm2445_vm5, %v4765_v51, 0.0  ;;  %v4766_v43 = vmul.f32 %v4733_v55, %v4654_v39  ;;  %v5667_v17 = vpop.f32.mrb[203].mxu0 }
 0x49a   :  { %v4791_v10 = vadd.f32 %v4790_v40, %v4789_v49  ;;  %v4597_v4 = vadd.f32 %v5665_v62, %v4417_v6  ;;  %v5668_v56 = vadd.f32 %v5667_v17, %v5666_v33 }
 0x49b   :  { %v4792_v11 = vsel %vm2445_vm5, %v4766_v43, 0.0 }
 0x49c   :  { %v4793_v26 = vadd.f32 %v4792_v11, %v4791_v10  ;;  %vm4623_vm9 = vcmp.ge.f32.partialorder %v4597_v4, 0.0  ;;  %v4639_v7 = vmul.f32 0.2, %v4597_v4  ;;  %v4600_v29 = vadd.f32 %v5668_v56, %v4422_v63  ;;  %v4812_v63 = vpop.permute.xlu0 %4811 }
 0x49d   :  { %v4817_v55 = vrot.slane %v4812_v63, %v4816_v2 }
 0x49e   :  { %v4655_v22 = vsel %vm4623_vm9, %v4597_v4, %v4639_v7  ;;  %vm4624_vm10 = vcmp.ge.f32.partialorder %v4600_v29, 0.0  ;;  %v4640_v3 = vmul.f32 0.2, %v4600_v29  ;;  %v5669_v59 = vpop.f32.mrb[204].mxu0 }
 0x49f   :  { %v4767_v57 = vmul.f32 %v4738_v0, %v4655_v22  ;;  %v5670_v28 = vpop.f32.mrb[205].mxu0 }
 0x4a0   :  { %v4656_v30 = vsel %vm4624_vm10, %v4600_v29, %v4640_v3  ;;  %v5671_v15 = vadd.f32 %v5670_v28, %v5669_v59  ;;  %v5672_v13 = vpop.f32.mrb[206].mxu0 }
 0x4a1   :  { %v4794_v42 = vsel %vm2445_vm5, %v4767_v57, 0.0  ;;  %v4768_v9 = vmul.f32 %v4743_v38, %v4656_v30  ;;  %v5673_v19 = vpop.f32.mrb[207].mxu0 }
 0x4a2   :  { %v4795_v60 = vadd.f32 %v4794_v42, %v4793_v26  ;;  %v4605_v48 = vadd.f32 %v5671_v15, %v4427_v46  ;;  %v5674_v12 = vadd.f32 %v5673_v19, %v5672_v13 }
 0x4a3   :  { %v4796_v34 = vsel %vm2445_vm5, %v4768_v9, 0.0 }
 0x4a4   :  { %v4797_v31 = vadd.f32 %v4796_v34, %v4795_v60  ;;  %vm4625_vm11 = vcmp.ge.f32.partialorder %v4605_v48, 0.0  ;;  %v4641_v52 = vmul.f32 0.2, %v4605_v48  ;;  %v4608_v35 = vadd.f32 %v5674_v12, %v4432_v27 }
 0x4a6   :  { %v4657_v47 = vsel %vm4625_vm11, %v4605_v48, %v4641_v52  ;;  %vm4626_vm12 = vcmp.ge.f32.partialorder %v4608_v35, 0.0  ;;  %v4642_v6 = vmul.f32 0.2, %v4608_v35 }
 0x4a7   :  { %v4769_v14 = vmul.f32 %v4748_v58, %v4657_v47 }
 0x4a8   :  { %v4658_v1 = vsel %vm4626_vm12, %v4608_v35, %v4642_v6 }
 0x4a9   :  { %v4798_v21 = vsel %vm2445_vm5, %v4769_v14, 0.0  ;;  %v4770_v53 = vmul.f32 %v4753_v20, %v4658_v1 }
 0x4aa   :  { %v4799_v5 = vadd.f32 %v4798_v21, %v4797_v31 }
 0x4ab   :  { %v4800_v36 = vsel %vm2445_vm5, %v4770_v53, 0.0 }
 0x4ac   :  { %v4801_v18 = vadd.f32 %v4800_v36, %v4799_v5 }
 0x4ae   :  { %v4802_v61 = vrot.slane %v4801_v18, 4 }
 0x4b0   :  { %v4803_v32 = vadd.f32 %v4802_v61, %v4801_v18 }
 0x4b2   :  { %v4804_v23 = vrot.slane %v4803_v32, 2 }
 0x4b4   :  { %v4805_v24 = vadd.f32 %v4804_v23, %v4803_v32 }
 0x4b6   :  { %v4806_v8 = vrot.slane %v4805_v24, 1 }
 0x4b8   :  { %v4807_v49 = vadd.f32 %v4806_v8, %v4805_v24 }
 0x4ba   :  { %v4818_v16 = vadd.f32 %v4817_v55, %v4807_v49 }
 0x4bc   :  { %4820 = vst.msk [vmem:[%s8180_s9] sm:$0x1] %vm4819_vm13, %v4818_v16 }

</bundles_post_ra>
